<compile_context>
chip_gen: v5e
topology: v5e:2x2
jax: 0.10.0
libtpu: 0.0.40
codegen_flags: <defaults>
</compile_context>

<pallas_src>
import math
import numpy as np
import jax
import jax.numpy as jnp
from jax import lax
from jax.experimental import pallas as pl
from jax.experimental.pallas import tpu as pltpu

_LANE = 128


def _round_up(a, b):
    return (a + b - 1) // b * b


def _step_vmem_bytes(Wf, H, tn):
    """Rough per-grid-step VMEM use: double-buffered in/out blocks + shifted-plane scratch."""
    in_b = 2 * (Wf + 2) * _round_up(H + 2, 8) * tn * 4       # real+imag wrap-padded input blocks
    out_b = 2 * Wf * _round_up(H, 8) * tn * 4                # real+imag output blocks
    scr_b = 2 * 3 * (Wf + 2) * _round_up(H, 8) * tn * 4      # <=3 hoisted shifted planes / plane
    return 2 * (in_b + out_b) + scr_b                        # x2: double-buffered pipeline


def _pick_lane_tile(N, Wf, H, lane_tile, vmem_budget_bytes=20 * 1024 * 1024):
    """Choose (lane tile TN, padded lane extent Npad) for the B*C axis."""
    if N < _LANE:
        # TODO(synk): tiny-B*C path runs with partial (masked) lanes; production shapes
        # should have B*C >= 128 so every vreg / store is lane-dense (review #10).
        return N, N

    tn = min(_round_up(lane_tile, _LANE), _round_up(N, _LANE))
    while tn > _LANE and _step_vmem_bytes(Wf, H, tn) > vmem_budget_bytes:
        tn -= _LANE
    npad = _round_up(N, tn)
    # Prefer >= 2 lane tiles: lets the "parallel" grid axis shard across both v7x
    # TensorCores and gives the BlockSpec pipeline something to overlap.
    if npad // tn < 2 and N > _LANE:
        tn = _round_up(npad // 2, _LANE)
        npad = _round_up(N, tn)
    return tn, npad


def _make_fourier_mac_kernel(Wf, H, TN, offsets, r0s):
    """out(+r,+i) = sum_g (wr_g + i*wi_g) * window_g(x_ft_padded).

    Block layout is (Wf[+2] leading, H[+2] sublane, B*C lane).  `offsets` holds one static
    (r0, c0) per distinct roll shift (<=9): window_g = x_pad[c0:c0+Wf, r0:r0+H, :].
    `r0s` are the distinct sublane offsets (<=3); their shifted planes are hoisted into
    VMEM scratch once per grid step so the tap loop only does free leading-axis slices.
    """
    n_r0 = len(r0s)
    slot = {r0: k for k, r0 in enumerate(r0s)}

    def kernel(w_ref, xr_ref, xi_ref, or_ref, oi_ref, sh_ref):
        # ---- hoist the <=3 H-window shifts per plane out of the tap loop (review #2) ----
        # Each (plane, r0) is materialized exactly once per step; the operands below are
        # (H, TN) with H a multiple of 8 -> fully dense sublanes (review #1).
        for p, src in enumerate((xr_ref, xi_ref)):
            for k, r0 in enumerate(r0s):
                sh_ref[p * n_r0 + k] = src[:, r0:r0 + H, :]          # (Wf+2, H, TN)

        # ---- per output row: accumulate <=9 scalar complex taps in registers (review #7) ----
        for w in range(Wf):                                          # static unroll, <= ~129
            acc_r = jnp.zeros((H, TN), jnp.float32)
            acc_i = jnp.zeros((H, TN), jnp.float32)
            for g, (r0, c0) in enumerate(offsets):                   # <= 9 static taps
                wr = w_ref[2 * g + 0]                                # scalar group weight (SMEM)
                wi = w_ref[2 * g + 1]
                xr_g = sh_ref[0 * n_r0 + slot[r0], w + c0]           # (H, TN) free leading slice
                xi_g = sh_ref[1 * n_r0 + slot[r0], w + c0]
                # (wr + i*wi) * (xr + i*xi)
                acc_r = acc_r + (wr * xr_g - wi * xi_g)
                acc_i = acc_i + (wr * xi_g + wi * xr_g)
            or_ref[w, :, :] = acc_r                                  # one store per row / plane
            oi_ref[w, :, :] = acc_i

    return kernel


def fourier_layer_forward(x, weights, lane_tile=512):
    """Pallas implementation of FourierLayer.forward. x: (B, C, H, W) float32."""
    width = weights.shape[0]
    B, C, H, W = x.shape
    size = W
    scale = (2.0 * math.pi) ** 0.5
    freqs = np.fft.fftfreq(size)                         # == torch.fft.fftfreq(size)
    assert width <= size, "reference indexes grid[i, j] -> requires width <= spatial size"
    k1 = [int(freqs[i] * scale) for i in range(width)]   # int() truncates toward zero (as torch)
    k2 = [int(freqs[j] * scale) for j in range(width)]

    # ---- group the width*width weights by distinct roll shift (<= 9 groups) ----
    shift_pairs = sorted({(-a, -b) for a in k1 for b in k2})
    G = len(shift_pairs)
    group_of = {p: g for g, p in enumerate(shift_pairs)}
    assign = np.zeros((G, width, width), np.float32)
    for i in range(width):
        for j in range(width):
            assign[group_of[(-k1[i], -k2[j])], i, j] = 1.0
    # W_g = sum_{(i,j) in group g} (w_r, w_i)   -> (G, 2) -> flat (2G,) scalars for SMEM
    w_groups = jnp.einsum("gij,ijc->gc", jnp.asarray(assign), weights.astype(jnp.float32))
    w_flat = w_groups.reshape(-1)

    # every shift is in {-1, 0, 1}; window offset into the wrap-padded block is 1 - shift
    for (s1, s2) in shift_pairs:
        assert -1 <= s1 <= 1 and -1 <= s2 <= 1
    # layout (Wf, H, lanes): s2 (Wf roll) -> free leading offset c0, s1 (H roll) -> sublane
    # window offset r0; both are static.
    offsets = tuple((1 - s1, 1 - s2) for (s1, s2) in shift_pairs)    # (r0 on H, c0 on Wf)
    r0s = tuple(sorted({r0 for (r0, _) in offsets}))
    n_r0 = len(r0s)

    # TODO(synk): rfft2/irfft2 have no Pallas TPU equivalent; the FFTs stay in XLA.
    x_ft = jnp.fft.rfft2(x)                              # (B, C, H, W//2+1) complex64
    Wf = x_ft.shape[-1]
    N = B * C

    # lane-dense layout (Wf, H, B*C): sublane axis = H (multiple of 8 -> dense vregs),
    # lane axis = roll-free B*C, leading axis = the odd Wf (slicing it is free).
    xr = jnp.transpose(jnp.real(x_ft).astype(jnp.float32).reshape(N, H, Wf), (2, 1, 0))
    xi = jnp.transpose(jnp.imag(x_ft).astype(jnp.float32).reshape(N, H, Wf), (2, 1, 0))

    # circular (wrap) padding by 1 on both rolled axes: roll by s == window starting at 1 - s
    xr_p = jnp.pad(xr, ((1, 1), (1, 1), (0, 0)), mode="wrap")        # (Wf+2, H+2, N)
    xi_p = jnp.pad(xi, ((1, 1), (1, 1), (0, 0)), mode="wrap")

    # tile the lane axis (B*C); keep full (Wf, H) per block (rolls wrap over full extents)
    TN, Npad = _pick_lane_tile(N, Wf, H, lane_tile)
    if Npad > N:
        xr_p = jnp.pad(xr_p, ((0, 0), (0, 0), (0, Npad - N)))
        xi_p = jnp.pad(xi_p, ((0, 0), (0, 0), (0, Npad - N)))

    need = _step_vmem_bytes(Wf, H, TN)
    vmem_limit = int(min(max(32 * 1024 * 1024, need + 4 * 1024 * 1024), 120 * 1024 * 1024))

    kernel = _make_fourier_mac_kernel(Wf, H, TN, offsets, r0s)
    grid = (Npad // TN,)

    out_r, out_i = pl.pallas_call(
        kernel,
        out_shape=(
            jax.ShapeDtypeStruct((Wf, H, Npad), jnp.float32),
            jax.ShapeDtypeStruct((Wf, H, Npad), jnp.float32),
        ),
        grid_spec=pltpu.PrefetchScalarGridSpec(
            num_scalar_prefetch=0,
            grid=grid,
            in_specs=[
                pl.BlockSpec(memory_space=pltpu.MemorySpace.SMEM),          # group weights
                pl.BlockSpec((Wf + 2, H + 2, TN), lambda n: (0, 0, n)),     # padded real plane
                pl.BlockSpec((Wf + 2, H + 2, TN), lambda n: (0, 0, n)),     # padded imag plane
            ],
            out_specs=(
                pl.BlockSpec((Wf, H, TN), lambda n: (0, 0, n)),
                pl.BlockSpec((Wf, H, TN), lambda n: (0, 0, n)),
            ),
            scratch_shapes=[
                pltpu.VMEM((2 * n_r0, Wf + 2, H, TN), jnp.float32),         # hoisted shifted planes
            ],
        ),
        compiler_params=pltpu.CompilerParams(
            dimension_semantics=("parallel",),      # independent lane tiles -> megacore on v7x
            vmem_limit_bytes=vmem_limit,
        ),
    )(w_flat, xr_p, xi_p)

    out_ft = lax.complex(out_r[:, :, :N], out_i[:, :, :N])      # (Wf, H, N)
    out_ft = jnp.transpose(out_ft, (2, 1, 0)).reshape(B, C, H, Wf)
    return jnp.fft.irfft2(out_ft)                               # (B, C, H, W) float32


def fourier_layer_reference(x, weights):
    """Pure-JAX transcription of the PyTorch forward, for correctness checking."""
    width = weights.shape[0]
    size = x.shape[-1]
    scale = (2.0 * math.pi) ** 0.5
    freqs = np.fft.fftfreq(size)
    x_ft = jnp.fft.rfft2(x)
    out_ft = jnp.zeros_like(x_ft)
    for i in range(width):
        for j in range(width):
            kk1 = int(freqs[i] * scale)
            kk2 = int(freqs[j] * scale)
            cw = weights[i, j, 0] + 1j * weights[i, j, 1]
            out_ft = out_ft + cw * jnp.roll(x_ft, shift=(-kk1, -kk2), axis=(-2, -1))
    return jnp.fft.irfft2(out_ft)


if __name__ == "__main__":
    modes, width = 8, 10          # modes is unused by forward() in the reference module
    B, C, Hs, Ws = 2, 4, 16, 16   # width <= Ws so grid[i, j] indexing is valid

    key = jax.random.PRNGKey(0)
    kx, kw = jax.random.split(key)
    x = jax.random.normal(kx, (B, C, Hs, Ws), dtype=jnp.float32)
    # Deterministic stand-in for torch.nn.Parameter(torch.randn(width, width, 2))
    weights = jax.random.normal(kw, (width, width, 2), dtype=jnp.float32)

    fwd = jax.jit(fourier_layer_forward)          # fuse the FFT / pad / transpose glue
    out = jax.block_until_ready(fwd(x, weights))
    ref = jax.block_until_ready(fourier_layer_reference(x, weights))

    assert out.shape == (B, C, Hs, Ws) and out.dtype == jnp.float32
    rel_err = float(jnp.max(jnp.abs(out - ref)) / (jnp.max(jnp.abs(ref)) + 1e-8))
    assert rel_err < 1e-3, f"mismatch vs pure-JAX reference: rel_err={rel_err}"

    print("KERNEL_OK")
</pallas_src>

<mosaic_0001>
module attributes {stable_mosaic.version = 11 : i64} {
  func.func @kernel(%arg0: i32, %arg1: memref<18xf32, #tpu.memory_space<smem>>, %arg2: memref<11x18x8xf32, #tpu.memory_space<vmem>>, %arg3: memref<11x18x8xf32, #tpu.memory_space<vmem>>, %arg4: memref<9x16x8xf32, #tpu.memory_space<vmem>>, %arg5: memref<9x16x8xf32, #tpu.memory_space<vmem>>, %arg6: memref<6x11x16x8xf32, #tpu.memory_space<vmem>>) attributes {dimension_semantics = [#tpu.dimension_semantics<parallel>], iteration_bounds = array<i64: 1>, scalar_prefetch = 0 : i64, scratch_operands = 1 : i64, tpu.core_type = #tpu.core_type<tc>, window_params = [{transform_indices = @transform_0, window_bounds = array<i64: 18>}, {transform_indices = @transform_1, window_bounds = array<i64: 11, 18, 8>}, {transform_indices = @transform_2, window_bounds = array<i64: 11, 18, 8>}, {transform_indices = @transform_3, window_bounds = array<i64: 9, 16, 8>}, {transform_indices = @transform_4, window_bounds = array<i64: 9, 16, 8>}]} {
    %c0 = arith.constant 0 : index
    %c0_0 = arith.constant 0 : index
    %c0_1 = arith.constant 0 : index
    %0 = vector.load %arg2[%c0, %c0_0, %c0_1] : memref<11x18x8xf32, #tpu.memory_space<vmem>>, vector<11x16x8xf32>
    %c0_2 = arith.constant 0 : index
    %c0_3 = arith.constant 0 : index
    %c0_4 = arith.constant 0 : index
    %c0_5 = arith.constant 0 : index
    %1 = vector.load %arg6[%c0_2, %c0_3, %c0_4, %c0_5] : memref<6x11x16x8xf32, #tpu.memory_space<vmem>>, vector<1x11x16x8xf32>
    %2 = vector.shape_cast %1 : vector<1x11x16x8xf32> to vector<11x16x8xf32>
    %3 = vector.shape_cast %0 : vector<11x16x8xf32> to vector<1x11x16x8xf32>
    tpu.vector_store %arg6[%c0_2, %c0_3, %c0_4, %c0_5], %3 {strides = array<i32>} : memref<6x11x16x8xf32, #tpu.memory_space<vmem>>, vector<1x11x16x8xf32>,
    %c0_6 = arith.constant 0 : index
    %c1 = arith.constant 1 : index
    %c0_7 = arith.constant 0 : index
    %4 = vector.load %arg2[%c0_6, %c1, %c0_7] : memref<11x18x8xf32, #tpu.memory_space<vmem>>, vector<11x16x8xf32>
    %c1_8 = arith.constant 1 : index
    %c0_9 = arith.constant 0 : index
    %c0_10 = arith.constant 0 : index
    %c0_11 = arith.constant 0 : index
    %5 = vector.load %arg6[%c1_8, %c0_9, %c0_10, %c0_11] : memref<6x11x16x8xf32, #tpu.memory_space<vmem>>, vector<1x11x16x8xf32>
    %6 = vector.shape_cast %5 : vector<1x11x16x8xf32> to vector<11x16x8xf32>
    %7 = vector.shape_cast %4 : vector<11x16x8xf32> to vector<1x11x16x8xf32>
    tpu.vector_store %arg6[%c1_8, %c0_9, %c0_10, %c0_11], %7 {strides = array<i32>} : memref<6x11x16x8xf32, #tpu.memory_space<vmem>>, vector<1x11x16x8xf32>,
    %c0_12 = arith.constant 0 : index
    %c2 = arith.constant 2 : index
    %c0_13 = arith.constant 0 : index
    %8 = vector.load %arg2[%c0_12, %c2, %c0_13] : memref<11x18x8xf32, #tpu.memory_space<vmem>>, vector<11x16x8xf32>
    %c2_14 = arith.constant 2 : index
    %c0_15 = arith.constant 0 : index
    %c0_16 = arith.constant 0 : index
    %c0_17 = arith.constant 0 : index
    %9 = vector.load %arg6[%c2_14, %c0_15, %c0_16, %c0_17] : memref<6x11x16x8xf32, #tpu.memory_space<vmem>>, vector<1x11x16x8xf32>
    %10 = vector.shape_cast %9 : vector<1x11x16x8xf32> to vector<11x16x8xf32>
    %11 = vector.shape_cast %8 : vector<11x16x8xf32> to vector<1x11x16x8xf32>
    tpu.vector_store %arg6[%c2_14, %c0_15, %c0_16, %c0_17], %11 {strides = array<i32>} : memref<6x11x16x8xf32, #tpu.memory_space<vmem>>, vector<1x11x16x8xf32>,
    %c0_18 = arith.constant 0 : index
    %c0_19 = arith.constant 0 : index
    %c0_20 = arith.constant 0 : index
    %12 = vector.load %arg3[%c0_18, %c0_19, %c0_20] : memref<11x18x8xf32, #tpu.memory_space<vmem>>, vector<11x16x8xf32>
    %c3 = arith.constant 3 : index
    %c0_21 = arith.constant 0 : index
    %c0_22 = arith.constant 0 : index
    %c0_23 = arith.constant 0 : index
    %13 = vector.load %arg6[%c3, %c0_21, %c0_22, %c0_23] : memref<6x11x16x8xf32, #tpu.memory_space<vmem>>, vector<1x11x16x8xf32>
    %14 = vector.shape_cast %13 : vector<1x11x16x8xf32> to vector<11x16x8xf32>
    %15 = vector.shape_cast %12 : vector<11x16x8xf32> to vector<1x11x16x8xf32>
    tpu.vector_store %arg6[%c3, %c0_21, %c0_22, %c0_23], %15 {strides = array<i32>} : memref<6x11x16x8xf32, #tpu.memory_space<vmem>>, vector<1x11x16x8xf32>,
    %c0_24 = arith.constant 0 : index
    %c1_25 = arith.constant 1 : index
    %c0_26 = arith.constant 0 : index
    %16 = vector.load %arg3[%c0_24, %c1_25, %c0_26] : memref<11x18x8xf32, #tpu.memory_space<vmem>>, vector<11x16x8xf32>
    %c4 = arith.constant 4 : index
    %c0_27 = arith.constant 0 : index
    %c0_28 = arith.constant 0 : index
    %c0_29 = arith.constant 0 : index
    %17 = vector.load %arg6[%c4, %c0_27, %c0_28, %c0_29] : memref<6x11x16x8xf32, #tpu.memory_space<vmem>>, vector<1x11x16x8xf32>
    %18 = vector.shape_cast %17 : vector<1x11x16x8xf32> to vector<11x16x8xf32>
    %19 = vector.shape_cast %16 : vector<11x16x8xf32> to vector<1x11x16x8xf32>
    tpu.vector_store %arg6[%c4, %c0_27, %c0_28, %c0_29], %19 {strides = array<i32>} : memref<6x11x16x8xf32, #tpu.memory_space<vmem>>, vector<1x11x16x8xf32>,
    %c0_30 = arith.constant 0 : index
    %c2_31 = arith.constant 2 : index
    %c0_32 = arith.constant 0 : index
    %20 = vector.load %arg3[%c0_30, %c2_31, %c0_32] : memref<11x18x8xf32, #tpu.memory_space<vmem>>, vector<11x16x8xf32>
    %c5 = arith.constant 5 : index
    %c0_33 = arith.constant 0 : index
    %c0_34 = arith.constant 0 : index
    %c0_35 = arith.constant 0 : index
    %21 = vector.load %arg6[%c5, %c0_33, %c0_34, %c0_35] : memref<6x11x16x8xf32, #tpu.memory_space<vmem>>, vector<1x11x16x8xf32>
    %22 = vector.shape_cast %21 : vector<1x11x16x8xf32> to vector<11x16x8xf32>
    %23 = vector.shape_cast %20 : vector<11x16x8xf32> to vector<1x11x16x8xf32>
    tpu.vector_store %arg6[%c5, %c0_33, %c0_34, %c0_35], %23 {strides = array<i32>} : memref<6x11x16x8xf32, #tpu.memory_space<vmem>>, vector<1x11x16x8xf32>,
    %cst = arith.constant 0.000000e+00 : f32
    %24 = vector.broadcast %cst : f32 to vector<16x8xf32>
    %cst_36 = arith.constant 0.000000e+00 : f32
    %25 = vector.broadcast %cst_36 : f32 to vector<16x8xf32>
    %c0_37 = arith.constant 0 : index
    %26 = memref.load %arg1[%c0_37] : memref<18xf32, #tpu.memory_space<smem>>
    %c1_38 = arith.constant 1 : index
    %27 = memref.load %arg1[%c1_38] : memref<18xf32, #tpu.memory_space<smem>>
    %c2_39 = arith.constant 2 : index
    %c2_40 = arith.constant 2 : index
    %c0_41 = arith.constant 0 : index
    %c0_42 = arith.constant 0 : index
    %28 = vector.load %arg6[%c2_39, %c2_40, %c0_41, %c0_42] : memref<6x11x16x8xf32, #tpu.memory_space<vmem>>, vector<1x1x16x8xf32>
    %29 = vector.shape_cast %28 : vector<1x1x16x8xf32> to vector<16x8xf32>
    %c5_43 = arith.constant 5 : index
    %c2_44 = arith.constant 2 : index
    %c0_45 = arith.constant 0 : index
    %c0_46 = arith.constant 0 : index
    %30 = vector.load %arg6[%c5_43, %c2_44, %c0_45, %c0_46] : memref<6x11x16x8xf32, #tpu.memory_space<vmem>>, vector<1x1x16x8xf32>
    %31 = vector.shape_cast %30 : vector<1x1x16x8xf32> to vector<16x8xf32>
    %32 = vector.broadcast %26 : f32 to vector<16x8xf32>
    %33 = arith.mulf %32, %29 : vector<16x8xf32>
    %34 = vector.broadcast %27 : f32 to vector<16x8xf32>
    %35 = arith.mulf %34, %31 : vector<16x8xf32>
    %36 = arith.subf %33, %35 : vector<16x8xf32>
    %37 = arith.addf %24, %36 : vector<16x8xf32>
    %38 = vector.broadcast %26 : f32 to vector<16x8xf32>
    %39 = arith.mulf %38, %31 : vector<16x8xf32>
    %40 = vector.broadcast %27 : f32 to vector<16x8xf32>
    %41 = arith.mulf %40, %29 : vector<16x8xf32>
    %42 = arith.addf %39, %41 : vector<16x8xf32>
    %43 = arith.addf %25, %42 : vector<16x8xf32>
    %c2_47 = arith.constant 2 : index
    %44 = memref.load %arg1[%c2_47] : memref<18xf32, #tpu.memory_space<smem>>
    %c3_48 = arith.constant 3 : index
    %45 = memref.load %arg1[%c3_48] : memref<18xf32, #tpu.memory_space<smem>>
    %c2_49 = arith.constant 2 : index
    %c1_50 = arith.constant 1 : index
    %c0_51 = arith.constant 0 : index
    %c0_52 = arith.constant 0 : index
    %46 = vector.load %arg6[%c2_49, %c1_50, %c0_51, %c0_52] : memref<6x11x16x8xf32, #tpu.memory_space<vmem>>, vector<1x1x16x8xf32>
    %47 = vector.shape_cast %46 : vector<1x1x16x8xf32> to vector<16x8xf32>
    %c5_53 = arith.constant 5 : index
    %c1_54 = arith.constant 1 : index
    %c0_55 = arith.constant 0 : index
    %c0_56 = arith.constant 0 : index
    %48 = vector.load %arg6[%c5_53, %c1_54, %c0_55, %c0_56] : memref<6x11x16x8xf32, #tpu.memory_space<vmem>>, vector<1x1x16x8xf32>
    %49 = vector.shape_cast %48 : vector<1x1x16x8xf32> to vector<16x8xf32>
    %50 = vector.broadcast %44 : f32 to vector<16x8xf32>
    %51 = arith.mulf %50, %47 : vector<16x8xf32>
    %52 = vector.broadcast %45 : f32 to vector<16x8xf32>
    %53 = arith.mulf %52, %49 : vector<16x8xf32>
    %54 = arith.subf %51, %53 : vector<16x8xf32>
    %55 = arith.addf %37, %54 : vector<16x8xf32>
    %56 = vector.broadcast %44 : f32 to vector<16x8xf32>
    %57 = arith.mulf %56, %49 : vector<16x8xf32>
    %58 = vector.broadcast %45 : f32 to vector<16x8xf32>
    %59 = arith.mulf %58, %47 : vector<16x8xf32>
    %60 = arith.addf %57, %59 : vector<16x8xf32>
    %61 = arith.addf %43, %60 : vector<16x8xf32>
    %c4_57 = arith.constant 4 : index
    %62 = memref.load %arg1[%c4_57] : memref<18xf32, #tpu.memory_space<smem>>
    %c5_58 = arith.constant 5 : index
    %63 = memref.load %arg1[%c5_58] : memref<18xf32, #tpu.memory_space<smem>>
    %c2_59 = arith.constant 2 : index
    %c0_60 = arith.constant 0 : index
    %c0_61 = arith.constant 0 : index
    %c0_62 = arith.constant 0 : index
    %64 = vector.load %arg6[%c2_59, %c0_60, %c0_61, %c0_62] : memref<6x11x16x8xf32, #tpu.memory_space<vmem>>, vector<1x1x16x8xf32>
    %65 = vector.shape_cast %64 : vector<1x1x16x8xf32> to vector<16x8xf32>
    %c5_63 = arith.constant 5 : index
    %c0_64 = arith.constant 0 : index
    %c0_65 = arith.constant 0 : index
    %c0_66 = arith.constant 0 : index
    %66 = vector.load %arg6[%c5_63, %c0_64, %c0_65, %c0_66] : memref<6x11x16x8xf32, #tpu.memory_space<vmem>>, vector<1x1x16x8xf32>
    %67 = vector.shape_cast %66 : vector<1x1x16x8xf32> to vector<16x8xf32>
    %68 = vector.broadcast %62 : f32 to vector<16x8xf32>
    %69 = arith.mulf %68, %65 : vector<16x8xf32>
    %70 = vector.broadcast %63 : f32 to vector<16x8xf32>
    %71 = arith.mulf %70, %67 : vector<16x8xf32>
    %72 = arith.subf %69, %71 : vector<16x8xf32>
    %73 = arith.addf %55, %72 : vector<16x8xf32>
    %74 = vector.broadcast %62 : f32 to vector<16x8xf32>
    %75 = arith.mulf %74, %67 : vector<16x8xf32>
    %76 = vector.broadcast %63 : f32 to vector<16x8xf32>
    %77 = arith.mulf %76, %65 : vector<16x8xf32>
    %78 = arith.addf %75, %77 : vector<16x8xf32>
    %79 = arith.addf %61, %78 : vector<16x8xf32>
    %c6 = arith.constant 6 : index
    %80 = memref.load %arg1[%c6] : memref<18xf32, #tpu.memory_space<smem>>
    %c7 = arith.constant 7 : index
    %81 = memref.load %arg1[%c7] : memref<18xf32, #tpu.memory_space<smem>>
    %c1_67 = arith.constant 1 : index
    %c2_68 = arith.constant 2 : index
    %c0_69 = arith.constant 0 : index
    %c0_70 = arith.constant 0 : index
    %82 = vector.load %arg6[%c1_67, %c2_68, %c0_69, %c0_70] : memref<6x11x16x8xf32, #tpu.memory_space<vmem>>, vector<1x1x16x8xf32>
    %83 = vector.shape_cast %82 : vector<1x1x16x8xf32> to vector<16x8xf32>
    %c4_71 = arith.constant 4 : index
    %c2_72 = arith.constant 2 : index
    %c0_73 = arith.constant 0 : index
    %c0_74 = arith.constant 0 : index
    %84 = vector.load %arg6[%c4_71, %c2_72, %c0_73, %c0_74] : memref<6x11x16x8xf32, #tpu.memory_space<vmem>>, vector<1x1x16x8xf32>
    %85 = vector.shape_cast %84 : vector<1x1x16x8xf32> to vector<16x8xf32>
    %86 = vector.broadcast %80 : f32 to vector<16x8xf32>
    %87 = arith.mulf %86, %83 : vector<16x8xf32>
    %88 = vector.broadcast %81 : f32 to vector<16x8xf32>
    %89 = arith.mulf %88, %85 : vector<16x8xf32>
    %90 = arith.subf %87, %89 : vector<16x8xf32>
    %91 = arith.addf %73, %90 : vector<16x8xf32>
    %92 = vector.broadcast %80 : f32 to vector<16x8xf32>
    %93 = arith.mulf %92, %85 : vector<16x8xf32>
    %94 = vector.broadcast %81 : f32 to vector<16x8xf32>
    %95 = arith.mulf %94, %83 : vector<16x8xf32>
    %96 = arith.addf %93, %95 : vector<16x8xf32>
    %97 = arith.addf %79, %96 : vector<16x8xf32>
    %c8 = arith.constant 8 : index
    %98 = memref.load %arg1[%c8] : memref<18xf32, #tpu.memory_space<smem>>
    %c9 = arith.constant 9 : index
    %99 = memref.load %arg1[%c9] : memref<18xf32, #tpu.memory_space<smem>>
    %c1_75 = arith.constant 1 : index
    %c1_76 = arith.constant 1 : index
    %c0_77 = arith.constant 0 : index
    %c0_78 = arith.constant 0 : index
    %100 = vector.load %arg6[%c1_75, %c1_76, %c0_77, %c0_78] : memref<6x11x16x8xf32, #tpu.memory_space<vmem>>, vector<1x1x16x8xf32>
    %101 = vector.shape_cast %100 : vector<1x1x16x8xf32> to vector<16x8xf32>
    %c4_79 = arith.constant 4 : index
    %c1_80 = arith.constant 1 : index
    %c0_81 = arith.constant 0 : index
    %c0_82 = arith.constant 0 : index
    %102 = vector.load %arg6[%c4_79, %c1_80, %c0_81, %c0_82] : memref<6x11x16x8xf32, #tpu.memory_space<vmem>>, vector<1x1x16x8xf32>
    %103 = vector.shape_cast %102 : vector<1x1x16x8xf32> to vector<16x8xf32>
    %104 = vector.broadcast %98 : f32 to vector<16x8xf32>
    %105 = arith.mulf %104, %101 : vector<16x8xf32>
    %106 = vector.broadcast %99 : f32 to vector<16x8xf32>
    %107 = arith.mulf %106, %103 : vector<16x8xf32>
    %108 = arith.subf %105, %107 : vector<16x8xf32>
    %109 = arith.addf %91, %108 : vector<16x8xf32>
    %110 = vector.broadcast %98 : f32 to vector<16x8xf32>
    %111 = arith.mulf %110, %103 : vector<16x8xf32>
    %112 = vector.broadcast %99 : f32 to vector<16x8xf32>
    %113 = arith.mulf %112, %101 : vector<16x8xf32>
    %114 = arith.addf %111, %113 : vector<16x8xf32>
    %115 = arith.addf %97, %114 : vector<16x8xf32>
    %c10 = arith.constant 10 : index
    %116 = memref.load %arg1[%c10] : memref<18xf32, #tpu.memory_space<smem>>
    %c11 = arith.constant 11 : index
    %117 = memref.load %arg1[%c11] : memref<18xf32, #tpu.memory_space<smem>>
    %c1_83 = arith.constant 1 : index
    %c0_84 = arith.constant 0 : index
    %c0_85 = arith.constant 0 : index
    %c0_86 = arith.constant 0 : index
    %118 = vector.load %arg6[%c1_83, %c0_84, %c0_85, %c0_86] : memref<6x11x16x8xf32, #tpu.memory_space<vmem>>, vector<1x1x16x8xf32>
    %119 = vector.shape_cast %118 : vector<1x1x16x8xf32> to vector<16x8xf32>
    %c4_87 = arith.constant 4 : index
    %c0_88 = arith.constant 0 : index
    %c0_89 = arith.constant 0 : index
    %c0_90 = arith.constant 0 : index
    %120 = vector.load %arg6[%c4_87, %c0_88, %c0_89, %c0_90] : memref<6x11x16x8xf32, #tpu.memory_space<vmem>>, vector<1x1x16x8xf32>
    %121 = vector.shape_cast %120 : vector<1x1x16x8xf32> to vector<16x8xf32>
    %122 = vector.broadcast %116 : f32 to vector<16x8xf32>
    %123 = arith.mulf %122, %119 : vector<16x8xf32>
    %124 = vector.broadcast %117 : f32 to vector<16x8xf32>
    %125 = arith.mulf %124, %121 : vector<16x8xf32>
    %126 = arith.subf %123, %125 : vector<16x8xf32>
    %127 = arith.addf %109, %126 : vector<16x8xf32>
    %128 = vector.broadcast %116 : f32 to vector<16x8xf32>
    %129 = arith.mulf %128, %121 : vector<16x8xf32>
    %130 = vector.broadcast %117 : f32 to vector<16x8xf32>
    %131 = arith.mulf %130, %119 : vector<16x8xf32>
    %132 = arith.addf %129, %131 : vector<16x8xf32>
    %133 = arith.addf %115, %132 : vector<16x8xf32>
    %c12 = arith.constant 12 : index
    %134 = memref.load %arg1[%c12] : memref<18xf32, #tpu.memory_space<smem>>
    %c13 = arith.constant 13 : index
    %135 = memref.load %arg1[%c13] : memref<18xf32, #tpu.memory_space<smem>>
    %c0_91 = arith.constant 0 : index
    %c2_92 = arith.constant 2 : index
    %c0_93 = arith.constant 0 : index
    %c0_94 = arith.constant 0 : index
    %136 = vector.load %arg6[%c0_91, %c2_92, %c0_93, %c0_94] : memref<6x11x16x8xf32, #tpu.memory_space<vmem>>, vector<1x1x16x8xf32>
    %137 = vector.shape_cast %136 : vector<1x1x16x8xf32> to vector<16x8xf32>
    %c3_95 = arith.constant 3 : index
    %c2_96 = arith.constant 2 : index
    %c0_97 = arith.constant 0 : index
    %c0_98 = arith.constant 0 : index
    %138 = vector.load %arg6[%c3_95, %c2_96, %c0_97, %c0_98] : memref<6x11x16x8xf32, #tpu.memory_space<vmem>>, vector<1x1x16x8xf32>
    %139 = vector.shape_cast %138 : vector<1x1x16x8xf32> to vector<16x8xf32>
    %140 = vector.broadcast %134 : f32 to vector<16x8xf32>
    %141 = arith.mulf %140, %137 : vector<16x8xf32>
    %142 = vector.broadcast %135 : f32 to vector<16x8xf32>
    %143 = arith.mulf %142, %139 : vector<16x8xf32>
    %144 = arith.subf %141, %143 : vector<16x8xf32>
    %145 = arith.addf %127, %144 : vector<16x8xf32>
    %146 = vector.broadcast %134 : f32 to vector<16x8xf32>
    %147 = arith.mulf %146, %139 : vector<16x8xf32>
    %148 = vector.broadcast %135 : f32 to vector<16x8xf32>
    %149 = arith.mulf %148, %137 : vector<16x8xf32>
    %150 = arith.addf %147, %149 : vector<16x8xf32>
    %151 = arith.addf %133, %150 : vector<16x8xf32>
    %c14 = arith.constant 14 : index
    %152 = memref.load %arg1[%c14] : memref<18xf32, #tpu.memory_space<smem>>
    %c15 = arith.constant 15 : index
    %153 = memref.load %arg1[%c15] : memref<18xf32, #tpu.memory_space<smem>>
    %c0_99 = arith.constant 0 : index
    %c1_100 = arith.constant 1 : index
    %c0_101 = arith.constant 0 : index
    %c0_102 = arith.constant 0 : index
    %154 = vector.load %arg6[%c0_99, %c1_100, %c0_101, %c0_102] : memref<6x11x16x8xf32, #tpu.memory_space<vmem>>, vector<1x1x16x8xf32>
    %155 = vector.shape_cast %154 : vector<1x1x16x8xf32> to vector<16x8xf32>
    %c3_103 = arith.constant 3 : index
    %c1_104 = arith.constant 1 : index
    %c0_105 = arith.constant 0 : index
    %c0_106 = arith.constant 0 : index
    %156 = vector.load %arg6[%c3_103, %c1_104, %c0_105, %c0_106] : memref<6x11x16x8xf32, #tpu.memory_space<vmem>>, vector<1x1x16x8xf32>
    %157 = vector.shape_cast %156 : vector<1x1x16x8xf32> to vector<16x8xf32>
    %158 = vector.broadcast %152 : f32 to vector<16x8xf32>
    %159 = arith.mulf %158, %155 : vector<16x8xf32>
    %160 = vector.broadcast %153 : f32 to vector<16x8xf32>
    %161 = arith.mulf %160, %157 : vector<16x8xf32>
    %162 = arith.subf %159, %161 : vector<16x8xf32>
    %163 = arith.addf %145, %162 : vector<16x8xf32>
    %164 = vector.broadcast %152 : f32 to vector<16x8xf32>
    %165 = arith.mulf %164, %157 : vector<16x8xf32>
    %166 = vector.broadcast %153 : f32 to vector<16x8xf32>
    %167 = arith.mulf %166, %155 : vector<16x8xf32>
    %168 = arith.addf %165, %167 : vector<16x8xf32>
    %169 = arith.addf %151, %168 : vector<16x8xf32>
    %c16 = arith.constant 16 : index
    %170 = memref.load %arg1[%c16] : memref<18xf32, #tpu.memory_space<smem>>
    %c17 = arith.constant 17 : index
    %171 = memref.load %arg1[%c17] : memref<18xf32, #tpu.memory_space<smem>>
    %c0_107 = arith.constant 0 : index
    %c0_108 = arith.constant 0 : index
    %c0_109 = arith.constant 0 : index
    %c0_110 = arith.constant 0 : index
    %172 = vector.load %arg6[%c0_107, %c0_108, %c0_109, %c0_110] : memref<6x11x16x8xf32, #tpu.memory_space<vmem>>, vector<1x1x16x8xf32>
    %173 = vector.shape_cast %172 : vector<1x1x16x8xf32> to vector<16x8xf32>
    %c3_111 = arith.constant 3 : index
    %c0_112 = arith.constant 0 : index
    %c0_113 = arith.constant 0 : index
    %c0_114 = arith.constant 0 : index
    %174 = vector.load %arg6[%c3_111, %c0_112, %c0_113, %c0_114] : memref<6x11x16x8xf32, #tpu.memory_space<vmem>>, vector<1x1x16x8xf32>
    %175 = vector.shape_cast %174 : vector<1x1x16x8xf32> to vector<16x8xf32>
    %176 = vector.broadcast %170 : f32 to vector<16x8xf32>
    %177 = arith.mulf %176, %173 : vector<16x8xf32>
    %178 = vector.broadcast %171 : f32 to vector<16x8xf32>
    %179 = arith.mulf %178, %175 : vector<16x8xf32>
    %180 = arith.subf %177, %179 : vector<16x8xf32>
    %181 = arith.addf %163, %180 : vector<16x8xf32>
    %182 = vector.broadcast %170 : f32 to vector<16x8xf32>
    %183 = arith.mulf %182, %175 : vector<16x8xf32>
    %184 = vector.broadcast %171 : f32 to vector<16x8xf32>
    %185 = arith.mulf %184, %173 : vector<16x8xf32>
    %186 = arith.addf %183, %185 : vector<16x8xf32>
    %187 = arith.addf %169, %186 : vector<16x8xf32>
    %c0_115 = arith.constant 0 : index
    %c0_116 = arith.constant 0 : index
    %c0_117 = arith.constant 0 : index
    %188 = vector.load %arg4[%c0_115, %c0_116, %c0_117] : memref<9x16x8xf32, #tpu.memory_space<vmem>>, vector<1x16x8xf32>
    %189 = vector.shape_cast %188 : vector<1x16x8xf32> to vector<16x8xf32>
    %190 = vector.shape_cast %181 : vector<16x8xf32> to vector<1x16x8xf32>
    tpu.vector_store %arg4[%c0_115, %c0_116, %c0_117], %190 {strides = array<i32>} : memref<9x16x8xf32, #tpu.memory_space<vmem>>, vector<1x16x8xf32>,
    %c0_118 = arith.constant 0 : index
    %c0_119 = arith.constant 0 : index
    %c0_120 = arith.constant 0 : index
    %191 = vector.load %arg5[%c0_118, %c0_119, %c0_120] : memref<9x16x8xf32, #tpu.memory_space<vmem>>, vector<1x16x8xf32>
    %192 = vector.shape_cast %191 : vector<1x16x8xf32> to vector<16x8xf32>
    %193 = vector.shape_cast %187 : vector<16x8xf32> to vector<1x16x8xf32>
    tpu.vector_store %arg5[%c0_118, %c0_119, %c0_120], %193 {strides = array<i32>} : memref<9x16x8xf32, #tpu.memory_space<vmem>>, vector<1x16x8xf32>,
    %cst_121 = arith.constant 0.000000e+00 : f32
    %194 = vector.broadcast %cst_121 : f32 to vector<16x8xf32>
    %cst_122 = arith.constant 0.000000e+00 : f32
    %195 = vector.broadcast %cst_122 : f32 to vector<16x8xf32>
    %c0_123 = arith.constant 0 : index
    %196 = memref.load %arg1[%c0_123] : memref<18xf32, #tpu.memory_space<smem>>
    %c1_124 = arith.constant 1 : index
    %197 = memref.load %arg1[%c1_124] : memref<18xf32, #tpu.memory_space<smem>>
    %c2_125 = arith.constant 2 : index
    %c3_126 = arith.constant 3 : index
    %c0_127 = arith.constant 0 : index
    %c0_128 = arith.constant 0 : index
    %198 = vector.load %arg6[%c2_125, %c3_126, %c0_127, %c0_128] : memref<6x11x16x8xf32, #tpu.memory_space<vmem>>, vector<1x1x16x8xf32>
    %199 = vector.shape_cast %198 : vector<1x1x16x8xf32> to vector<16x8xf32>
    %c5_129 = arith.constant 5 : index
    %c3_130 = arith.constant 3 : index
    %c0_131 = arith.constant 0 : index
    %c0_132 = arith.constant 0 : index
    %200 = vector.load %arg6[%c5_129, %c3_130, %c0_131, %c0_132] : memref<6x11x16x8xf32, #tpu.memory_space<vmem>>, vector<1x1x16x8xf32>
    %201 = vector.shape_cast %200 : vector<1x1x16x8xf32> to vector<16x8xf32>
    %202 = vector.broadcast %196 : f32 to vector<16x8xf32>
    %203 = arith.mulf %202, %199 : vector<16x8xf32>
    %204 = vector.broadcast %197 : f32 to vector<16x8xf32>
    %205 = arith.mulf %204, %201 : vector<16x8xf32>
    %206 = arith.subf %203, %205 : vector<16x8xf32>
    %207 = arith.addf %194, %206 : vector<16x8xf32>
    %208 = vector.broadcast %196 : f32 to vector<16x8xf32>
    %209 = arith.mulf %208, %201 : vector<16x8xf32>
    %210 = vector.broadcast %197 : f32 to vector<16x8xf32>
    %211 = arith.mulf %210, %199 : vector<16x8xf32>
    %212 = arith.addf %209, %211 : vector<16x8xf32>
    %213 = arith.addf %195, %212 : vector<16x8xf32>
    %c2_133 = arith.constant 2 : index
    %214 = memref.load %arg1[%c2_133] : memref<18xf32, #tpu.memory_space<smem>>
    %c3_134 = arith.constant 3 : index
    %215 = memref.load %arg1[%c3_134] : memref<18xf32, #tpu.memory_space<smem>>
    %c2_135 = arith.constant 2 : index
    %c2_136 = arith.constant 2 : index
    %c0_137 = arith.constant 0 : index
    %c0_138 = arith.constant 0 : index
    %216 = vector.load %arg6[%c2_135, %c2_136, %c0_137, %c0_138] : memref<6x11x16x8xf32, #tpu.memory_space<vmem>>, vector<1x1x16x8xf32>
    %217 = vector.shape_cast %216 : vector<1x1x16x8xf32> to vector<16x8xf32>
    %c5_139 = arith.constant 5 : index
    %c2_140 = arith.constant 2 : index
    %c0_141 = arith.constant 0 : index
    %c0_142 = arith.constant 0 : index
    %218 = vector.load %arg6[%c5_139, %c2_140, %c0_141, %c0_142] : memref<6x11x16x8xf32, #tpu.memory_space<vmem>>, vector<1x1x16x8xf32>
    %219 = vector.shape_cast %218 : vector<1x1x16x8xf32> to vector<16x8xf32>
    %220 = vector.broadcast %214 : f32 to vector<16x8xf32>
    %221 = arith.mulf %220, %217 : vector<16x8xf32>
    %222 = vector.broadcast %215 : f32 to vector<16x8xf32>
    %223 = arith.mulf %222, %219 : vector<16x8xf32>
    %224 = arith.subf %221, %223 : vector<16x8xf32>
    %225 = arith.addf %207, %224 : vector<16x8xf32>
    %226 = vector.broadcast %214 : f32 to vector<16x8xf32>
    %227 = arith.mulf %226, %219 : vector<16x8xf32>
    %228 = vector.broadcast %215 : f32 to vector<16x8xf32>
    %229 = arith.mulf %228, %217 : vector<16x8xf32>
    %230 = arith.addf %227, %229 : vector<16x8xf32>
    %231 = arith.addf %213, %230 : vector<16x8xf32>
    %c4_143 = arith.constant 4 : index
    %232 = memref.load %arg1[%c4_143] : memref<18xf32, #tpu.memory_space<smem>>
    %c5_144 = arith.constant 5 : index
    %233 = memref.load %arg1[%c5_144] : memref<18xf32, #tpu.memory_space<smem>>
    %c2_145 = arith.constant 2 : index
    %c1_146 = arith.constant 1 : index
    %c0_147 = arith.constant 0 : index
    %c0_148 = arith.constant 0 : index
    %234 = vector.load %arg6[%c2_145, %c1_146, %c0_147, %c0_148] : memref<6x11x16x8xf32, #tpu.memory_space<vmem>>, vector<1x1x16x8xf32>
    %235 = vector.shape_cast %234 : vector<1x1x16x8xf32> to vector<16x8xf32>
    %c5_149 = arith.constant 5 : index
    %c1_150 = arith.constant 1 : index
    %c0_151 = arith.constant 0 : index
    %c0_152 = arith.constant 0 : index
    %236 = vector.load %arg6[%c5_149, %c1_150, %c0_151, %c0_152] : memref<6x11x16x8xf32, #tpu.memory_space<vmem>>, vector<1x1x16x8xf32>
    %237 = vector.shape_cast %236 : vector<1x1x16x8xf32> to vector<16x8xf32>
    %238 = vector.broadcast %232 : f32 to vector<16x8xf32>
    %239 = arith.mulf %238, %235 : vector<16x8xf32>
    %240 = vector.broadcast %233 : f32 to vector<16x8xf32>
    %241 = arith.mulf %240, %237 : vector<16x8xf32>
    %242 = arith.subf %239, %241 : vector<16x8xf32>
    %243 = arith.addf %225, %242 : vector<16x8xf32>
    %244 = vector.broadcast %232 : f32 to vector<16x8xf32>
    %245 = arith.mulf %244, %237 : vector<16x8xf32>
    %246 = vector.broadcast %233 : f32 to vector<16x8xf32>
    %247 = arith.mulf %246, %235 : vector<16x8xf32>
    %248 = arith.addf %245, %247 : vector<16x8xf32>
    %249 = arith.addf %231, %248 : vector<16x8xf32>
    %c6_153 = arith.constant 6 : index
    %250 = memref.load %arg1[%c6_153] : memref<18xf32, #tpu.memory_space<smem>>
    %c7_154 = arith.constant 7 : index
    %251 = memref.load %arg1[%c7_154] : memref<18xf32, #tpu.memory_space<smem>>
    %c1_155 = arith.constant 1 : index
    %c3_156 = arith.constant 3 : index
    %c0_157 = arith.constant 0 : index
    %c0_158 = arith.constant 0 : index
    %252 = vector.load %arg6[%c1_155, %c3_156, %c0_157, %c0_158] : memref<6x11x16x8xf32, #tpu.memory_space<vmem>>, vector<1x1x16x8xf32>
    %253 = vector.shape_cast %252 : vector<1x1x16x8xf32> to vector<16x8xf32>
    %c4_159 = arith.constant 4 : index
    %c3_160 = arith.constant 3 : index
    %c0_161 = arith.constant 0 : index
    %c0_162 = arith.constant 0 : index
    %254 = vector.load %arg6[%c4_159, %c3_160, %c0_161, %c0_162] : memref<6x11x16x8xf32, #tpu.memory_space<vmem>>, vector<1x1x16x8xf32>
    %255 = vector.shape_cast %254 : vector<1x1x16x8xf32> to vector<16x8xf32>
    %256 = vector.broadcast %250 : f32 to vector<16x8xf32>
    %257 = arith.mulf %256, %253 : vector<16x8xf32>
    %258 = vector.broadcast %251 : f32 to vector<16x8xf32>
    %259 = arith.mulf %258, %255 : vector<16x8xf32>
    %260 = arith.subf %257, %259 : vector<16x8xf32>
    %261 = arith.addf %243, %260 : vector<16x8xf32>
    %262 = vector.broadcast %250 : f32 to vector<16x8xf32>
    %263 = arith.mulf %262, %255 : vector<16x8xf32>
    %264 = vector.broadcast %251 : f32 to vector<16x8xf32>
    %265 = arith.mulf %264, %253 : vector<16x8xf32>
    %266 = arith.addf %263, %265 : vector<16x8xf32>
    %267 = arith.addf %249, %266 : vector<16x8xf32>
    %c8_163 = arith.constant 8 : index
    %268 = memref.load %arg1[%c8_163] : memref<18xf32, #tpu.memory_space<smem>>
    %c9_164 = arith.constant 9 : index
    %269 = memref.load %arg1[%c9_164] : memref<18xf32, #tpu.memory_space<smem>>
    %c1_165 = arith.constant 1 : index
    %c2_166 = arith.constant 2 : index
    %c0_167 = arith.constant 0 : index
    %c0_168 = arith.constant 0 : index
    %270 = vector.load %arg6[%c1_165, %c2_166, %c0_167, %c0_168] : memref<6x11x16x8xf32, #tpu.memory_space<vmem>>, vector<1x1x16x8xf32>
    %271 = vector.shape_cast %270 : vector<1x1x16x8xf32> to vector<16x8xf32>
    %c4_169 = arith.constant 4 : index
    %c2_170 = arith.constant 2 : index
    %c0_171 = arith.constant 0 : index
    %c0_172 = arith.constant 0 : index
    %272 = vector.load %arg6[%c4_169, %c2_170, %c0_171, %c0_172] : memref<6x11x16x8xf32, #tpu.memory_space<vmem>>, vector<1x1x16x8xf32>
    %273 = vector.shape_cast %272 : vector<1x1x16x8xf32> to vector<16x8xf32>
    %274 = vector.broadcast %268 : f32 to vector<16x8xf32>
    %275 = arith.mulf %274, %271 : vector<16x8xf32>
    %276 = vector.broadcast %269 : f32 to vector<16x8xf32>
    %277 = arith.mulf %276, %273 : vector<16x8xf32>
    %278 = arith.subf %275, %277 : vector<16x8xf32>
    %279 = arith.addf %261, %278 : vector<16x8xf32>
    %280 = vector.broadcast %268 : f32 to vector<16x8xf32>
    %281 = arith.mulf %280, %273 : vector<16x8xf32>
    %282 = vector.broadcast %269 : f32 to vector<16x8xf32>
    %283 = arith.mulf %282, %271 : vector<16x8xf32>
    %284 = arith.addf %281, %283 : vector<16x8xf32>
    %285 = arith.addf %267, %284 : vector<16x8xf32>
    %c10_173 = arith.constant 10 : index
    %286 = memref.load %arg1[%c10_173] : memref<18xf32, #tpu.memory_space<smem>>
    %c11_174 = arith.constant 11 : index
    %287 = memref.load %arg1[%c11_174] : memref<18xf32, #tpu.memory_space<smem>>
    %c1_175 = arith.constant 1 : index
    %c1_176 = arith.constant 1 : index
    %c0_177 = arith.constant 0 : index
    %c0_178 = arith.constant 0 : index
    %288 = vector.load %arg6[%c1_175, %c1_176, %c0_177, %c0_178] : memref<6x11x16x8xf32, #tpu.memory_space<vmem>>, vector<1x1x16x8xf32>
    %289 = vector.shape_cast %288 : vector<1x1x16x8xf32> to vector<16x8xf32>
    %c4_179 = arith.constant 4 : index
    %c1_180 = arith.constant 1 : index
    %c0_181 = arith.constant 0 : index
    %c0_182 = arith.constant 0 : index
    %290 = vector.load %arg6[%c4_179, %c1_180, %c0_181, %c0_182] : memref<6x11x16x8xf32, #tpu.memory_space<vmem>>, vector<1x1x16x8xf32>
    %291 = vector.shape_cast %290 : vector<1x1x16x8xf32> to vector<16x8xf32>
    %292 = vector.broadcast %286 : f32 to vector<16x8xf32>
    %293 = arith.mulf %292, %289 : vector<16x8xf32>
    %294 = vector.broadcast %287 : f32 to vector<16x8xf32>
    %295 = arith.mulf %294, %291 : vector<16x8xf32>
    %296 = arith.subf %293, %295 : vector<16x8xf32>
    %297 = arith.addf %279, %296 : vector<16x8xf32>
    %298 = vector.broadcast %286 : f32 to vector<16x8xf32>
    %299 = arith.mulf %298, %291 : vector<16x8xf32>
    %300 = vector.broadcast %287 : f32 to vector<16x8xf32>
    %301 = arith.mulf %300, %289 : vector<16x8xf32>
    %302 = arith.addf %299, %301 : vector<16x8xf32>
    %303 = arith.addf %285, %302 : vector<16x8xf32>
    %c12_183 = arith.constant 12 : index
    %304 = memref.load %arg1[%c12_183] : memref<18xf32, #tpu.memory_space<smem>>
    %c13_184 = arith.constant 13 : index
    %305 = memref.load %arg1[%c13_184] : memref<18xf32, #tpu.memory_space<smem>>
    %c0_185 = arith.constant 0 : index
    %c3_186 = arith.constant 3 : index
    %c0_187 = arith.constant 0 : index
    %c0_188 = arith.constant 0 : index
    %306 = vector.load %arg6[%c0_185, %c3_186, %c0_187, %c0_188] : memref<6x11x16x8xf32, #tpu.memory_space<vmem>>, vector<1x1x16x8xf32>
    %307 = vector.shape_cast %306 : vector<1x1x16x8xf32> to vector<16x8xf32>
    %c3_189 = arith.constant 3 : index
    %c3_190 = arith.constant 3 : index
    %c0_191 = arith.constant 0 : index
    %c0_192 = arith.constant 0 : index
    %308 = vector.load %arg6[%c3_189, %c3_190, %c0_191, %c0_192] : memref<6x11x16x8xf32, #tpu.memory_space<vmem>>, vector<1x1x16x8xf32>
    %309 = vector.shape_cast %308 : vector<1x1x16x8xf32> to vector<16x8xf32>
    %310 = vector.broadcast %304 : f32 to vector<16x8xf32>
    %311 = arith.mulf %310, %307 : vector<16x8xf32>
    %312 = vector.broadcast %305 : f32 to vector<16x8xf32>
    %313 = arith.mulf %312, %309 : vector<16x8xf32>
    %314 = arith.subf %311, %313 : vector<16x8xf32>
    %315 = arith.addf %297, %314 : vector<16x8xf32>
    %316 = vector.broadcast %304 : f32 to vector<16x8xf32>
    %317 = arith.mulf %316, %309 : vector<16x8xf32>
    %318 = vector.broadcast %305 : f32 to vector<16x8xf32>
    %319 = arith.mulf %318, %307 : vector<16x8xf32>
    %320 = arith.addf %317, %319 : vector<16x8xf32>
    %321 = arith.addf %303, %320 : vector<16x8xf32>
    %c14_193 = arith.constant 14 : index
    %322 = memref.load %arg1[%c14_193] : memref<18xf32, #tpu.memory_space<smem>>
    %c15_194 = arith.constant 15 : index
    %323 = memref.load %arg1[%c15_194] : memref<18xf32, #tpu.memory_space<smem>>
    %c0_195 = arith.constant 0 : index
    %c2_196 = arith.constant 2 : index
    %c0_197 = arith.constant 0 : index
    %c0_198 = arith.constant 0 : index
    %324 = vector.load %arg6[%c0_195, %c2_196, %c0_197, %c0_198] : memref<6x11x16x8xf32, #tpu.memory_space<vmem>>, vector<1x1x16x8xf32>
    %325 = vector.shape_cast %324 : vector<1x1x16x8xf32> to vector<16x8xf32>
    %c3_199 = arith.constant 3 : index
    %c2_200 = arith.constant 2 : index
    %c0_201 = arith.constant 0 : index
    %c0_202 = arith.constant 0 : index
    %326 = vector.load %arg6[%c3_199, %c2_200, %c0_201, %c0_202] : memref<6x11x16x8xf32, #tpu.memory_space<vmem>>, vector<1x1x16x8xf32>
    %327 = vector.shape_cast %326 : vector<1x1x16x8xf32> to vector<16x8xf32>
    %328 = vector.broadcast %322 : f32 to vector<16x8xf32>
    %329 = arith.mulf %328, %325 : vector<16x8xf32>
    %330 = vector.broadcast %323 : f32 to vector<16x8xf32>
    %331 = arith.mulf %330, %327 : vector<16x8xf32>
    %332 = arith.subf %329, %331 : vector<16x8xf32>
    %333 = arith.addf %315, %332 : vector<16x8xf32>
    %334 = vector.broadcast %322 : f32 to vector<16x8xf32>
    %335 = arith.mulf %334, %327 : vector<16x8xf32>
    %336 = vector.broadcast %323 : f32 to vector<16x8xf32>
    %337 = arith.mulf %336, %325 : vector<16x8xf32>
    %338 = arith.addf %335, %337 : vector<16x8xf32>
    %339 = arith.addf %321, %338 : vector<16x8xf32>
    %c16_203 = arith.constant 16 : index
    %340 = memref.load %arg1[%c16_203] : memref<18xf32, #tpu.memory_space<smem>>
    %c17_204 = arith.constant 17 : index
    %341 = memref.load %arg1[%c17_204] : memref<18xf32, #tpu.memory_space<smem>>
    %c0_205 = arith.constant 0 : index
    %c1_206 = arith.constant 1 : index
    %c0_207 = arith.constant 0 : index
    %c0_208 = arith.constant 0 : index
    %342 = vector.load %arg6[%c0_205, %c1_206, %c0_207, %c0_208] : memref<6x11x16x8xf32, #tpu.memory_space<vmem>>, vector<1x1x16x8xf32>
    %343 = vector.shape_cast %342 : vector<1x1x16x8xf32> to vector<16x8xf32>
    %c3_209 = arith.constant 3 : index
    %c1_210 = arith.constant 1 : index
    %c0_211 = arith.constant 0 : index
    %c0_212 = arith.constant 0 : index
    %344 = vector.load %arg6[%c3_209, %c1_210, %c0_211, %c0_212] : memref<6x11x16x8xf32, #tpu.memory_space<vmem>>, vector<1x1x16x8xf32>
    %345 = vector.shape_cast %344 : vector<1x1x16x8xf32> to vector<16x8xf32>
    %346 = vector.broadcast %340 : f32 to vector<16x8xf32>
    %347 = arith.mulf %346, %343 : vector<16x8xf32>
    %348 = vector.broadcast %341 : f32 to vector<16x8xf32>
    %349 = arith.mulf %348, %345 : vector<16x8xf32>
    %350 = arith.subf %347, %349 : vector<16x8xf32>
    %351 = arith.addf %333, %350 : vector<16x8xf32>
    %352 = vector.broadcast %340 : f32 to vector<16x8xf32>
    %353 = arith.mulf %352, %345 : vector<16x8xf32>
    %354 = vector.broadcast %341 : f32 to vector<16x8xf32>
    %355 = arith.mulf %354, %343 : vector<16x8xf32>
    %356 = arith.addf %353, %355 : vector<16x8xf32>
    %357 = arith.addf %339, %356 : vector<16x8xf32>
    %c1_213 = arith.constant 1 : index
    %c0_214 = arith.constant 0 : index
    %c0_215 = arith.constant 0 : index
    %358 = vector.load %arg4[%c1_213, %c0_214, %c0_215] : memref<9x16x8xf32, #tpu.memory_space<vmem>>, vector<1x16x8xf32>
    %359 = vector.shape_cast %358 : vector<1x16x8xf32> to vector<16x8xf32>
    %360 = vector.shape_cast %351 : vector<16x8xf32> to vector<1x16x8xf32>
    tpu.vector_store %arg4[%c1_213, %c0_214, %c0_215], %360 {strides = array<i32>} : memref<9x16x8xf32, #tpu.memory_space<vmem>>, vector<1x16x8xf32>,
    %c1_216 = arith.constant 1 : index
    %c0_217 = arith.constant 0 : index
    %c0_218 = arith.constant 0 : index
    %361 = vector.load %arg5[%c1_216, %c0_217, %c0_218] : memref<9x16x8xf32, #tpu.memory_space<vmem>>, vector<1x16x8xf32>
    %362 = vector.shape_cast %361 : vector<1x16x8xf32> to vector<16x8xf32>
    %363 = vector.shape_cast %357 : vector<16x8xf32> to vector<1x16x8xf32>
    tpu.vector_store %arg5[%c1_216, %c0_217, %c0_218], %363 {strides = array<i32>} : memref<9x16x8xf32, #tpu.memory_space<vmem>>, vector<1x16x8xf32>,
    %cst_219 = arith.constant 0.000000e+00 : f32
    %364 = vector.broadcast %cst_219 : f32 to vector<16x8xf32>
    %cst_220 = arith.constant 0.000000e+00 : f32
    %365 = vector.broadcast %cst_220 : f32 to vector<16x8xf32>
    %c0_221 = arith.constant 0 : index
    %366 = memref.load %arg1[%c0_221] : memref<18xf32, #tpu.memory_space<smem>>
    %c1_222 = arith.constant 1 : index
    %367 = memref.load %arg1[%c1_222] : memref<18xf32, #tpu.memory_space<smem>>
    %c2_223 = arith.constant 2 : index
    %c4_224 = arith.constant 4 : index
    %c0_225 = arith.constant 0 : index
    %c0_226 = arith.constant 0 : index
    %368 = vector.load %arg6[%c2_223, %c4_224, %c0_225, %c0_226] : memref<6x11x16x8xf32, #tpu.memory_space<vmem>>, vector<1x1x16x8xf32>
    %369 = vector.shape_cast %368 : vector<1x1x16x8xf32> to vector<16x8xf32>
    %c5_227 = arith.constant 5 : index
    %c4_228 = arith.constant 4 : index
    %c0_229 = arith.constant 0 : index
    %c0_230 = arith.constant 0 : index
    %370 = vector.load %arg6[%c5_227, %c4_228, %c0_229, %c0_230] : memref<6x11x16x8xf32, #tpu.memory_space<vmem>>, vector<1x1x16x8xf32>
    %371 = vector.shape_cast %370 : vector<1x1x16x8xf32> to vector<16x8xf32>
    %372 = vector.broadcast %366 : f32 to vector<16x8xf32>
    %373 = arith.mulf %372, %369 : vector<16x8xf32>
    %374 = vector.broadcast %367 : f32 to vector<16x8xf32>
    %375 = arith.mulf %374, %371 : vector<16x8xf32>
    %376 = arith.subf %373, %375 : vector<16x8xf32>
    %377 = arith.addf %364, %376 : vector<16x8xf32>
    %378 = vector.broadcast %366 : f32 to vector<16x8xf32>
    %379 = arith.mulf %378, %371 : vector<16x8xf32>
    %380 = vector.broadcast %367 : f32 to vector<16x8xf32>
    %381 = arith.mulf %380, %369 : vector<16x8xf32>
    %382 = arith.addf %379, %381 : vector<16x8xf32>
    %383 = arith.addf %365, %382 : vector<16x8xf32>
    %c2_231 = arith.constant 2 : index
    %384 = memref.load %arg1[%c2_231] : memref<18xf32, #tpu.memory_space<smem>>
    %c3_232 = arith.constant 3 : index
    %385 = memref.load %arg1[%c3_232] : memref<18xf32, #tpu.memory_space<smem>>
    %c2_233 = arith.constant 2 : index
    %c3_234 = arith.constant 3 : index
    %c0_235 = arith.constant 0 : index
    %c0_236 = arith.constant 0 : index
    %386 = vector.load %arg6[%c2_233, %c3_234, %c0_235, %c0_236] : memref<6x11x16x8xf32, #tpu.memory_space<vmem>>, vector<1x1x16x8xf32>
    %387 = vector.shape_cast %386 : vector<1x1x16x8xf32> to vector<16x8xf32>
    %c5_237 = arith.constant 5 : index
    %c3_238 = arith.constant 3 : index
    %c0_239 = arith.constant 0 : index
    %c0_240 = arith.constant 0 : index
    %388 = vector.load %arg6[%c5_237, %c3_238, %c0_239, %c0_240] : memref<6x11x16x8xf32, #tpu.memory_space<vmem>>, vector<1x1x16x8xf32>
    %389 = vector.shape_cast %388 : vector<1x1x16x8xf32> to vector<16x8xf32>
    %390 = vector.broadcast %384 : f32 to vector<16x8xf32>
    %391 = arith.mulf %390, %387 : vector<16x8xf32>
    %392 = vector.broadcast %385 : f32 to vector<16x8xf32>
    %393 = arith.mulf %392, %389 : vector<16x8xf32>
    %394 = arith.subf %391, %393 : vector<16x8xf32>
    %395 = arith.addf %377, %394 : vector<16x8xf32>
    %396 = vector.broadcast %384 : f32 to vector<16x8xf32>
    %397 = arith.mulf %396, %389 : vector<16x8xf32>
    %398 = vector.broadcast %385 : f32 to vector<16x8xf32>
    %399 = arith.mulf %398, %387 : vector<16x8xf32>
    %400 = arith.addf %397, %399 : vector<16x8xf32>
    %401 = arith.addf %383, %400 : vector<16x8xf32>
    %c4_241 = arith.constant 4 : index
    %402 = memref.load %arg1[%c4_241] : memref<18xf32, #tpu.memory_space<smem>>
    %c5_242 = arith.constant 5 : index
    %403 = memref.load %arg1[%c5_242] : memref<18xf32, #tpu.memory_space<smem>>
    %c2_243 = arith.constant 2 : index
    %c2_244 = arith.constant 2 : index
    %c0_245 = arith.constant 0 : index
    %c0_246 = arith.constant 0 : index
    %404 = vector.load %arg6[%c2_243, %c2_244, %c0_245, %c0_246] : memref<6x11x16x8xf32, #tpu.memory_space<vmem>>, vector<1x1x16x8xf32>
    %405 = vector.shape_cast %404 : vector<1x1x16x8xf32> to vector<16x8xf32>
    %c5_247 = arith.constant 5 : index
    %c2_248 = arith.constant 2 : index
    %c0_249 = arith.constant 0 : index
    %c0_250 = arith.constant 0 : index
    %406 = vector.load %arg6[%c5_247, %c2_248, %c0_249, %c0_250] : memref<6x11x16x8xf32, #tpu.memory_space<vmem>>, vector<1x1x16x8xf32>
    %407 = vector.shape_cast %406 : vector<1x1x16x8xf32> to vector<16x8xf32>
    %408 = vector.broadcast %402 : f32 to vector<16x8xf32>
    %409 = arith.mulf %408, %405 : vector<16x8xf32>
    %410 = vector.broadcast %403 : f32 to vector<16x8xf32>
    %411 = arith.mulf %410, %407 : vector<16x8xf32>
    %412 = arith.subf %409, %411 : vector<16x8xf32>
    %413 = arith.addf %395, %412 : vector<16x8xf32>
    %414 = vector.broadcast %402 : f32 to vector<16x8xf32>
    %415 = arith.mulf %414, %407 : vector<16x8xf32>
    %416 = vector.broadcast %403 : f32 to vector<16x8xf32>
    %417 = arith.mulf %416, %405 : vector<16x8xf32>
    %418 = arith.addf %415, %417 : vector<16x8xf32>
    %419 = arith.addf %401, %418 : vector<16x8xf32>
    %c6_251 = arith.constant 6 : index
    %420 = memref.load %arg1[%c6_251] : memref<18xf32, #tpu.memory_space<smem>>
    %c7_252 = arith.constant 7 : index
    %421 = memref.load %arg1[%c7_252] : memref<18xf32, #tpu.memory_space<smem>>
    %c1_253 = arith.constant 1 : index
    %c4_254 = arith.constant 4 : index
    %c0_255 = arith.constant 0 : index
    %c0_256 = arith.constant 0 : index
    %422 = vector.load %arg6[%c1_253, %c4_254, %c0_255, %c0_256] : memref<6x11x16x8xf32, #tpu.memory_space<vmem>>, vector<1x1x16x8xf32>
    %423 = vector.shape_cast %422 : vector<1x1x16x8xf32> to vector<16x8xf32>
    %c4_257 = arith.constant 4 : index
    %c4_258 = arith.constant 4 : index
    %c0_259 = arith.constant 0 : index
    %c0_260 = arith.constant 0 : index
    %424 = vector.load %arg6[%c4_257, %c4_258, %c0_259, %c0_260] : memref<6x11x16x8xf32, #tpu.memory_space<vmem>>, vector<1x1x16x8xf32>
    %425 = vector.shape_cast %424 : vector<1x1x16x8xf32> to vector<16x8xf32>
    %426 = vector.broadcast %420 : f32 to vector<16x8xf32>
    %427 = arith.mulf %426, %423 : vector<16x8xf32>
    %428 = vector.broadcast %421 : f32 to vector<16x8xf32>
    %429 = arith.mulf %428, %425 : vector<16x8xf32>
    %430 = arith.subf %427, %429 : vector<16x8xf32>
    %431 = arith.addf %413, %430 : vector<16x8xf32>
    %432 = vector.broadcast %420 : f32 to vector<16x8xf32>
    %433 = arith.mulf %432, %425 : vector<16x8xf32>
    %434 = vector.broadcast %421 : f32 to vector<16x8xf32>
    %435 = arith.mulf %434, %423 : vector<16x8xf32>
    %436 = arith.addf %433, %435 : vector<16x8xf32>
    %437 = arith.addf %419, %436 : vector<16x8xf32>
    %c8_261 = arith.constant 8 : index
    %438 = memref.load %arg1[%c8_261] : memref<18xf32, #tpu.memory_space<smem>>
    %c9_262 = arith.constant 9 : index
    %439 = memref.load %arg1[%c9_262] : memref<18xf32, #tpu.memory_space<smem>>
    %c1_263 = arith.constant 1 : index
    %c3_264 = arith.constant 3 : index
    %c0_265 = arith.constant 0 : index
    %c0_266 = arith.constant 0 : index
    %440 = vector.load %arg6[%c1_263, %c3_264, %c0_265, %c0_266] : memref<6x11x16x8xf32, #tpu.memory_space<vmem>>, vector<1x1x16x8xf32>
    %441 = vector.shape_cast %440 : vector<1x1x16x8xf32> to vector<16x8xf32>
    %c4_267 = arith.constant 4 : index
    %c3_268 = arith.constant 3 : index
    %c0_269 = arith.constant 0 : index
    %c0_270 = arith.constant 0 : index
    %442 = vector.load %arg6[%c4_267, %c3_268, %c0_269, %c0_270] : memref<6x11x16x8xf32, #tpu.memory_space<vmem>>, vector<1x1x16x8xf32>
    %443 = vector.shape_cast %442 : vector<1x1x16x8xf32> to vector<16x8xf32>
    %444 = vector.broadcast %438 : f32 to vector<16x8xf32>
    %445 = arith.mulf %444, %441 : vector<16x8xf32>
    %446 = vector.broadcast %439 : f32 to vector<16x8xf32>
    %447 = arith.mulf %446, %443 : vector<16x8xf32>
    %448 = arith.subf %445, %447 : vector<16x8xf32>
    %449 = arith.addf %431, %448 : vector<16x8xf32>
    %450 = vector.broadcast %438 : f32 to vector<16x8xf32>
    %451 = arith.mulf %450, %443 : vector<16x8xf32>
    %452 = vector.broadcast %439 : f32 to vector<16x8xf32>
    %453 = arith.mulf %452, %441 : vector<16x8xf32>
    %454 = arith.addf %451, %453 : vector<16x8xf32>
    %455 = arith.addf %437, %454 : vector<16x8xf32>
    %c10_271 = arith.constant 10 : index
    %456 = memref.load %arg1[%c10_271] : memref<18xf32, #tpu.memory_space<smem>>
    %c11_272 = arith.constant 11 : index
    %457 = memref.load %arg1[%c11_272] : memref<18xf32, #tpu.memory_space<smem>>
    %c1_273 = arith.constant 1 : index
    %c2_274 = arith.constant 2 : index
    %c0_275 = arith.constant 0 : index
    %c0_276 = arith.constant 0 : index
    %458 = vector.load %arg6[%c1_273, %c2_274, %c0_275, %c0_276] : memref<6x11x16x8xf32, #tpu.memory_space<vmem>>, vector<1x1x16x8xf32>
    %459 = vector.shape_cast %458 : vector<1x1x16x8xf32> to vector<16x8xf32>
    %c4_277 = arith.constant 4 : index
    %c2_278 = arith.constant 2 : index
    %c0_279 = arith.constant 0 : index
    %c0_280 = arith.constant 0 : index
    %460 = vector.load %arg6[%c4_277, %c2_278, %c0_279, %c0_280] : memref<6x11x16x8xf32, #tpu.memory_space<vmem>>, vector<1x1x16x8xf32>
    %461 = vector.shape_cast %460 : vector<1x1x16x8xf32> to vector<16x8xf32>
    %462 = vector.broadcast %456 : f32 to vector<16x8xf32>
    %463 = arith.mulf %462, %459 : vector<16x8xf32>
    %464 = vector.broadcast %457 : f32 to vector<16x8xf32>
    %465 = arith.mulf %464, %461 : vector<16x8xf32>
    %466 = arith.subf %463, %465 : vector<16x8xf32>
    %467 = arith.addf %449, %466 : vector<16x8xf32>
    %468 = vector.broadcast %456 : f32 to vector<16x8xf32>
    %469 = arith.mulf %468, %461 : vector<16x8xf32>
    %470 = vector.broadcast %457 : f32 to vector<16x8xf32>
    %471 = arith.mulf %470, %459 : vector<16x8xf32>
    %472 = arith.addf %469, %471 : vector<16x8xf32>
    %473 = arith.addf %455, %472 : vector<16x8xf32>
    %c12_281 = arith.constant 12 : index
    %474 = memref.load %arg1[%c12_281] : memref<18xf32, #tpu.memory_space<smem>>
    %c13_282 = arith.constant 13 : index
    %475 = memref.load %arg1[%c13_282] : memref<18xf32, #tpu.memory_space<smem>>
    %c0_283 = arith.constant 0 : index
    %c4_284 = arith.constant 4 : index
    %c0_285 = arith.constant 0 : index
    %c0_286 = arith.constant 0 : index
    %476 = vector.load %arg6[%c0_283, %c4_284, %c0_285, %c0_286] : memref<6x11x16x8xf32, #tpu.memory_space<vmem>>, vector<1x1x16x8xf32>
    %477 = vector.shape_cast %476 : vector<1x1x16x8xf32> to vector<16x8xf32>
    %c3_287 = arith.constant 3 : index
    %c4_288 = arith.constant 4 : index
    %c0_289 = arith.constant 0 : index
    %c0_290 = arith.constant 0 : index
    %478 = vector.load %arg6[%c3_287, %c4_288, %c0_289, %c0_290] : memref<6x11x16x8xf32, #tpu.memory_space<vmem>>, vector<1x1x16x8xf32>
    %479 = vector.shape_cast %478 : vector<1x1x16x8xf32> to vector<16x8xf32>
    %480 = vector.broadcast %474 : f32 to vector<16x8xf32>
    %481 = arith.mulf %480, %477 : vector<16x8xf32>
    %482 = vector.broadcast %475 : f32 to vector<16x8xf32>
    %483 = arith.mulf %482, %479 : vector<16x8xf32>
    %484 = arith.subf %481, %483 : vector<16x8xf32>
    %485 = arith.addf %467, %484 : vector<16x8xf32>
    %486 = vector.broadcast %474 : f32 to vector<16x8xf32>
    %487 = arith.mulf %486, %479 : vector<16x8xf32>
    %488 = vector.broadcast %475 : f32 to vector<16x8xf32>
    %489 = arith.mulf %488, %477 : vector<16x8xf32>
    %490 = arith.addf %487, %489 : vector<16x8xf32>
    %491 = arith.addf %473, %490 : vector<16x8xf32>
    %c14_291 = arith.constant 14 : index
    %492 = memref.load %arg1[%c14_291] : memref<18xf32, #tpu.memory_space<smem>>
    %c15_292 = arith.constant 15 : index
    %493 = memref.load %arg1[%c15_292] : memref<18xf32, #tpu.memory_space<smem>>
    %c0_293 = arith.constant 0 : index
    %c3_294 = arith.constant 3 : index
    %c0_295 = arith.constant 0 : index
    %c0_296 = arith.constant 0 : index
    %494 = vector.load %arg6[%c0_293, %c3_294, %c0_295, %c0_296] : memref<6x11x16x8xf32, #tpu.memory_space<vmem>>, vector<1x1x16x8xf32>
    %495 = vector.shape_cast %494 : vector<1x1x16x8xf32> to vector<16x8xf32>
    %c3_297 = arith.constant 3 : index
    %c3_298 = arith.constant 3 : index
    %c0_299 = arith.constant 0 : index
    %c0_300 = arith.constant 0 : index
    %496 = vector.load %arg6[%c3_297, %c3_298, %c0_299, %c0_300] : memref<6x11x16x8xf32, #tpu.memory_space<vmem>>, vector<1x1x16x8xf32>
    %497 = vector.shape_cast %496 : vector<1x1x16x8xf32> to vector<16x8xf32>
    %498 = vector.broadcast %492 : f32 to vector<16x8xf32>
    %499 = arith.mulf %498, %495 : vector<16x8xf32>
    %500 = vector.broadcast %493 : f32 to vector<16x8xf32>
    %501 = arith.mulf %500, %497 : vector<16x8xf32>
    %502 = arith.subf %499, %501 : vector<16x8xf32>
    %503 = arith.addf %485, %502 : vector<16x8xf32>
    %504 = vector.broadcast %492 : f32 to vector<16x8xf32>
    %505 = arith.mulf %504, %497 : vector<16x8xf32>
    %506 = vector.broadcast %493 : f32 to vector<16x8xf32>
    %507 = arith.mulf %506, %495 : vector<16x8xf32>
    %508 = arith.addf %505, %507 : vector<16x8xf32>
    %509 = arith.addf %491, %508 : vector<16x8xf32>
    %c16_301 = arith.constant 16 : index
    %510 = memref.load %arg1[%c16_301] : memref<18xf32, #tpu.memory_space<smem>>
    %c17_302 = arith.constant 17 : index
    %511 = memref.load %arg1[%c17_302] : memref<18xf32, #tpu.memory_space<smem>>
    %c0_303 = arith.constant 0 : index
    %c2_304 = arith.constant 2 : index
    %c0_305 = arith.constant 0 : index
    %c0_306 = arith.constant 0 : index
    %512 = vector.load %arg6[%c0_303, %c2_304, %c0_305, %c0_306] : memref<6x11x16x8xf32, #tpu.memory_space<vmem>>, vector<1x1x16x8xf32>
    %513 = vector.shape_cast %512 : vector<1x1x16x8xf32> to vector<16x8xf32>
    %c3_307 = arith.constant 3 : index
    %c2_308 = arith.constant 2 : index
    %c0_309 = arith.constant 0 : index
    %c0_310 = arith.constant 0 : index
    %514 = vector.load %arg6[%c3_307, %c2_308, %c0_309, %c0_310] : memref<6x11x16x8xf32, #tpu.memory_space<vmem>>, vector<1x1x16x8xf32>
    %515 = vector.shape_cast %514 : vector<1x1x16x8xf32> to vector<16x8xf32>
    %516 = vector.broadcast %510 : f32 to vector<16x8xf32>
    %517 = arith.mulf %516, %513 : vector<16x8xf32>
    %518 = vector.broadcast %511 : f32 to vector<16x8xf32>
    %519 = arith.mulf %518, %515 : vector<16x8xf32>
    %520 = arith.subf %517, %519 : vector<16x8xf32>
    %521 = arith.addf %503, %520 : vector<16x8xf32>
    %522 = vector.broadcast %510 : f32 to vector<16x8xf32>
    %523 = arith.mulf %522, %515 : vector<16x8xf32>
    %524 = vector.broadcast %511 : f32 to vector<16x8xf32>
    %525 = arith.mulf %524, %513 : vector<16x8xf32>
    %526 = arith.addf %523, %525 : vector<16x8xf32>
    %527 = arith.addf %509, %526 : vector<16x8xf32>
    %c2_311 = arith.constant 2 : index
    %c0_312 = arith.constant 0 : index
    %c0_313 = arith.constant 0 : index
    %528 = vector.load %arg4[%c2_311, %c0_312, %c0_313] : memref<9x16x8xf32, #tpu.memory_space<vmem>>, vector<1x16x8xf32>
    %529 = vector.shape_cast %528 : vector<1x16x8xf32> to vector<16x8xf32>
    %530 = vector.shape_cast %521 : vector<16x8xf32> to vector<1x16x8xf32>
    tpu.vector_store %arg4[%c2_311, %c0_312, %c0_313], %530 {strides = array<i32>} : memref<9x16x8xf32, #tpu.memory_space<vmem>>, vector<1x16x8xf32>,
    %c2_314 = arith.constant 2 : index
    %c0_315 = arith.constant 0 : index
    %c0_316 = arith.constant 0 : index
    %531 = vector.load %arg5[%c2_314, %c0_315, %c0_316] : memref<9x16x8xf32, #tpu.memory_space<vmem>>, vector<1x16x8xf32>
    %532 = vector.shape_cast %531 : vector<1x16x8xf32> to vector<16x8xf32>
    %533 = vector.shape_cast %527 : vector<16x8xf32> to vector<1x16x8xf32>
    tpu.vector_store %arg5[%c2_314, %c0_315, %c0_316], %533 {strides = array<i32>} : memref<9x16x8xf32, #tpu.memory_space<vmem>>, vector<1x16x8xf32>,
    %cst_317 = arith.constant 0.000000e+00 : f32
    %534 = vector.broadcast %cst_317 : f32 to vector<16x8xf32>
    %cst_318 = arith.constant 0.000000e+00 : f32
    %535 = vector.broadcast %cst_318 : f32 to vector<16x8xf32>
    %c0_319 = arith.constant 0 : index
    %536 = memref.load %arg1[%c0_319] : memref<18xf32, #tpu.memory_space<smem>>
    %c1_320 = arith.constant 1 : index
    %537 = memref.load %arg1[%c1_320] : memref<18xf32, #tpu.memory_space<smem>>
    %c2_321 = arith.constant 2 : index
    %c5_322 = arith.constant 5 : index
    %c0_323 = arith.constant 0 : index
    %c0_324 = arith.constant 0 : index
    %538 = vector.load %arg6[%c2_321, %c5_322, %c0_323, %c0_324] : memref<6x11x16x8xf32, #tpu.memory_space<vmem>>, vector<1x1x16x8xf32>
    %539 = vector.shape_cast %538 : vector<1x1x16x8xf32> to vector<16x8xf32>
    %c5_325 = arith.constant 5 : index
    %c5_326 = arith.constant 5 : index
    %c0_327 = arith.constant 0 : index
    %c0_328 = arith.constant 0 : index
    %540 = vector.load %arg6[%c5_325, %c5_326, %c0_327, %c0_328] : memref<6x11x16x8xf32, #tpu.memory_space<vmem>>, vector<1x1x16x8xf32>
    %541 = vector.shape_cast %540 : vector<1x1x16x8xf32> to vector<16x8xf32>
    %542 = vector.broadcast %536 : f32 to vector<16x8xf32>
    %543 = arith.mulf %542, %539 : vector<16x8xf32>
    %544 = vector.broadcast %537 : f32 to vector<16x8xf32>
    %545 = arith.mulf %544, %541 : vector<16x8xf32>
    %546 = arith.subf %543, %545 : vector<16x8xf32>
    %547 = arith.addf %534, %546 : vector<16x8xf32>
    %548 = vector.broadcast %536 : f32 to vector<16x8xf32>
    %549 = arith.mulf %548, %541 : vector<16x8xf32>
    %550 = vector.broadcast %537 : f32 to vector<16x8xf32>
    %551 = arith.mulf %550, %539 : vector<16x8xf32>
    %552 = arith.addf %549, %551 : vector<16x8xf32>
    %553 = arith.addf %535, %552 : vector<16x8xf32>
    %c2_329 = arith.constant 2 : index
    %554 = memref.load %arg1[%c2_329] : memref<18xf32, #tpu.memory_space<smem>>
    %c3_330 = arith.constant 3 : index
    %555 = memref.load %arg1[%c3_330] : memref<18xf32, #tpu.memory_space<smem>>
    %c2_331 = arith.constant 2 : index
    %c4_332 = arith.constant 4 : index
    %c0_333 = arith.constant 0 : index
    %c0_334 = arith.constant 0 : index
    %556 = vector.load %arg6[%c2_331, %c4_332, %c0_333, %c0_334] : memref<6x11x16x8xf32, #tpu.memory_space<vmem>>, vector<1x1x16x8xf32>
    %557 = vector.shape_cast %556 : vector<1x1x16x8xf32> to vector<16x8xf32>
    %c5_335 = arith.constant 5 : index
    %c4_336 = arith.constant 4 : index
    %c0_337 = arith.constant 0 : index
    %c0_338 = arith.constant 0 : index
    %558 = vector.load %arg6[%c5_335, %c4_336, %c0_337, %c0_338] : memref<6x11x16x8xf32, #tpu.memory_space<vmem>>, vector<1x1x16x8xf32>
    %559 = vector.shape_cast %558 : vector<1x1x16x8xf32> to vector<16x8xf32>
    %560 = vector.broadcast %554 : f32 to vector<16x8xf32>
    %561 = arith.mulf %560, %557 : vector<16x8xf32>
    %562 = vector.broadcast %555 : f32 to vector<16x8xf32>
    %563 = arith.mulf %562, %559 : vector<16x8xf32>
    %564 = arith.subf %561, %563 : vector<16x8xf32>
    %565 = arith.addf %547, %564 : vector<16x8xf32>
    %566 = vector.broadcast %554 : f32 to vector<16x8xf32>
    %567 = arith.mulf %566, %559 : vector<16x8xf32>
    %568 = vector.broadcast %555 : f32 to vector<16x8xf32>
    %569 = arith.mulf %568, %557 : vector<16x8xf32>
    %570 = arith.addf %567, %569 : vector<16x8xf32>
    %571 = arith.addf %553, %570 : vector<16x8xf32>
    %c4_339 = arith.constant 4 : index
    %572 = memref.load %arg1[%c4_339] : memref<18xf32, #tpu.memory_space<smem>>
    %c5_340 = arith.constant 5 : index
    %573 = memref.load %arg1[%c5_340] : memref<18xf32, #tpu.memory_space<smem>>
    %c2_341 = arith.constant 2 : index
    %c3_342 = arith.constant 3 : index
    %c0_343 = arith.constant 0 : index
    %c0_344 = arith.constant 0 : index
    %574 = vector.load %arg6[%c2_341, %c3_342, %c0_343, %c0_344] : memref<6x11x16x8xf32, #tpu.memory_space<vmem>>, vector<1x1x16x8xf32>
    %575 = vector.shape_cast %574 : vector<1x1x16x8xf32> to vector<16x8xf32>
    %c5_345 = arith.constant 5 : index
    %c3_346 = arith.constant 3 : index
    %c0_347 = arith.constant 0 : index
    %c0_348 = arith.constant 0 : index
    %576 = vector.load %arg6[%c5_345, %c3_346, %c0_347, %c0_348] : memref<6x11x16x8xf32, #tpu.memory_space<vmem>>, vector<1x1x16x8xf32>
    %577 = vector.shape_cast %576 : vector<1x1x16x8xf32> to vector<16x8xf32>
    %578 = vector.broadcast %572 : f32 to vector<16x8xf32>
    %579 = arith.mulf %578, %575 : vector<16x8xf32>
    %580 = vector.broadcast %573 : f32 to vector<16x8xf32>
    %581 = arith.mulf %580, %577 : vector<16x8xf32>
    %582 = arith.subf %579, %581 : vector<16x8xf32>
    %583 = arith.addf %565, %582 : vector<16x8xf32>
    %584 = vector.broadcast %572 : f32 to vector<16x8xf32>
    %585 = arith.mulf %584, %577 : vector<16x8xf32>
    %586 = vector.broadcast %573 : f32 to vector<16x8xf32>
    %587 = arith.mulf %586, %575 : vector<16x8xf32>
    %588 = arith.addf %585, %587 : vector<16x8xf32>
    %589 = arith.addf %571, %588 : vector<16x8xf32>
    %c6_349 = arith.constant 6 : index
    %590 = memref.load %arg1[%c6_349] : memref<18xf32, #tpu.memory_space<smem>>
    %c7_350 = arith.constant 7 : index
    %591 = memref.load %arg1[%c7_350] : memref<18xf32, #tpu.memory_space<smem>>
    %c1_351 = arith.constant 1 : index
    %c5_352 = arith.constant 5 : index
    %c0_353 = arith.constant 0 : index
    %c0_354 = arith.constant 0 : index
    %592 = vector.load %arg6[%c1_351, %c5_352, %c0_353, %c0_354] : memref<6x11x16x8xf32, #tpu.memory_space<vmem>>, vector<1x1x16x8xf32>
    %593 = vector.shape_cast %592 : vector<1x1x16x8xf32> to vector<16x8xf32>
    %c4_355 = arith.constant 4 : index
    %c5_356 = arith.constant 5 : index
    %c0_357 = arith.constant 0 : index
    %c0_358 = arith.constant 0 : index
    %594 = vector.load %arg6[%c4_355, %c5_356, %c0_357, %c0_358] : memref<6x11x16x8xf32, #tpu.memory_space<vmem>>, vector<1x1x16x8xf32>
    %595 = vector.shape_cast %594 : vector<1x1x16x8xf32> to vector<16x8xf32>
    %596 = vector.broadcast %590 : f32 to vector<16x8xf32>
    %597 = arith.mulf %596, %593 : vector<16x8xf32>
    %598 = vector.broadcast %591 : f32 to vector<16x8xf32>
    %599 = arith.mulf %598, %595 : vector<16x8xf32>
    %600 = arith.subf %597, %599 : vector<16x8xf32>
    %601 = arith.addf %583, %600 : vector<16x8xf32>
    %602 = vector.broadcast %590 : f32 to vector<16x8xf32>
    %603 = arith.mulf %602, %595 : vector<16x8xf32>
    %604 = vector.broadcast %591 : f32 to vector<16x8xf32>
    %605 = arith.mulf %604, %593 : vector<16x8xf32>
    %606 = arith.addf %603, %605 : vector<16x8xf32>
    %607 = arith.addf %589, %606 : vector<16x8xf32>
    %c8_359 = arith.constant 8 : index
    %608 = memref.load %arg1[%c8_359] : memref<18xf32, #tpu.memory_space<smem>>
    %c9_360 = arith.constant 9 : index
    %609 = memref.load %arg1[%c9_360] : memref<18xf32, #tpu.memory_space<smem>>
    %c1_361 = arith.constant 1 : index
    %c4_362 = arith.constant 4 : index
    %c0_363 = arith.constant 0 : index
    %c0_364 = arith.constant 0 : index
    %610 = vector.load %arg6[%c1_361, %c4_362, %c0_363, %c0_364] : memref<6x11x16x8xf32, #tpu.memory_space<vmem>>, vector<1x1x16x8xf32>
    %611 = vector.shape_cast %610 : vector<1x1x16x8xf32> to vector<16x8xf32>
    %c4_365 = arith.constant 4 : index
    %c4_366 = arith.constant 4 : index
    %c0_367 = arith.constant 0 : index
    %c0_368 = arith.constant 0 : index
    %612 = vector.load %arg6[%c4_365, %c4_366, %c0_367, %c0_368] : memref<6x11x16x8xf32, #tpu.memory_space<vmem>>, vector<1x1x16x8xf32>
    %613 = vector.shape_cast %612 : vector<1x1x16x8xf32> to vector<16x8xf32>
    %614 = vector.broadcast %608 : f32 to vector<16x8xf32>
    %615 = arith.mulf %614, %611 : vector<16x8xf32>
    %616 = vector.broadcast %609 : f32 to vector<16x8xf32>
    %617 = arith.mulf %616, %613 : vector<16x8xf32>
    %618 = arith.subf %615, %617 : vector<16x8xf32>
    %619 = arith.addf %601, %618 : vector<16x8xf32>
    %620 = vector.broadcast %608 : f32 to vector<16x8xf32>
    %621 = arith.mulf %620, %613 : vector<16x8xf32>
    %622 = vector.broadcast %609 : f32 to vector<16x8xf32>
    %623 = arith.mulf %622, %611 : vector<16x8xf32>
    %624 = arith.addf %621, %623 : vector<16x8xf32>
    %625 = arith.addf %607, %624 : vector<16x8xf32>
    %c10_369 = arith.constant 10 : index
    %626 = memref.load %arg1[%c10_369] : memref<18xf32, #tpu.memory_space<smem>>
    %c11_370 = arith.constant 11 : index
    %627 = memref.load %arg1[%c11_370] : memref<18xf32, #tpu.memory_space<smem>>
    %c1_371 = arith.constant 1 : index
    %c3_372 = arith.constant 3 : index
    %c0_373 = arith.constant 0 : index
    %c0_374 = arith.constant 0 : index
    %628 = vector.load %arg6[%c1_371, %c3_372, %c0_373, %c0_374] : memref<6x11x16x8xf32, #tpu.memory_space<vmem>>, vector<1x1x16x8xf32>
    %629 = vector.shape_cast %628 : vector<1x1x16x8xf32> to vector<16x8xf32>
    %c4_375 = arith.constant 4 : index
    %c3_376 = arith.constant 3 : index
    %c0_377 = arith.constant 0 : index
    %c0_378 = arith.constant 0 : index
    %630 = vector.load %arg6[%c4_375, %c3_376, %c0_377, %c0_378] : memref<6x11x16x8xf32, #tpu.memory_space<vmem>>, vector<1x1x16x8xf32>
    %631 = vector.shape_cast %630 : vector<1x1x16x8xf32> to vector<16x8xf32>
    %632 = vector.broadcast %626 : f32 to vector<16x8xf32>
    %633 = arith.mulf %632, %629 : vector<16x8xf32>
    %634 = vector.broadcast %627 : f32 to vector<16x8xf32>
    %635 = arith.mulf %634, %631 : vector<16x8xf32>
    %636 = arith.subf %633, %635 : vector<16x8xf32>
    %637 = arith.addf %619, %636 : vector<16x8xf32>
    %638 = vector.broadcast %626 : f32 to vector<16x8xf32>
    %639 = arith.mulf %638, %631 : vector<16x8xf32>
    %640 = vector.broadcast %627 : f32 to vector<16x8xf32>
    %641 = arith.mulf %640, %629 : vector<16x8xf32>
    %642 = arith.addf %639, %641 : vector<16x8xf32>
    %643 = arith.addf %625, %642 : vector<16x8xf32>
    %c12_379 = arith.constant 12 : index
    %644 = memref.load %arg1[%c12_379] : memref<18xf32, #tpu.memory_space<smem>>
    %c13_380 = arith.constant 13 : index
    %645 = memref.load %arg1[%c13_380] : memref<18xf32, #tpu.memory_space<smem>>
    %c0_381 = arith.constant 0 : index
    %c5_382 = arith.constant 5 : index
    %c0_383 = arith.constant 0 : index
    %c0_384 = arith.constant 0 : index
    %646 = vector.load %arg6[%c0_381, %c5_382, %c0_383, %c0_384] : memref<6x11x16x8xf32, #tpu.memory_space<vmem>>, vector<1x1x16x8xf32>
    %647 = vector.shape_cast %646 : vector<1x1x16x8xf32> to vector<16x8xf32>
    %c3_385 = arith.constant 3 : index
    %c5_386 = arith.constant 5 : index
    %c0_387 = arith.constant 0 : index
    %c0_388 = arith.constant 0 : index
    %648 = vector.load %arg6[%c3_385, %c5_386, %c0_387, %c0_388] : memref<6x11x16x8xf32, #tpu.memory_space<vmem>>, vector<1x1x16x8xf32>
    %649 = vector.shape_cast %648 : vector<1x1x16x8xf32> to vector<16x8xf32>
    %650 = vector.broadcast %644 : f32 to vector<16x8xf32>
    %651 = arith.mulf %650, %647 : vector<16x8xf32>
    %652 = vector.broadcast %645 : f32 to vector<16x8xf32>
    %653 = arith.mulf %652, %649 : vector<16x8xf32>
    %654 = arith.subf %651, %653 : vector<16x8xf32>
    %655 = arith.addf %637, %654 : vector<16x8xf32>
    %656 = vector.broadcast %644 : f32 to vector<16x8xf32>
    %657 = arith.mulf %656, %649 : vector<16x8xf32>
    %658 = vector.broadcast %645 : f32 to vector<16x8xf32>
    %659 = arith.mulf %658, %647 : vector<16x8xf32>
    %660 = arith.addf %657, %659 : vector<16x8xf32>
    %661 = arith.addf %643, %660 : vector<16x8xf32>
    %c14_389 = arith.constant 14 : index
    %662 = memref.load %arg1[%c14_389] : memref<18xf32, #tpu.memory_space<smem>>
    %c15_390 = arith.constant 15 : index
    %663 = memref.load %arg1[%c15_390] : memref<18xf32, #tpu.memory_space<smem>>
    %c0_391 = arith.constant 0 : index
    %c4_392 = arith.constant 4 : index
    %c0_393 = arith.constant 0 : index
    %c0_394 = arith.constant 0 : index
    %664 = vector.load %arg6[%c0_391, %c4_392, %c0_393, %c0_394] : memref<6x11x16x8xf32, #tpu.memory_space<vmem>>, vector<1x1x16x8xf32>
    %665 = vector.shape_cast %664 : vector<1x1x16x8xf32> to vector<16x8xf32>
    %c3_395 = arith.constant 3 : index
    %c4_396 = arith.constant 4 : index
    %c0_397 = arith.constant 0 : index
    %c0_398 = arith.constant 0 : index
    %666 = vector.load %arg6[%c3_395, %c4_396, %c0_397, %c0_398] : memref<6x11x16x8xf32, #tpu.memory_space<vmem>>, vector<1x1x16x8xf32>
    %667 = vector.shape_cast %666 : vector<1x1x16x8xf32> to vector<16x8xf32>
    %668 = vector.broadcast %662 : f32 to vector<16x8xf32>
    %669 = arith.mulf %668, %665 : vector<16x8xf32>
    %670 = vector.broadcast %663 : f32 to vector<16x8xf32>
    %671 = arith.mulf %670, %667 : vector<16x8xf32>
    %672 = arith.subf %669, %671 : vector<16x8xf32>
    %673 = arith.addf %655, %672 : vector<16x8xf32>
    %674 = vector.broadcast %662 : f32 to vector<16x8xf32>
    %675 = arith.mulf %674, %667 : vector<16x8xf32>
    %676 = vector.broadcast %663 : f32 to vector<16x8xf32>
    %677 = arith.mulf %676, %665 : vector<16x8xf32>
    %678 = arith.addf %675, %677 : vector<16x8xf32>
    %679 = arith.addf %661, %678 : vector<16x8xf32>
    %c16_399 = arith.constant 16 : index
    %680 = memref.load %arg1[%c16_399] : memref<18xf32, #tpu.memory_space<smem>>
    %c17_400 = arith.constant 17 : index
    %681 = memref.load %arg1[%c17_400] : memref<18xf32, #tpu.memory_space<smem>>
    %c0_401 = arith.constant 0 : index
    %c3_402 = arith.constant 3 : index
    %c0_403 = arith.constant 0 : index
    %c0_404 = arith.constant 0 : index
    %682 = vector.load %arg6[%c0_401, %c3_402, %c0_403, %c0_404] : memref<6x11x16x8xf32, #tpu.memory_space<vmem>>, vector<1x1x16x8xf32>
    %683 = vector.shape_cast %682 : vector<1x1x16x8xf32> to vector<16x8xf32>
    %c3_405 = arith.constant 3 : index
    %c3_406 = arith.constant 3 : index
    %c0_407 = arith.constant 0 : index
    %c0_408 = arith.constant 0 : index
    %684 = vector.load %arg6[%c3_405, %c3_406, %c0_407, %c0_408] : memref<6x11x16x8xf32, #tpu.memory_space<vmem>>, vector<1x1x16x8xf32>
    %685 = vector.shape_cast %684 : vector<1x1x16x8xf32> to vector<16x8xf32>
    %686 = vector.broadcast %680 : f32 to vector<16x8xf32>
    %687 = arith.mulf %686, %683 : vector<16x8xf32>
    %688 = vector.broadcast %681 : f32 to vector<16x8xf32>
    %689 = arith.mulf %688, %685 : vector<16x8xf32>
    %690 = arith.subf %687, %689 : vector<16x8xf32>
    %691 = arith.addf %673, %690 : vector<16x8xf32>
    %692 = vector.broadcast %680 : f32 to vector<16x8xf32>
    %693 = arith.mulf %692, %685 : vector<16x8xf32>
    %694 = vector.broadcast %681 : f32 to vector<16x8xf32>
    %695 = arith.mulf %694, %683 : vector<16x8xf32>
    %696 = arith.addf %693, %695 : vector<16x8xf32>
    %697 = arith.addf %679, %696 : vector<16x8xf32>
    %c3_409 = arith.constant 3 : index
    %c0_410 = arith.constant 0 : index
    %c0_411 = arith.constant 0 : index
    %698 = vector.load %arg4[%c3_409, %c0_410, %c0_411] : memref<9x16x8xf32, #tpu.memory_space<vmem>>, vector<1x16x8xf32>
    %699 = vector.shape_cast %698 : vector<1x16x8xf32> to vector<16x8xf32>
    %700 = vector.shape_cast %691 : vector<16x8xf32> to vector<1x16x8xf32>
    tpu.vector_store %arg4[%c3_409, %c0_410, %c0_411], %700 {strides = array<i32>} : memref<9x16x8xf32, #tpu.memory_space<vmem>>, vector<1x16x8xf32>,
    %c3_412 = arith.constant 3 : index
    %c0_413 = arith.constant 0 : index
    %c0_414 = arith.constant 0 : index
    %701 = vector.load %arg5[%c3_412, %c0_413, %c0_414] : memref<9x16x8xf32, #tpu.memory_space<vmem>>, vector<1x16x8xf32>
    %702 = vector.shape_cast %701 : vector<1x16x8xf32> to vector<16x8xf32>
    %703 = vector.shape_cast %697 : vector<16x8xf32> to vector<1x16x8xf32>
    tpu.vector_store %arg5[%c3_412, %c0_413, %c0_414], %703 {strides = array<i32>} : memref<9x16x8xf32, #tpu.memory_space<vmem>>, vector<1x16x8xf32>,
    %cst_415 = arith.constant 0.000000e+00 : f32
    %704 = vector.broadcast %cst_415 : f32 to vector<16x8xf32>
    %cst_416 = arith.constant 0.000000e+00 : f32
    %705 = vector.broadcast %cst_416 : f32 to vector<16x8xf32>
    %c0_417 = arith.constant 0 : index
    %706 = memref.load %arg1[%c0_417] : memref<18xf32, #tpu.memory_space<smem>>
    %c1_418 = arith.constant 1 : index
    %707 = memref.load %arg1[%c1_418] : memref<18xf32, #tpu.memory_space<smem>>
    %c2_419 = arith.constant 2 : index
    %c6_420 = arith.constant 6 : index
    %c0_421 = arith.constant 0 : index
    %c0_422 = arith.constant 0 : index
    %708 = vector.load %arg6[%c2_419, %c6_420, %c0_421, %c0_422] : memref<6x11x16x8xf32, #tpu.memory_space<vmem>>, vector<1x1x16x8xf32>
    %709 = vector.shape_cast %708 : vector<1x1x16x8xf32> to vector<16x8xf32>
    %c5_423 = arith.constant 5 : index
    %c6_424 = arith.constant 6 : index
    %c0_425 = arith.constant 0 : index
    %c0_426 = arith.constant 0 : index
    %710 = vector.load %arg6[%c5_423, %c6_424, %c0_425, %c0_426] : memref<6x11x16x8xf32, #tpu.memory_space<vmem>>, vector<1x1x16x8xf32>
    %711 = vector.shape_cast %710 : vector<1x1x16x8xf32> to vector<16x8xf32>
    %712 = vector.broadcast %706 : f32 to vector<16x8xf32>
    %713 = arith.mulf %712, %709 : vector<16x8xf32>
    %714 = vector.broadcast %707 : f32 to vector<16x8xf32>
    %715 = arith.mulf %714, %711 : vector<16x8xf32>
    %716 = arith.subf %713, %715 : vector<16x8xf32>
    %717 = arith.addf %704, %716 : vector<16x8xf32>
    %718 = vector.broadcast %706 : f32 to vector<16x8xf32>
    %719 = arith.mulf %718, %711 : vector<16x8xf32>
    %720 = vector.broadcast %707 : f32 to vector<16x8xf32>
    %721 = arith.mulf %720, %709 : vector<16x8xf32>
    %722 = arith.addf %719, %721 : vector<16x8xf32>
    %723 = arith.addf %705, %722 : vector<16x8xf32>
    %c2_427 = arith.constant 2 : index
    %724 = memref.load %arg1[%c2_427] : memref<18xf32, #tpu.memory_space<smem>>
    %c3_428 = arith.constant 3 : index
    %725 = memref.load %arg1[%c3_428] : memref<18xf32, #tpu.memory_space<smem>>
    %c2_429 = arith.constant 2 : index
    %c5_430 = arith.constant 5 : index
    %c0_431 = arith.constant 0 : index
    %c0_432 = arith.constant 0 : index
    %726 = vector.load %arg6[%c2_429, %c5_430, %c0_431, %c0_432] : memref<6x11x16x8xf32, #tpu.memory_space<vmem>>, vector<1x1x16x8xf32>
    %727 = vector.shape_cast %726 : vector<1x1x16x8xf32> to vector<16x8xf32>
    %c5_433 = arith.constant 5 : index
    %c5_434 = arith.constant 5 : index
    %c0_435 = arith.constant 0 : index
    %c0_436 = arith.constant 0 : index
    %728 = vector.load %arg6[%c5_433, %c5_434, %c0_435, %c0_436] : memref<6x11x16x8xf32, #tpu.memory_space<vmem>>, vector<1x1x16x8xf32>
    %729 = vector.shape_cast %728 : vector<1x1x16x8xf32> to vector<16x8xf32>
    %730 = vector.broadcast %724 : f32 to vector<16x8xf32>
    %731 = arith.mulf %730, %727 : vector<16x8xf32>
    %732 = vector.broadcast %725 : f32 to vector<16x8xf32>
    %733 = arith.mulf %732, %729 : vector<16x8xf32>
    %734 = arith.subf %731, %733 : vector<16x8xf32>
    %735 = arith.addf %717, %734 : vector<16x8xf32>
    %736 = vector.broadcast %724 : f32 to vector<16x8xf32>
    %737 = arith.mulf %736, %729 : vector<16x8xf32>
    %738 = vector.broadcast %725 : f32 to vector<16x8xf32>
    %739 = arith.mulf %738, %727 : vector<16x8xf32>
    %740 = arith.addf %737, %739 : vector<16x8xf32>
    %741 = arith.addf %723, %740 : vector<16x8xf32>
    %c4_437 = arith.constant 4 : index
    %742 = memref.load %arg1[%c4_437] : memref<18xf32, #tpu.memory_space<smem>>
    %c5_438 = arith.constant 5 : index
    %743 = memref.load %arg1[%c5_438] : memref<18xf32, #tpu.memory_space<smem>>
    %c2_439 = arith.constant 2 : index
    %c4_440 = arith.constant 4 : index
    %c0_441 = arith.constant 0 : index
    %c0_442 = arith.constant 0 : index
    %744 = vector.load %arg6[%c2_439, %c4_440, %c0_441, %c0_442] : memref<6x11x16x8xf32, #tpu.memory_space<vmem>>, vector<1x1x16x8xf32>
    %745 = vector.shape_cast %744 : vector<1x1x16x8xf32> to vector<16x8xf32>
    %c5_443 = arith.constant 5 : index
    %c4_444 = arith.constant 4 : index
    %c0_445 = arith.constant 0 : index
    %c0_446 = arith.constant 0 : index
    %746 = vector.load %arg6[%c5_443, %c4_444, %c0_445, %c0_446] : memref<6x11x16x8xf32, #tpu.memory_space<vmem>>, vector<1x1x16x8xf32>
    %747 = vector.shape_cast %746 : vector<1x1x16x8xf32> to vector<16x8xf32>
    %748 = vector.broadcast %742 : f32 to vector<16x8xf32>
    %749 = arith.mulf %748, %745 : vector<16x8xf32>
    %750 = vector.broadcast %743 : f32 to vector<16x8xf32>
    %751 = arith.mulf %750, %747 : vector<16x8xf32>
    %752 = arith.subf %749, %751 : vector<16x8xf32>
    %753 = arith.addf %735, %752 : vector<16x8xf32>
    %754 = vector.broadcast %742 : f32 to vector<16x8xf32>
    %755 = arith.mulf %754, %747 : vector<16x8xf32>
    %756 = vector.broadcast %743 : f32 to vector<16x8xf32>
    %757 = arith.mulf %756, %745 : vector<16x8xf32>
    %758 = arith.addf %755, %757 : vector<16x8xf32>
    %759 = arith.addf %741, %758 : vector<16x8xf32>
    %c6_447 = arith.constant 6 : index
    %760 = memref.load %arg1[%c6_447] : memref<18xf32, #tpu.memory_space<smem>>
    %c7_448 = arith.constant 7 : index
    %761 = memref.load %arg1[%c7_448] : memref<18xf32, #tpu.memory_space<smem>>
    %c1_449 = arith.constant 1 : index
    %c6_450 = arith.constant 6 : index
    %c0_451 = arith.constant 0 : index
    %c0_452 = arith.constant 0 : index
    %762 = vector.load %arg6[%c1_449, %c6_450, %c0_451, %c0_452] : memref<6x11x16x8xf32, #tpu.memory_space<vmem>>, vector<1x1x16x8xf32>
    %763 = vector.shape_cast %762 : vector<1x1x16x8xf32> to vector<16x8xf32>
    %c4_453 = arith.constant 4 : index
    %c6_454 = arith.constant 6 : index
    %c0_455 = arith.constant 0 : index
    %c0_456 = arith.constant 0 : index
    %764 = vector.load %arg6[%c4_453, %c6_454, %c0_455, %c0_456] : memref<6x11x16x8xf32, #tpu.memory_space<vmem>>, vector<1x1x16x8xf32>
    %765 = vector.shape_cast %764 : vector<1x1x16x8xf32> to vector<16x8xf32>
    %766 = vector.broadcast %760 : f32 to vector<16x8xf32>
    %767 = arith.mulf %766, %763 : vector<16x8xf32>
    %768 = vector.broadcast %761 : f32 to vector<16x8xf32>
    %769 = arith.mulf %768, %765 : vector<16x8xf32>
    %770 = arith.subf %767, %769 : vector<16x8xf32>
    %771 = arith.addf %753, %770 : vector<16x8xf32>
    %772 = vector.broadcast %760 : f32 to vector<16x8xf32>
    %773 = arith.mulf %772, %765 : vector<16x8xf32>
    %774 = vector.broadcast %761 : f32 to vector<16x8xf32>
    %775 = arith.mulf %774, %763 : vector<16x8xf32>
    %776 = arith.addf %773, %775 : vector<16x8xf32>
    %777 = arith.addf %759, %776 : vector<16x8xf32>
    %c8_457 = arith.constant 8 : index
    %778 = memref.load %arg1[%c8_457] : memref<18xf32, #tpu.memory_space<smem>>
    %c9_458 = arith.constant 9 : index
    %779 = memref.load %arg1[%c9_458] : memref<18xf32, #tpu.memory_space<smem>>
    %c1_459 = arith.constant 1 : index
    %c5_460 = arith.constant 5 : index
    %c0_461 = arith.constant 0 : index
    %c0_462 = arith.constant 0 : index
    %780 = vector.load %arg6[%c1_459, %c5_460, %c0_461, %c0_462] : memref<6x11x16x8xf32, #tpu.memory_space<vmem>>, vector<1x1x16x8xf32>
    %781 = vector.shape_cast %780 : vector<1x1x16x8xf32> to vector<16x8xf32>
    %c4_463 = arith.constant 4 : index
    %c5_464 = arith.constant 5 : index
    %c0_465 = arith.constant 0 : index
    %c0_466 = arith.constant 0 : index
    %782 = vector.load %arg6[%c4_463, %c5_464, %c0_465, %c0_466] : memref<6x11x16x8xf32, #tpu.memory_space<vmem>>, vector<1x1x16x8xf32>
    %783 = vector.shape_cast %782 : vector<1x1x16x8xf32> to vector<16x8xf32>
    %784 = vector.broadcast %778 : f32 to vector<16x8xf32>
    %785 = arith.mulf %784, %781 : vector<16x8xf32>
    %786 = vector.broadcast %779 : f32 to vector<16x8xf32>
    %787 = arith.mulf %786, %783 : vector<16x8xf32>
    %788 = arith.subf %785, %787 : vector<16x8xf32>
    %789 = arith.addf %771, %788 : vector<16x8xf32>
    %790 = vector.broadcast %778 : f32 to vector<16x8xf32>
    %791 = arith.mulf %790, %783 : vector<16x8xf32>
    %792 = vector.broadcast %779 : f32 to vector<16x8xf32>
    %793 = arith.mulf %792, %781 : vector<16x8xf32>
    %794 = arith.addf %791, %793 : vector<16x8xf32>
    %795 = arith.addf %777, %794 : vector<16x8xf32>
    %c10_467 = arith.constant 10 : index
    %796 = memref.load %arg1[%c10_467] : memref<18xf32, #tpu.memory_space<smem>>
    %c11_468 = arith.constant 11 : index
    %797 = memref.load %arg1[%c11_468] : memref<18xf32, #tpu.memory_space<smem>>
    %c1_469 = arith.constant 1 : index
    %c4_470 = arith.constant 4 : index
    %c0_471 = arith.constant 0 : index
    %c0_472 = arith.constant 0 : index
    %798 = vector.load %arg6[%c1_469, %c4_470, %c0_471, %c0_472] : memref<6x11x16x8xf32, #tpu.memory_space<vmem>>, vector<1x1x16x8xf32>
    %799 = vector.shape_cast %798 : vector<1x1x16x8xf32> to vector<16x8xf32>
    %c4_473 = arith.constant 4 : index
    %c4_474 = arith.constant 4 : index
    %c0_475 = arith.constant 0 : index
    %c0_476 = arith.constant 0 : index
    %800 = vector.load %arg6[%c4_473, %c4_474, %c0_475, %c0_476] : memref<6x11x16x8xf32, #tpu.memory_space<vmem>>, vector<1x1x16x8xf32>
    %801 = vector.shape_cast %800 : vector<1x1x16x8xf32> to vector<16x8xf32>
    %802 = vector.broadcast %796 : f32 to vector<16x8xf32>
    %803 = arith.mulf %802, %799 : vector<16x8xf32>
    %804 = vector.broadcast %797 : f32 to vector<16x8xf32>
    %805 = arith.mulf %804, %801 : vector<16x8xf32>
    %806 = arith.subf %803, %805 : vector<16x8xf32>
    %807 = arith.addf %789, %806 : vector<16x8xf32>
    %808 = vector.broadcast %796 : f32 to vector<16x8xf32>
    %809 = arith.mulf %808, %801 : vector<16x8xf32>
    %810 = vector.broadcast %797 : f32 to vector<16x8xf32>
    %811 = arith.mulf %810, %799 : vector<16x8xf32>
    %812 = arith.addf %809, %811 : vector<16x8xf32>
    %813 = arith.addf %795, %812 : vector<16x8xf32>
    %c12_477 = arith.constant 12 : index
    %814 = memref.load %arg1[%c12_477] : memref<18xf32, #tpu.memory_space<smem>>
    %c13_478 = arith.constant 13 : index
    %815 = memref.load %arg1[%c13_478] : memref<18xf32, #tpu.memory_space<smem>>
    %c0_479 = arith.constant 0 : index
    %c6_480 = arith.constant 6 : index
    %c0_481 = arith.constant 0 : index
    %c0_482 = arith.constant 0 : index
    %816 = vector.load %arg6[%c0_479, %c6_480, %c0_481, %c0_482] : memref<6x11x16x8xf32, #tpu.memory_space<vmem>>, vector<1x1x16x8xf32>
    %817 = vector.shape_cast %816 : vector<1x1x16x8xf32> to vector<16x8xf32>
    %c3_483 = arith.constant 3 : index
    %c6_484 = arith.constant 6 : index
    %c0_485 = arith.constant 0 : index
    %c0_486 = arith.constant 0 : index
    %818 = vector.load %arg6[%c3_483, %c6_484, %c0_485, %c0_486] : memref<6x11x16x8xf32, #tpu.memory_space<vmem>>, vector<1x1x16x8xf32>
    %819 = vector.shape_cast %818 : vector<1x1x16x8xf32> to vector<16x8xf32>
    %820 = vector.broadcast %814 : f32 to vector<16x8xf32>
    %821 = arith.mulf %820, %817 : vector<16x8xf32>
    %822 = vector.broadcast %815 : f32 to vector<16x8xf32>
    %823 = arith.mulf %822, %819 : vector<16x8xf32>
    %824 = arith.subf %821, %823 : vector<16x8xf32>
    %825 = arith.addf %807, %824 : vector<16x8xf32>
    %826 = vector.broadcast %814 : f32 to vector<16x8xf32>
    %827 = arith.mulf %826, %819 : vector<16x8xf32>
    %828 = vector.broadcast %815 : f32 to vector<16x8xf32>
    %829 = arith.mulf %828, %817 : vector<16x8xf32>
    %830 = arith.addf %827, %829 : vector<16x8xf32>
    %831 = arith.addf %813, %830 : vector<16x8xf32>
    %c14_487 = arith.constant 14 : index
    %832 = memref.load %arg1[%c14_487] : memref<18xf32, #tpu.memory_space<smem>>
    %c15_488 = arith.constant 15 : index
    %833 = memref.load %arg1[%c15_488] : memref<18xf32, #tpu.memory_space<smem>>
    %c0_489 = arith.constant 0 : index
    %c5_490 = arith.constant 5 : index
    %c0_491 = arith.constant 0 : index
    %c0_492 = arith.constant 0 : index
    %834 = vector.load %arg6[%c0_489, %c5_490, %c0_491, %c0_492] : memref<6x11x16x8xf32, #tpu.memory_space<vmem>>, vector<1x1x16x8xf32>
    %835 = vector.shape_cast %834 : vector<1x1x16x8xf32> to vector<16x8xf32>
    %c3_493 = arith.constant 3 : index
    %c5_494 = arith.constant 5 : index
    %c0_495 = arith.constant 0 : index
    %c0_496 = arith.constant 0 : index
    %836 = vector.load %arg6[%c3_493, %c5_494, %c0_495, %c0_496] : memref<6x11x16x8xf32, #tpu.memory_space<vmem>>, vector<1x1x16x8xf32>
    %837 = vector.shape_cast %836 : vector<1x1x16x8xf32> to vector<16x8xf32>
    %838 = vector.broadcast %832 : f32 to vector<16x8xf32>
    %839 = arith.mulf %838, %835 : vector<16x8xf32>
    %840 = vector.broadcast %833 : f32 to vector<16x8xf32>
    %841 = arith.mulf %840, %837 : vector<16x8xf32>
    %842 = arith.subf %839, %841 : vector<16x8xf32>
    %843 = arith.addf %825, %842 : vector<16x8xf32>
    %844 = vector.broadcast %832 : f32 to vector<16x8xf32>
    %845 = arith.mulf %844, %837 : vector<16x8xf32>
    %846 = vector.broadcast %833 : f32 to vector<16x8xf32>
    %847 = arith.mulf %846, %835 : vector<16x8xf32>
    %848 = arith.addf %845, %847 : vector<16x8xf32>
    %849 = arith.addf %831, %848 : vector<16x8xf32>
    %c16_497 = arith.constant 16 : index
    %850 = memref.load %arg1[%c16_497] : memref<18xf32, #tpu.memory_space<smem>>
    %c17_498 = arith.constant 17 : index
    %851 = memref.load %arg1[%c17_498] : memref<18xf32, #tpu.memory_space<smem>>
    %c0_499 = arith.constant 0 : index
    %c4_500 = arith.constant 4 : index
    %c0_501 = arith.constant 0 : index
    %c0_502 = arith.constant 0 : index
    %852 = vector.load %arg6[%c0_499, %c4_500, %c0_501, %c0_502] : memref<6x11x16x8xf32, #tpu.memory_space<vmem>>, vector<1x1x16x8xf32>
    %853 = vector.shape_cast %852 : vector<1x1x16x8xf32> to vector<16x8xf32>
    %c3_503 = arith.constant 3 : index
    %c4_504 = arith.constant 4 : index
    %c0_505 = arith.constant 0 : index
    %c0_506 = arith.constant 0 : index
    %854 = vector.load %arg6[%c3_503, %c4_504, %c0_505, %c0_506] : memref<6x11x16x8xf32, #tpu.memory_space<vmem>>, vector<1x1x16x8xf32>
    %855 = vector.shape_cast %854 : vector<1x1x16x8xf32> to vector<16x8xf32>
    %856 = vector.broadcast %850 : f32 to vector<16x8xf32>
    %857 = arith.mulf %856, %853 : vector<16x8xf32>
    %858 = vector.broadcast %851 : f32 to vector<16x8xf32>
    %859 = arith.mulf %858, %855 : vector<16x8xf32>
    %860 = arith.subf %857, %859 : vector<16x8xf32>
    %861 = arith.addf %843, %860 : vector<16x8xf32>
    %862 = vector.broadcast %850 : f32 to vector<16x8xf32>
    %863 = arith.mulf %862, %855 : vector<16x8xf32>
    %864 = vector.broadcast %851 : f32 to vector<16x8xf32>
    %865 = arith.mulf %864, %853 : vector<16x8xf32>
    %866 = arith.addf %863, %865 : vector<16x8xf32>
    %867 = arith.addf %849, %866 : vector<16x8xf32>
    %c4_507 = arith.constant 4 : index
    %c0_508 = arith.constant 0 : index
    %c0_509 = arith.constant 0 : index
    %868 = vector.load %arg4[%c4_507, %c0_508, %c0_509] : memref<9x16x8xf32, #tpu.memory_space<vmem>>, vector<1x16x8xf32>
    %869 = vector.shape_cast %868 : vector<1x16x8xf32> to vector<16x8xf32>
    %870 = vector.shape_cast %861 : vector<16x8xf32> to vector<1x16x8xf32>
    tpu.vector_store %arg4[%c4_507, %c0_508, %c0_509], %870 {strides = array<i32>} : memref<9x16x8xf32, #tpu.memory_space<vmem>>, vector<1x16x8xf32>,
    %c4_510 = arith.constant 4 : index
    %c0_511 = arith.constant 0 : index
    %c0_512 = arith.constant 0 : index
    %871 = vector.load %arg5[%c4_510, %c0_511, %c0_512] : memref<9x16x8xf32, #tpu.memory_space<vmem>>, vector<1x16x8xf32>
    %872 = vector.shape_cast %871 : vector<1x16x8xf32> to vector<16x8xf32>
    %873 = vector.shape_cast %867 : vector<16x8xf32> to vector<1x16x8xf32>
    tpu.vector_store %arg5[%c4_510, %c0_511, %c0_512], %873 {strides = array<i32>} : memref<9x16x8xf32, #tpu.memory_space<vmem>>, vector<1x16x8xf32>,
    %cst_513 = arith.constant 0.000000e+00 : f32
    %874 = vector.broadcast %cst_513 : f32 to vector<16x8xf32>
    %cst_514 = arith.constant 0.000000e+00 : f32
    %875 = vector.broadcast %cst_514 : f32 to vector<16x8xf32>
    %c0_515 = arith.constant 0 : index
    %876 = memref.load %arg1[%c0_515] : memref<18xf32, #tpu.memory_space<smem>>
    %c1_516 = arith.constant 1 : index
    %877 = memref.load %arg1[%c1_516] : memref<18xf32, #tpu.memory_space<smem>>
    %c2_517 = arith.constant 2 : index
    %c7_518 = arith.constant 7 : index
    %c0_519 = arith.constant 0 : index
    %c0_520 = arith.constant 0 : index
    %878 = vector.load %arg6[%c2_517, %c7_518, %c0_519, %c0_520] : memref<6x11x16x8xf32, #tpu.memory_space<vmem>>, vector<1x1x16x8xf32>
    %879 = vector.shape_cast %878 : vector<1x1x16x8xf32> to vector<16x8xf32>
    %c5_521 = arith.constant 5 : index
    %c7_522 = arith.constant 7 : index
    %c0_523 = arith.constant 0 : index
    %c0_524 = arith.constant 0 : index
    %880 = vector.load %arg6[%c5_521, %c7_522, %c0_523, %c0_524] : memref<6x11x16x8xf32, #tpu.memory_space<vmem>>, vector<1x1x16x8xf32>
    %881 = vector.shape_cast %880 : vector<1x1x16x8xf32> to vector<16x8xf32>
    %882 = vector.broadcast %876 : f32 to vector<16x8xf32>
    %883 = arith.mulf %882, %879 : vector<16x8xf32>
    %884 = vector.broadcast %877 : f32 to vector<16x8xf32>
    %885 = arith.mulf %884, %881 : vector<16x8xf32>
    %886 = arith.subf %883, %885 : vector<16x8xf32>
    %887 = arith.addf %874, %886 : vector<16x8xf32>
    %888 = vector.broadcast %876 : f32 to vector<16x8xf32>
    %889 = arith.mulf %888, %881 : vector<16x8xf32>
    %890 = vector.broadcast %877 : f32 to vector<16x8xf32>
    %891 = arith.mulf %890, %879 : vector<16x8xf32>
    %892 = arith.addf %889, %891 : vector<16x8xf32>
    %893 = arith.addf %875, %892 : vector<16x8xf32>
    %c2_525 = arith.constant 2 : index
    %894 = memref.load %arg1[%c2_525] : memref<18xf32, #tpu.memory_space<smem>>
    %c3_526 = arith.constant 3 : index
    %895 = memref.load %arg1[%c3_526] : memref<18xf32, #tpu.memory_space<smem>>
    %c2_527 = arith.constant 2 : index
    %c6_528 = arith.constant 6 : index
    %c0_529 = arith.constant 0 : index
    %c0_530 = arith.constant 0 : index
    %896 = vector.load %arg6[%c2_527, %c6_528, %c0_529, %c0_530] : memref<6x11x16x8xf32, #tpu.memory_space<vmem>>, vector<1x1x16x8xf32>
    %897 = vector.shape_cast %896 : vector<1x1x16x8xf32> to vector<16x8xf32>
    %c5_531 = arith.constant 5 : index
    %c6_532 = arith.constant 6 : index
    %c0_533 = arith.constant 0 : index
    %c0_534 = arith.constant 0 : index
    %898 = vector.load %arg6[%c5_531, %c6_532, %c0_533, %c0_534] : memref<6x11x16x8xf32, #tpu.memory_space<vmem>>, vector<1x1x16x8xf32>
    %899 = vector.shape_cast %898 : vector<1x1x16x8xf32> to vector<16x8xf32>
    %900 = vector.broadcast %894 : f32 to vector<16x8xf32>
    %901 = arith.mulf %900, %897 : vector<16x8xf32>
    %902 = vector.broadcast %895 : f32 to vector<16x8xf32>
    %903 = arith.mulf %902, %899 : vector<16x8xf32>
    %904 = arith.subf %901, %903 : vector<16x8xf32>
    %905 = arith.addf %887, %904 : vector<16x8xf32>
    %906 = vector.broadcast %894 : f32 to vector<16x8xf32>
    %907 = arith.mulf %906, %899 : vector<16x8xf32>
    %908 = vector.broadcast %895 : f32 to vector<16x8xf32>
    %909 = arith.mulf %908, %897 : vector<16x8xf32>
    %910 = arith.addf %907, %909 : vector<16x8xf32>
    %911 = arith.addf %893, %910 : vector<16x8xf32>
    %c4_535 = arith.constant 4 : index
    %912 = memref.load %arg1[%c4_535] : memref<18xf32, #tpu.memory_space<smem>>
    %c5_536 = arith.constant 5 : index
    %913 = memref.load %arg1[%c5_536] : memref<18xf32, #tpu.memory_space<smem>>
    %c2_537 = arith.constant 2 : index
    %c5_538 = arith.constant 5 : index
    %c0_539 = arith.constant 0 : index
    %c0_540 = arith.constant 0 : index
    %914 = vector.load %arg6[%c2_537, %c5_538, %c0_539, %c0_540] : memref<6x11x16x8xf32, #tpu.memory_space<vmem>>, vector<1x1x16x8xf32>
    %915 = vector.shape_cast %914 : vector<1x1x16x8xf32> to vector<16x8xf32>
    %c5_541 = arith.constant 5 : index
    %c5_542 = arith.constant 5 : index
    %c0_543 = arith.constant 0 : index
    %c0_544 = arith.constant 0 : index
    %916 = vector.load %arg6[%c5_541, %c5_542, %c0_543, %c0_544] : memref<6x11x16x8xf32, #tpu.memory_space<vmem>>, vector<1x1x16x8xf32>
    %917 = vector.shape_cast %916 : vector<1x1x16x8xf32> to vector<16x8xf32>
    %918 = vector.broadcast %912 : f32 to vector<16x8xf32>
    %919 = arith.mulf %918, %915 : vector<16x8xf32>
    %920 = vector.broadcast %913 : f32 to vector<16x8xf32>
    %921 = arith.mulf %920, %917 : vector<16x8xf32>
    %922 = arith.subf %919, %921 : vector<16x8xf32>
    %923 = arith.addf %905, %922 : vector<16x8xf32>
    %924 = vector.broadcast %912 : f32 to vector<16x8xf32>
    %925 = arith.mulf %924, %917 : vector<16x8xf32>
    %926 = vector.broadcast %913 : f32 to vector<16x8xf32>
    %927 = arith.mulf %926, %915 : vector<16x8xf32>
    %928 = arith.addf %925, %927 : vector<16x8xf32>
    %929 = arith.addf %911, %928 : vector<16x8xf32>
    %c6_545 = arith.constant 6 : index
    %930 = memref.load %arg1[%c6_545] : memref<18xf32, #tpu.memory_space<smem>>
    %c7_546 = arith.constant 7 : index
    %931 = memref.load %arg1[%c7_546] : memref<18xf32, #tpu.memory_space<smem>>
    %c1_547 = arith.constant 1 : index
    %c7_548 = arith.constant 7 : index
    %c0_549 = arith.constant 0 : index
    %c0_550 = arith.constant 0 : index
    %932 = vector.load %arg6[%c1_547, %c7_548, %c0_549, %c0_550] : memref<6x11x16x8xf32, #tpu.memory_space<vmem>>, vector<1x1x16x8xf32>
    %933 = vector.shape_cast %932 : vector<1x1x16x8xf32> to vector<16x8xf32>
    %c4_551 = arith.constant 4 : index
    %c7_552 = arith.constant 7 : index
    %c0_553 = arith.constant 0 : index
    %c0_554 = arith.constant 0 : index
    %934 = vector.load %arg6[%c4_551, %c7_552, %c0_553, %c0_554] : memref<6x11x16x8xf32, #tpu.memory_space<vmem>>, vector<1x1x16x8xf32>
    %935 = vector.shape_cast %934 : vector<1x1x16x8xf32> to vector<16x8xf32>
    %936 = vector.broadcast %930 : f32 to vector<16x8xf32>
    %937 = arith.mulf %936, %933 : vector<16x8xf32>
    %938 = vector.broadcast %931 : f32 to vector<16x8xf32>
    %939 = arith.mulf %938, %935 : vector<16x8xf32>
    %940 = arith.subf %937, %939 : vector<16x8xf32>
    %941 = arith.addf %923, %940 : vector<16x8xf32>
    %942 = vector.broadcast %930 : f32 to vector<16x8xf32>
    %943 = arith.mulf %942, %935 : vector<16x8xf32>
    %944 = vector.broadcast %931 : f32 to vector<16x8xf32>
    %945 = arith.mulf %944, %933 : vector<16x8xf32>
    %946 = arith.addf %943, %945 : vector<16x8xf32>
    %947 = arith.addf %929, %946 : vector<16x8xf32>
    %c8_555 = arith.constant 8 : index
    %948 = memref.load %arg1[%c8_555] : memref<18xf32, #tpu.memory_space<smem>>
    %c9_556 = arith.constant 9 : index
    %949 = memref.load %arg1[%c9_556] : memref<18xf32, #tpu.memory_space<smem>>
    %c1_557 = arith.constant 1 : index
    %c6_558 = arith.constant 6 : index
    %c0_559 = arith.constant 0 : index
    %c0_560 = arith.constant 0 : index
    %950 = vector.load %arg6[%c1_557, %c6_558, %c0_559, %c0_560] : memref<6x11x16x8xf32, #tpu.memory_space<vmem>>, vector<1x1x16x8xf32>
    %951 = vector.shape_cast %950 : vector<1x1x16x8xf32> to vector<16x8xf32>
    %c4_561 = arith.constant 4 : index
    %c6_562 = arith.constant 6 : index
    %c0_563 = arith.constant 0 : index
    %c0_564 = arith.constant 0 : index
    %952 = vector.load %arg6[%c4_561, %c6_562, %c0_563, %c0_564] : memref<6x11x16x8xf32, #tpu.memory_space<vmem>>, vector<1x1x16x8xf32>
    %953 = vector.shape_cast %952 : vector<1x1x16x8xf32> to vector<16x8xf32>
    %954 = vector.broadcast %948 : f32 to vector<16x8xf32>
    %955 = arith.mulf %954, %951 : vector<16x8xf32>
    %956 = vector.broadcast %949 : f32 to vector<16x8xf32>
    %957 = arith.mulf %956, %953 : vector<16x8xf32>
    %958 = arith.subf %955, %957 : vector<16x8xf32>
    %959 = arith.addf %941, %958 : vector<16x8xf32>
    %960 = vector.broadcast %948 : f32 to vector<16x8xf32>
    %961 = arith.mulf %960, %953 : vector<16x8xf32>
    %962 = vector.broadcast %949 : f32 to vector<16x8xf32>
    %963 = arith.mulf %962, %951 : vector<16x8xf32>
    %964 = arith.addf %961, %963 : vector<16x8xf32>
    %965 = arith.addf %947, %964 : vector<16x8xf32>
    %c10_565 = arith.constant 10 : index
    %966 = memref.load %arg1[%c10_565] : memref<18xf32, #tpu.memory_space<smem>>
    %c11_566 = arith.constant 11 : index
    %967 = memref.load %arg1[%c11_566] : memref<18xf32, #tpu.memory_space<smem>>
    %c1_567 = arith.constant 1 : index
    %c5_568 = arith.constant 5 : index
    %c0_569 = arith.constant 0 : index
    %c0_570 = arith.constant 0 : index
    %968 = vector.load %arg6[%c1_567, %c5_568, %c0_569, %c0_570] : memref<6x11x16x8xf32, #tpu.memory_space<vmem>>, vector<1x1x16x8xf32>
    %969 = vector.shape_cast %968 : vector<1x1x16x8xf32> to vector<16x8xf32>
    %c4_571 = arith.constant 4 : index
    %c5_572 = arith.constant 5 : index
    %c0_573 = arith.constant 0 : index
    %c0_574 = arith.constant 0 : index
    %970 = vector.load %arg6[%c4_571, %c5_572, %c0_573, %c0_574] : memref<6x11x16x8xf32, #tpu.memory_space<vmem>>, vector<1x1x16x8xf32>
    %971 = vector.shape_cast %970 : vector<1x1x16x8xf32> to vector<16x8xf32>
    %972 = vector.broadcast %966 : f32 to vector<16x8xf32>
    %973 = arith.mulf %972, %969 : vector<16x8xf32>
    %974 = vector.broadcast %967 : f32 to vector<16x8xf32>
    %975 = arith.mulf %974, %971 : vector<16x8xf32>
    %976 = arith.subf %973, %975 : vector<16x8xf32>
    %977 = arith.addf %959, %976 : vector<16x8xf32>
    %978 = vector.broadcast %966 : f32 to vector<16x8xf32>
    %979 = arith.mulf %978, %971 : vector<16x8xf32>
    %980 = vector.broadcast %967 : f32 to vector<16x8xf32>
    %981 = arith.mulf %980, %969 : vector<16x8xf32>
    %982 = arith.addf %979, %981 : vector<16x8xf32>
    %983 = arith.addf %965, %982 : vector<16x8xf32>
    %c12_575 = arith.constant 12 : index
    %984 = memref.load %arg1[%c12_575] : memref<18xf32, #tpu.memory_space<smem>>
    %c13_576 = arith.constant 13 : index
    %985 = memref.load %arg1[%c13_576] : memref<18xf32, #tpu.memory_space<smem>>
    %c0_577 = arith.constant 0 : index
    %c7_578 = arith.constant 7 : index
    %c0_579 = arith.constant 0 : index
    %c0_580 = arith.constant 0 : index
    %986 = vector.load %arg6[%c0_577, %c7_578, %c0_579, %c0_580] : memref<6x11x16x8xf32, #tpu.memory_space<vmem>>, vector<1x1x16x8xf32>
    %987 = vector.shape_cast %986 : vector<1x1x16x8xf32> to vector<16x8xf32>
    %c3_581 = arith.constant 3 : index
    %c7_582 = arith.constant 7 : index
    %c0_583 = arith.constant 0 : index
    %c0_584 = arith.constant 0 : index
    %988 = vector.load %arg6[%c3_581, %c7_582, %c0_583, %c0_584] : memref<6x11x16x8xf32, #tpu.memory_space<vmem>>, vector<1x1x16x8xf32>
    %989 = vector.shape_cast %988 : vector<1x1x16x8xf32> to vector<16x8xf32>
    %990 = vector.broadcast %984 : f32 to vector<16x8xf32>
    %991 = arith.mulf %990, %987 : vector<16x8xf32>
    %992 = vector.broadcast %985 : f32 to vector<16x8xf32>
    %993 = arith.mulf %992, %989 : vector<16x8xf32>
    %994 = arith.subf %991, %993 : vector<16x8xf32>
    %995 = arith.addf %977, %994 : vector<16x8xf32>
    %996 = vector.broadcast %984 : f32 to vector<16x8xf32>
    %997 = arith.mulf %996, %989 : vector<16x8xf32>
    %998 = vector.broadcast %985 : f32 to vector<16x8xf32>
    %999 = arith.mulf %998, %987 : vector<16x8xf32>
    %1000 = arith.addf %997, %999 : vector<16x8xf32>
    %1001 = arith.addf %983, %1000 : vector<16x8xf32>
    %c14_585 = arith.constant 14 : index
    %1002 = memref.load %arg1[%c14_585] : memref<18xf32, #tpu.memory_space<smem>>
    %c15_586 = arith.constant 15 : index
    %1003 = memref.load %arg1[%c15_586] : memref<18xf32, #tpu.memory_space<smem>>
    %c0_587 = arith.constant 0 : index
    %c6_588 = arith.constant 6 : index
    %c0_589 = arith.constant 0 : index
    %c0_590 = arith.constant 0 : index
    %1004 = vector.load %arg6[%c0_587, %c6_588, %c0_589, %c0_590] : memref<6x11x16x8xf32, #tpu.memory_space<vmem>>, vector<1x1x16x8xf32>
    %1005 = vector.shape_cast %1004 : vector<1x1x16x8xf32> to vector<16x8xf32>
    %c3_591 = arith.constant 3 : index
    %c6_592 = arith.constant 6 : index
    %c0_593 = arith.constant 0 : index
    %c0_594 = arith.constant 0 : index
    %1006 = vector.load %arg6[%c3_591, %c6_592, %c0_593, %c0_594] : memref<6x11x16x8xf32, #tpu.memory_space<vmem>>, vector<1x1x16x8xf32>
    %1007 = vector.shape_cast %1006 : vector<1x1x16x8xf32> to vector<16x8xf32>
    %1008 = vector.broadcast %1002 : f32 to vector<16x8xf32>
    %1009 = arith.mulf %1008, %1005 : vector<16x8xf32>
    %1010 = vector.broadcast %1003 : f32 to vector<16x8xf32>
    %1011 = arith.mulf %1010, %1007 : vector<16x8xf32>
    %1012 = arith.subf %1009, %1011 : vector<16x8xf32>
    %1013 = arith.addf %995, %1012 : vector<16x8xf32>
    %1014 = vector.broadcast %1002 : f32 to vector<16x8xf32>
    %1015 = arith.mulf %1014, %1007 : vector<16x8xf32>
    %1016 = vector.broadcast %1003 : f32 to vector<16x8xf32>
    %1017 = arith.mulf %1016, %1005 : vector<16x8xf32>
    %1018 = arith.addf %1015, %1017 : vector<16x8xf32>
    %1019 = arith.addf %1001, %1018 : vector<16x8xf32>
    %c16_595 = arith.constant 16 : index
    %1020 = memref.load %arg1[%c16_595] : memref<18xf32, #tpu.memory_space<smem>>
    %c17_596 = arith.constant 17 : index
    %1021 = memref.load %arg1[%c17_596] : memref<18xf32, #tpu.memory_space<smem>>
    %c0_597 = arith.constant 0 : index
    %c5_598 = arith.constant 5 : index
    %c0_599 = arith.constant 0 : index
    %c0_600 = arith.constant 0 : index
    %1022 = vector.load %arg6[%c0_597, %c5_598, %c0_599, %c0_600] : memref<6x11x16x8xf32, #tpu.memory_space<vmem>>, vector<1x1x16x8xf32>
    %1023 = vector.shape_cast %1022 : vector<1x1x16x8xf32> to vector<16x8xf32>
    %c3_601 = arith.constant 3 : index
    %c5_602 = arith.constant 5 : index
    %c0_603 = arith.constant 0 : index
    %c0_604 = arith.constant 0 : index
    %1024 = vector.load %arg6[%c3_601, %c5_602, %c0_603, %c0_604] : memref<6x11x16x8xf32, #tpu.memory_space<vmem>>, vector<1x1x16x8xf32>
    %1025 = vector.shape_cast %1024 : vector<1x1x16x8xf32> to vector<16x8xf32>
    %1026 = vector.broadcast %1020 : f32 to vector<16x8xf32>
    %1027 = arith.mulf %1026, %1023 : vector<16x8xf32>
    %1028 = vector.broadcast %1021 : f32 to vector<16x8xf32>
    %1029 = arith.mulf %1028, %1025 : vector<16x8xf32>
    %1030 = arith.subf %1027, %1029 : vector<16x8xf32>
    %1031 = arith.addf %1013, %1030 : vector<16x8xf32>
    %1032 = vector.broadcast %1020 : f32 to vector<16x8xf32>
    %1033 = arith.mulf %1032, %1025 : vector<16x8xf32>
    %1034 = vector.broadcast %1021 : f32 to vector<16x8xf32>
    %1035 = arith.mulf %1034, %1023 : vector<16x8xf32>
    %1036 = arith.addf %1033, %1035 : vector<16x8xf32>
    %1037 = arith.addf %1019, %1036 : vector<16x8xf32>
    %c5_605 = arith.constant 5 : index
    %c0_606 = arith.constant 0 : index
    %c0_607 = arith.constant 0 : index
    %1038 = vector.load %arg4[%c5_605, %c0_606, %c0_607] : memref<9x16x8xf32, #tpu.memory_space<vmem>>, vector<1x16x8xf32>
    %1039 = vector.shape_cast %1038 : vector<1x16x8xf32> to vector<16x8xf32>
    %1040 = vector.shape_cast %1031 : vector<16x8xf32> to vector<1x16x8xf32>
    tpu.vector_store %arg4[%c5_605, %c0_606, %c0_607], %1040 {strides = array<i32>} : memref<9x16x8xf32, #tpu.memory_space<vmem>>, vector<1x16x8xf32>,
    %c5_608 = arith.constant 5 : index
    %c0_609 = arith.constant 0 : index
    %c0_610 = arith.constant 0 : index
    %1041 = vector.load %arg5[%c5_608, %c0_609, %c0_610] : memref<9x16x8xf32, #tpu.memory_space<vmem>>, vector<1x16x8xf32>
    %1042 = vector.shape_cast %1041 : vector<1x16x8xf32> to vector<16x8xf32>
    %1043 = vector.shape_cast %1037 : vector<16x8xf32> to vector<1x16x8xf32>
    tpu.vector_store %arg5[%c5_608, %c0_609, %c0_610], %1043 {strides = array<i32>} : memref<9x16x8xf32, #tpu.memory_space<vmem>>, vector<1x16x8xf32>,
    %cst_611 = arith.constant 0.000000e+00 : f32
    %1044 = vector.broadcast %cst_611 : f32 to vector<16x8xf32>
    %cst_612 = arith.constant 0.000000e+00 : f32
    %1045 = vector.broadcast %cst_612 : f32 to vector<16x8xf32>
    %c0_613 = arith.constant 0 : index
    %1046 = memref.load %arg1[%c0_613] : memref<18xf32, #tpu.memory_space<smem>>
    %c1_614 = arith.constant 1 : index
    %1047 = memref.load %arg1[%c1_614] : memref<18xf32, #tpu.memory_space<smem>>
    %c2_615 = arith.constant 2 : index
    %c8_616 = arith.constant 8 : index
    %c0_617 = arith.constant 0 : index
    %c0_618 = arith.constant 0 : index
    %1048 = vector.load %arg6[%c2_615, %c8_616, %c0_617, %c0_618] : memref<6x11x16x8xf32, #tpu.memory_space<vmem>>, vector<1x1x16x8xf32>
    %1049 = vector.shape_cast %1048 : vector<1x1x16x8xf32> to vector<16x8xf32>
    %c5_619 = arith.constant 5 : index
    %c8_620 = arith.constant 8 : index
    %c0_621 = arith.constant 0 : index
    %c0_622 = arith.constant 0 : index
    %1050 = vector.load %arg6[%c5_619, %c8_620, %c0_621, %c0_622] : memref<6x11x16x8xf32, #tpu.memory_space<vmem>>, vector<1x1x16x8xf32>
    %1051 = vector.shape_cast %1050 : vector<1x1x16x8xf32> to vector<16x8xf32>
    %1052 = vector.broadcast %1046 : f32 to vector<16x8xf32>
    %1053 = arith.mulf %1052, %1049 : vector<16x8xf32>
    %1054 = vector.broadcast %1047 : f32 to vector<16x8xf32>
    %1055 = arith.mulf %1054, %1051 : vector<16x8xf32>
    %1056 = arith.subf %1053, %1055 : vector<16x8xf32>
    %1057 = arith.addf %1044, %1056 : vector<16x8xf32>
    %1058 = vector.broadcast %1046 : f32 to vector<16x8xf32>
    %1059 = arith.mulf %1058, %1051 : vector<16x8xf32>
    %1060 = vector.broadcast %1047 : f32 to vector<16x8xf32>
    %1061 = arith.mulf %1060, %1049 : vector<16x8xf32>
    %1062 = arith.addf %1059, %1061 : vector<16x8xf32>
    %1063 = arith.addf %1045, %1062 : vector<16x8xf32>
    %c2_623 = arith.constant 2 : index
    %1064 = memref.load %arg1[%c2_623] : memref<18xf32, #tpu.memory_space<smem>>
    %c3_624 = arith.constant 3 : index
    %1065 = memref.load %arg1[%c3_624] : memref<18xf32, #tpu.memory_space<smem>>
    %c2_625 = arith.constant 2 : index
    %c7_626 = arith.constant 7 : index
    %c0_627 = arith.constant 0 : index
    %c0_628 = arith.constant 0 : index
    %1066 = vector.load %arg6[%c2_625, %c7_626, %c0_627, %c0_628] : memref<6x11x16x8xf32, #tpu.memory_space<vmem>>, vector<1x1x16x8xf32>
    %1067 = vector.shape_cast %1066 : vector<1x1x16x8xf32> to vector<16x8xf32>
    %c5_629 = arith.constant 5 : index
    %c7_630 = arith.constant 7 : index
    %c0_631 = arith.constant 0 : index
    %c0_632 = arith.constant 0 : index
    %1068 = vector.load %arg6[%c5_629, %c7_630, %c0_631, %c0_632] : memref<6x11x16x8xf32, #tpu.memory_space<vmem>>, vector<1x1x16x8xf32>
    %1069 = vector.shape_cast %1068 : vector<1x1x16x8xf32> to vector<16x8xf32>
    %1070 = vector.broadcast %1064 : f32 to vector<16x8xf32>
    %1071 = arith.mulf %1070, %1067 : vector<16x8xf32>
    %1072 = vector.broadcast %1065 : f32 to vector<16x8xf32>
    %1073 = arith.mulf %1072, %1069 : vector<16x8xf32>
    %1074 = arith.subf %1071, %1073 : vector<16x8xf32>
    %1075 = arith.addf %1057, %1074 : vector<16x8xf32>
    %1076 = vector.broadcast %1064 : f32 to vector<16x8xf32>
    %1077 = arith.mulf %1076, %1069 : vector<16x8xf32>
    %1078 = vector.broadcast %1065 : f32 to vector<16x8xf32>
    %1079 = arith.mulf %1078, %1067 : vector<16x8xf32>
    %1080 = arith.addf %1077, %1079 : vector<16x8xf32>
    %1081 = arith.addf %1063, %1080 : vector<16x8xf32>
    %c4_633 = arith.constant 4 : index
    %1082 = memref.load %arg1[%c4_633] : memref<18xf32, #tpu.memory_space<smem>>
    %c5_634 = arith.constant 5 : index
    %1083 = memref.load %arg1[%c5_634] : memref<18xf32, #tpu.memory_space<smem>>
    %c2_635 = arith.constant 2 : index
    %c6_636 = arith.constant 6 : index
    %c0_637 = arith.constant 0 : index
    %c0_638 = arith.constant 0 : index
    %1084 = vector.load %arg6[%c2_635, %c6_636, %c0_637, %c0_638] : memref<6x11x16x8xf32, #tpu.memory_space<vmem>>, vector<1x1x16x8xf32>
    %1085 = vector.shape_cast %1084 : vector<1x1x16x8xf32> to vector<16x8xf32>
    %c5_639 = arith.constant 5 : index
    %c6_640 = arith.constant 6 : index
    %c0_641 = arith.constant 0 : index
    %c0_642 = arith.constant 0 : index
    %1086 = vector.load %arg6[%c5_639, %c6_640, %c0_641, %c0_642] : memref<6x11x16x8xf32, #tpu.memory_space<vmem>>, vector<1x1x16x8xf32>
    %1087 = vector.shape_cast %1086 : vector<1x1x16x8xf32> to vector<16x8xf32>
    %1088 = vector.broadcast %1082 : f32 to vector<16x8xf32>
    %1089 = arith.mulf %1088, %1085 : vector<16x8xf32>
    %1090 = vector.broadcast %1083 : f32 to vector<16x8xf32>
    %1091 = arith.mulf %1090, %1087 : vector<16x8xf32>
    %1092 = arith.subf %1089, %1091 : vector<16x8xf32>
    %1093 = arith.addf %1075, %1092 : vector<16x8xf32>
    %1094 = vector.broadcast %1082 : f32 to vector<16x8xf32>
    %1095 = arith.mulf %1094, %1087 : vector<16x8xf32>
    %1096 = vector.broadcast %1083 : f32 to vector<16x8xf32>
    %1097 = arith.mulf %1096, %1085 : vector<16x8xf32>
    %1098 = arith.addf %1095, %1097 : vector<16x8xf32>
    %1099 = arith.addf %1081, %1098 : vector<16x8xf32>
    %c6_643 = arith.constant 6 : index
    %1100 = memref.load %arg1[%c6_643] : memref<18xf32, #tpu.memory_space<smem>>
    %c7_644 = arith.constant 7 : index
    %1101 = memref.load %arg1[%c7_644] : memref<18xf32, #tpu.memory_space<smem>>
    %c1_645 = arith.constant 1 : index
    %c8_646 = arith.constant 8 : index
    %c0_647 = arith.constant 0 : index
    %c0_648 = arith.constant 0 : index
    %1102 = vector.load %arg6[%c1_645, %c8_646, %c0_647, %c0_648] : memref<6x11x16x8xf32, #tpu.memory_space<vmem>>, vector<1x1x16x8xf32>
    %1103 = vector.shape_cast %1102 : vector<1x1x16x8xf32> to vector<16x8xf32>
    %c4_649 = arith.constant 4 : index
    %c8_650 = arith.constant 8 : index
    %c0_651 = arith.constant 0 : index
    %c0_652 = arith.constant 0 : index
    %1104 = vector.load %arg6[%c4_649, %c8_650, %c0_651, %c0_652] : memref<6x11x16x8xf32, #tpu.memory_space<vmem>>, vector<1x1x16x8xf32>
    %1105 = vector.shape_cast %1104 : vector<1x1x16x8xf32> to vector<16x8xf32>
    %1106 = vector.broadcast %1100 : f32 to vector<16x8xf32>
    %1107 = arith.mulf %1106, %1103 : vector<16x8xf32>
    %1108 = vector.broadcast %1101 : f32 to vector<16x8xf32>
    %1109 = arith.mulf %1108, %1105 : vector<16x8xf32>
    %1110 = arith.subf %1107, %1109 : vector<16x8xf32>
    %1111 = arith.addf %1093, %1110 : vector<16x8xf32>
    %1112 = vector.broadcast %1100 : f32 to vector<16x8xf32>
    %1113 = arith.mulf %1112, %1105 : vector<16x8xf32>
    %1114 = vector.broadcast %1101 : f32 to vector<16x8xf32>
    %1115 = arith.mulf %1114, %1103 : vector<16x8xf32>
    %1116 = arith.addf %1113, %1115 : vector<16x8xf32>
    %1117 = arith.addf %1099, %1116 : vector<16x8xf32>
    %c8_653 = arith.constant 8 : index
    %1118 = memref.load %arg1[%c8_653] : memref<18xf32, #tpu.memory_space<smem>>
    %c9_654 = arith.constant 9 : index
    %1119 = memref.load %arg1[%c9_654] : memref<18xf32, #tpu.memory_space<smem>>
    %c1_655 = arith.constant 1 : index
    %c7_656 = arith.constant 7 : index
    %c0_657 = arith.constant 0 : index
    %c0_658 = arith.constant 0 : index
    %1120 = vector.load %arg6[%c1_655, %c7_656, %c0_657, %c0_658] : memref<6x11x16x8xf32, #tpu.memory_space<vmem>>, vector<1x1x16x8xf32>
    %1121 = vector.shape_cast %1120 : vector<1x1x16x8xf32> to vector<16x8xf32>
    %c4_659 = arith.constant 4 : index
    %c7_660 = arith.constant 7 : index
    %c0_661 = arith.constant 0 : index
    %c0_662 = arith.constant 0 : index
    %1122 = vector.load %arg6[%c4_659, %c7_660, %c0_661, %c0_662] : memref<6x11x16x8xf32, #tpu.memory_space<vmem>>, vector<1x1x16x8xf32>
    %1123 = vector.shape_cast %1122 : vector<1x1x16x8xf32> to vector<16x8xf32>
    %1124 = vector.broadcast %1118 : f32 to vector<16x8xf32>
    %1125 = arith.mulf %1124, %1121 : vector<16x8xf32>
    %1126 = vector.broadcast %1119 : f32 to vector<16x8xf32>
    %1127 = arith.mulf %1126, %1123 : vector<16x8xf32>
    %1128 = arith.subf %1125, %1127 : vector<16x8xf32>
    %1129 = arith.addf %1111, %1128 : vector<16x8xf32>
    %1130 = vector.broadcast %1118 : f32 to vector<16x8xf32>
    %1131 = arith.mulf %1130, %1123 : vector<16x8xf32>
    %1132 = vector.broadcast %1119 : f32 to vector<16x8xf32>
    %1133 = arith.mulf %1132, %1121 : vector<16x8xf32>
    %1134 = arith.addf %1131, %1133 : vector<16x8xf32>
    %1135 = arith.addf %1117, %1134 : vector<16x8xf32>
    %c10_663 = arith.constant 10 : index
    %1136 = memref.load %arg1[%c10_663] : memref<18xf32, #tpu.memory_space<smem>>
    %c11_664 = arith.constant 11 : index
    %1137 = memref.load %arg1[%c11_664] : memref<18xf32, #tpu.memory_space<smem>>
    %c1_665 = arith.constant 1 : index
    %c6_666 = arith.constant 6 : index
    %c0_667 = arith.constant 0 : index
    %c0_668 = arith.constant 0 : index
    %1138 = vector.load %arg6[%c1_665, %c6_666, %c0_667, %c0_668] : memref<6x11x16x8xf32, #tpu.memory_space<vmem>>, vector<1x1x16x8xf32>
    %1139 = vector.shape_cast %1138 : vector<1x1x16x8xf32> to vector<16x8xf32>
    %c4_669 = arith.constant 4 : index
    %c6_670 = arith.constant 6 : index
    %c0_671 = arith.constant 0 : index
    %c0_672 = arith.constant 0 : index
    %1140 = vector.load %arg6[%c4_669, %c6_670, %c0_671, %c0_672] : memref<6x11x16x8xf32, #tpu.memory_space<vmem>>, vector<1x1x16x8xf32>
    %1141 = vector.shape_cast %1140 : vector<1x1x16x8xf32> to vector<16x8xf32>
    %1142 = vector.broadcast %1136 : f32 to vector<16x8xf32>
    %1143 = arith.mulf %1142, %1139 : vector<16x8xf32>
    %1144 = vector.broadcast %1137 : f32 to vector<16x8xf32>
    %1145 = arith.mulf %1144, %1141 : vector<16x8xf32>
    %1146 = arith.subf %1143, %1145 : vector<16x8xf32>
    %1147 = arith.addf %1129, %1146 : vector<16x8xf32>
    %1148 = vector.broadcast %1136 : f32 to vector<16x8xf32>
    %1149 = arith.mulf %1148, %1141 : vector<16x8xf32>
    %1150 = vector.broadcast %1137 : f32 to vector<16x8xf32>
    %1151 = arith.mulf %1150, %1139 : vector<16x8xf32>
    %1152 = arith.addf %1149, %1151 : vector<16x8xf32>
    %1153 = arith.addf %1135, %1152 : vector<16x8xf32>
    %c12_673 = arith.constant 12 : index
    %1154 = memref.load %arg1[%c12_673] : memref<18xf32, #tpu.memory_space<smem>>
    %c13_674 = arith.constant 13 : index
    %1155 = memref.load %arg1[%c13_674] : memref<18xf32, #tpu.memory_space<smem>>
    %c0_675 = arith.constant 0 : index
    %c8_676 = arith.constant 8 : index
    %c0_677 = arith.constant 0 : index
    %c0_678 = arith.constant 0 : index
    %1156 = vector.load %arg6[%c0_675, %c8_676, %c0_677, %c0_678] : memref<6x11x16x8xf32, #tpu.memory_space<vmem>>, vector<1x1x16x8xf32>
    %1157 = vector.shape_cast %1156 : vector<1x1x16x8xf32> to vector<16x8xf32>
    %c3_679 = arith.constant 3 : index
    %c8_680 = arith.constant 8 : index
    %c0_681 = arith.constant 0 : index
    %c0_682 = arith.constant 0 : index
    %1158 = vector.load %arg6[%c3_679, %c8_680, %c0_681, %c0_682] : memref<6x11x16x8xf32, #tpu.memory_space<vmem>>, vector<1x1x16x8xf32>
    %1159 = vector.shape_cast %1158 : vector<1x1x16x8xf32> to vector<16x8xf32>
    %1160 = vector.broadcast %1154 : f32 to vector<16x8xf32>
    %1161 = arith.mulf %1160, %1157 : vector<16x8xf32>
    %1162 = vector.broadcast %1155 : f32 to vector<16x8xf32>
    %1163 = arith.mulf %1162, %1159 : vector<16x8xf32>
    %1164 = arith.subf %1161, %1163 : vector<16x8xf32>
    %1165 = arith.addf %1147, %1164 : vector<16x8xf32>
    %1166 = vector.broadcast %1154 : f32 to vector<16x8xf32>
    %1167 = arith.mulf %1166, %1159 : vector<16x8xf32>
    %1168 = vector.broadcast %1155 : f32 to vector<16x8xf32>
    %1169 = arith.mulf %1168, %1157 : vector<16x8xf32>
    %1170 = arith.addf %1167, %1169 : vector<16x8xf32>
    %1171 = arith.addf %1153, %1170 : vector<16x8xf32>
    %c14_683 = arith.constant 14 : index
    %1172 = memref.load %arg1[%c14_683] : memref<18xf32, #tpu.memory_space<smem>>
    %c15_684 = arith.constant 15 : index
    %1173 = memref.load %arg1[%c15_684] : memref<18xf32, #tpu.memory_space<smem>>
    %c0_685 = arith.constant 0 : index
    %c7_686 = arith.constant 7 : index
    %c0_687 = arith.constant 0 : index
    %c0_688 = arith.constant 0 : index
    %1174 = vector.load %arg6[%c0_685, %c7_686, %c0_687, %c0_688] : memref<6x11x16x8xf32, #tpu.memory_space<vmem>>, vector<1x1x16x8xf32>
    %1175 = vector.shape_cast %1174 : vector<1x1x16x8xf32> to vector<16x8xf32>
    %c3_689 = arith.constant 3 : index
    %c7_690 = arith.constant 7 : index
    %c0_691 = arith.constant 0 : index
    %c0_692 = arith.constant 0 : index
    %1176 = vector.load %arg6[%c3_689, %c7_690, %c0_691, %c0_692] : memref<6x11x16x8xf32, #tpu.memory_space<vmem>>, vector<1x1x16x8xf32>
    %1177 = vector.shape_cast %1176 : vector<1x1x16x8xf32> to vector<16x8xf32>
    %1178 = vector.broadcast %1172 : f32 to vector<16x8xf32>
    %1179 = arith.mulf %1178, %1175 : vector<16x8xf32>
    %1180 = vector.broadcast %1173 : f32 to vector<16x8xf32>
    %1181 = arith.mulf %1180, %1177 : vector<16x8xf32>
    %1182 = arith.subf %1179, %1181 : vector<16x8xf32>
    %1183 = arith.addf %1165, %1182 : vector<16x8xf32>
    %1184 = vector.broadcast %1172 : f32 to vector<16x8xf32>
    %1185 = arith.mulf %1184, %1177 : vector<16x8xf32>
    %1186 = vector.broadcast %1173 : f32 to vector<16x8xf32>
    %1187 = arith.mulf %1186, %1175 : vector<16x8xf32>
    %1188 = arith.addf %1185, %1187 : vector<16x8xf32>
    %1189 = arith.addf %1171, %1188 : vector<16x8xf32>
    %c16_693 = arith.constant 16 : index
    %1190 = memref.load %arg1[%c16_693] : memref<18xf32, #tpu.memory_space<smem>>
    %c17_694 = arith.constant 17 : index
    %1191 = memref.load %arg1[%c17_694] : memref<18xf32, #tpu.memory_space<smem>>
    %c0_695 = arith.constant 0 : index
    %c6_696 = arith.constant 6 : index
    %c0_697 = arith.constant 0 : index
    %c0_698 = arith.constant 0 : index
    %1192 = vector.load %arg6[%c0_695, %c6_696, %c0_697, %c0_698] : memref<6x11x16x8xf32, #tpu.memory_space<vmem>>, vector<1x1x16x8xf32>
    %1193 = vector.shape_cast %1192 : vector<1x1x16x8xf32> to vector<16x8xf32>
    %c3_699 = arith.constant 3 : index
    %c6_700 = arith.constant 6 : index
    %c0_701 = arith.constant 0 : index
    %c0_702 = arith.constant 0 : index
    %1194 = vector.load %arg6[%c3_699, %c6_700, %c0_701, %c0_702] : memref<6x11x16x8xf32, #tpu.memory_space<vmem>>, vector<1x1x16x8xf32>
    %1195 = vector.shape_cast %1194 : vector<1x1x16x8xf32> to vector<16x8xf32>
    %1196 = vector.broadcast %1190 : f32 to vector<16x8xf32>
    %1197 = arith.mulf %1196, %1193 : vector<16x8xf32>
    %1198 = vector.broadcast %1191 : f32 to vector<16x8xf32>
    %1199 = arith.mulf %1198, %1195 : vector<16x8xf32>
    %1200 = arith.subf %1197, %1199 : vector<16x8xf32>
    %1201 = arith.addf %1183, %1200 : vector<16x8xf32>
    %1202 = vector.broadcast %1190 : f32 to vector<16x8xf32>
    %1203 = arith.mulf %1202, %1195 : vector<16x8xf32>
    %1204 = vector.broadcast %1191 : f32 to vector<16x8xf32>
    %1205 = arith.mulf %1204, %1193 : vector<16x8xf32>
    %1206 = arith.addf %1203, %1205 : vector<16x8xf32>
    %1207 = arith.addf %1189, %1206 : vector<16x8xf32>
    %c6_703 = arith.constant 6 : index
    %c0_704 = arith.constant 0 : index
    %c0_705 = arith.constant 0 : index
    %1208 = vector.load %arg4[%c6_703, %c0_704, %c0_705] : memref<9x16x8xf32, #tpu.memory_space<vmem>>, vector<1x16x8xf32>
    %1209 = vector.shape_cast %1208 : vector<1x16x8xf32> to vector<16x8xf32>
    %1210 = vector.shape_cast %1201 : vector<16x8xf32> to vector<1x16x8xf32>
    tpu.vector_store %arg4[%c6_703, %c0_704, %c0_705], %1210 {strides = array<i32>} : memref<9x16x8xf32, #tpu.memory_space<vmem>>, vector<1x16x8xf32>,
    %c6_706 = arith.constant 6 : index
    %c0_707 = arith.constant 0 : index
    %c0_708 = arith.constant 0 : index
    %1211 = vector.load %arg5[%c6_706, %c0_707, %c0_708] : memref<9x16x8xf32, #tpu.memory_space<vmem>>, vector<1x16x8xf32>
    %1212 = vector.shape_cast %1211 : vector<1x16x8xf32> to vector<16x8xf32>
    %1213 = vector.shape_cast %1207 : vector<16x8xf32> to vector<1x16x8xf32>
    tpu.vector_store %arg5[%c6_706, %c0_707, %c0_708], %1213 {strides = array<i32>} : memref<9x16x8xf32, #tpu.memory_space<vmem>>, vector<1x16x8xf32>,
    %cst_709 = arith.constant 0.000000e+00 : f32
    %1214 = vector.broadcast %cst_709 : f32 to vector<16x8xf32>
    %cst_710 = arith.constant 0.000000e+00 : f32
    %1215 = vector.broadcast %cst_710 : f32 to vector<16x8xf32>
    %c0_711 = arith.constant 0 : index
    %1216 = memref.load %arg1[%c0_711] : memref<18xf32, #tpu.memory_space<smem>>
    %c1_712 = arith.constant 1 : index
    %1217 = memref.load %arg1[%c1_712] : memref<18xf32, #tpu.memory_space<smem>>
    %c2_713 = arith.constant 2 : index
    %c9_714 = arith.constant 9 : index
    %c0_715 = arith.constant 0 : index
    %c0_716 = arith.constant 0 : index
    %1218 = vector.load %arg6[%c2_713, %c9_714, %c0_715, %c0_716] : memref<6x11x16x8xf32, #tpu.memory_space<vmem>>, vector<1x1x16x8xf32>
    %1219 = vector.shape_cast %1218 : vector<1x1x16x8xf32> to vector<16x8xf32>
    %c5_717 = arith.constant 5 : index
    %c9_718 = arith.constant 9 : index
    %c0_719 = arith.constant 0 : index
    %c0_720 = arith.constant 0 : index
    %1220 = vector.load %arg6[%c5_717, %c9_718, %c0_719, %c0_720] : memref<6x11x16x8xf32, #tpu.memory_space<vmem>>, vector<1x1x16x8xf32>
    %1221 = vector.shape_cast %1220 : vector<1x1x16x8xf32> to vector<16x8xf32>
    %1222 = vector.broadcast %1216 : f32 to vector<16x8xf32>
    %1223 = arith.mulf %1222, %1219 : vector<16x8xf32>
    %1224 = vector.broadcast %1217 : f32 to vector<16x8xf32>
    %1225 = arith.mulf %1224, %1221 : vector<16x8xf32>
    %1226 = arith.subf %1223, %1225 : vector<16x8xf32>
    %1227 = arith.addf %1214, %1226 : vector<16x8xf32>
    %1228 = vector.broadcast %1216 : f32 to vector<16x8xf32>
    %1229 = arith.mulf %1228, %1221 : vector<16x8xf32>
    %1230 = vector.broadcast %1217 : f32 to vector<16x8xf32>
    %1231 = arith.mulf %1230, %1219 : vector<16x8xf32>
    %1232 = arith.addf %1229, %1231 : vector<16x8xf32>
    %1233 = arith.addf %1215, %1232 : vector<16x8xf32>
    %c2_721 = arith.constant 2 : index
    %1234 = memref.load %arg1[%c2_721] : memref<18xf32, #tpu.memory_space<smem>>
    %c3_722 = arith.constant 3 : index
    %1235 = memref.load %arg1[%c3_722] : memref<18xf32, #tpu.memory_space<smem>>
    %c2_723 = arith.constant 2 : index
    %c8_724 = arith.constant 8 : index
    %c0_725 = arith.constant 0 : index
    %c0_726 = arith.constant 0 : index
    %1236 = vector.load %arg6[%c2_723, %c8_724, %c0_725, %c0_726] : memref<6x11x16x8xf32, #tpu.memory_space<vmem>>, vector<1x1x16x8xf32>
    %1237 = vector.shape_cast %1236 : vector<1x1x16x8xf32> to vector<16x8xf32>
    %c5_727 = arith.constant 5 : index
    %c8_728 = arith.constant 8 : index
    %c0_729 = arith.constant 0 : index
    %c0_730 = arith.constant 0 : index
    %1238 = vector.load %arg6[%c5_727, %c8_728, %c0_729, %c0_730] : memref<6x11x16x8xf32, #tpu.memory_space<vmem>>, vector<1x1x16x8xf32>
    %1239 = vector.shape_cast %1238 : vector<1x1x16x8xf32> to vector<16x8xf32>
    %1240 = vector.broadcast %1234 : f32 to vector<16x8xf32>
    %1241 = arith.mulf %1240, %1237 : vector<16x8xf32>
    %1242 = vector.broadcast %1235 : f32 to vector<16x8xf32>
    %1243 = arith.mulf %1242, %1239 : vector<16x8xf32>
    %1244 = arith.subf %1241, %1243 : vector<16x8xf32>
    %1245 = arith.addf %1227, %1244 : vector<16x8xf32>
    %1246 = vector.broadcast %1234 : f32 to vector<16x8xf32>
    %1247 = arith.mulf %1246, %1239 : vector<16x8xf32>
    %1248 = vector.broadcast %1235 : f32 to vector<16x8xf32>
    %1249 = arith.mulf %1248, %1237 : vector<16x8xf32>
    %1250 = arith.addf %1247, %1249 : vector<16x8xf32>
    %1251 = arith.addf %1233, %1250 : vector<16x8xf32>
    %c4_731 = arith.constant 4 : index
    %1252 = memref.load %arg1[%c4_731] : memref<18xf32, #tpu.memory_space<smem>>
    %c5_732 = arith.constant 5 : index
    %1253 = memref.load %arg1[%c5_732] : memref<18xf32, #tpu.memory_space<smem>>
    %c2_733 = arith.constant 2 : index
    %c7_734 = arith.constant 7 : index
    %c0_735 = arith.constant 0 : index
    %c0_736 = arith.constant 0 : index
    %1254 = vector.load %arg6[%c2_733, %c7_734, %c0_735, %c0_736] : memref<6x11x16x8xf32, #tpu.memory_space<vmem>>, vector<1x1x16x8xf32>
    %1255 = vector.shape_cast %1254 : vector<1x1x16x8xf32> to vector<16x8xf32>
    %c5_737 = arith.constant 5 : index
    %c7_738 = arith.constant 7 : index
    %c0_739 = arith.constant 0 : index
    %c0_740 = arith.constant 0 : index
    %1256 = vector.load %arg6[%c5_737, %c7_738, %c0_739, %c0_740] : memref<6x11x16x8xf32, #tpu.memory_space<vmem>>, vector<1x1x16x8xf32>
    %1257 = vector.shape_cast %1256 : vector<1x1x16x8xf32> to vector<16x8xf32>
    %1258 = vector.broadcast %1252 : f32 to vector<16x8xf32>
    %1259 = arith.mulf %1258, %1255 : vector<16x8xf32>
    %1260 = vector.broadcast %1253 : f32 to vector<16x8xf32>
    %1261 = arith.mulf %1260, %1257 : vector<16x8xf32>
    %1262 = arith.subf %1259, %1261 : vector<16x8xf32>
    %1263 = arith.addf %1245, %1262 : vector<16x8xf32>
    %1264 = vector.broadcast %1252 : f32 to vector<16x8xf32>
    %1265 = arith.mulf %1264, %1257 : vector<16x8xf32>
    %1266 = vector.broadcast %1253 : f32 to vector<16x8xf32>
    %1267 = arith.mulf %1266, %1255 : vector<16x8xf32>
    %1268 = arith.addf %1265, %1267 : vector<16x8xf32>
    %1269 = arith.addf %1251, %1268 : vector<16x8xf32>
    %c6_741 = arith.constant 6 : index
    %1270 = memref.load %arg1[%c6_741] : memref<18xf32, #tpu.memory_space<smem>>
    %c7_742 = arith.constant 7 : index
    %1271 = memref.load %arg1[%c7_742] : memref<18xf32, #tpu.memory_space<smem>>
    %c1_743 = arith.constant 1 : index
    %c9_744 = arith.constant 9 : index
    %c0_745 = arith.constant 0 : index
    %c0_746 = arith.constant 0 : index
    %1272 = vector.load %arg6[%c1_743, %c9_744, %c0_745, %c0_746] : memref<6x11x16x8xf32, #tpu.memory_space<vmem>>, vector<1x1x16x8xf32>
    %1273 = vector.shape_cast %1272 : vector<1x1x16x8xf32> to vector<16x8xf32>
    %c4_747 = arith.constant 4 : index
    %c9_748 = arith.constant 9 : index
    %c0_749 = arith.constant 0 : index
    %c0_750 = arith.constant 0 : index
    %1274 = vector.load %arg6[%c4_747, %c9_748, %c0_749, %c0_750] : memref<6x11x16x8xf32, #tpu.memory_space<vmem>>, vector<1x1x16x8xf32>
    %1275 = vector.shape_cast %1274 : vector<1x1x16x8xf32> to vector<16x8xf32>
    %1276 = vector.broadcast %1270 : f32 to vector<16x8xf32>
    %1277 = arith.mulf %1276, %1273 : vector<16x8xf32>
    %1278 = vector.broadcast %1271 : f32 to vector<16x8xf32>
    %1279 = arith.mulf %1278, %1275 : vector<16x8xf32>
    %1280 = arith.subf %1277, %1279 : vector<16x8xf32>
    %1281 = arith.addf %1263, %1280 : vector<16x8xf32>
    %1282 = vector.broadcast %1270 : f32 to vector<16x8xf32>
    %1283 = arith.mulf %1282, %1275 : vector<16x8xf32>
    %1284 = vector.broadcast %1271 : f32 to vector<16x8xf32>
    %1285 = arith.mulf %1284, %1273 : vector<16x8xf32>
    %1286 = arith.addf %1283, %1285 : vector<16x8xf32>
    %1287 = arith.addf %1269, %1286 : vector<16x8xf32>
    %c8_751 = arith.constant 8 : index
    %1288 = memref.load %arg1[%c8_751] : memref<18xf32, #tpu.memory_space<smem>>
    %c9_752 = arith.constant 9 : index
    %1289 = memref.load %arg1[%c9_752] : memref<18xf32, #tpu.memory_space<smem>>
    %c1_753 = arith.constant 1 : index
    %c8_754 = arith.constant 8 : index
    %c0_755 = arith.constant 0 : index
    %c0_756 = arith.constant 0 : index
    %1290 = vector.load %arg6[%c1_753, %c8_754, %c0_755, %c0_756] : memref<6x11x16x8xf32, #tpu.memory_space<vmem>>, vector<1x1x16x8xf32>
    %1291 = vector.shape_cast %1290 : vector<1x1x16x8xf32> to vector<16x8xf32>
    %c4_757 = arith.constant 4 : index
    %c8_758 = arith.constant 8 : index
    %c0_759 = arith.constant 0 : index
    %c0_760 = arith.constant 0 : index
    %1292 = vector.load %arg6[%c4_757, %c8_758, %c0_759, %c0_760] : memref<6x11x16x8xf32, #tpu.memory_space<vmem>>, vector<1x1x16x8xf32>
    %1293 = vector.shape_cast %1292 : vector<1x1x16x8xf32> to vector<16x8xf32>
    %1294 = vector.broadcast %1288 : f32 to vector<16x8xf32>
    %1295 = arith.mulf %1294, %1291 : vector<16x8xf32>
    %1296 = vector.broadcast %1289 : f32 to vector<16x8xf32>
    %1297 = arith.mulf %1296, %1293 : vector<16x8xf32>
    %1298 = arith.subf %1295, %1297 : vector<16x8xf32>
    %1299 = arith.addf %1281, %1298 : vector<16x8xf32>
    %1300 = vector.broadcast %1288 : f32 to vector<16x8xf32>
    %1301 = arith.mulf %1300, %1293 : vector<16x8xf32>
    %1302 = vector.broadcast %1289 : f32 to vector<16x8xf32>
    %1303 = arith.mulf %1302, %1291 : vector<16x8xf32>
    %1304 = arith.addf %1301, %1303 : vector<16x8xf32>
    %1305 = arith.addf %1287, %1304 : vector<16x8xf32>
    %c10_761 = arith.constant 10 : index
    %1306 = memref.load %arg1[%c10_761] : memref<18xf32, #tpu.memory_space<smem>>
    %c11_762 = arith.constant 11 : index
    %1307 = memref.load %arg1[%c11_762] : memref<18xf32, #tpu.memory_space<smem>>
    %c1_763 = arith.constant 1 : index
    %c7_764 = arith.constant 7 : index
    %c0_765 = arith.constant 0 : index
    %c0_766 = arith.constant 0 : index
    %1308 = vector.load %arg6[%c1_763, %c7_764, %c0_765, %c0_766] : memref<6x11x16x8xf32, #tpu.memory_space<vmem>>, vector<1x1x16x8xf32>
    %1309 = vector.shape_cast %1308 : vector<1x1x16x8xf32> to vector<16x8xf32>
    %c4_767 = arith.constant 4 : index
    %c7_768 = arith.constant 7 : index
    %c0_769 = arith.constant 0 : index
    %c0_770 = arith.constant 0 : index
    %1310 = vector.load %arg6[%c4_767, %c7_768, %c0_769, %c0_770] : memref<6x11x16x8xf32, #tpu.memory_space<vmem>>, vector<1x1x16x8xf32>
    %1311 = vector.shape_cast %1310 : vector<1x1x16x8xf32> to vector<16x8xf32>
    %1312 = vector.broadcast %1306 : f32 to vector<16x8xf32>
    %1313 = arith.mulf %1312, %1309 : vector<16x8xf32>
    %1314 = vector.broadcast %1307 : f32 to vector<16x8xf32>
    %1315 = arith.mulf %1314, %1311 : vector<16x8xf32>
    %1316 = arith.subf %1313, %1315 : vector<16x8xf32>
    %1317 = arith.addf %1299, %1316 : vector<16x8xf32>
    %1318 = vector.broadcast %1306 : f32 to vector<16x8xf32>
    %1319 = arith.mulf %1318, %1311 : vector<16x8xf32>
    %1320 = vector.broadcast %1307 : f32 to vector<16x8xf32>
    %1321 = arith.mulf %1320, %1309 : vector<16x8xf32>
    %1322 = arith.addf %1319, %1321 : vector<16x8xf32>
    %1323 = arith.addf %1305, %1322 : vector<16x8xf32>
    %c12_771 = arith.constant 12 : index
    %1324 = memref.load %arg1[%c12_771] : memref<18xf32, #tpu.memory_space<smem>>
    %c13_772 = arith.constant 13 : index
    %1325 = memref.load %arg1[%c13_772] : memref<18xf32, #tpu.memory_space<smem>>
    %c0_773 = arith.constant 0 : index
    %c9_774 = arith.constant 9 : index
    %c0_775 = arith.constant 0 : index
    %c0_776 = arith.constant 0 : index
    %1326 = vector.load %arg6[%c0_773, %c9_774, %c0_775, %c0_776] : memref<6x11x16x8xf32, #tpu.memory_space<vmem>>, vector<1x1x16x8xf32>
    %1327 = vector.shape_cast %1326 : vector<1x1x16x8xf32> to vector<16x8xf32>
    %c3_777 = arith.constant 3 : index
    %c9_778 = arith.constant 9 : index
    %c0_779 = arith.constant 0 : index
    %c0_780 = arith.constant 0 : index
    %1328 = vector.load %arg6[%c3_777, %c9_778, %c0_779, %c0_780] : memref<6x11x16x8xf32, #tpu.memory_space<vmem>>, vector<1x1x16x8xf32>
    %1329 = vector.shape_cast %1328 : vector<1x1x16x8xf32> to vector<16x8xf32>
    %1330 = vector.broadcast %1324 : f32 to vector<16x8xf32>
    %1331 = arith.mulf %1330, %1327 : vector<16x8xf32>
    %1332 = vector.broadcast %1325 : f32 to vector<16x8xf32>
    %1333 = arith.mulf %1332, %1329 : vector<16x8xf32>
    %1334 = arith.subf %1331, %1333 : vector<16x8xf32>
    %1335 = arith.addf %1317, %1334 : vector<16x8xf32>
    %1336 = vector.broadcast %1324 : f32 to vector<16x8xf32>
    %1337 = arith.mulf %1336, %1329 : vector<16x8xf32>
    %1338 = vector.broadcast %1325 : f32 to vector<16x8xf32>
    %1339 = arith.mulf %1338, %1327 : vector<16x8xf32>
    %1340 = arith.addf %1337, %1339 : vector<16x8xf32>
    %1341 = arith.addf %1323, %1340 : vector<16x8xf32>
    %c14_781 = arith.constant 14 : index
    %1342 = memref.load %arg1[%c14_781] : memref<18xf32, #tpu.memory_space<smem>>
    %c15_782 = arith.constant 15 : index
    %1343 = memref.load %arg1[%c15_782] : memref<18xf32, #tpu.memory_space<smem>>
    %c0_783 = arith.constant 0 : index
    %c8_784 = arith.constant 8 : index
    %c0_785 = arith.constant 0 : index
    %c0_786 = arith.constant 0 : index
    %1344 = vector.load %arg6[%c0_783, %c8_784, %c0_785, %c0_786] : memref<6x11x16x8xf32, #tpu.memory_space<vmem>>, vector<1x1x16x8xf32>
    %1345 = vector.shape_cast %1344 : vector<1x1x16x8xf32> to vector<16x8xf32>
    %c3_787 = arith.constant 3 : index
    %c8_788 = arith.constant 8 : index
    %c0_789 = arith.constant 0 : index
    %c0_790 = arith.constant 0 : index
    %1346 = vector.load %arg6[%c3_787, %c8_788, %c0_789, %c0_790] : memref<6x11x16x8xf32, #tpu.memory_space<vmem>>, vector<1x1x16x8xf32>
    %1347 = vector.shape_cast %1346 : vector<1x1x16x8xf32> to vector<16x8xf32>
    %1348 = vector.broadcast %1342 : f32 to vector<16x8xf32>
    %1349 = arith.mulf %1348, %1345 : vector<16x8xf32>
    %1350 = vector.broadcast %1343 : f32 to vector<16x8xf32>
    %1351 = arith.mulf %1350, %1347 : vector<16x8xf32>
    %1352 = arith.subf %1349, %1351 : vector<16x8xf32>
    %1353 = arith.addf %1335, %1352 : vector<16x8xf32>
    %1354 = vector.broadcast %1342 : f32 to vector<16x8xf32>
    %1355 = arith.mulf %1354, %1347 : vector<16x8xf32>
    %1356 = vector.broadcast %1343 : f32 to vector<16x8xf32>
    %1357 = arith.mulf %1356, %1345 : vector<16x8xf32>
    %1358 = arith.addf %1355, %1357 : vector<16x8xf32>
    %1359 = arith.addf %1341, %1358 : vector<16x8xf32>
    %c16_791 = arith.constant 16 : index
    %1360 = memref.load %arg1[%c16_791] : memref<18xf32, #tpu.memory_space<smem>>
    %c17_792 = arith.constant 17 : index
    %1361 = memref.load %arg1[%c17_792] : memref<18xf32, #tpu.memory_space<smem>>
    %c0_793 = arith.constant 0 : index
    %c7_794 = arith.constant 7 : index
    %c0_795 = arith.constant 0 : index
    %c0_796 = arith.constant 0 : index
    %1362 = vector.load %arg6[%c0_793, %c7_794, %c0_795, %c0_796] : memref<6x11x16x8xf32, #tpu.memory_space<vmem>>, vector<1x1x16x8xf32>
    %1363 = vector.shape_cast %1362 : vector<1x1x16x8xf32> to vector<16x8xf32>
    %c3_797 = arith.constant 3 : index
    %c7_798 = arith.constant 7 : index
    %c0_799 = arith.constant 0 : index
    %c0_800 = arith.constant 0 : index
    %1364 = vector.load %arg6[%c3_797, %c7_798, %c0_799, %c0_800] : memref<6x11x16x8xf32, #tpu.memory_space<vmem>>, vector<1x1x16x8xf32>
    %1365 = vector.shape_cast %1364 : vector<1x1x16x8xf32> to vector<16x8xf32>
    %1366 = vector.broadcast %1360 : f32 to vector<16x8xf32>
    %1367 = arith.mulf %1366, %1363 : vector<16x8xf32>
    %1368 = vector.broadcast %1361 : f32 to vector<16x8xf32>
    %1369 = arith.mulf %1368, %1365 : vector<16x8xf32>
    %1370 = arith.subf %1367, %1369 : vector<16x8xf32>
    %1371 = arith.addf %1353, %1370 : vector<16x8xf32>
    %1372 = vector.broadcast %1360 : f32 to vector<16x8xf32>
    %1373 = arith.mulf %1372, %1365 : vector<16x8xf32>
    %1374 = vector.broadcast %1361 : f32 to vector<16x8xf32>
    %1375 = arith.mulf %1374, %1363 : vector<16x8xf32>
    %1376 = arith.addf %1373, %1375 : vector<16x8xf32>
    %1377 = arith.addf %1359, %1376 : vector<16x8xf32>
    %c7_801 = arith.constant 7 : index
    %c0_802 = arith.constant 0 : index
    %c0_803 = arith.constant 0 : index
    %1378 = vector.load %arg4[%c7_801, %c0_802, %c0_803] : memref<9x16x8xf32, #tpu.memory_space<vmem>>, vector<1x16x8xf32>
    %1379 = vector.shape_cast %1378 : vector<1x16x8xf32> to vector<16x8xf32>
    %1380 = vector.shape_cast %1371 : vector<16x8xf32> to vector<1x16x8xf32>
    tpu.vector_store %arg4[%c7_801, %c0_802, %c0_803], %1380 {strides = array<i32>} : memref<9x16x8xf32, #tpu.memory_space<vmem>>, vector<1x16x8xf32>,
    %c7_804 = arith.constant 7 : index
    %c0_805 = arith.constant 0 : index
    %c0_806 = arith.constant 0 : index
    %1381 = vector.load %arg5[%c7_804, %c0_805, %c0_806] : memref<9x16x8xf32, #tpu.memory_space<vmem>>, vector<1x16x8xf32>
    %1382 = vector.shape_cast %1381 : vector<1x16x8xf32> to vector<16x8xf32>
    %1383 = vector.shape_cast %1377 : vector<16x8xf32> to vector<1x16x8xf32>
    tpu.vector_store %arg5[%c7_804, %c0_805, %c0_806], %1383 {strides = array<i32>} : memref<9x16x8xf32, #tpu.memory_space<vmem>>, vector<1x16x8xf32>,
    %cst_807 = arith.constant 0.000000e+00 : f32
    %1384 = vector.broadcast %cst_807 : f32 to vector<16x8xf32>
    %cst_808 = arith.constant 0.000000e+00 : f32
    %1385 = vector.broadcast %cst_808 : f32 to vector<16x8xf32>
    %c0_809 = arith.constant 0 : index
    %1386 = memref.load %arg1[%c0_809] : memref<18xf32, #tpu.memory_space<smem>>
    %c1_810 = arith.constant 1 : index
    %1387 = memref.load %arg1[%c1_810] : memref<18xf32, #tpu.memory_space<smem>>
    %c2_811 = arith.constant 2 : index
    %c10_812 = arith.constant 10 : index
    %c0_813 = arith.constant 0 : index
    %c0_814 = arith.constant 0 : index
    %1388 = vector.load %arg6[%c2_811, %c10_812, %c0_813, %c0_814] : memref<6x11x16x8xf32, #tpu.memory_space<vmem>>, vector<1x1x16x8xf32>
    %1389 = vector.shape_cast %1388 : vector<1x1x16x8xf32> to vector<16x8xf32>
    %c5_815 = arith.constant 5 : index
    %c10_816 = arith.constant 10 : index
    %c0_817 = arith.constant 0 : index
    %c0_818 = arith.constant 0 : index
    %1390 = vector.load %arg6[%c5_815, %c10_816, %c0_817, %c0_818] : memref<6x11x16x8xf32, #tpu.memory_space<vmem>>, vector<1x1x16x8xf32>
    %1391 = vector.shape_cast %1390 : vector<1x1x16x8xf32> to vector<16x8xf32>
    %1392 = vector.broadcast %1386 : f32 to vector<16x8xf32>
    %1393 = arith.mulf %1392, %1389 : vector<16x8xf32>
    %1394 = vector.broadcast %1387 : f32 to vector<16x8xf32>
    %1395 = arith.mulf %1394, %1391 : vector<16x8xf32>
    %1396 = arith.subf %1393, %1395 : vector<16x8xf32>
    %1397 = arith.addf %1384, %1396 : vector<16x8xf32>
    %1398 = vector.broadcast %1386 : f32 to vector<16x8xf32>
    %1399 = arith.mulf %1398, %1391 : vector<16x8xf32>
    %1400 = vector.broadcast %1387 : f32 to vector<16x8xf32>
    %1401 = arith.mulf %1400, %1389 : vector<16x8xf32>
    %1402 = arith.addf %1399, %1401 : vector<16x8xf32>
    %1403 = arith.addf %1385, %1402 : vector<16x8xf32>
    %c2_819 = arith.constant 2 : index
    %1404 = memref.load %arg1[%c2_819] : memref<18xf32, #tpu.memory_space<smem>>
    %c3_820 = arith.constant 3 : index
    %1405 = memref.load %arg1[%c3_820] : memref<18xf32, #tpu.memory_space<smem>>
    %c2_821 = arith.constant 2 : index
    %c9_822 = arith.constant 9 : index
    %c0_823 = arith.constant 0 : index
    %c0_824 = arith.constant 0 : index
    %1406 = vector.load %arg6[%c2_821, %c9_822, %c0_823, %c0_824] : memref<6x11x16x8xf32, #tpu.memory_space<vmem>>, vector<1x1x16x8xf32>
    %1407 = vector.shape_cast %1406 : vector<1x1x16x8xf32> to vector<16x8xf32>
    %c5_825 = arith.constant 5 : index
    %c9_826 = arith.constant 9 : index
    %c0_827 = arith.constant 0 : index
    %c0_828 = arith.constant 0 : index
    %1408 = vector.load %arg6[%c5_825, %c9_826, %c0_827, %c0_828] : memref<6x11x16x8xf32, #tpu.memory_space<vmem>>, vector<1x1x16x8xf32>
    %1409 = vector.shape_cast %1408 : vector<1x1x16x8xf32> to vector<16x8xf32>
    %1410 = vector.broadcast %1404 : f32 to vector<16x8xf32>
    %1411 = arith.mulf %1410, %1407 : vector<16x8xf32>
    %1412 = vector.broadcast %1405 : f32 to vector<16x8xf32>
    %1413 = arith.mulf %1412, %1409 : vector<16x8xf32>
    %1414 = arith.subf %1411, %1413 : vector<16x8xf32>
    %1415 = arith.addf %1397, %1414 : vector<16x8xf32>
    %1416 = vector.broadcast %1404 : f32 to vector<16x8xf32>
    %1417 = arith.mulf %1416, %1409 : vector<16x8xf32>
    %1418 = vector.broadcast %1405 : f32 to vector<16x8xf32>
    %1419 = arith.mulf %1418, %1407 : vector<16x8xf32>
    %1420 = arith.addf %1417, %1419 : vector<16x8xf32>
    %1421 = arith.addf %1403, %1420 : vector<16x8xf32>
    %c4_829 = arith.constant 4 : index
    %1422 = memref.load %arg1[%c4_829] : memref<18xf32, #tpu.memory_space<smem>>
    %c5_830 = arith.constant 5 : index
    %1423 = memref.load %arg1[%c5_830] : memref<18xf32, #tpu.memory_space<smem>>
    %c2_831 = arith.constant 2 : index
    %c8_832 = arith.constant 8 : index
    %c0_833 = arith.constant 0 : index
    %c0_834 = arith.constant 0 : index
    %1424 = vector.load %arg6[%c2_831, %c8_832, %c0_833, %c0_834] : memref<6x11x16x8xf32, #tpu.memory_space<vmem>>, vector<1x1x16x8xf32>
    %1425 = vector.shape_cast %1424 : vector<1x1x16x8xf32> to vector<16x8xf32>
    %c5_835 = arith.constant 5 : index
    %c8_836 = arith.constant 8 : index
    %c0_837 = arith.constant 0 : index
    %c0_838 = arith.constant 0 : index
    %1426 = vector.load %arg6[%c5_835, %c8_836, %c0_837, %c0_838] : memref<6x11x16x8xf32, #tpu.memory_space<vmem>>, vector<1x1x16x8xf32>
    %1427 = vector.shape_cast %1426 : vector<1x1x16x8xf32> to vector<16x8xf32>
    %1428 = vector.broadcast %1422 : f32 to vector<16x8xf32>
    %1429 = arith.mulf %1428, %1425 : vector<16x8xf32>
    %1430 = vector.broadcast %1423 : f32 to vector<16x8xf32>
    %1431 = arith.mulf %1430, %1427 : vector<16x8xf32>
    %1432 = arith.subf %1429, %1431 : vector<16x8xf32>
    %1433 = arith.addf %1415, %1432 : vector<16x8xf32>
    %1434 = vector.broadcast %1422 : f32 to vector<16x8xf32>
    %1435 = arith.mulf %1434, %1427 : vector<16x8xf32>
    %1436 = vector.broadcast %1423 : f32 to vector<16x8xf32>
    %1437 = arith.mulf %1436, %1425 : vector<16x8xf32>
    %1438 = arith.addf %1435, %1437 : vector<16x8xf32>
    %1439 = arith.addf %1421, %1438 : vector<16x8xf32>
    %c6_839 = arith.constant 6 : index
    %1440 = memref.load %arg1[%c6_839] : memref<18xf32, #tpu.memory_space<smem>>
    %c7_840 = arith.constant 7 : index
    %1441 = memref.load %arg1[%c7_840] : memref<18xf32, #tpu.memory_space<smem>>
    %c1_841 = arith.constant 1 : index
    %c10_842 = arith.constant 10 : index
    %c0_843 = arith.constant 0 : index
    %c0_844 = arith.constant 0 : index
    %1442 = vector.load %arg6[%c1_841, %c10_842, %c0_843, %c0_844] : memref<6x11x16x8xf32, #tpu.memory_space<vmem>>, vector<1x1x16x8xf32>
    %1443 = vector.shape_cast %1442 : vector<1x1x16x8xf32> to vector<16x8xf32>
    %c4_845 = arith.constant 4 : index
    %c10_846 = arith.constant 10 : index
    %c0_847 = arith.constant 0 : index
    %c0_848 = arith.constant 0 : index
    %1444 = vector.load %arg6[%c4_845, %c10_846, %c0_847, %c0_848] : memref<6x11x16x8xf32, #tpu.memory_space<vmem>>, vector<1x1x16x8xf32>
    %1445 = vector.shape_cast %1444 : vector<1x1x16x8xf32> to vector<16x8xf32>
    %1446 = vector.broadcast %1440 : f32 to vector<16x8xf32>
    %1447 = arith.mulf %1446, %1443 : vector<16x8xf32>
    %1448 = vector.broadcast %1441 : f32 to vector<16x8xf32>
    %1449 = arith.mulf %1448, %1445 : vector<16x8xf32>
    %1450 = arith.subf %1447, %1449 : vector<16x8xf32>
    %1451 = arith.addf %1433, %1450 : vector<16x8xf32>
    %1452 = vector.broadcast %1440 : f32 to vector<16x8xf32>
    %1453 = arith.mulf %1452, %1445 : vector<16x8xf32>
    %1454 = vector.broadcast %1441 : f32 to vector<16x8xf32>
    %1455 = arith.mulf %1454, %1443 : vector<16x8xf32>
    %1456 = arith.addf %1453, %1455 : vector<16x8xf32>
    %1457 = arith.addf %1439, %1456 : vector<16x8xf32>
    %c8_849 = arith.constant 8 : index
    %1458 = memref.load %arg1[%c8_849] : memref<18xf32, #tpu.memory_space<smem>>
    %c9_850 = arith.constant 9 : index
    %1459 = memref.load %arg1[%c9_850] : memref<18xf32, #tpu.memory_space<smem>>
    %c1_851 = arith.constant 1 : index
    %c9_852 = arith.constant 9 : index
    %c0_853 = arith.constant 0 : index
    %c0_854 = arith.constant 0 : index
    %1460 = vector.load %arg6[%c1_851, %c9_852, %c0_853, %c0_854] : memref<6x11x16x8xf32, #tpu.memory_space<vmem>>, vector<1x1x16x8xf32>
    %1461 = vector.shape_cast %1460 : vector<1x1x16x8xf32> to vector<16x8xf32>
    %c4_855 = arith.constant 4 : index
    %c9_856 = arith.constant 9 : index
    %c0_857 = arith.constant 0 : index
    %c0_858 = arith.constant 0 : index
    %1462 = vector.load %arg6[%c4_855, %c9_856, %c0_857, %c0_858] : memref<6x11x16x8xf32, #tpu.memory_space<vmem>>, vector<1x1x16x8xf32>
    %1463 = vector.shape_cast %1462 : vector<1x1x16x8xf32> to vector<16x8xf32>
    %1464 = vector.broadcast %1458 : f32 to vector<16x8xf32>
    %1465 = arith.mulf %1464, %1461 : vector<16x8xf32>
    %1466 = vector.broadcast %1459 : f32 to vector<16x8xf32>
    %1467 = arith.mulf %1466, %1463 : vector<16x8xf32>
    %1468 = arith.subf %1465, %1467 : vector<16x8xf32>
    %1469 = arith.addf %1451, %1468 : vector<16x8xf32>
    %1470 = vector.broadcast %1458 : f32 to vector<16x8xf32>
    %1471 = arith.mulf %1470, %1463 : vector<16x8xf32>
    %1472 = vector.broadcast %1459 : f32 to vector<16x8xf32>
    %1473 = arith.mulf %1472, %1461 : vector<16x8xf32>
    %1474 = arith.addf %1471, %1473 : vector<16x8xf32>
    %1475 = arith.addf %1457, %1474 : vector<16x8xf32>
    %c10_859 = arith.constant 10 : index
    %1476 = memref.load %arg1[%c10_859] : memref<18xf32, #tpu.memory_space<smem>>
    %c11_860 = arith.constant 11 : index
    %1477 = memref.load %arg1[%c11_860] : memref<18xf32, #tpu.memory_space<smem>>
    %c1_861 = arith.constant 1 : index
    %c8_862 = arith.constant 8 : index
    %c0_863 = arith.constant 0 : index
    %c0_864 = arith.constant 0 : index
    %1478 = vector.load %arg6[%c1_861, %c8_862, %c0_863, %c0_864] : memref<6x11x16x8xf32, #tpu.memory_space<vmem>>, vector<1x1x16x8xf32>
    %1479 = vector.shape_cast %1478 : vector<1x1x16x8xf32> to vector<16x8xf32>
    %c4_865 = arith.constant 4 : index
    %c8_866 = arith.constant 8 : index
    %c0_867 = arith.constant 0 : index
    %c0_868 = arith.constant 0 : index
    %1480 = vector.load %arg6[%c4_865, %c8_866, %c0_867, %c0_868] : memref<6x11x16x8xf32, #tpu.memory_space<vmem>>, vector<1x1x16x8xf32>
    %1481 = vector.shape_cast %1480 : vector<1x1x16x8xf32> to vector<16x8xf32>
    %1482 = vector.broadcast %1476 : f32 to vector<16x8xf32>
    %1483 = arith.mulf %1482, %1479 : vector<16x8xf32>
    %1484 = vector.broadcast %1477 : f32 to vector<16x8xf32>
    %1485 = arith.mulf %1484, %1481 : vector<16x8xf32>
    %1486 = arith.subf %1483, %1485 : vector<16x8xf32>
    %1487 = arith.addf %1469, %1486 : vector<16x8xf32>
    %1488 = vector.broadcast %1476 : f32 to vector<16x8xf32>
    %1489 = arith.mulf %1488, %1481 : vector<16x8xf32>
    %1490 = vector.broadcast %1477 : f32 to vector<16x8xf32>
    %1491 = arith.mulf %1490, %1479 : vector<16x8xf32>
    %1492 = arith.addf %1489, %1491 : vector<16x8xf32>
    %1493 = arith.addf %1475, %1492 : vector<16x8xf32>
    %c12_869 = arith.constant 12 : index
    %1494 = memref.load %arg1[%c12_869] : memref<18xf32, #tpu.memory_space<smem>>
    %c13_870 = arith.constant 13 : index
    %1495 = memref.load %arg1[%c13_870] : memref<18xf32, #tpu.memory_space<smem>>
    %c0_871 = arith.constant 0 : index
    %c10_872 = arith.constant 10 : index
    %c0_873 = arith.constant 0 : index
    %c0_874 = arith.constant 0 : index
    %1496 = vector.load %arg6[%c0_871, %c10_872, %c0_873, %c0_874] : memref<6x11x16x8xf32, #tpu.memory_space<vmem>>, vector<1x1x16x8xf32>
    %1497 = vector.shape_cast %1496 : vector<1x1x16x8xf32> to vector<16x8xf32>
    %c3_875 = arith.constant 3 : index
    %c10_876 = arith.constant 10 : index
    %c0_877 = arith.constant 0 : index
    %c0_878 = arith.constant 0 : index
    %1498 = vector.load %arg6[%c3_875, %c10_876, %c0_877, %c0_878] : memref<6x11x16x8xf32, #tpu.memory_space<vmem>>, vector<1x1x16x8xf32>
    %1499 = vector.shape_cast %1498 : vector<1x1x16x8xf32> to vector<16x8xf32>
    %1500 = vector.broadcast %1494 : f32 to vector<16x8xf32>
    %1501 = arith.mulf %1500, %1497 : vector<16x8xf32>
    %1502 = vector.broadcast %1495 : f32 to vector<16x8xf32>
    %1503 = arith.mulf %1502, %1499 : vector<16x8xf32>
    %1504 = arith.subf %1501, %1503 : vector<16x8xf32>
    %1505 = arith.addf %1487, %1504 : vector<16x8xf32>
    %1506 = vector.broadcast %1494 : f32 to vector<16x8xf32>
    %1507 = arith.mulf %1506, %1499 : vector<16x8xf32>
    %1508 = vector.broadcast %1495 : f32 to vector<16x8xf32>
    %1509 = arith.mulf %1508, %1497 : vector<16x8xf32>
    %1510 = arith.addf %1507, %1509 : vector<16x8xf32>
    %1511 = arith.addf %1493, %1510 : vector<16x8xf32>
    %c14_879 = arith.constant 14 : index
    %1512 = memref.load %arg1[%c14_879] : memref<18xf32, #tpu.memory_space<smem>>
    %c15_880 = arith.constant 15 : index
    %1513 = memref.load %arg1[%c15_880] : memref<18xf32, #tpu.memory_space<smem>>
    %c0_881 = arith.constant 0 : index
    %c9_882 = arith.constant 9 : index
    %c0_883 = arith.constant 0 : index
    %c0_884 = arith.constant 0 : index
    %1514 = vector.load %arg6[%c0_881, %c9_882, %c0_883, %c0_884] : memref<6x11x16x8xf32, #tpu.memory_space<vmem>>, vector<1x1x16x8xf32>
    %1515 = vector.shape_cast %1514 : vector<1x1x16x8xf32> to vector<16x8xf32>
    %c3_885 = arith.constant 3 : index
    %c9_886 = arith.constant 9 : index
    %c0_887 = arith.constant 0 : index
    %c0_888 = arith.constant 0 : index
    %1516 = vector.load %arg6[%c3_885, %c9_886, %c0_887, %c0_888] : memref<6x11x16x8xf32, #tpu.memory_space<vmem>>, vector<1x1x16x8xf32>
    %1517 = vector.shape_cast %1516 : vector<1x1x16x8xf32> to vector<16x8xf32>
    %1518 = vector.broadcast %1512 : f32 to vector<16x8xf32>
    %1519 = arith.mulf %1518, %1515 : vector<16x8xf32>
    %1520 = vector.broadcast %1513 : f32 to vector<16x8xf32>
    %1521 = arith.mulf %1520, %1517 : vector<16x8xf32>
    %1522 = arith.subf %1519, %1521 : vector<16x8xf32>
    %1523 = arith.addf %1505, %1522 : vector<16x8xf32>
    %1524 = vector.broadcast %1512 : f32 to vector<16x8xf32>
    %1525 = arith.mulf %1524, %1517 : vector<16x8xf32>
    %1526 = vector.broadcast %1513 : f32 to vector<16x8xf32>
    %1527 = arith.mulf %1526, %1515 : vector<16x8xf32>
    %1528 = arith.addf %1525, %1527 : vector<16x8xf32>
    %1529 = arith.addf %1511, %1528 : vector<16x8xf32>
    %c16_889 = arith.constant 16 : index
    %1530 = memref.load %arg1[%c16_889] : memref<18xf32, #tpu.memory_space<smem>>
    %c17_890 = arith.constant 17 : index
    %1531 = memref.load %arg1[%c17_890] : memref<18xf32, #tpu.memory_space<smem>>
    %c0_891 = arith.constant 0 : index
    %c8_892 = arith.constant 8 : index
    %c0_893 = arith.constant 0 : index
    %c0_894 = arith.constant 0 : index
    %1532 = vector.load %arg6[%c0_891, %c8_892, %c0_893, %c0_894] : memref<6x11x16x8xf32, #tpu.memory_space<vmem>>, vector<1x1x16x8xf32>
    %1533 = vector.shape_cast %1532 : vector<1x1x16x8xf32> to vector<16x8xf32>
    %c3_895 = arith.constant 3 : index
    %c8_896 = arith.constant 8 : index
    %c0_897 = arith.constant 0 : index
    %c0_898 = arith.constant 0 : index
    %1534 = vector.load %arg6[%c3_895, %c8_896, %c0_897, %c0_898] : memref<6x11x16x8xf32, #tpu.memory_space<vmem>>, vector<1x1x16x8xf32>
    %1535 = vector.shape_cast %1534 : vector<1x1x16x8xf32> to vector<16x8xf32>
    %1536 = vector.broadcast %1530 : f32 to vector<16x8xf32>
    %1537 = arith.mulf %1536, %1533 : vector<16x8xf32>
    %1538 = vector.broadcast %1531 : f32 to vector<16x8xf32>
    %1539 = arith.mulf %1538, %1535 : vector<16x8xf32>
    %1540 = arith.subf %1537, %1539 : vector<16x8xf32>
    %1541 = arith.addf %1523, %1540 : vector<16x8xf32>
    %1542 = vector.broadcast %1530 : f32 to vector<16x8xf32>
    %1543 = arith.mulf %1542, %1535 : vector<16x8xf32>
    %1544 = vector.broadcast %1531 : f32 to vector<16x8xf32>
    %1545 = arith.mulf %1544, %1533 : vector<16x8xf32>
    %1546 = arith.addf %1543, %1545 : vector<16x8xf32>
    %1547 = arith.addf %1529, %1546 : vector<16x8xf32>
    %c8_899 = arith.constant 8 : index
    %c0_900 = arith.constant 0 : index
    %c0_901 = arith.constant 0 : index
    %1548 = vector.load %arg4[%c8_899, %c0_900, %c0_901] : memref<9x16x8xf32, #tpu.memory_space<vmem>>, vector<1x16x8xf32>
    %1549 = vector.shape_cast %1548 : vector<1x16x8xf32> to vector<16x8xf32>
    %1550 = vector.shape_cast %1541 : vector<16x8xf32> to vector<1x16x8xf32>
    tpu.vector_store %arg4[%c8_899, %c0_900, %c0_901], %1550 {strides = array<i32>} : memref<9x16x8xf32, #tpu.memory_space<vmem>>, vector<1x16x8xf32>,
    %c8_902 = arith.constant 8 : index
    %c0_903 = arith.constant 0 : index
    %c0_904 = arith.constant 0 : index
    %1551 = vector.load %arg5[%c8_902, %c0_903, %c0_904] : memref<9x16x8xf32, #tpu.memory_space<vmem>>, vector<1x16x8xf32>
    %1552 = vector.shape_cast %1551 : vector<1x16x8xf32> to vector<16x8xf32>
    %1553 = vector.shape_cast %1547 : vector<16x8xf32> to vector<1x16x8xf32>
    tpu.vector_store %arg5[%c8_902, %c0_903, %c0_904], %1553 {strides = array<i32>} : memref<9x16x8xf32, #tpu.memory_space<vmem>>, vector<1x16x8xf32>,
    return
  }
  func.func @transform_0(%arg0: i32) -> i32 {
    %c0_i32 = arith.constant 0 : i32
    %c0_i32_0 = arith.constant 0 : i32
    return %c0_i32 : i32
  }
  func.func @transform_1(%arg0: i32) -> (i32, i32, i32) {
    %c0_i32 = arith.constant 0 : i32
    %c0_i32_0 = arith.constant 0 : i32
    %c0_i32_1 = arith.constant 0 : i32
    return %c0_i32, %c0_i32_0, %arg0 : i32, i32, i32
  }
  func.func @transform_2(%arg0: i32) -> (i32, i32, i32) {
    %c0_i32 = arith.constant 0 : i32
    %c0_i32_0 = arith.constant 0 : i32
    %c0_i32_1 = arith.constant 0 : i32
    return %c0_i32, %c0_i32_0, %arg0 : i32, i32, i32
  }
  func.func @transform_3(%arg0: i32) -> (i32, i32, i32) {
    %c0_i32 = arith.constant 0 : i32
    %c0_i32_0 = arith.constant 0 : i32
    %c0_i32_1 = arith.constant 0 : i32
    return %c0_i32, %c0_i32_0, %arg0 : i32, i32, i32
  }
  func.func @transform_4(%arg0: i32) -> (i32, i32, i32) {
    %c0_i32 = arith.constant 0 : i32
    %c0_i32_0 = arith.constant 0 : i32
    %c0_i32_1 = arith.constant 0 : i32
    return %c0_i32, %c0_i32_0, %arg0 : i32, i32, i32
  }
}

</mosaic_0001>

<bundles_post_ra>
// kernel: reverse.1
= control target key start
LH: loop header
LB: loop body
LE: loop exit
PB: predicated region body
PF: predicated region fallthrough
CT: control target
= control target key end

     0   :  { %v72_v3 = vlaneseq  ;;  %v65_v6 = vld [vmem:[#allocation0 + $0x7] ss:$-1 sm:$0xff]  ;;  %v79_v8 = vld [vmem:[#allocation0 + $0x17] ss:$-1 sm:$0xff]  ;;  %s331_s0 = inlined_call_operand.vmem [shape: f32[2,4,16,7], index: 0, kind: input, shape index: {}]   ;;  %s332_s1 = inlined_call_operand.vmem [shape: f32[2,4,16,7], index: 1, kind: output, shape index: {}]  }
   0x1   :  { %v45_v0 = vld [vmem:[%s331_s0] sm:$0xff]  ;;  %v47_v1 = vld [vmem:[%s331_s0 + $0x8] sm:$0xff]  ;;  %v49_v2 = vld [vmem:[%s331_s0 + $0x10] sm:$0xff]  ;;  %v66_v12 = vrot.slane %v65_v6, 1  ;;  %v80_v13 = vrot.slane %v79_v8, 1 }
   0x2   :  { %46 = vst [vmem:[#allocation0 + $0x8] sm:$0xff] %v45_v0  ;;  %v51_v4 = vld [vmem:[%s331_s0 + $0x18] sm:$0xff]  ;;  %v53_v5 = vld [vmem:[%s331_s0 + $0x20] sm:$0xff]  ;;  %v55_v7 = vld [vmem:[%s331_s0 + $0x28] sm:$0xff]  ;;  %v73_v10 = vshrl.u32 %v72_v3, 7 }
   0x3   :  { %48 = vst [vmem:[#allocation0 + $0x18] sm:$0xff] %v47_v1  ;;  %v57_v9 = vld [vmem:[%s331_s0 + $0x30] sm:$0xff]  ;;  %v59_v11 = vld [vmem:[%s331_s0 + $0x38] sm:$0xff]  ;;  %v93_v14 = vld [vmem:[#allocation0 + $0x27] ss:$-1 sm:$0xff] }
   0x4   :  { %50 = vst [vmem:[#allocation0 + $0x28] sm:$0xff] %v49_v2  ;;  %vm74_vm0 = vcmp.lt.s32.totalorder %v73_v10, 7  ;;  %v107_v16 = vld [vmem:[#allocation0 + $0x37] ss:$-1 sm:$0xff]  ;;  %v94_v19 = vrot.slane %v93_v14, 1 }
   0x5   :  { %52 = vst [vmem:[#allocation0 + $0x38] sm:$0xff] %v51_v4  ;;  %v121_v22 = vld [vmem:[#allocation0 + $0x47] ss:$-1 sm:$0xff]  ;;  %v108_v24 = vrot.slane %v107_v16, 1  ;;  %v135_v28 = vld [vmem:[#allocation0 + $0x57] ss:$-1 sm:$0xff] }
   0x6   :  { %54 = vst [vmem:[#allocation0 + $0x48] sm:$0xff] %v53_v5  ;;  %v122_v29 = vrot.slane %v121_v22, 1  ;;  %v149_v32 = vld [vmem:[#allocation0 + $0x67] ss:$-1 sm:$0xff]  ;;  %v136_v33 = vrot.slane %v135_v28, 1 }
   0x7   :  { %56 = vst [vmem:[#allocation0 + $0x58] sm:$0xff] %v55_v7  ;;  %v163_v36 = vld [vmem:[#allocation0 + $0x77] ss:$-1 sm:$0xff]  ;;  %v150_v37 = vrot.slane %v149_v32, 1 }
   0x8   :  { %58 = vst [vmem:[#allocation0 + $0x68] sm:$0xff] %v57_v9  ;;  %v164_v40 = vrot.slane %v163_v36, 1 }
   0x9   :  { %60 = vst [vmem:[#allocation0 + $0x78] sm:$0xff] %v59_v11  ;;  %v70_v15 = vld [vmem:[#allocation0 + $0xf] ss:$-1 sm:$0xff] }
   0xa   :  { %67 = vst [vmem:[#allocation1] sm:$0xff] %v66_v12  ;;  %v71_v17 = vrot.slane %v70_v15, 1  ;;  %v84_v18 = vld [vmem:[#allocation0 + $0x1f] ss:$-1 sm:$0xff] }
   0xb   :  { %81 = vst [vmem:[#allocation1 + $0x8] sm:$0xff] %v80_v13  ;;  %v85_v20 = vrot.slane %v84_v18, 1  ;;  %v98_v21 = vld [vmem:[#allocation0 + $0x2f] ss:$-1 sm:$0xff] }
   0xc   :  { %75 = vst.msk [vmem:[#allocation1] sm:$0xff] %vm74_vm0, %v71_v17  ;;  %v99_v23 = vrot.slane %v98_v21, 1  ;;  %v112_v25 = vld [vmem:[#allocation0 + $0x3f] ss:$-1 sm:$0xff] }
   0xd   :  { %89 = vst.msk [vmem:[#allocation1 + $0x8] sm:$0xff] %vm74_vm0, %v85_v20  ;;  %v113_v26 = vrot.slane %v112_v25, 1  ;;  %v126_v27 = vld [vmem:[#allocation0 + $0x4f] ss:$-1 sm:$0xff] }
   0xe   :  { %95 = vst [vmem:[#allocation1 + $0x10] sm:$0xff] %v94_v19  ;;  %v140_v30 = vld [vmem:[#allocation0 + $0x5f] ss:$-1 sm:$0xff]  ;;  %v127_v31 = vrot.slane %v126_v27, 1 }
   0xf   :  { %103 = vst.msk [vmem:[#allocation1 + $0x10] sm:$0xff] %vm74_vm0, %v99_v23  ;;  %v154_v34 = vld [vmem:[#allocation0 + $0x6f] ss:$-1 sm:$0xff]  ;;  %v141_v35 = vrot.slane %v140_v30, 1 }
  0x10   :  { %109 = vst [vmem:[#allocation1 + $0x18] sm:$0xff] %v108_v24  ;;  %v168_v38 = vld [vmem:[#allocation0 + $0x7f] ss:$-1 sm:$0xff]  ;;  %v155_v39 = vrot.slane %v154_v34, 1 }
  0x11   :  { %117 = vst.msk [vmem:[#allocation1 + $0x18] sm:$0xff] %vm74_vm0, %v113_v26  ;;  %v169_v41 = vrot.slane %v168_v38, 1 }
  0x12   :  { %123 = vst [vmem:[#allocation1 + $0x20] sm:$0xff] %v122_v29 }
  0x13   :  { %131 = vst.msk [vmem:[#allocation1 + $0x20] sm:$0xff] %vm74_vm0, %v127_v31  ;;  %v216_v42 = vld [vmem:[#allocation1] sm:$0xff] }
  0x14   :  { %137 = vst [vmem:[#allocation1 + $0x28] sm:$0xff] %v136_v33  ;;  %v218_v43 = vld [vmem:[#allocation1 + $0x8] sm:$0xff] }
  0x15   :  { %145 = vst.msk [vmem:[#allocation1 + $0x28] sm:$0xff] %vm74_vm0, %v141_v35 }
  0x16   :  { %151 = vst [vmem:[#allocation1 + $0x30] sm:$0xff] %v150_v37  ;;  %v220_v44 = vld [vmem:[#allocation1 + $0x10] sm:$0xff] }
  0x17   :  { %159 = vst.msk [vmem:[#allocation1 + $0x30] sm:$0xff] %vm74_vm0, %v155_v39 }
  0x18   :  { %165 = vst [vmem:[#allocation1 + $0x38] sm:$0xff] %v164_v40  ;;  %v222_v45 = vld [vmem:[#allocation1 + $0x18] sm:$0xff] }
  0x19   :  { %173 = vst.msk [vmem:[#allocation1 + $0x38] sm:$0xff] %vm74_vm0, %v169_v41 }
  0x1a   :  { %217 = vst [vmem:[%s332_s1] sm:$0xff] %v216_v42  ;;  %v224_v46 = vld [vmem:[#allocation1 + $0x20] sm:$0xff] }
  0x1b   :  { %219 = vst [vmem:[%s332_s1 + $0x8] sm:$0xff] %v218_v43 }
  0x1c   :  { %221 = vst [vmem:[%s332_s1 + $0x10] sm:$0xff] %v220_v44  ;;  %v226_v47 = vld [vmem:[#allocation1 + $0x28] sm:$0xff] }
  0x1d   :  { %223 = vst [vmem:[%s332_s1 + $0x18] sm:$0xff] %v222_v45 }
  0x1e   :  { %225 = vst [vmem:[%s332_s1 + $0x20] sm:$0xff] %v224_v46  ;;  %v228_v48 = vld [vmem:[#allocation1 + $0x30] sm:$0xff] }
  0x1f   :  { %227 = vst [vmem:[%s332_s1 + $0x28] sm:$0xff] %v226_v47 }
  0x20   :  { %229 = vst [vmem:[%s332_s1 + $0x30] sm:$0xff] %v228_v48  ;;  %v230_v49 = vld [vmem:[#allocation1 + $0x38] sm:$0xff] }
  0x21   :  { %231 = vst [vmem:[%s332_s1 + $0x38] sm:$0xff] %v230_v49 }

// kernel: fourier_layer_forward.1
= control target key start
LH: loop header
LB: loop body
LE: loop exit
PB: predicated region body
PF: predicated region fallthrough
CT: control target
= control target key end

     0   :  { %10 = vsyncpa [#allocation4], 0  ;;  %s2567_s18 = smov [#allocation3]   ;;  %s5115_s0 = inlined_call_operand.vmem [shape: f32[18], index: 0, kind: input, shape index: {}]   ;;  %s5116_s1 = inlined_call_operand.vmem [shape: f32[11,18,8], index: 1, kind: input, shape index: {}]   ;;  %s5117_s2 = inlined_call_operand.vmem [shape: f32[11,18,8], index: 2, kind: input, shape index: {}]   ;;  %s5118_s3 = inlined_call_operand.vmem [shape: f32[9,16,8], index: 3, kind: output, shape index: {0}]   ;;  %s5119_s4 = inlined_call_operand.vmem [shape: f32[9,16,8], index: 4, kind: output, shape index: {1}]  }
   0x1   :  { %s16_s17 = sshll.u32 %s5115_s0, 4  ;;  %s17_s17 = int_to_ptr.vmem [resolvable:$true] %s16_s17 }
   0x2   :  { %19 = dma.vmem_to_smem %s17_s17, 16, %s2567_s18, [#allocation4]  }
   0x3   :  { %2565 = dma.done.wait [#allocation4], 16  }
   0x4   :  { %2566 = vsyncadd [#allocation4], 4294967280 }
   0x5   :  { %28 = sfence }
   0x6   :  { %vm51_vm0 = vcmask 64512   ;;  %v121_v0 = vld [vmem:[%s5116_s1 + $0x1a] sm:$0xff]  ;;  %v122_v1 = vld [vmem:[%s5116_s1 + $0x22] sm:$0xff]  ;;  %v123_v2 = vld [vmem:[%s5116_s1 + $0x32] sm:$0xff]  ;;  %s2917_s19 = sld [smem:[#allocation3]] }
   0x7   :  { %144 = vst.msk [vmem:[#allocation2 + $0x170] sm:$0xff] %vm51_vm0, %v121_v0  ;;  %v124_v3 = vld [vmem:[%s5116_s1 + $0x3a] sm:$0xff]  ;;  %v125_v4 = vld [vmem:[%s5116_s1 + $0x4a] sm:$0xff]  ;;  %v126_v5 = vld [vmem:[%s5116_s1 + $0x52] sm:$0xff]  ;;  %s2923_s22 = sld [smem:[#allocation3 + $0x1]] }
   0x8   :  { %145 = vst.msk [vmem:[#allocation2 + $0x178] sm:$0xff] %vm51_vm0, %v122_v1  ;;  %v127_v6 = vld [vmem:[%s5116_s1 + $0x62] sm:$0xff]  ;;  %v128_v7 = vld [vmem:[%s5116_s1 + $0x6a] sm:$0xff]  ;;  %v129_v8 = vld [vmem:[%s5116_s1 + $0x7a] sm:$0xff]  ;;  %s2929_s0 = sld [smem:[#allocation3 + $0x2]] }
   0x9   :  { %146 = vst.msk [vmem:[#allocation2 + $0x180] sm:$0xff] %vm51_vm0, %v123_v2  ;;  %v130_v9 = vld [vmem:[%s5116_s1 + $0x82] sm:$0xff]  ;;  %v131_v10 = vld [vmem:[%s5116_s1 + $0x92] sm:$0xff]  ;;  %v132_v11 = vld [vmem:[%s5116_s1 + $0x9a] sm:$0xff]  ;;  %s2935_s27 = sld [smem:[#allocation3 + $0x3]] }
   0xa   :  { %147 = vst.msk [vmem:[#allocation2 + $0x188] sm:$0xff] %vm51_vm0, %v124_v3  ;;  %v133_v12 = vld [vmem:[%s5116_s1 + $0xaa] sm:$0xff]  ;;  %v134_v13 = vld [vmem:[%s5116_s1 + $0xb2] sm:$0xff]  ;;  %v135_v14 = vld [vmem:[%s5116_s1 + $0xc2] sm:$0xff]  ;;  %s2941_s30 = sld [smem:[#allocation3 + $0x4]] }
   0xb   :  { %148 = vst.msk [vmem:[#allocation2 + $0x190] sm:$0xff] %vm51_vm0, %v125_v4  ;;  %v136_v15 = vld [vmem:[%s5116_s1 + $0xca] sm:$0xff]  ;;  %v137_v16 = vld [vmem:[%s5116_s1 + $0xda] sm:$0xff]  ;;  %v138_v17 = vld [vmem:[%s5116_s1 + $0xe2] sm:$0xff]  ;;  %s2947_s7 = sld [smem:[#allocation3 + $0x5]] }
   0xc   :  { %149 = vst.msk [vmem:[#allocation2 + $0x198] sm:$0xff] %vm51_vm0, %v126_v5  ;;  %v139_v18 = vld [vmem:[%s5116_s1 + $0xf2] sm:$0xff]  ;;  %v140_v19 = vld [vmem:[%s5116_s1 + $0xfa] sm:$0xff]  ;;  %v257_v21 = vld [vmem:[%s5117_s2 + $0x22] sm:$0xff]  ;;  %s2953_s10 = sld [smem:[#allocation3 + $0x6]] }
   0xd   :  { %150 = vst.msk [vmem:[#allocation2 + $0x1a0] sm:$0xff] %vm51_vm0, %v127_v6  ;;  %v256_v20 = vld [vmem:[%s5117_s2 + $0x1a] sm:$0xff]  ;;  %v258_v22 = vld [vmem:[%s5117_s2 + $0x32] sm:$0xff]  ;;  %v260_v24 = vld [vmem:[%s5117_s2 + $0x4a] sm:$0xff]  ;;  %s2959_s13 = sld [smem:[#allocation3 + $0x7]] }
   0xe   :  { %151 = vst.msk [vmem:[#allocation2 + $0x1a8] sm:$0xff] %vm51_vm0, %v128_v7  ;;  %v259_v23 = vld [vmem:[%s5117_s2 + $0x3a] sm:$0xff]  ;;  %v261_v25 = vld [vmem:[%s5117_s2 + $0x52] sm:$0xff]  ;;  %v262_v26 = vld [vmem:[%s5117_s2 + $0x62] sm:$0xff]  ;;  %s2965_s16 = sld [smem:[#allocation3 + $0x8]] }
   0xf   :  { %152 = vst.msk [vmem:[#allocation2 + $0x1b0] sm:$0xff] %vm51_vm0, %v129_v8  ;;  %v263_v27 = vld [vmem:[%s5117_s2 + $0x6a] sm:$0xff]  ;;  %v264_v28 = vld [vmem:[%s5117_s2 + $0x7a] sm:$0xff]  ;;  %v265_v29 = vld [vmem:[%s5117_s2 + $0x82] sm:$0xff]  ;;  %s2971_s20 = sld [smem:[#allocation3 + $0x9]] }
  0x10   :  { %153 = vst.msk [vmem:[#allocation2 + $0x1b8] sm:$0xff] %vm51_vm0, %v130_v9  ;;  %v266_v30 = vld [vmem:[%s5117_s2 + $0x92] sm:$0xff]  ;;  %v267_v31 = vld [vmem:[%s5117_s2 + $0x9a] sm:$0xff]  ;;  %v268_v32 = vld [vmem:[%s5117_s2 + $0xaa] sm:$0xff]  ;;  %s2977_s24 = sld [smem:[#allocation3 + $0xa]] }
  0x11   :  { %154 = vst.msk [vmem:[#allocation2 + $0x1c0] sm:$0xff] %vm51_vm0, %v131_v10  ;;  %v269_v33 = vld [vmem:[%s5117_s2 + $0xb2] sm:$0xff]  ;;  %v270_v34 = vld [vmem:[%s5117_s2 + $0xc2] sm:$0xff]  ;;  %v271_v35 = vld [vmem:[%s5117_s2 + $0xca] sm:$0xff]  ;;  %s2983_s28 = sld [smem:[#allocation3 + $0xb]] }
  0x12   :  { %155 = vst.msk [vmem:[#allocation2 + $0x1c8] sm:$0xff] %vm51_vm0, %v132_v11  ;;  %v272_v36 = vld [vmem:[%s5117_s2 + $0xda] sm:$0xff]  ;;  %v273_v37 = vld [vmem:[%s5117_s2 + $0xe2] sm:$0xff]  ;;  %v274_v38 = vld [vmem:[%s5117_s2 + $0xf2] sm:$0xff]  ;;  %s2989_s6 = sld [smem:[#allocation3 + $0xc]] }
  0x13   :  { %156 = vst.msk [vmem:[#allocation2 + $0x1d0] sm:$0xff] %vm51_vm0, %v133_v12  ;;  %v275_v39 = vld [vmem:[%s5117_s2 + $0xfa] sm:$0xff]  ;;  %v119_v40 = vld [vmem:[%s5116_s1 + $0x2] sm:$0xff]  ;;  %v120_v41 = vld [vmem:[%s5116_s1 + $0xa] sm:$0xff]  ;;  %s2995_s11 = sld [smem:[#allocation3 + $0xd]] }
  0x14   :  { %157 = vst.msk [vmem:[#allocation2 + $0x1d8] sm:$0xff] %vm51_vm0, %v134_v13  ;;  %v254_v42 = vld [vmem:[%s5117_s2 + $0x2] sm:$0xff]  ;;  %v255_v43 = vld [vmem:[%s5117_s2 + $0xa] sm:$0xff]  ;;  %v79_v45 = vld [vmem:[%s5116_s1 + $0x39] sm:$0xff]  ;;  %s3001_s15 = sld [smem:[#allocation3 + $0xe]] }
  0x15   :  { %158 = vst.msk [vmem:[#allocation2 + $0x1e0] sm:$0xff] %vm51_vm0, %v135_v14  ;;  %v78_v44 = vld [vmem:[%s5116_s1 + $0x31] sm:$0xff]  ;;  %v80_v46 = vld [vmem:[%s5116_s1 + $0x49] sm:$0xff]  ;;  %v82_v48 = vld [vmem:[%s5116_s1 + $0x61] sm:$0xff]  ;;  %s3018_s25 = sld [smem:[#allocation3 + $0xf]] }
  0x16   :  { %159 = vst.msk [vmem:[#allocation2 + $0x1e8] sm:$0xff] %vm51_vm0, %v136_v15  ;;  %v81_v47 = vld [vmem:[%s5116_s1 + $0x51] sm:$0xff]  ;;  %v83_v49 = vld [vmem:[%s5116_s1 + $0x69] sm:$0xff]  ;;  %v84_v50 = vld [vmem:[%s5116_s1 + $0x79] sm:$0xff]  ;;  %s3781_s5 = sld [smem:[#allocation3 + $0x1]] }
  0x17   :  { %160 = vst.msk [vmem:[#allocation2 + $0x1f0] sm:$0xff] %vm51_vm0, %v137_v16  ;;  %v85_v51 = vld [vmem:[%s5116_s1 + $0x81] sm:$0xff]  ;;  %v86_v52 = vld [vmem:[%s5116_s1 + $0x91] sm:$0xff]  ;;  %v87_v53 = vld [vmem:[%s5116_s1 + $0x99] sm:$0xff]  ;;  %s3785_s8 = sld [smem:[#allocation3 + $0x2]] }
  0x18   :  { %161 = vst.msk [vmem:[#allocation2 + $0x1f8] sm:$0xff] %vm51_vm0, %v138_v17  ;;  %v88_v54 = vld [vmem:[%s5116_s1 + $0xa9] sm:$0xff]  ;;  %v89_v55 = vld [vmem:[%s5116_s1 + $0xb1] sm:$0xff]  ;;  %v90_v56 = vld [vmem:[%s5116_s1 + $0xc1] sm:$0xff]  ;;  %s3793_s9 = sld [smem:[#allocation3 + $0x3]] }
  0x19   :  { %162 = vst.msk [vmem:[#allocation2 + $0x200] sm:$0xff] %vm51_vm0, %v139_v18  ;;  %v91_v57 = vld [vmem:[%s5116_s1 + $0xc9] sm:$0xff]  ;;  %v92_v58 = vld [vmem:[%s5116_s1 + $0xd9] sm:$0xff]  ;;  %v93_v59 = vld [vmem:[%s5116_s1 + $0xe1] sm:$0xff]  ;;  %s3797_s12 = sld [smem:[#allocation3 + $0x4]] }
  0x1a   :  { %163 = vst.msk [vmem:[#allocation2 + $0x208] sm:$0xff] %vm51_vm0, %v140_v19  ;;  %v94_v60 = vld [vmem:[%s5116_s1 + $0xf1] sm:$0xff]  ;;  %v95_v61 = vld [vmem:[%s5116_s1 + $0xf9] sm:$0xff]  ;;  %v215_v0 = vld [vmem:[%s5117_s2 + $0x49] sm:$0xff]  ;;  %s3805_s14 = sld [smem:[#allocation3 + $0x5]] }
  0x1b   :  { %279 = vst.msk [vmem:[#allocation2 + $0x380] sm:$0xff] %vm51_vm0, %v256_v20  ;;  %v213_v62 = vld [vmem:[%s5117_s2 + $0x31] sm:$0xff]  ;;  %v214_v63 = vld [vmem:[%s5117_s2 + $0x39] sm:$0xff]  ;;  %v217_v2 = vld [vmem:[%s5117_s2 + $0x61] sm:$0xff]  ;;  %s3808_s17 = sld [smem:[#allocation3 + $0x6]] }
  0x1c   :  { %280 = vst.msk [vmem:[#allocation2 + $0x388] sm:$0xff] %vm51_vm0, %v257_v21  ;;  %v216_v1 = vld [vmem:[%s5117_s2 + $0x51] sm:$0xff]  ;;  %v218_v3 = vld [vmem:[%s5117_s2 + $0x69] sm:$0xff]  ;;  %v219_v4 = vld [vmem:[%s5117_s2 + $0x79] sm:$0xff]  ;;  %s3840_s18 = sld [smem:[#allocation3 + $0xa]] }
  0x1d   :  { %281 = vst.msk [vmem:[#allocation2 + $0x390] sm:$0xff] %vm51_vm0, %v258_v22  ;;  %v220_v5 = vld [vmem:[%s5117_s2 + $0x81] sm:$0xff]  ;;  %v221_v6 = vld [vmem:[%s5117_s2 + $0x91] sm:$0xff]  ;;  %v222_v7 = vld [vmem:[%s5117_s2 + $0x99] sm:$0xff]  ;;  %s3896_s23 = sld [smem:[#allocation3 + $0x10]] }
  0x1e   :  { %282 = vst.msk [vmem:[#allocation2 + $0x398] sm:$0xff] %vm51_vm0, %v259_v23  ;;  %v223_v8 = vld [vmem:[%s5117_s2 + $0xa9] sm:$0xff]  ;;  %v224_v9 = vld [vmem:[%s5117_s2 + $0xb1] sm:$0xff]  ;;  %v225_v10 = vld [vmem:[%s5117_s2 + $0xc1] sm:$0xff]  ;;  %s4447_s21 = sld [smem:[#allocation3 + $0x6]] }
  0x1f   :  { %283 = vst.msk [vmem:[#allocation2 + $0x3a0] sm:$0xff] %vm51_vm0, %v260_v24  ;;  %v226_v11 = vld [vmem:[%s5117_s2 + $0xc9] sm:$0xff]  ;;  %v227_v12 = vld [vmem:[%s5117_s2 + $0xd9] sm:$0xff]  ;;  %v228_v13 = vld [vmem:[%s5117_s2 + $0xe1] sm:$0xff]  ;;  %s4467_s29 = sld [smem:[#allocation3 + $0x8]] }
  0x20   :  { %284 = vst.msk [vmem:[#allocation2 + $0x3a8] sm:$0xff] %vm51_vm0, %v261_v25  ;;  %v229_v14 = vld [vmem:[%s5117_s2 + $0xf1] sm:$0xff]  ;;  %v230_v15 = vld [vmem:[%s5117_s2 + $0xf9] sm:$0xff]  ;;  %v77_v17 = vld [vmem:[%s5116_s1 + $0x21] sm:$0xff] }
  0x21   :  { %285 = vst.msk [vmem:[#allocation2 + $0x3b0] sm:$0xff] %vm51_vm0, %v262_v26  ;;  %v76_v16 = vld [vmem:[%s5116_s1 + $0x19] sm:$0xff]  ;;  %v212_v19 = vld [vmem:[%s5117_s2 + $0x21] sm:$0xff]  ;;  %v75_v21 = vld [vmem:[%s5116_s1 + $0x9] sm:$0xff] }
  0x22   :  { %286 = vst.msk [vmem:[#allocation2 + $0x3b8] sm:$0xff] %vm51_vm0, %v263_v27  ;;  %v211_v18 = vld [vmem:[%s5117_s2 + $0x19] sm:$0xff]  ;;  %v74_v20 = vld [vmem:[%s5116_s1 + $0x1] sm:$0xff]  ;;  %v210_v23 = vld [vmem:[%s5117_s2 + $0x9] sm:$0xff] }
  0x23   :  { %287 = vst.msk [vmem:[#allocation2 + $0x3c0] sm:$0xff] %vm51_vm0, %v264_v28  ;;  %v209_v22 = vld [vmem:[%s5117_s2 + $0x1] sm:$0xff]  ;;  %v33_v24 = vld [vmem:[%s5116_s1 + $0x30] sm:$0xff]  ;;  %v34_v25 = vld [vmem:[%s5116_s1 + $0x38] sm:$0xff] }
  0x24   :  { %288 = vst.msk [vmem:[#allocation2 + $0x3c8] sm:$0xff] %vm51_vm0, %v265_v29  ;;  %v35_v26 = vld [vmem:[%s5116_s1 + $0x48] sm:$0xff]  ;;  %v36_v27 = vld [vmem:[%s5116_s1 + $0x50] sm:$0xff]  ;;  %v37_v28 = vld [vmem:[%s5116_s1 + $0x60] sm:$0xff] }
  0x25   :  { %289 = vst.msk [vmem:[#allocation2 + $0x3d0] sm:$0xff] %vm51_vm0, %v266_v30  ;;  %v38_v29 = vld [vmem:[%s5116_s1 + $0x68] sm:$0xff]  ;;  %v39_v30 = vld [vmem:[%s5116_s1 + $0x78] sm:$0xff] }
  0x26   :  { %290 = vst.msk [vmem:[#allocation2 + $0x3d8] sm:$0xff] %vm51_vm0, %v267_v31  ;;  %v40_v31 = vld [vmem:[%s5116_s1 + $0x80] sm:$0xff] }
  0x27   :  { %291 = vst.msk [vmem:[#allocation2 + $0x3e0] sm:$0xff] %vm51_vm0, %v268_v32  ;;  %v41_v32 = vld [vmem:[%s5116_s1 + $0x90] sm:$0xff] }
  0x28   :  { %292 = vst.msk [vmem:[#allocation2 + $0x3e8] sm:$0xff] %vm51_vm0, %v269_v33  ;;  %v3010_v33 = vld [vmem:[#allocation2 + $0x180] sm:$0xff] }
  0x29   :  { %293 = vst.msk [vmem:[#allocation2 + $0x3f0] sm:$0xff] %vm51_vm0, %v270_v34  ;;  %v3013_v34 = vstv %s2917_s19  ;;  %s3039_s19 = sld [smem:[#allocation3 + $0x10]] }
  0x2a   :  { %294 = vst.msk [vmem:[#allocation2 + $0x3f8] sm:$0xff] %vm51_vm0, %v271_v35  ;;  %v3016_v35 = vstv %s2923_s22  ;;  %s3055_s22 = sld [smem:[#allocation3 + $0x11]] }
  0x2b   :  { %295 = vst.msk [vmem:[#allocation2 + $0x400] sm:$0xff] %vm51_vm0, %v272_v36  ;;  %v42_v36 = vld [vmem:[%s5116_s1 + $0x98] sm:$0xff] }
  0x2c   :  { %296 = vst.msk [vmem:[#allocation2 + $0x408] sm:$0xff] %vm51_vm0, %v273_v37  ;;  %v3024_v37 = vld [vmem:[#allocation2 + $0x390] sm:$0xff] }
  0x2d   :  { %297 = vst.msk [vmem:[#allocation2 + $0x410] sm:$0xff] %vm51_vm0, %v274_v38  ;;  %v308_v38 = vmul.f32 %v3013_v34, %v3010_v33 }
  0x2e   :  { %298 = vst.msk [vmem:[#allocation2 + $0x418] sm:$0xff] %vm51_vm0, %v275_v39  ;;  %v3028_v39 = vld [vmem:[#allocation2 + $0x170] sm:$0xff] }
  0x2f   :  { %142 = vst.msk [vmem:[#allocation2 + $0x160] sm:$0xff] %vm51_vm0, %v119_v40  ;;  %v3031_v40 = vstv %s2929_s0  ;;  %s4487_s0 = sld [smem:[#allocation3 + $0xb]] }
  0x30   :  { %143 = vst.msk [vmem:[#allocation2 + $0x168] sm:$0xff] %vm51_vm0, %v120_v41  ;;  %v3034_v41 = vstv %s2935_s27  ;;  %s4493_s27 = sld [smem:[#allocation3 + $0xc]] }
  0x31   :  { %277 = vst.msk [vmem:[#allocation2 + $0x370] sm:$0xff] %vm51_vm0, %v254_v42  ;;  %v3037_v42 = vstv %s2941_s30  ;;  %s4501_s30 = sld [smem:[#allocation3 + $0xd]] }
  0x32   :  { %278 = vst.msk [vmem:[#allocation2 + $0x378] sm:$0xff] %vm51_vm0, %v255_v43  ;;  %v311_v43 = vmul.f32 %v3016_v35, %v3024_v37 }
  0x33   :  { %101 = vst.msk [vmem:[#allocation2 + $0xd0] sm:$0xff] %vm51_vm0, %v78_v44  ;;  %v3044_v44 = vld [vmem:[#allocation2 + $0x380] sm:$0xff] }
  0x34   :  { %102 = vst.msk [vmem:[#allocation2 + $0xd8] sm:$0xff] %vm51_vm0, %v79_v45  ;;  %v334_v45 = vmul.f32 %v3031_v40, %v3028_v39 }
  0x35   :  { %103 = vst.msk [vmem:[#allocation2 + $0xe0] sm:$0xff] %vm51_vm0, %v80_v46 }
  0x36   :  { %104 = vst.msk [vmem:[#allocation2 + $0xe8] sm:$0xff] %vm51_vm0, %v81_v47  ;;  %v3048_v46 = vld [vmem:[#allocation2 + $0x160] sm:$0xff] }
  0x37   :  { %105 = vst.msk [vmem:[#allocation2 + $0xf0] sm:$0xff] %vm51_vm0, %v82_v48  ;;  %v3053_v48 = vstv %s2947_s7  ;;  %s3773_s7 = sld [smem:[#allocation3]] }
  0x38   :  { %106 = vst.msk [vmem:[#allocation2 + $0xf8] sm:$0xff] %vm51_vm0, %v83_v49  ;;  %v3050_v47 = vld [vmem:[#allocation2 + $0x370] sm:$0xff]  ;;  %v3059_v49 = vmul.f32 %v3013_v34, %v3024_v37 }
  0x39   :  { %107 = vst.msk [vmem:[#allocation2 + $0x100] sm:$0xff] %vm51_vm0, %v84_v50  ;;  %v43_v50 = vld [vmem:[%s5116_s1 + $0xa8] sm:$0xff] }
  0x3a   :  { %108 = vst.msk [vmem:[#allocation2 + $0x108] sm:$0xff] %vm51_vm0, %v85_v51  ;;  %v337_v51 = vmul.f32 %v3034_v41, %v3044_v44 }
  0x3b   :  { %109 = vst.msk [vmem:[#allocation2 + $0x110] sm:$0xff] %vm51_vm0, %v86_v52  ;;  %v358_v52 = vmul.f32 %v3037_v42, %v3048_v46 }
  0x3c   :  { %110 = vst.msk [vmem:[#allocation2 + $0x118] sm:$0xff] %vm51_vm0, %v87_v53  ;;  %v361_v53 = vmul.f32 %v3053_v48, %v3050_v47 }
  0x3d   :  { %111 = vst.msk [vmem:[#allocation2 + $0x120] sm:$0xff] %vm51_vm0, %v88_v54  ;;  %v3071_v54 = vld [vmem:[#allocation2 + $0x188] sm:$0xff] }
  0x3e   :  { %112 = vst.msk [vmem:[#allocation2 + $0x128] sm:$0xff] %vm51_vm0, %v89_v55  ;;  %v3075_v55 = vmul.f32 %v3016_v35, %v3010_v33 }
  0x3f   :  { %113 = vst.msk [vmem:[#allocation2 + $0x130] sm:$0xff] %vm51_vm0, %v90_v56  ;;  %v44_v56 = vld [vmem:[%s5116_s1 + $0xb0] sm:$0xff] }
  0x40   :  { %114 = vst.msk [vmem:[#allocation2 + $0x138] sm:$0xff] %vm51_vm0, %v91_v57  ;;  %v45_v57 = vld [vmem:[%s5116_s1 + $0xc0] sm:$0xff] }
  0x41   :  { %115 = vst.msk [vmem:[#allocation2 + $0x140] sm:$0xff] %vm51_vm0, %v92_v58  ;;  %v313_v58 = vsub.f32 %v308_v38, %v311_v43  ;;  %v3172_v38 = vld [vmem:[#allocation2 + $0xd8] sm:$0xff] }
  0x42   :  { %116 = vst.msk [vmem:[#allocation2 + $0x148] sm:$0xff] %vm51_vm0, %v93_v59  ;;  %v3084_v59 = vld [vmem:[#allocation2 + $0xd0] sm:$0xff] }
  0x43   :  { %117 = vst.msk [vmem:[#allocation2 + $0x150] sm:$0xff] %vm51_vm0, %v94_v60  ;;  %v3087_v60 = vstv %s2953_s10  ;;  %s3816_s10 = sld [smem:[#allocation3 + $0x7]] }
  0x44   :  { %118 = vst.msk [vmem:[#allocation2 + $0x158] sm:$0xff] %vm51_vm0, %v95_v61  ;;  %v3090_v61 = vstv %s2959_s13 }
  0x45   :  { %236 = vst.msk [vmem:[#allocation2 + $0x2e0] sm:$0xff] %vm51_vm0, %v213_v62  ;;  %v3094_v62 = vmul.f32 %v3013_v34, %v3071_v54 }
  0x46   :  { %237 = vst.msk [vmem:[#allocation2 + $0x2e8] sm:$0xff] %vm51_vm0, %v214_v63  ;;  %v46_v63 = vld [vmem:[%s5116_s1 + $0xc8] sm:$0xff] }
  0x47   :  { %238 = vst.msk [vmem:[#allocation2 + $0x2f0] sm:$0xff] %vm51_vm0, %v215_v0  ;;  %v47_v0 = vld [vmem:[%s5116_s1 + $0xd8] sm:$0xff] }
  0x48   :  { %239 = vst.msk [vmem:[#allocation2 + $0x2f8] sm:$0xff] %vm51_vm0, %v216_v1  ;;  %v339_v1 = vsub.f32 %v334_v45, %v337_v51  ;;  %v50_v45 = vld [vmem:[%s5116_s1 + $0xf8] sm:$0xff]  ;;  %v3181_v51 = vstv %s3018_s25  ;;  %s3906_s25 = sld [smem:[#allocation3 + $0x11]] }
  0x49   :  { %240 = vst.msk [vmem:[#allocation2 + $0x300] sm:$0xff] %vm51_vm0, %v217_v2  ;;  %v363_v2 = vsub.f32 %v358_v52, %v361_v53  ;;  %v3184_v52 = vstv %s3039_s19  ;;  %v3187_v53 = vstv %s3055_s22  ;;  %s4471_s19 = sld [smem:[#allocation3 + $0x9]] }
  0x4a   :  { %241 = vst.msk [vmem:[#allocation2 + $0x308] sm:$0xff] %vm51_vm0, %v218_v3  ;;  %s4477_s22 = sld [smem:[#allocation3 + $0xa]] }
  0x4b   :  { %242 = vst.msk [vmem:[#allocation2 + $0x310] sm:$0xff] %vm51_vm0, %v219_v4  ;;  %v384_v4 = vmul.f32 %v3087_v60, %v3084_v59 }
  0x4c   :  { %243 = vst.msk [vmem:[#allocation2 + $0x318] sm:$0xff] %vm51_vm0, %v220_v5  ;;  %v3103_v3 = vld [vmem:[#allocation2 + $0x2e0] sm:$0xff]  ;;  %v3108_v5 = vstv %s2965_s16  ;;  %s3826_s16 = sld [smem:[#allocation3 + $0x8]] }
  0x4d   :  { %244 = vst.msk [vmem:[#allocation2 + $0x320] sm:$0xff] %vm51_vm0, %v221_v6  ;;  %v48_v6 = vld [vmem:[%s5116_s1 + $0xe0] sm:$0xff]  ;;  %v3174_v43 = vld [vmem:[#allocation2 + $0x2e8] sm:$0xff] }
  0x4e   :  { %245 = vst.msk [vmem:[#allocation2 + $0x328] sm:$0xff] %vm51_vm0, %v222_v7  ;;  %v387_v7 = vmul.f32 %v3090_v61, %v3103_v3 }
  0x4f   :  { %246 = vst.msk [vmem:[#allocation2 + $0x330] sm:$0xff] %vm51_vm0, %v223_v8 }
  0x50   :  { %247 = vst.msk [vmem:[#allocation2 + $0x338] sm:$0xff] %vm51_vm0, %v224_v9 }
  0x51   :  { %248 = vst.msk [vmem:[#allocation2 + $0x340] sm:$0xff] %vm51_vm0, %v225_v10  ;;  %v3121_v10 = vstv %s2971_s20  ;;  %s3848_s20 = sld [smem:[#allocation3 + $0xb]] }
  0x52   :  { %249 = vst.msk [vmem:[#allocation2 + $0x348] sm:$0xff] %vm51_vm0, %v226_v11  ;;  %v3124_v11 = vstv %s2977_s24  ;;  %s3855_s24 = sld [smem:[#allocation3 + $0xc]] }
  0x53   :  { %250 = vst.msk [vmem:[#allocation2 + $0x350] sm:$0xff] %vm51_vm0, %v227_v12  ;;  %v3127_v12 = vstv %s2983_s28  ;;  %s3862_s28 = sld [smem:[#allocation3 + $0xd]] }
  0x54   :  { %251 = vst.msk [vmem:[#allocation2 + $0x358] sm:$0xff] %vm51_vm0, %v228_v13  ;;  %v3129_v13 = vld [vmem:[#allocation2 + $0x398] sm:$0xff] }
  0x55   :  { %252 = vst.msk [vmem:[#allocation2 + $0x360] sm:$0xff] %vm51_vm0, %v229_v14  ;;  %v49_v14 = vld [vmem:[%s5116_s1 + $0xf0] sm:$0xff] }
  0x56   :  { %253 = vst.msk [vmem:[#allocation2 + $0x368] sm:$0xff] %vm51_vm0, %v230_v15  ;;  %v341_v15 = vadd.f32 %v339_v1, %v313_v58 }
  0x57   :  { %99 = vst.msk [vmem:[#allocation2 + $0xc0] sm:$0xff] %vm51_vm0, %v76_v16 }
  0x58   :  { %100 = vst.msk [vmem:[#allocation2 + $0xc8] sm:$0xff] %vm51_vm0, %v77_v17 }
  0x59   :  { %234 = vst.msk [vmem:[#allocation2 + $0x2d0] sm:$0xff] %vm51_vm0, %v211_v18 }
  0x5a   :  { %235 = vst.msk [vmem:[#allocation2 + $0x2d8] sm:$0xff] %vm51_vm0, %v212_v19 }
  0x5b   :  { %97 = vst.msk [vmem:[#allocation2 + $0xb0] sm:$0xff] %vm51_vm0, %v74_v20 }
  0x5c   :  { %98 = vst.msk [vmem:[#allocation2 + $0xb8] sm:$0xff] %vm51_vm0, %v75_v21  ;;  %v3146_v21 = vstv %s2989_s6  ;;  %s3869_s6 = sld [smem:[#allocation3 + $0xe]] }
  0x5d   :  { %232 = vst.msk [vmem:[#allocation2 + $0x2c0] sm:$0xff] %vm51_vm0, %v209_v22  ;;  %v389_v22 = vsub.f32 %v384_v4, %v387_v7 }
  0x5e   :  { %233 = vst.msk [vmem:[#allocation2 + $0x2c8] sm:$0xff] %vm51_vm0, %v210_v23  ;;  %v3116_v8 = vld [vmem:[#allocation2 + $0xc0] sm:$0xff] }
  0x5f   :  { %56 = vst.msk [vmem:[#allocation2 + $0x20] sm:$0xff] %vm51_vm0, %v33_v24  ;;  %v410_v16 = vmul.f32 %v3108_v5, %v3116_v8 }
  0x60   :  { %57 = vst.msk [vmem:[#allocation2 + $0x28] sm:$0xff] %vm51_vm0, %v34_v25  ;;  %v3118_v9 = vld [vmem:[#allocation2 + $0x2d0] sm:$0xff] }
  0x61   :  { %58 = vst.msk [vmem:[#allocation2 + $0x30] sm:$0xff] %vm51_vm0, %v35_v26  ;;  %v413_v17 = vmul.f32 %v3121_v10, %v3118_v9  ;;  %v3157_v26 = vld [vmem:[#allocation2 + $0x178] sm:$0xff] }
  0x62   :  { %59 = vst.msk [vmem:[#allocation2 + $0x38] sm:$0xff] %vm51_vm0, %v36_v27  ;;  %v3139_v18 = vld [vmem:[#allocation2 + $0xb0] sm:$0xff]  ;;  %v3159_v27 = vld [vmem:[#allocation2 + $0x388] sm:$0xff] }
  0x63   :  { %60 = vst.msk [vmem:[#allocation2 + $0x40] sm:$0xff] %vm51_vm0, %v37_v28  ;;  %v434_v23 = vmul.f32 %v3124_v11, %v3139_v18  ;;  %v3161_v28 = vld [vmem:[#allocation2 + $0x168] sm:$0xff]  ;;  %v338_v1 = vmul.f32 %v3034_v41, %v3159_v27  ;;  %v3203_v4 = vld [vmem:[#allocation2 + $0xb8] sm:$0xff] }
  0x64   :  { %61 = vst.msk [vmem:[#allocation2 + $0x48] sm:$0xff] %vm51_vm0, %v38_v29  ;;  %v3141_v19 = vld [vmem:[#allocation2 + $0x2c0] sm:$0xff]  ;;  %v365_v29 = vadd.f32 %v363_v2, %v341_v15  ;;  %v3201_v2 = vld [vmem:[#allocation2 + $0x2d8] sm:$0xff]  ;;  %v359_v7 = vmul.f32 %v3037_v42, %v3161_v28 }
  0x65   :  { %5325 = vst [vmem:[#allocation6_spill] sm:$0xff] %v3024_v37  ;;  %v437_v24 = vmul.f32 %v3127_v12, %v3141_v19 }
  0x66   :  { %5326 = vst [vmem:[#allocation7_spill] sm:$0xff] %v3028_v39  ;;  %v3143_v20 = vld [vmem:[#allocation2 + $0x20] sm:$0xff]  ;;  %v391_v58 = vadd.f32 %v389_v22, %v365_v29  ;;  %v3217_v22 = vld [vmem:[#allocation2 + $0x2c8] sm:$0xff] }
  0x67   :  { %5327 = vst [vmem:[#allocation8_spill] sm:$0xff] %v3034_v41  ;;  %v3155_v25 = vmul.f32 %v3146_v21, %v3143_v20 }
  0x68   :  { %5328 = vst [vmem:[#allocation9_spill] sm:$0xff] %v3037_v42 }
  0x69   :  { %62 = vst.msk [vmem:[#allocation2 + $0x50] sm:$0xff] %vm51_vm0, %v39_v30  ;;  %v415_v30 = vsub.f32 %v410_v16, %v413_v17  ;;  %v385_v16 = vmul.f32 %v3087_v60, %v3172_v38  ;;  %v388_v17 = vmul.f32 %v3090_v61, %v3174_v43 }
  0x6a   :  { %5329 = vst [vmem:[#allocation10_spill] sm:$0xff] %v3044_v44 }
  0x6b   :  { %5330 = vst [vmem:[#allocation11_spill] sm:$0xff] %v3053_v48  ;;  %v390_v37 = vsub.f32 %v385_v16, %v388_v17 }
  0x6c   :  { %63 = vst.msk [vmem:[#allocation2 + $0x58] sm:$0xff] %vm51_vm0, %v40_v31  ;;  %v3165_v31 = vstv %s2995_s11  ;;  %s3883_s11 = sld [smem:[#allocation3 + $0xf]] }
  0x6d   :  { %5331 = vst [vmem:[#allocation12_spill] sm:$0xff] %v3071_v54 }
  0x6e   :  { %64 = vst.msk [vmem:[#allocation2 + $0x60] sm:$0xff] %vm51_vm0, %v41_v32  ;;  %v3168_v32 = vstv %s3001_s15  ;;  %s4441_s15 = sld [smem:[#allocation3 + $0x5]] }
  0x6f   :  { %5332 = vst [vmem:[#allocation13_spill] sm:$0xff] %v3084_v59 }
  0x70   :  { %65 = vst.msk [vmem:[#allocation2 + $0x68] sm:$0xff] %vm51_vm0, %v42_v36  ;;  %v3170_v36 = vld [vmem:[#allocation2 + $0x378] sm:$0xff] }
  0x71   :  { %5333 = vst [vmem:[#allocation14_spill] sm:$0xff] %v3103_v3  ;;  %v362_v15 = vmul.f32 %v3053_v48, %v3170_v36 }
  0x72   :  { %66 = vst.msk [vmem:[#allocation2 + $0x70] sm:$0xff] %vm51_vm0, %v43_v50  ;;  %v439_v50 = vsub.f32 %v434_v23, %v437_v24  ;;  %v3219_v23 = vld [vmem:[#allocation2 + $0x28] sm:$0xff]  ;;  %v417_v24 = vadd.f32 %v415_v30, %v391_v58  ;;  %v435_v30 = vmul.f32 %v3124_v11, %v3203_v4 }
  0x73   :  { %5334 = vst [vmem:[#allocation15_spill] sm:$0xff] %v3116_v8 }
  0x74   :  { %5335 = vst [vmem:[#allocation16_spill] sm:$0xff] %v3118_v9  ;;  %v3240_v58 = vadd.f32 %v439_v50, %v417_v24  ;;  %v343_v50 = vmul.f32 %v3031_v40, %v3044_v44  ;;  %v419_v24 = vmul.f32 %v3108_v5, %v3118_v9 }
  0x75   :  { %5336 = vst [vmem:[#allocation17_spill] sm:$0xff] %v3129_v13 }
  0x76   :  { %67 = vst.msk [vmem:[#allocation2 + $0x78] sm:$0xff] %vm51_vm0, %v44_v56  ;;  %v3189_v56 = vld [vmem:[#allocation2 + $0xc8] sm:$0xff] }
  0x77   :  { %5337 = vst [vmem:[#allocation18_spill] sm:$0xff] %v3143_v20 }
  0x78   :  { %68 = vst.msk [vmem:[#allocation2 + $0x80] sm:$0xff] %vm51_vm0, %v45_v57  ;;  %v168_v57 = vld [vmem:[%s5117_s2 + $0x30] sm:$0xff] }
  0x79   :  { %5338 = vst [vmem:[#allocation19_spill] sm:$0xff] %v3157_v26 }
  0x7a   :  { %5339 = vst [vmem:[#allocation20_spill] sm:$0xff] %v3159_v27 }
  0x7b   :  { %69 = vst.msk [vmem:[#allocation2 + $0x88] sm:$0xff] %vm51_vm0, %v46_v63  ;;  %v312_v63 = vmul.f32 %v3016_v35, %v3129_v13 }
  0x7c   :  { %5340 = vst [vmem:[#allocation21_spill] sm:$0xff] %v3168_v32  ;;  %v364_v32 = vsub.f32 %v359_v7, %v362_v15  ;;  %v321_v7 = vadd.f32 %v3075_v55, %v3059_v49  ;;  %v174_v15 = vld [vmem:[%s5117_s2 + $0x78] sm:$0xff]  ;;  %v369_v49 = vmul.f32 %v3053_v48, %v3048_v46  ;;  %v175_v55 = vld [vmem:[%s5117_s2 + $0x80] sm:$0xff]  ;;  %v176_v46 = vld [vmem:[%s5117_s2 + $0x90] sm:$0xff] }
  0x7d   :  { %5341 = vst [vmem:[#allocation22_spill] sm:$0xff] %v3172_v38  ;;  %v314_v29 = vsub.f32 %v3094_v62, %v312_v63  ;;  %v172_v62 = vld [vmem:[%s5117_s2 + $0x60] sm:$0xff]  ;;  %v438_v63 = vmul.f32 %v3127_v12, %v3217_v22 }
  0x7e   :  { %5342 = vst [vmem:[#allocation23_spill] sm:$0xff] %v3174_v43 }
  0x7f   :  { %70 = vst.msk [vmem:[#allocation2 + $0x90] sm:$0xff] %vm51_vm0, %v47_v0  ;;  %v335_v0 = vmul.f32 %v3031_v40, %v3157_v26  ;;  %v440_v17 = vsub.f32 %v435_v30, %v438_v63  ;;  %v443_v30 = vmul.f32 %v3124_v11, %v3141_v19  ;;  %v178_v19 = vld [vmem:[%s5117_s2 + $0xa8] sm:$0xff] }
  0x80   :  { %5343 = vst [vmem:[#allocation24_spill] sm:$0xff] %v3181_v51  ;;  %v171_v51 = vld [vmem:[%s5117_s2 + $0x50] sm:$0xff] }
  0x81   :  { %5344 = vst [vmem:[#allocation25_spill] sm:$0xff] %v3184_v52  ;;  %v411_v52 = vmul.f32 %v3108_v5, %v3189_v56 }
  0x82   :  { %5345 = vst [vmem:[#allocation26_spill] sm:$0xff] %v3187_v53  ;;  %v340_v53 = vsub.f32 %v335_v0, %v338_v1  ;;  %v3246_v0 = vmul.f32 %v3146_v21, %v3219_v23  ;;  %v173_v1 = vld [vmem:[%s5117_s2 + $0x68] sm:$0xff] }
  0x83   :  { %71 = vst.msk [vmem:[#allocation2 + $0x98] sm:$0xff] %vm51_vm0, %v48_v6  ;;  %v169_v6 = vld [vmem:[%s5117_s2 + $0x38] sm:$0xff] }
  0x84   :  { %72 = vst.msk [vmem:[#allocation2 + $0xa0] sm:$0xff] %vm51_vm0, %v49_v14  ;;  %v170_v14 = vld [vmem:[%s5117_s2 + $0x48] sm:$0xff] }
  0x85   :  { %73 = vst.msk [vmem:[#allocation2 + $0xa8] sm:$0xff] %vm51_vm0, %v50_v45  ;;  %v414_v45 = vmul.f32 %v3121_v10, %v3201_v2 }
  0x86   :  { %191 = vst.msk [vmem:[#allocation2 + $0x230] sm:$0xff] %vm51_vm0, %v168_v57  ;;  %v342_v57 = vadd.f32 %v340_v53, %v314_v29  ;;  %v345_v53 = vmul.f32 %v3034_v41, %v3028_v39 }
  0x87   :  { %192 = vst.msk [vmem:[#allocation2 + $0x238] sm:$0xff] %vm51_vm0, %v169_v6  ;;  %v416_v6 = vsub.f32 %v411_v52, %v414_v45  ;;  %v367_v52 = vmul.f32 %v3037_v42, %v3050_v47  ;;  %v421_v45 = vmul.f32 %v3121_v10, %v3116_v8 }
  0x88   :  { %193 = vst.msk [vmem:[#allocation2 + $0x240] sm:$0xff] %vm51_vm0, %v170_v14  ;;  %v366_v16 = vadd.f32 %v364_v32, %v342_v57  ;;  %v347_v14 = vadd.f32 %v345_v53, %v343_v50  ;;  %v395_v32 = vmul.f32 %v3090_v61, %v3084_v59 }
  0x89   :  { %194 = vst.msk [vmem:[#allocation2 + $0x248] sm:$0xff] %vm51_vm0, %v171_v51  ;;  %v393_v51 = vmul.f32 %v3087_v60, %v3103_v3  ;;  %v371_v29 = vadd.f32 %v369_v49, %v367_v52 }
  0x8a   :  { %195 = vst.msk [vmem:[#allocation2 + $0x250] sm:$0xff] %vm51_vm0, %v172_v62  ;;  %v392_v47 = vadd.f32 %v390_v37, %v366_v16  ;;  %v177_v62 = vld [vmem:[%s5117_s2 + $0x98] sm:$0xff]  ;;  %v349_v57 = vadd.f32 %v347_v14, %v321_v7  ;;  %v471_v37 = vmul.f32 %v3165_v31, %v3143_v20  ;;  %v318_v7 = vmul.f32 %v3013_v34, %v3129_v13 }
  0x8b   :  { %196 = vst.msk [vmem:[#allocation2 + $0x258] sm:$0xff] %vm51_vm0, %v173_v1  ;;  %v397_v63 = vadd.f32 %v395_v32, %v393_v51  ;;  %v445_v1 = vmul.f32 %v3127_v12, %v3139_v18  ;;  %v320_v16 = vmul.f32 %v3016_v35, %v3071_v54  ;;  %v179_v18 = vld [vmem:[%s5117_s2 + $0xb0] sm:$0xff]  ;;  %v180_v51 = vld [vmem:[%s5117_s2 + $0xc0] sm:$0xff] }
  0x8c   :  { %197 = vst.msk [vmem:[#allocation2 + $0x260] sm:$0xff] %vm51_vm0, %v174_v15  ;;  %v418_v53 = vadd.f32 %v416_v6, %v392_v47  ;;  %v423_v15 = vadd.f32 %v421_v45, %v419_v24  ;;  %v344_v47 = vmul.f32 %v3031_v40, %v3159_v27 }
  0x8d   :  { %198 = vst.msk [vmem:[#allocation2 + $0x268] sm:$0xff] %vm51_vm0, %v175_v55  ;;  %v3296_v50 = vld [vmem:[#allocation2 + $0x230] sm:$0xff]  ;;  %v373_v55 = vadd.f32 %v371_v29, %v349_v57  ;;  %v447_v6 = vadd.f32 %v445_v1, %v443_v30  ;;  %v181_v29 = vld [vmem:[%s5117_s2 + $0xc8] sm:$0xff]  ;;  %v182_v57 = vld [vmem:[%s5117_s2 + $0xd8] sm:$0xff] }
  0x8e   :  { %5346 = vst [vmem:[#allocation27_spill] sm:$0xff] %v3296_v50  ;;  %v463_v52 = vmul.f32 %v3165_v31, %v3296_v50  ;;  %v3308_v49 = vld [vmem:[#allocation2 + $0x238] sm:$0xff]  ;;  %v469_v14 = vmul.f32 %v3146_v21, %v3296_v50  ;;  %v442_v32 = vadd.f32 %v440_v17, %v418_v53  ;;  %v346_v17 = vmul.f32 %v3034_v41, %v3157_v26 }
  0x8f   :  { %199 = vst.msk [vmem:[#allocation2 + $0x270] sm:$0xff] %vm51_vm0, %v176_v46  ;;  %v464_v24 = vmul.f32 %v3165_v31, %v3308_v49  ;;  %v322_v46 = vadd.f32 %v320_v16, %v318_v7  ;;  %v399_v30 = vadd.f32 %v397_v63, %v373_v55  ;;  %v370_v53 = vmul.f32 %v3053_v48, %v3161_v28  ;;  %v183_v63 = vld [vmem:[%s5117_s2 + $0xe0] sm:$0xff]  ;;  %v184_v28 = vld [vmem:[%s5117_s2 + $0xf0] sm:$0xff] }
  0x90   :  { %200 = vst.msk [vmem:[#allocation2 + $0x278] sm:$0xff] %vm51_vm0, %v177_v62  ;;  %v465_v45 = vsub.f32 %v3155_v25, %v463_v52  ;;  %v473_v62 = vadd.f32 %v471_v37, %v469_v14  ;;  %v394_v25 = vmul.f32 %v3087_v60, %v3174_v43  ;;  %v420_v52 = vmul.f32 %v3108_v5, %v3201_v2  ;;  %v3359_v55 = vld [vmem:[#allocation2 + $0x3a0] sm:$0xff]  ;;  %v185_v14 = vld [vmem:[%s5117_s2 + $0xf8] sm:$0xff] }
  0x91   :  { %201 = vst.msk [vmem:[#allocation2 + $0x280] sm:$0xff] %vm51_vm0, %v178_v19  ;;  %v466_v1 = vsub.f32 %v3246_v0, %v464_v24  ;;  %v368_v19 = vmul.f32 %v3037_v42, %v3170_v36  ;;  %v425_v7 = vadd.f32 %v423_v15, %v399_v30  ;;  %v348_v0 = vadd.f32 %v346_v17, %v344_v47  ;;  %v3357_v15 = vld [vmem:[#allocation2 + $0x190] sm:$0xff] }
  0x92   :  { %202 = vst.msk [vmem:[#allocation2 + $0x288] sm:$0xff] %vm51_vm0, %v179_v18  ;;  %v3343_v37 = vadd.f32 %v465_v45, %v3240_v58  ;;  %v396_v36 = vmul.f32 %v3090_v61, %v3172_v38  ;;  %v422_v58 = vmul.f32 %v3121_v10, %v3189_v56  ;;  %v444_v47 = vmul.f32 %v3124_v11, %v3217_v22  ;;  %v32_v22 = vld [vmem:[%s5116_s1 + $0x20] sm:$0xff] }
  0x93   :  { %203 = vst.msk [vmem:[#allocation2 + $0x290] sm:$0xff] %vm51_vm0, %v180_v51  ;;  %v3351_v16 = vadd.f32 %v466_v1, %v442_v32  ;;  %v372_v18 = vadd.f32 %v370_v53, %v368_v19  ;;  %v449_v51 = vadd.f32 %v447_v6, %v425_v7  ;;  %v350_v32 = vadd.f32 %v348_v0, %v322_v46  ;;  %v3387_v19 = vld [vmem:[#allocation2 + $0xe0] sm:$0xff]  ;;  %v3389_v53 = vld [vmem:[#allocation2 + $0x2f0] sm:$0xff] }
  0x94   :  { %204 = vst.msk [vmem:[#allocation2 + $0x298] sm:$0xff] %vm51_vm0, %v181_v29  ;;  %v398_v24 = vadd.f32 %v396_v36, %v394_v25  ;;  %v31_v29 = vld [vmem:[%s5116_s1 + $0x18] sm:$0xff]  ;;  %v424_v45 = vadd.f32 %v422_v58, %v420_v52  ;;  %v446_v30 = vmul.f32 %v3127_v12, %v3203_v4  ;;  %v470_v17 = vmul.f32 %v3146_v21, %v3308_v49  ;;  %v5349_v0 = vld [vmem:[#allocation6_spill] sm:$0xff] }
  0x95   :  { %205 = vst.msk [vmem:[#allocation2 + $0x2a0] sm:$0xff] %vm51_vm0, %v182_v57  ;;  %v472_v6 = vmul.f32 %v3165_v31, %v3219_v23  ;;  %v3381_v46 = vadd.f32 %v473_v62, %v449_v51  ;;  %v374_v57 = vadd.f32 %v372_v18, %v350_v32  ;;  %v540_v1 = vmul.f32 %v3357_v15, %v3013_v34  ;;  %v166_v25 = vld [vmem:[%s5117_s2 + $0x18] sm:$0xff]  ;;  %v3407_v51 = vld [vmem:[#allocation2 + $0x30] sm:$0xff]  ;;  %v29_v32 = vld [vmem:[%s5116_s1] sm:$0xff] }
  0x96   :  { %206 = vst.msk [vmem:[#allocation2 + $0x2a8] sm:$0xff] %vm51_vm0, %v183_v63  ;;  %v543_v4 = vmul.f32 %v3359_v55, %v3016_v35  ;;  %v448_v63 = vadd.f32 %v446_v30, %v444_v47  ;;  %v564_v7 = vmul.f32 %v3031_v40, %v3010_v33  ;;  %v567_v36 = vmul.f32 %v3034_v41, %v5349_v0 }
  0x97   :  { %207 = vst.msk [vmem:[#allocation2 + $0x2b0] sm:$0xff] %vm51_vm0, %v184_v28  ;;  %v474_v62 = vadd.f32 %v472_v6, %v470_v17  ;;  %v167_v28 = vld [vmem:[%s5117_s2 + $0x20] sm:$0xff]  ;;  %v400_v18 = vadd.f32 %v398_v24, %v374_v57  ;;  %v588_v58 = vmul.f32 %v3037_v42, %v3028_v39  ;;  %v617_v24 = vmul.f32 %v3389_v53, %v3090_v61  ;;  %v30_v6 = vld [vmem:[%s5116_s1 + $0x8] sm:$0xff] }
  0x98   :  { %5347 = vst [vmem:[#allocation28_spill] sm:$0xff] %v3387_v19  ;;  %v545_v52 = vsub.f32 %v540_v1, %v543_v4  ;;  %v569_v47 = vsub.f32 %v564_v7, %v567_v36  ;;  %v638_v30 = vmul.f32 %v3108_v5, %v3084_v59  ;;  %v3419_v17 = vld [vmem:[#allocation2 + $0x240] sm:$0xff]  ;;  %v641_v1 = vmul.f32 %v3121_v10, %v3103_v3  ;;  %v3429_v7 = vld [vmem:[#allocation2 + $0x198] sm:$0xff] }
  0x99   :  { %5348 = vst [vmem:[#allocation29_spill] sm:$0xff] %v3389_v53  ;;  %v662_v4 = vmul.f32 %v3124_v11, %v3116_v8  ;;  %v541_v3 = vmul.f32 %v3429_v7, %v3013_v34 }
  0x9a   :  { %208 = vst.msk [vmem:[#allocation2 + $0x2b8] sm:$0xff] %vm51_vm0, %v185_v14  ;;  %v591_v14 = vmul.f32 %v3053_v48, %v3044_v44  ;;  %v571_v36 = vadd.f32 %v569_v47, %v545_v52  ;;  %v643_v8 = vsub.f32 %v638_v30, %v641_v1  ;;  %v691_v52 = vmul.f32 %v3419_v17, %v3165_v31  ;;  %v5354_v47 = vld [vmem:[#allocation21_spill] sm:$0xff] }
  0x9b   :  { %54 = vst.msk [vmem:[#allocation2 + $0x10] sm:$0xff] %vm51_vm0, %v31_v29  ;;  %v614_v29 = vmul.f32 %v3387_v19, %v3087_v60 }
  0x9c   :  { %5350 = vst [vmem:[#allocation6_spill] sm:$0xff] %v3407_v51  ;;  %v593_v57 = vsub.f32 %v588_v58, %v591_v14  ;;  %v3441_v58 = vld [vmem:[#allocation2 + $0x3a8] sm:$0xff] }
  0x9d   :  { %55 = vst.msk [vmem:[#allocation2 + $0x18] sm:$0xff] %vm51_vm0, %v32_v22  ;;  %v426_v22 = vadd.f32 %v424_v45, %v400_v18  ;;  %v619_v59 = vsub.f32 %v614_v29, %v617_v24  ;;  %v665_v45 = vmul.f32 %v3127_v12, %v3118_v9  ;;  %v3439_v18 = vmul.f32 %v3407_v51, %v3146_v21  ;;  %v5355_v9 = vld [vmem:[#allocation24_spill] sm:$0xff] }
  0x9e   :  { %5351 = vst [vmem:[#allocation30_spill] sm:$0xff] %v3419_v17  ;;  %v3451_v29 = vmul.f32 %v5354_v47, %v3143_v20  ;;  %v595_v24 = vadd.f32 %v593_v57, %v571_v36 }
  0x9f   :  { %189 = vst.msk [vmem:[#allocation2 + $0x220] sm:$0xff] %vm51_vm0, %v166_v25  ;;  %v164_v25 = vld [vmem:[%s5117_s2] sm:$0xff]  ;;  %v450_v14 = vadd.f32 %v448_v63, %v426_v22  ;;  %v667_v51 = vsub.f32 %v662_v4, %v665_v45  ;;  %v693_v30 = vsub.f32 %v3439_v18, %v691_v52  ;;  %v544_v22 = vmul.f32 %v3441_v58, %v3016_v35 }
  0xa0   :  { %5352 = vst [vmem:[#allocation31_spill] sm:$0xff] %v3429_v7  ;;  %v621_v1 = vadd.f32 %v619_v59, %v595_v24 }
  0xa1   :  { %190 = vst.msk [vmem:[#allocation2 + $0x228] sm:$0xff] %vm51_vm0, %v167_v28  ;;  %v165_v28 = vld [vmem:[%s5117_s2 + $0x8] sm:$0xff]  ;;  %v476_v63 = vadd.f32 %v474_v62, %v450_v14  ;;  %v589_v62 = vmul.f32 %v3037_v42, %v3157_v26  ;;  %v546_v14 = vsub.f32 %v541_v3, %v544_v22  ;;  %v5359_v3 = vld [vmem:[#allocation26_spill] sm:$0xff]  ;;  %s3832_s2 = sld [smem:[#allocation3 + $0x9]] }
  0xa2   :  { %5353 = vst [vmem:[#allocation32_spill] sm:$0xff] %v3441_v58  ;;  %v3467_v57 = vld [vmem:[#allocation2 + $0x10] sm:$0xff]  ;;  %v592_v58 = vmul.f32 %v3053_v48, %v3159_v27 }
  0xa3   :  { %52 = vst.msk [vmem:[#allocation2] sm:$0xff] %vm51_vm0, %v29_v32  ;;  %v3456_v32 = vmul.f32 %v5355_v9, %v3296_v50  ;;  %v486_v36 = vmul.f32 %v5354_v47, %v3467_v57  ;;  %v497_v18 = vmul.f32 %v5355_v9, %v3467_v57 }
  0xa4   :  { %53 = vst.msk [vmem:[#allocation2 + $0x8] sm:$0xff] %vm51_vm0, %v30_v6  ;;  %v565_v6 = vmul.f32 %v3031_v40, %v3071_v54  ;;  %v3477_v45 = vld [vmem:[#allocation2 + $0x18] sm:$0xff] }
  0xa5   :  { %187 = vst.msk [vmem:[#allocation2 + $0x210] sm:$0xff] %vm51_vm0, %v164_v25  ;;  %v717_v4 = vsub.f32 %v3451_v29, %v3456_v32  ;;  %v568_v25 = vmul.f32 %v3034_v41, %v3129_v13  ;;  %v487_v29 = vmul.f32 %v5354_v47, %v3477_v45  ;;  %v498_v24 = vmul.f32 %v5355_v9, %v3477_v45 }
  0xa6   :  { %188 = vst.msk [vmem:[#allocation2 + $0x218] sm:$0xff] %vm51_vm0, %v165_v28  ;;  %v5357_v28 = vld [vmem:[#allocation25_spill] sm:$0xff]  ;;  %v3483_v52 = vld [vmem:[#allocation2 + $0x220] sm:$0xff]  ;;  %v645_v32 = vadd.f32 %v643_v8, %v621_v1 }
  0xa7   :  { %5356 = vst [vmem:[#allocation21_spill] sm:$0xff] %v3467_v57  ;;  %v736_v59 = vmul.f32 %v5357_v28, %v3467_v57  ;;  %v570_v26 = vsub.f32 %v565_v6, %v568_v25  ;;  %v489_v54 = vmul.f32 %v5355_v9, %v3483_v52  ;;  %v495_v7 = vmul.f32 %v5354_v47, %v3483_v52 }
  0xa8   :  { %5358 = vst [vmem:[#allocation24_spill] sm:$0xff] %v3483_v52  ;;  %v3491_v13 = vld [vmem:[#allocation2 + $0x228] sm:$0xff]  ;;  %v739_v22 = vmul.f32 %v5359_v3, %v3483_v52  ;;  %v669_v6 = vadd.f32 %v667_v51, %v645_v32 }
  0xa9   :  { %v490_v20 = vmul.f32 %v5355_v9, %v3491_v13  ;;  %v496_v8 = vmul.f32 %v5354_v47, %v3491_v13  ;;  %v572_v1 = vadd.f32 %v570_v26, %v546_v14  ;;  %v491_v25 = vsub.f32 %v486_v36, %v489_v54  ;;  %v3511_v36 = vld [vmem:[#allocation2 + $0xe8] sm:$0xff]  ;;  %v3516_v14 = vld [vmem:[#allocation2 + $0x2f8] sm:$0xff] }
  0xaa   :  { %v505_v57 = vld [vmem:[#allocation2] sm:$0xff]  ;;  %v499_v19 = vadd.f32 %v497_v18, %v495_v7  ;;  %5360 = vst [vmem:[#allocation25_spill] sm:$0xff] %v3511_v36 }
  0xab   :  { %v510_v50 = vmul.f32 %v5357_v28, %v505_v57  ;;  %v506_v17 = vld [vmem:[#allocation2 + $0x8] sm:$0xff]  ;;  %v521_v53 = vmul.f32 %v5359_v3, %v505_v57  ;;  %v492_v39 = vsub.f32 %v487_v29, %v490_v20  ;;  %v500_v48 = vadd.f32 %v498_v24, %v496_v8  ;;  %5361 = vst [vmem:[#allocation26_spill] sm:$0xff] %v3516_v14 }
  0xac   :  { %v507_v52 = vld [vmem:[#allocation2 + $0x210] sm:$0xff]  ;;  %v511_v27 = vmul.f32 %v5357_v28, %v506_v17  ;;  %v522_v42 = vmul.f32 %v5359_v3, %v506_v17  ;;  %v493_v44 = vadd.f32 %v491_v25, %v3343_v37  ;;  %v501_v54 = vadd.f32 %v499_v19, %v3381_v46 }
  0xad   :  { %v513_v41 = vmul.f32 %v5359_v3, %v507_v52  ;;  %v508_v51 = vld [vmem:[#allocation2 + $0x218] sm:$0xff]  ;;  %v519_v26 = vmul.f32 %v5357_v28, %v507_v52  ;;  %v494_v7 = vadd.f32 %v492_v39, %v3351_v16  ;;  %v502_v57 = vadd.f32 %v500_v48, %v476_v63  ;;  %v3524_v63 = vld [vmem:[#allocation2 + $0x248] sm:$0xff] }
  0xae   :  { %v514_v20 = vmul.f32 %v5359_v3, %v508_v51  ;;  %v520_v18 = vmul.f32 %v5357_v28, %v508_v51  ;;  %v695_v29 = vadd.f32 %v693_v30, %v669_v6  ;;  %v741_v24 = vsub.f32 %v736_v59, %v739_v22  ;;  %v3522_v16 = vld [vmem:[#allocation2 + $0x38] sm:$0xff] }
  0xaf   :  { %v515_v17 = vsub.f32 %v510_v50, %v513_v41  ;;  %v523_v37 = vadd.f32 %v521_v53, %v519_v26  ;;  %v594_v46 = vsub.f32 %v589_v62, %v592_v58  ;;  %v615_v19 = vmul.f32 %v3511_v36, %v3087_v60 }
  0xb0   :  { %v516_v32 = vsub.f32 %v511_v27, %v514_v20  ;;  %v524_v8 = vadd.f32 %v522_v42, %v520_v18  ;;  %v719_v39 = vadd.f32 %v717_v4, %v695_v29  ;;  %v618_v48 = vmul.f32 %v3516_v14, %v3090_v61 }
  0xb1   :  { %v517_v52 = vadd.f32 %v515_v17, %v493_v44  ;;  %v525_v25 = vadd.f32 %v523_v37, %v501_v54  ;;  %v596_v53 = vadd.f32 %v594_v46, %v572_v1  ;;  %v639_v42 = vmul.f32 %v3108_v5, %v3172_v38  ;;  %v5363_v46 = vld [vmem:[#allocation10_spill] sm:$0xff] }
  0xb2   :  { %v518_v41 = vadd.f32 %v516_v32, %v494_v7  ;;  %v526_v50 = vadd.f32 %v524_v8, %v502_v57  ;;  %v743_v44 = vadd.f32 %v741_v24, %v719_v39  ;;  %v620_v27 = vsub.f32 %v615_v19, %v618_v48  ;;  %v5362_v32 = vld [vmem:[#allocation8_spill] sm:$0xff]  ;;  %v5364_v19 = vld [vmem:[#allocation9_spill] sm:$0xff]  ;;  %v5366_v39 = vld [vmem:[#allocation11_spill] sm:$0xff] }
  0xb3   :  { %527 = vst.msk [vmem:[%s5118_s3] sm:$0xff] %vm51_vm0, %v517_v52  ;;  %v642_v58 = vmul.f32 %v3121_v10, %v3174_v43  ;;  %v663_v30 = vmul.f32 %v3124_v11, %v3189_v56  ;;  %v666_v4 = vmul.f32 %v3127_v12, %v3201_v2  ;;  %v689_v62 = vmul.f32 %v3522_v16, %v3146_v21 }
  0xb4   :  { %528 = vst.msk [vmem:[%s5118_s3 + $0x8] sm:$0xff] %vm51_vm0, %v518_v41  ;;  %v692_v59 = vmul.f32 %v3524_v63, %v3165_v31  ;;  %v713_v22 = vmul.f32 %v5354_v47, %v3219_v23  ;;  %v622_v6 = vadd.f32 %v620_v27, %v596_v53  ;;  %v716_v51 = vmul.f32 %v5355_v9, %v3308_v49  ;;  %v5367_v53 = vld [vmem:[#allocation29_spill] sm:$0xff] }
  0xb5   :  { %529 = vst.msk [vmem:[%s5119_s4] sm:$0xff] %vm51_vm0, %v525_v25  ;;  %v644_v1 = vsub.f32 %v639_v42, %v642_v58  ;;  %v737_v54 = vmul.f32 %v5357_v28, %v3477_v45  ;;  %v668_v26 = vsub.f32 %v663_v30, %v666_v4  ;;  %v740_v20 = vmul.f32 %v5359_v3, %v3491_v13  ;;  %v5365_v25 = vld [vmem:[#allocation7_spill] sm:$0xff]  ;;  %v5369_v4 = vld [vmem:[#allocation14_spill] sm:$0xff] }
  0xb6   :  { %530 = vst.msk [vmem:[%s5119_s4 + $0x8] sm:$0xff] %vm51_vm0, %v526_v50  ;;  %v694_v7 = vsub.f32 %v689_v62, %v692_v59  ;;  %v549_v57 = vmul.f32 %v3359_v55, %v3013_v34  ;;  %v718_v17 = vsub.f32 %v713_v22, %v716_v51  ;;  %v551_v37 = vmul.f32 %v3357_v15, %v3016_v35  ;;  %v5370_v59 = vld [vmem:[#allocation13_spill] sm:$0xff]  ;;  %v5371_v51 = vld [vmem:[#allocation16_spill] sm:$0xff] }
  0xb7   :  { %2398 = vst.msk [vmem:[%s5118_s3 + $0x10] sm:$0xff] %vm51_vm0, %v743_v44  ;;  %v646_v18 = vadd.f32 %v644_v1, %v622_v6  ;;  %v573_v29 = vmul.f32 %v3031_v40, %v5349_v0  ;;  %v742_v24 = vsub.f32 %v737_v54, %v740_v20  ;;  %v575_v8 = vmul.f32 %v5362_v32, %v3010_v33  ;;  %v5368_v44 = vld [vmem:[#allocation28_spill] sm:$0xff] }
  0xb8   :  { %v597_v52 = vmul.f32 %v5364_v19, %v5363_v46  ;;  %v599_v48 = vmul.f32 %v5366_v39, %v5365_v25  ;;  %v553_v50 = vadd.f32 %v551_v37, %v549_v57  ;;  %v623_v42 = vmul.f32 %v5367_v53, %v3087_v60  ;;  %v5373_v37 = vld [vmem:[#allocation30_spill] sm:$0xff] }
  0xb9   :  { %v670_v41 = vadd.f32 %v668_v26, %v646_v18  ;;  %v625_v27 = vmul.f32 %v5368_v44, %v3090_v61  ;;  %v577_v58 = vadd.f32 %v575_v8, %v573_v29  ;;  %v647_v62 = vmul.f32 %v3108_v5, %v5369_v4  ;;  %v5372_v26 = vld [vmem:[#allocation15_spill] sm:$0xff]  ;;  %v5374_v8 = vld [vmem:[#allocation6_spill] sm:$0xff]  ;;  %v5377_v4 = vld [vmem:[#allocation24_spill] sm:$0xff] }
  0xba   :  { %v601_v30 = vadd.f32 %v599_v48, %v597_v52  ;;  %v649_v22 = vmul.f32 %v3121_v10, %v5370_v59  ;;  %v671_v54 = vmul.f32 %v3124_v11, %v5371_v51  ;;  %v673_v20 = vmul.f32 %v3127_v12, %v5372_v26  ;;  %v5375_v48 = vld [vmem:[#allocation27_spill] sm:$0xff] }
  0xbb   :  { %v696_v6 = vadd.f32 %v694_v7, %v670_v41  ;;  %v627_v1 = vadd.f32 %v625_v27, %v623_v42  ;;  %v579_v57 = vadd.f32 %v577_v58, %v553_v50  ;;  %v697_v29 = vmul.f32 %v5373_v37, %v3146_v21  ;;  %v5376_v41 = vld [vmem:[#allocation18_spill] sm:$0xff]  ;;  %v5378_v58 = vld [vmem:[#allocation21_spill] sm:$0xff]  ;;  %v5379_v37 = vld [vmem:[#allocation32_spill] sm:$0xff] }
  0xbc   :  { %v651_v18 = vadd.f32 %v649_v22, %v647_v62  ;;  %v699_v46 = vmul.f32 %v5374_v8, %v3165_v31  ;;  %v675_v25 = vadd.f32 %v673_v20, %v671_v54  ;;  %v721_v7 = vmul.f32 %v5354_v47, %v5375_v48  ;;  %v5381_v8 = vld [vmem:[#allocation17_spill] sm:$0xff] }
  0xbd   :  { %v720_v52 = vadd.f32 %v718_v17, %v696_v6  ;;  %v723_v42 = vmul.f32 %v5355_v9, %v5376_v41  ;;  %v603_v27 = vadd.f32 %v601_v30, %v579_v57  ;;  %v745_v50 = vmul.f32 %v5357_v28, %v5377_v4  ;;  %v5380_v6 = vld [vmem:[#allocation31_spill] sm:$0xff]  ;;  %v5382_v57 = vld [vmem:[#allocation12_spill] sm:$0xff] }
  0xbe   :  { %v701_v51 = vadd.f32 %v699_v46, %v697_v29  ;;  %v747_v62 = vmul.f32 %v5359_v3, %v5378_v58  ;;  %v550_v17 = vmul.f32 %v5379_v37, %v3013_v34  ;;  %v552_v54 = vmul.f32 %v5380_v6, %v3016_v35  ;;  %v5383_v4 = vld [vmem:[#allocation20_spill] sm:$0xff] }
  0xbf   :  { %v744_v22 = vadd.f32 %v742_v24, %v720_v52  ;;  %v725_v26 = vadd.f32 %v723_v42, %v721_v7  ;;  %v629_v20 = vadd.f32 %v627_v1, %v603_v27  ;;  %v574_v30 = vmul.f32 %v3031_v40, %v5381_v8  ;;  %v5384_v52 = vld [vmem:[#allocation19_spill] sm:$0xff] }
  0xc0   :  { %v749_v48 = vadd.f32 %v747_v62, %v745_v50  ;;  %v576_v29 = vmul.f32 %v5362_v32, %v5382_v57  ;;  %v554_v24 = vadd.f32 %v552_v54, %v550_v17  ;;  %v598_v46 = vmul.f32 %v5364_v19, %v5383_v4 }
  0xc1   :  { %2399 = vst.msk [vmem:[%s5118_s3 + $0x18] sm:$0xff] %vm51_vm0, %v744_v22  ;;  %v600_v7 = vmul.f32 %v5366_v39, %v5384_v52  ;;  %v624_v1 = vmul.f32 %v3516_v14, %v3087_v60  ;;  %v653_v42 = vadd.f32 %v651_v18, %v629_v20  ;;  %v626_v50 = vmul.f32 %v3511_v36, %v3090_v61 }
  0xc2   :  { %v578_v27 = vadd.f32 %v576_v29, %v574_v30  ;;  %v648_v58 = vmul.f32 %v3108_v5, %v3174_v43  ;;  %v650_v22 = vmul.f32 %v3121_v10, %v3172_v38  ;;  %v672_v17 = vmul.f32 %v3124_v11, %v3201_v2  ;;  %v3632_v30 = vld [vmem:[#allocation2 + $0x1a0] sm:$0xff]  ;;  %v3634_v29 = vld [vmem:[#allocation2 + $0x3b0] sm:$0xff] }
  0xc3   :  { %v602_v62 = vadd.f32 %v600_v7, %v598_v46  ;;  %v674_v54 = vmul.f32 %v3127_v12, %v3189_v56  ;;  %v677_v4 = vadd.f32 %v675_v25, %v653_v42  ;;  %v628_v18 = vadd.f32 %v626_v50, %v624_v1  ;;  %5385 = vst [vmem:[#allocation8_spill] sm:$0xff] %v3632_v30 }
  0xc4   :  { %v580_v52 = vadd.f32 %v578_v27, %v554_v24  ;;  %v698_v20 = vmul.f32 %v3524_v63, %v3146_v21  ;;  %5386 = vst [vmem:[#allocation10_spill] sm:$0xff] %v3634_v29  ;;  %v652_v46 = vadd.f32 %v650_v22, %v648_v58  ;;  %v700_v43 = vmul.f32 %v3522_v16, %v3165_v31  ;;  %v3650_v58 = vld [vmem:[#allocation2 + $0xf0] sm:$0xff] }
  0xc5   :  { %v676_v7 = vadd.f32 %v674_v54, %v672_v17  ;;  %v722_v2 = vmul.f32 %v5354_v47, %v3308_v49  ;;  %v703_v38 = vadd.f32 %v701_v51, %v677_v4  ;;  %v724_v25 = vmul.f32 %v5355_v9, %v3219_v23  ;;  %5387 = vst [vmem:[#allocation9_spill] sm:$0xff] %v3650_v58  ;;  %v3654_v54 = vld [vmem:[#allocation2 + $0x300] sm:$0xff] }
  0xc6   :  { %v604_v56 = vadd.f32 %v602_v62, %v580_v52  ;;  %v746_v24 = vmul.f32 %v5357_v28, %v3491_v13  ;;  %v702_v1 = vadd.f32 %v700_v43, %v698_v20  ;;  %v748_v42 = vmul.f32 %v5359_v3, %v3477_v45  ;;  %5388 = vst [vmem:[#allocation7_spill] sm:$0xff] %v3654_v54 }
  0xc7   :  { %v768_v27 = vmul.f32 %v3632_v30, %v3013_v34  ;;  %v771_v50 = vmul.f32 %v3634_v29, %v3016_v35  ;;  %v727_v51 = vadd.f32 %v725_v26, %v703_v38  ;;  %v726_v22 = vadd.f32 %v724_v25, %v722_v2 }
  0xc8   :  { %v630_v62 = vadd.f32 %v628_v18, %v604_v56  ;;  %v792_v17 = vmul.f32 %v3357_v15, %v3031_v40  ;;  %v750_v13 = vadd.f32 %v748_v42, %v746_v24  ;;  %v795_v45 = vmul.f32 %v3359_v55, %v5362_v32  ;;  %v3664_v18 = vld [vmem:[#allocation2 + $0x40] sm:$0xff] }
  0xc9   :  { %v773_v43 = vsub.f32 %v768_v27, %v771_v50  ;;  %v816_v4 = vmul.f32 %v5364_v19, %v3010_v33  ;;  %v751_v52 = vadd.f32 %v749_v48, %v727_v51  ;;  %v819_v38 = vmul.f32 %v5366_v39, %v5349_v0  ;;  %5389 = vst [vmem:[#allocation11_spill] sm:$0xff] %v3664_v18  ;;  %v3672_v48 = vld [vmem:[#allocation2 + $0x250] sm:$0xff]  ;;  %v5391_v27 = vld [vmem:[#allocation14_spill] sm:$0xff] }
  0xca   :  { %v654_v20 = vadd.f32 %v652_v46, %v630_v62  ;;  %v842_v26 = vmul.f32 %v3650_v58, %v3087_v60  ;;  %v797_v2 = vsub.f32 %v792_v17, %v795_v45  ;;  %v845_v56 = vmul.f32 %v3654_v54, %v3090_v61  ;;  %5390 = vst [vmem:[#allocation13_spill] sm:$0xff] %v3672_v48 }
  0xcb   :  { %v866_v25 = vmul.f32 %v5368_v44, %v3108_v5  ;;  %v869_v33 = vmul.f32 %v5367_v53, %v3121_v10  ;;  %2400 = vst.msk [vmem:[%s5119_s4 + $0x10] sm:$0xff] %vm51_vm0, %v751_v52  ;;  %v821_v24 = vsub.f32 %v816_v4, %v819_v38  ;;  %v890_v42 = vmul.f32 %v3124_v11, %v5370_v59  ;;  %v3684_v44 = vld [vmem:[#allocation2 + $0x1a8] sm:$0xff]  ;;  %v3686_v53 = vld [vmem:[#allocation2 + $0x3b8] sm:$0xff]  ;;  %v5393_v4 = vld [vmem:[#allocation6_spill] sm:$0xff] }
  0xcc   :  { %v678_v46 = vadd.f32 %v676_v7, %v654_v20  ;;  %v893_v50 = vmul.f32 %v3127_v12, %v5391_v27  ;;  %v799_v51 = vadd.f32 %v797_v2, %v773_v43  ;;  %v847_v62 = vsub.f32 %v842_v26, %v845_v56  ;;  %5392 = vst [vmem:[#allocation16_spill] sm:$0xff] %v3684_v44  ;;  %v5394_v43 = vld [vmem:[#allocation30_spill] sm:$0xff]  ;;  %v5395_v56 = vld [vmem:[#allocation27_spill] sm:$0xff] }
  0xcd   :  { %v871_v17 = vsub.f32 %v866_v25, %v869_v33  ;;  %v916_v45 = vmul.f32 %v3664_v18, %v3146_v21  ;;  %v919_v7 = vmul.f32 %v3672_v48, %v3165_v31  ;;  %v940_v20 = vmul.f32 %v5393_v4, %v5354_v47 }
  0xce   :  { %v704_v58 = vadd.f32 %v702_v1, %v678_v46  ;;  %v895_v52 = vsub.f32 %v890_v42, %v893_v50  ;;  %v823_v38 = vadd.f32 %v821_v24, %v799_v51  ;;  %v943_v26 = vmul.f32 %v5394_v43, %v5355_v9  ;;  %v3702_v42 = vld [vmem:[#allocation2 + $0xf8] sm:$0xff]  ;;  %v3704_v24 = vld [vmem:[#allocation2 + $0x308] sm:$0xff] }
  0xcf   :  { %v964_v2 = vmul.f32 %v5357_v28, %v5376_v41  ;;  %v967_v25 = vmul.f32 %v5359_v3, %v5395_v56  ;;  %v921_v18 = vsub.f32 %v916_v45, %v919_v7  ;;  %v769_v1 = vmul.f32 %v3684_v44, %v3013_v34  ;;  %5396 = vst [vmem:[#allocation15_spill] sm:$0xff] %v3702_v42 }
  0xd0   :  { %v728_v33 = vadd.f32 %v726_v22, %v704_v58  ;;  %v772_v46 = vmul.f32 %v3686_v53, %v3016_v35  ;;  %5397 = vst [vmem:[#allocation24_spill] sm:$0xff] %v3704_v24  ;;  %v849_v50 = vadd.f32 %v847_v62, %v823_v38  ;;  %v945_v51 = vsub.f32 %v940_v20, %v943_v26  ;;  %v3718_v38 = vld [vmem:[#allocation2 + $0x48] sm:$0xff] }
  0xd1   :  { %v969_v4 = vsub.f32 %v964_v2, %v967_v25  ;;  %v793_v41 = vmul.f32 %v5380_v6, %v3031_v40  ;;  %v796_v58 = vmul.f32 %v5379_v37, %v5362_v32  ;;  %v817_v22 = vmul.f32 %v5364_v19, %v5382_v57  ;;  %5398 = vst [vmem:[#allocation21_spill] sm:$0xff] %v3718_v38  ;;  %v5399_v2 = vld [vmem:[#allocation22_spill] sm:$0xff] }
  0xd2   :  { %v752_v43 = vadd.f32 %v750_v13, %v728_v33  ;;  %v774_v56 = vsub.f32 %v769_v1, %v772_v46  ;;  %v873_v45 = vadd.f32 %v871_v17, %v849_v50  ;;  %v820_v7 = vmul.f32 %v5366_v39, %v5381_v8  ;;  %v3720_v13 = vld [vmem:[#allocation2 + $0x258] sm:$0xff]  ;;  %v5400_v50 = vld [vmem:[#allocation23_spill] sm:$0xff] }
  0xd3   :  { %v843_v62 = vmul.f32 %v3702_v42, %v3087_v60  ;;  %v846_v20 = vmul.f32 %v3704_v24, %v3090_v61  ;;  %v798_v57 = vsub.f32 %v793_v41, %v796_v58  ;;  %v867_v17 = vmul.f32 %v3511_v36, %v3108_v5 }
  0xd4   :  { %2401 = vst.msk [vmem:[%s5119_s4 + $0x18] sm:$0xff] %vm51_vm0, %v752_v43  ;;  %v870_v26 = vmul.f32 %v3516_v14, %v3121_v10  ;;  %v891_v25 = vmul.f32 %v3124_v11, %v5399_v2  ;;  %v897_v33 = vadd.f32 %v895_v52, %v873_v45  ;;  %v822_v1 = vsub.f32 %v817_v22, %v820_v7 }
  0xd5   :  { %v848_v46 = vsub.f32 %v843_v62, %v846_v20  ;;  %v894_v42 = vmul.f32 %v3127_v12, %v5400_v50  ;;  %v800_v24 = vadd.f32 %v798_v57, %v774_v56  ;;  %v917_v41 = vmul.f32 %v3718_v38, %v3146_v21 }
  0xd6   :  { %v872_v8 = vsub.f32 %v867_v17, %v870_v26  ;;  %v920_v43 = vmul.f32 %v3720_v13, %v3165_v31  ;;  %v923_v58 = vadd.f32 %v921_v18, %v897_v33  ;;  %v941_v14 = vmul.f32 %v3522_v16, %v5354_v47 }
  0xd7   :  { %v896_v36 = vsub.f32 %v891_v25, %v894_v42  ;;  %v944_v52 = vmul.f32 %v3524_v63, %v5355_v9  ;;  %v824_v22 = vadd.f32 %v822_v1, %v800_v24  ;;  %v965_v56 = vmul.f32 %v5357_v28, %v3219_v23 }
  0xd8   :  { %v922_v45 = vsub.f32 %v917_v41, %v920_v43  ;;  %v968_v7 = vmul.f32 %v5359_v3, %v3308_v49  ;;  %v947_v62 = vadd.f32 %v945_v51, %v923_v58  ;;  %v777_v18 = vmul.f32 %v3634_v29, %v3013_v34  ;;  %v5401_v58 = vld [vmem:[#allocation9_spill] sm:$0xff] }
  0xd9   :  { %v946_v20 = vsub.f32 %v941_v14, %v944_v52  ;;  %v779_v42 = vmul.f32 %v3632_v30, %v3016_v35  ;;  %v850_v57 = vadd.f32 %v848_v46, %v824_v22  ;;  %v801_v24 = vmul.f32 %v3359_v55, %v3031_v40  ;;  %v2550_v14 = vld [vmem:[#allocation2 + $0x180] sm:$0xff]  ;;  %v5402_v22 = vld [vmem:[#allocation29_spill] sm:$0xff] }
  0xda   :  { %v970_v17 = vsub.f32 %v965_v56, %v968_v7  ;;  %v803_v26 = vmul.f32 %v3357_v15, %v5362_v32  ;;  %v971_v25 = vadd.f32 %v969_v4, %v947_v62  ;;  %v825_v51 = vmul.f32 %v5364_v19, %v5349_v0  ;;  %v5403_v56 = vld [vmem:[#allocation28_spill] sm:$0xff] }
  0xdb   :  { %v781_v33 = vadd.f32 %v779_v42, %v777_v18  ;;  %v827_v1 = vmul.f32 %v2550_v14, %v5366_v39  ;;  %v874_v41 = vadd.f32 %v872_v8, %v850_v57  ;;  %v851_v46 = vmul.f32 %v3654_v54, %v3087_v60  ;;  %v5405_v14 = vld [vmem:[#allocation30_spill] sm:$0xff] }
  0xdc   :  { %v805_v43 = vadd.f32 %v803_v26, %v801_v24  ;;  %v853_v52 = vmul.f32 %v5401_v58, %v3090_v61  ;;  %2419 = vst.msk [vmem:[%s5118_s3 + $0x20] sm:$0xff] %vm51_vm0, %v971_v25  ;;  %v875_v0 = vmul.f32 %v5402_v22, %v3108_v5  ;;  %v877_v7 = vmul.f32 %v5403_v56, %v3121_v10  ;;  %v5404_v25 = vld [vmem:[#allocation11_spill] sm:$0xff] }
  0xdd   :  { %v829_v4 = vadd.f32 %v827_v1, %v825_v51  ;;  %v899_v8 = vmul.f32 %v3124_v11, %v5391_v27  ;;  %v898_v62 = vadd.f32 %v896_v36, %v874_v41  ;;  %v901_v57 = vmul.f32 %v3127_v12, %v5370_v59  ;;  %v5406_v41 = vld [vmem:[#allocation6_spill] sm:$0xff] }
  0xde   :  { %v807_v18 = vadd.f32 %v805_v43, %v781_v33  ;;  %v855_v42 = vadd.f32 %v853_v52, %v851_v46  ;;  %v879_v24 = vadd.f32 %v877_v7, %v875_v0  ;;  %v925_v26 = vmul.f32 %v3672_v48, %v3146_v21  ;;  %v5407_v46 = vld [vmem:[#allocation27_spill] sm:$0xff]  ;;  %v5408_v0 = vld [vmem:[#allocation18_spill] sm:$0xff] }
  0xdf   :  { %v927_v51 = vmul.f32 %v5404_v25, %v3165_v31  ;;  %v949_v1 = vmul.f32 %v5405_v14, %v5354_v47  ;;  %v924_v36 = vadd.f32 %v922_v45, %v898_v62  ;;  %v903_v33 = vadd.f32 %v901_v57, %v899_v8 }
  0xe0   :  { %v831_v27 = vadd.f32 %v829_v4, %v807_v18  ;;  %v951_v59 = vmul.f32 %v5406_v41, %v5355_v9  ;;  %v973_v52 = vmul.f32 %v5357_v28, %v5407_v46  ;;  %v975_v7 = vmul.f32 %v5359_v3, %v5408_v0  ;;  %v5411_v46 = vld [vmem:[#allocation15_spill] sm:$0xff] }
  0xe1   :  { %v929_v43 = vadd.f32 %v927_v51, %v925_v26  ;;  %v778_v14 = vmul.f32 %v3686_v53, %v3013_v34  ;;  %v948_v45 = vadd.f32 %v946_v20, %v924_v36  ;;  %v780_v62 = vmul.f32 %v3684_v44, %v3016_v35  ;;  %v5409_v51 = vld [vmem:[#allocation17_spill] sm:$0xff]  ;;  %v2551_v36 = vld [vmem:[#allocation2 + $0x188] sm:$0xff] }
  0xe2   :  { %v857_v4 = vadd.f32 %v855_v42, %v831_v27  ;;  %v953_v8 = vadd.f32 %v951_v59, %v949_v1  ;;  %v977_v18 = vadd.f32 %v975_v7, %v973_v52  ;;  %v802_v57 = vmul.f32 %v5379_v37, %v3031_v40  ;;  %v5410_v59 = vld [vmem:[#allocation24_spill] sm:$0xff]  ;;  %v5412_v52 = vld [vmem:[#allocation26_spill] sm:$0xff] }
  0xe3   :  { %v804_v26 = vmul.f32 %v5380_v6, %v5362_v32  ;;  %v826_v34 = vmul.f32 %v5364_v19, %v5409_v51  ;;  %v972_v20 = vadd.f32 %v970_v17, %v948_v45  ;;  %v782_v1 = vadd.f32 %v780_v62, %v778_v14 }
  0xe4   :  { %v881_v42 = vadd.f32 %v879_v24, %v857_v4  ;;  %v828_v35 = vmul.f32 %v2551_v36, %v5366_v39  ;;  %v852_v40 = vmul.f32 %v5410_v59, %v3087_v60  ;;  %v854_v32 = vmul.f32 %v5411_v46, %v3090_v61  ;;  %v5413_v24 = vld [vmem:[#allocation25_spill] sm:$0xff]  ;;  %v3846_v4 = vld [vmem:[#allocation2 + $0x3c0] sm:$0xff]  ;;  %v3881_v36 = vld [vmem:[#allocation2 + $0x310] sm:$0xff] }
  0xe5   :  { %v806_v27 = vadd.f32 %v804_v26, %v802_v57  ;;  %v876_v19 = vmul.f32 %v5412_v52, %v3108_v5  ;;  %2420 = vst.msk [vmem:[%s5118_s3 + $0x28] sm:$0xff] %vm51_vm0, %v972_v20  ;;  %v878_v14 = vmul.f32 %v5413_v24, %v3121_v10  ;;  %v900_v60 = vmul.f32 %v3124_v11, %v5400_v50  ;;  %v3838_v50 = vld [vmem:[#allocation2 + $0x1b0] sm:$0xff] }
  0xe6   :  { %v905_v39 = vadd.f32 %v903_v33, %v881_v42  ;;  %v830_v17 = vadd.f32 %v828_v35, %v826_v34  ;;  %v856_v0 = vadd.f32 %v854_v32, %v852_v40  ;;  %v902_v5 = vmul.f32 %v3127_v12, %v5399_v2  ;;  %5414 = vst [vmem:[#allocation32_spill] sm:$0xff] %v3838_v50 }
  0xe7   :  { %v808_v61 = vadd.f32 %v806_v27, %v782_v1  ;;  %v926_v7 = vmul.f32 %v3720_v13, %v3146_v21  ;;  %v880_v45 = vadd.f32 %v878_v14, %v876_v19  ;;  %v928_v10 = vmul.f32 %v3718_v38, %v3165_v31  ;;  %5415 = vst [vmem:[#allocation31_spill] sm:$0xff] %v3846_v4 }
  0xe8   :  { %v931_v33 = vadd.f32 %v929_v43, %v905_v39  ;;  %v950_v11 = vmul.f32 %v3524_v63, %v5354_v47  ;;  %v904_v2 = vadd.f32 %v902_v5, %v900_v60  ;;  %v952_v21 = vmul.f32 %v3522_v16, %v5355_v9  ;;  %5417 = vst [vmem:[#allocation20_spill] sm:$0xff] %v3881_v36 }
  0xe9   :  { %v832_v12 = vadd.f32 %v830_v17, %v808_v61  ;;  %v974_v43 = vmul.f32 %v5357_v28, %v3308_v49  ;;  %v930_v47 = vadd.f32 %v928_v10, %v926_v7  ;;  %v976_v62 = vmul.f32 %v5359_v3, %v3219_v23  ;;  %v3920_v10 = vld [vmem:[#allocation2 + $0x50] sm:$0xff] }
  0xea   :  { %v955_v31 = vadd.f32 %v953_v8, %v931_v33  ;;  %v3853_v57 = vstv %s3773_s7  ;;  %v954_v26 = vadd.f32 %v952_v21, %v950_v11  ;;  %v3860_v28 = vstv %s3781_s5  ;;  %5418 = vst [vmem:[#allocation19_spill] sm:$0xff] %v3920_v10  ;;  %s4507_s7 = sld [smem:[#allocation3 + $0xe]] }
  0xeb   :  { %v858_v9 = vadd.f32 %v856_v0, %v832_v12  ;;  %v996_v49 = vmul.f32 %v3853_v57, %v3838_v50  ;;  %v978_v51 = vadd.f32 %v976_v62, %v974_v43  ;;  %v999_v23 = vmul.f32 %v3860_v28, %v3846_v4  ;;  %v3932_v62 = vld [vmem:[#allocation2 + $0x260] sm:$0xff]  ;;  %s4520_s5 = sld [smem:[#allocation3 + $0xf]] }
  0xec   :  { %v979_v8 = vadd.f32 %v977_v18, %v955_v31  ;;  %v3867_v3 = vstv %s3785_s8  ;;  %v3874_v42 = vstv %s3793_s9  ;;  %v3877_v1 = vstv %s3797_s12  ;;  %v3879_v18 = vld [vmem:[#allocation2 + $0x100] sm:$0xff]  ;;  %5419 = vst [vmem:[#allocation14_spill] sm:$0xff] %v3932_v62  ;;  %s4528_s8 = sld [smem:[#allocation3 + $0x10]] }
  0xed   :  { %v882_v34 = vadd.f32 %v880_v45, %v858_v9  ;;  %v1020_v20 = vmul.f32 %v3867_v3, %v3632_v30  ;;  %5416 = vst [vmem:[#allocation12_spill] sm:$0xff] %v3879_v18  ;;  %v1001_v35 = vsub.f32 %v996_v49, %v999_v23  ;;  %v1023_v27 = vmul.f32 %v3874_v42, %v3634_v29 }
  0xee   :  { %2421 = vst.msk [vmem:[%s5119_s4 + $0x20] sm:$0xff] %vm51_vm0, %v979_v8  ;;  %v1044_v40 = vmul.f32 %v3877_v1, %v3357_v15  ;;  %v3894_v32 = vstv %s3805_s14  ;;  %v3901_v17 = vstv %s3808_s17  ;;  %v3904_v14 = vstv %s3816_s10  ;;  %s4545_s14 = sld [smem:[#allocation3 + $0x11]] }
  0xef   :  { %v906_v19 = vadd.f32 %v904_v2, %v882_v34  ;;  %v1047_v39 = vmul.f32 %v3894_v32, %v3359_v55  ;;  %v1025_v60 = vsub.f32 %v1020_v20, %v1023_v27  ;;  %v1070_v15 = vmul.f32 %v3901_v17, %v3879_v18 }
  0xf0   :  { %v1073_v61 = vmul.f32 %v3904_v14, %v3881_v36  ;;  %v3913_v0 = vstv %s3826_s16  ;;  %v3918_v45 = vstv %s3832_s2  ;;  %v3925_v21 = vstv %s3840_s18 }
  0xf1   :  { %v932_v5 = vadd.f32 %v930_v47, %v906_v19  ;;  %v1049_v7 = vsub.f32 %v1044_v40, %v1047_v39  ;;  %v1094_v33 = vmul.f32 %v3913_v0, %v5401_v58  ;;  %v1027_v11 = vadd.f32 %v1025_v60, %v1001_v35 }
  0xf2   :  { %v1075_v12 = vsub.f32 %v1070_v15, %v1073_v61  ;;  %v1097_v2 = vmul.f32 %v3918_v45, %v3654_v54  ;;  %v1118_v31 = vmul.f32 %v3925_v21, %v5403_v56  ;;  %v3930_v47 = vstv %s3848_s20  ;;  %v3956_v61 = vld [vmem:[#allocation2 + $0x3c8] sm:$0xff]  ;;  %s4413_s20 = sld [smem:[#allocation3]] }
  0xf3   :  { %v956_v43 = vadd.f32 %v954_v26, %v932_v5  ;;  %v3935_v9 = vstv %s3855_s24  ;;  %v1051_v49 = vadd.f32 %v1049_v7, %v1027_v11  ;;  %v1121_v23 = vmul.f32 %v3930_v47, %v5402_v22  ;;  %v3941_v26 = vld [vmem:[#allocation2 + $0x1b8] sm:$0xff]  ;;  %5421 = vst [vmem:[#allocation23_spill] sm:$0xff] %v3956_v61  ;;  %s4417_s24 = sld [smem:[#allocation3 + $0x1]] }
  0xf4   :  { %v1099_v8 = vsub.f32 %v1094_v33, %v1097_v2  ;;  %v1144_v34 = vmul.f32 %v3935_v9, %v3920_v10  ;;  %5420 = vst [vmem:[#allocation22_spill] sm:$0xff] %v3941_v26  ;;  %v3944_v35 = vstv %s3862_s28  ;;  %v3947_v27 = vstv %s3869_s6  ;;  %s4423_s28 = sld [smem:[#allocation3 + $0x2]] }
  0xf5   :  { %v980_v20 = vadd.f32 %v978_v51, %v956_v43  ;;  %v3950_v40 = vstv %s3883_s11  ;;  %v1077_v19 = vadd.f32 %v1075_v12, %v1051_v49  ;;  %v1123_v39 = vsub.f32 %v1118_v31, %v1121_v23  ;;  %v5422_v43 = vld [vmem:[#allocation30_spill] sm:$0xff]  ;;  %v3976_v49 = vld [vmem:[#allocation2 + $0x108] sm:$0xff]  ;;  %v3978_v23 = vld [vmem:[#allocation2 + $0x318] sm:$0xff]  ;;  %s4431_s6 = sld [smem:[#allocation3 + $0x3]] }
  0xf6   :  { %v1147_v60 = vmul.f32 %v3944_v35, %v3932_v62  ;;  %v1168_v15 = vmul.f32 %v3947_v27, %v5404_v25  ;;  %v1171_v51 = vmul.f32 %v3950_v40, %v3672_v48  ;;  %v3965_v5 = vstv %s3896_s23  ;;  %5423 = vst [vmem:[#allocation29_spill] sm:$0xff] %v3976_v49  ;;  %s4437_s11 = sld [smem:[#allocation3 + $0x4]] }
  0xf7   :  { %2422 = vst.msk [vmem:[%s5119_s4 + $0x28] sm:$0xff] %vm51_vm0, %v980_v20  ;;  %v3968_v7 = vstv %s3906_s25  ;;  %v997_v33 = vmul.f32 %v3853_v57, %v3941_v26  ;;  %v1101_v11 = vadd.f32 %v1099_v8, %v1077_v19  ;;  %v1192_v2 = vmul.f32 %v3965_v5, %v5406_v41  ;;  %s4455_s23 = sld [smem:[#allocation3 + $0x7]] }
  0xf8   :  { %v1149_v12 = vsub.f32 %v1144_v34, %v1147_v60  ;;  %v1195_v31 = vmul.f32 %v3968_v7, %v5422_v43  ;;  %5424 = vst [vmem:[#allocation28_spill] sm:$0xff] %v3978_v23  ;;  %v1173_v20 = vsub.f32 %v1168_v15, %v1171_v51  ;;  %v1000_v25 = vmul.f32 %v3860_v28, %v3956_v61  ;;  %v3996_v61 = vld [vmem:[#allocation2 + $0x268] sm:$0xff] }
  0xf9   :  { %v1021_v48 = vmul.f32 %v3867_v3, %v3684_v44  ;;  %v1024_v8 = vmul.f32 %v3874_v42, %v3686_v53  ;;  %v1125_v34 = vadd.f32 %v1123_v39, %v1101_v11  ;;  %v1045_v60 = vmul.f32 %v3877_v1, %v5380_v6  ;;  %v3994_v44 = vld [vmem:[#allocation2 + $0x58] sm:$0xff]  ;;  %5426 = vst [vmem:[#allocation18_spill] sm:$0xff] %v3996_v61 }
  0xfa   :  { %v1197_v19 = vsub.f32 %v1192_v2, %v1195_v31  ;;  %v1048_v26 = vmul.f32 %v3894_v32, %v5379_v37  ;;  %v1002_v41 = vsub.f32 %v997_v33, %v1000_v25  ;;  %v1071_v15 = vmul.f32 %v3901_v17, %v3976_v49  ;;  %5425 = vst [vmem:[#allocation27_spill] sm:$0xff] %v3994_v44 }
  0xfb   :  { %v1026_v43 = vsub.f32 %v1021_v48, %v1024_v8  ;;  %v1074_v51 = vmul.f32 %v3904_v14, %v3978_v23  ;;  %v1151_v39 = vadd.f32 %v1149_v12, %v1125_v34  ;;  %v1095_v2 = vmul.f32 %v3913_v0, %v5411_v46 }
  0xfc   :  { %v1050_v11 = vsub.f32 %v1045_v60, %v1048_v26  ;;  %v1098_v31 = vmul.f32 %v3918_v45, %v5410_v59  ;;  %v1119_v33 = vmul.f32 %v3925_v21, %v5413_v24  ;;  %v1122_v8 = vmul.f32 %v3930_v47, %v5412_v52 }
  0xfd   :  { %v1028_v25 = vadd.f32 %v1026_v43, %v1002_v41  ;;  %v1076_v48 = vsub.f32 %v1071_v15, %v1074_v51  ;;  %v1175_v49 = vadd.f32 %v1173_v20, %v1151_v39  ;;  %v1145_v12 = vmul.f32 %v3935_v9, %v3994_v44 }
  0xfe   :  { %v1100_v23 = vsub.f32 %v1095_v2, %v1098_v31  ;;  %v1148_v26 = vmul.f32 %v3944_v35, %v3996_v61  ;;  %v1124_v60 = vsub.f32 %v1119_v33, %v1122_v8  ;;  %v1169_v41 = vmul.f32 %v3947_v27, %v3718_v38 }
  0xff   :  { %v1052_v34 = vadd.f32 %v1050_v11, %v1028_v25  ;;  %v1172_v43 = vmul.f32 %v3950_v40, %v3720_v13  ;;  %v1199_v15 = vadd.f32 %v1197_v19, %v1175_v49  ;;  %v1193_v20 = vmul.f32 %v3965_v5, %v3522_v16 }
 0x100   :  { %v1150_v51 = vsub.f32 %v1145_v12, %v1148_v26  ;;  %v1196_v39 = vmul.f32 %v3968_v7, %v3524_v63  ;;  %v1005_v11 = vmul.f32 %v3853_v57, %v3846_v4  ;;  %v1007_v25 = vmul.f32 %v3860_v28, %v3838_v50  ;;  %v2552_v26 = vld [vmem:[#allocation2 + $0x190] sm:$0xff] }
 0x101   :  { %v1078_v2 = vadd.f32 %v1076_v48, %v1052_v34  ;;  %v1174_v31 = vsub.f32 %v1169_v41, %v1172_v43  ;;  %2440 = vst.msk [vmem:[%s5118_s3 + $0x30] sm:$0xff] %vm51_vm0, %v1199_v15  ;;  %v1029_v19 = vmul.f32 %v3867_v3, %v3634_v29  ;;  %v1031_v33 = vmul.f32 %v3874_v42, %v3632_v30 }
 0x102   :  { %v1198_v49 = vsub.f32 %v1193_v20, %v1196_v39  ;;  %v1053_v48 = vmul.f32 %v3877_v1, %v3359_v55  ;;  %v1009_v12 = vadd.f32 %v1007_v25, %v1005_v11  ;;  %v1055_v34 = vmul.f32 %v2552_v26, %v3894_v32 }
 0x103   :  { %v1102_v8 = vadd.f32 %v1100_v23, %v1078_v2  ;;  %v1079_v41 = vmul.f32 %v3901_v17, %v3881_v36  ;;  %v1033_v43 = vadd.f32 %v1031_v33, %v1029_v19  ;;  %v1081_v15 = vmul.f32 %v3904_v14, %v3879_v18 }
 0x104   :  { %v1103_v20 = vmul.f32 %v3913_v0, %v3654_v54  ;;  %v1105_v39 = vmul.f32 %v3918_v45, %v5401_v58  ;;  %v1057_v55 = vadd.f32 %v1055_v34, %v1053_v48  ;;  %v1127_v23 = vmul.f32 %v3925_v21, %v5402_v22  ;;  %v5427_v58 = vld [vmem:[#allocation13_spill] sm:$0xff]  ;;  %v5429_v34 = vld [vmem:[#allocation30_spill] sm:$0xff] }
 0x105   :  { %v1126_v29 = vadd.f32 %v1124_v60, %v1102_v8  ;;  %v1129_v2 = vmul.f32 %v3930_v47, %v5403_v56  ;;  %v1035_v11 = vadd.f32 %v1033_v43, %v1009_v12  ;;  %v1083_v25 = vadd.f32 %v1081_v15, %v1079_v41  ;;  %v5428_v8 = vld [vmem:[#allocation11_spill] sm:$0xff]  ;;  %v5430_v12 = vld [vmem:[#allocation6_spill] sm:$0xff] }
 0x106   :  { %v1107_v19 = vadd.f32 %v1105_v39, %v1103_v20  ;;  %v1153_v33 = vmul.f32 %v3935_v9, %v3932_v62  ;;  %v1155_v54 = vmul.f32 %v3944_v35, %v3920_v10  ;;  %v1177_v60 = vmul.f32 %v3947_v27, %v5427_v58  ;;  %v5432_v20 = vld [vmem:[#allocation22_spill] sm:$0xff] }
 0x107   :  { %v1152_v26 = vadd.f32 %v1150_v51, %v1126_v29  ;;  %v1131_v36 = vadd.f32 %v1129_v2, %v1127_v23  ;;  %v1059_v48 = vadd.f32 %v1057_v55, %v1035_v11  ;;  %v1179_v22 = vmul.f32 %v3950_v40, %v5428_v8  ;;  %v5431_v29 = vld [vmem:[#allocation23_spill] sm:$0xff] }
 0x108   :  { %v1201_v56 = vmul.f32 %v3965_v5, %v5429_v34  ;;  %v1203_v41 = vmul.f32 %v3968_v7, %v5430_v12  ;;  %v1157_v15 = vadd.f32 %v1155_v54, %v1153_v33  ;;  %v1006_v51 = vmul.f32 %v3853_v57, %v5431_v29  ;;  %v5433_v34 = vld [vmem:[#allocation16_spill] sm:$0xff] }
 0x109   :  { %v1176_v43 = vadd.f32 %v1174_v31, %v1152_v26  ;;  %v1008_v39 = vmul.f32 %v3860_v28, %v5432_v20  ;;  %v1085_v23 = vadd.f32 %v1083_v25, %v1059_v48  ;;  %v1181_v2 = vadd.f32 %v1179_v22, %v1177_v60  ;;  %v5434_v26 = vld [vmem:[#allocation28_spill] sm:$0xff]  ;;  %v5435_v60 = vld [vmem:[#allocation29_spill] sm:$0xff] }
 0x10a   :  { %v1205_v55 = vadd.f32 %v1203_v41, %v1201_v56  ;;  %v1030_v11 = vmul.f32 %v3867_v3, %v3686_v53  ;;  %v1032_v62 = vmul.f32 %v3874_v42, %v5433_v34  ;;  %v1054_v54 = vmul.f32 %v3877_v1, %v5379_v37 }
 0x10b   :  { %v1200_v58 = vadd.f32 %v1198_v49, %v1176_v43  ;;  %v1010_v8 = vadd.f32 %v1008_v39, %v1006_v51  ;;  %v1109_v31 = vadd.f32 %v1107_v19, %v1085_v23  ;;  %v1056_v33 = vmul.f32 %v3894_v32, %v5380_v6  ;;  %v4089_v39 = vld [vmem:[#allocation2 + $0x1c0] sm:$0xff]  ;;  %v4091_v23 = vld [vmem:[#allocation2 + $0x3d0] sm:$0xff] }
 0x10c   :  { %v1080_v25 = vmul.f32 %v3901_v17, %v5434_v26  ;;  %v1082_v48 = vmul.f32 %v3904_v14, %v5435_v60  ;;  %v1034_v49 = vadd.f32 %v1032_v62, %v1030_v11  ;;  %v1104_v22 = vmul.f32 %v3913_v0, %v5410_v59  ;;  %5436 = vst [vmem:[#allocation17_spill] sm:$0xff] %v4089_v39 }
 0x10d   :  { %2441 = vst.msk [vmem:[%s5118_s3 + $0x38] sm:$0xff] %vm51_vm0, %v1200_v58  ;;  %v1106_v37 = vmul.f32 %v3918_v45, %v5411_v46  ;;  %v1128_v6 = vmul.f32 %v3925_v21, %v5412_v52  ;;  %v1133_v19 = vadd.f32 %v1131_v36, %v1109_v31  ;;  %v1058_v56 = vadd.f32 %v1056_v33, %v1054_v54 }
 0x10e   :  { %v1084_v12 = vadd.f32 %v1082_v48, %v1080_v25  ;;  %v1130_v41 = vmul.f32 %v3930_v47, %v5413_v24  ;;  %v1036_v43 = vadd.f32 %v1034_v49, %v1010_v8  ;;  %v1154_v58 = vmul.f32 %v3935_v9, %v3996_v61  ;;  %5437 = vst [vmem:[#allocation24_spill] sm:$0xff] %v4091_v23 }
 0x10f   :  { %v1108_v51 = vadd.f32 %v1106_v37, %v1104_v22  ;;  %v1156_v62 = vmul.f32 %v3944_v35, %v3994_v44  ;;  %v1159_v11 = vadd.f32 %v1157_v15, %v1133_v19  ;;  %v1178_v36 = vmul.f32 %v3947_v27, %v3720_v13  ;;  %v4105_v22 = vld [vmem:[#allocation2 + $0x110] sm:$0xff]  ;;  %v4107_v37 = vld [vmem:[#allocation2 + $0x320] sm:$0xff] }
 0x110   :  { %v1132_v52 = vadd.f32 %v1130_v41, %v1128_v6  ;;  %v1180_v24 = vmul.f32 %v3950_v40, %v3718_v38  ;;  %v1060_v8 = vadd.f32 %v1058_v56, %v1036_v43  ;;  %v1202_v31 = vmul.f32 %v3965_v5, %v3524_v63  ;;  %5438 = vst [vmem:[#allocation15_spill] sm:$0xff] %v4105_v22  ;;  %v5440_v43 = vld [vmem:[#allocation10_spill] sm:$0xff] }
 0x111   :  { %v1158_v54 = vadd.f32 %v1156_v62, %v1154_v58  ;;  %v1204_v33 = vmul.f32 %v3968_v7, %v3522_v16  ;;  %v1183_v25 = vadd.f32 %v1181_v2, %v1159_v11  ;;  %v1224_v15 = vmul.f32 %v4089_v39, %v3853_v57  ;;  %5439 = vst [vmem:[#allocation26_spill] sm:$0xff] %v4107_v37 }
 0x112   :  { %v1182_v48 = vadd.f32 %v1180_v24, %v1178_v36  ;;  %v1227_v49 = vmul.f32 %v4091_v23, %v3860_v28  ;;  %v1086_v6 = vadd.f32 %v1084_v12, %v1060_v8  ;;  %v1248_v63 = vmul.f32 %v3867_v3, %v3838_v50  ;;  %v4121_v24 = vld [vmem:[#allocation2 + $0x60] sm:$0xff]  ;;  %v4123_v8 = vld [vmem:[#allocation2 + $0x270] sm:$0xff] }
 0x113   :  { %v1206_v19 = vadd.f32 %v1204_v33, %v1202_v31  ;;  %v1251_v16 = vmul.f32 %v3874_v42, %v3846_v4  ;;  %v1207_v2 = vadd.f32 %v1205_v55, %v1183_v25  ;;  %v1272_v41 = vmul.f32 %v3877_v1, %v3632_v30  ;;  %5441 = vst [vmem:[#allocation25_spill] sm:$0xff] %v4121_v24  ;;  %v5443_v31 = vld [vmem:[#allocation20_spill] sm:$0xff]  ;;  %v5444_v25 = vld [vmem:[#allocation9_spill] sm:$0xff] }
 0x114   :  { %v1229_v56 = vsub.f32 %v1224_v15, %v1227_v49  ;;  %v1275_v58 = vmul.f32 %v3894_v32, %v5440_v43  ;;  %v1110_v62 = vadd.f32 %v1108_v51, %v1086_v6  ;;  %v1298_v12 = vmul.f32 %v4105_v22, %v3901_v17  ;;  %5442 = vst [vmem:[#allocation30_spill] sm:$0xff] %v4123_v8 }
 0x115   :  { %v1253_v11 = vsub.f32 %v1248_v63, %v1251_v16  ;;  %v1301_v36 = vmul.f32 %v4107_v37, %v3904_v14  ;;  %2442 = vst.msk [vmem:[%s5119_s4 + $0x30] sm:$0xff] %vm51_vm0, %v1207_v2  ;;  %v1322_v51 = vmul.f32 %v3913_v0, %v3879_v18  ;;  %v1325_v33 = vmul.f32 %v3918_v45, %v5443_v31  ;;  %v5445_v16 = vld [vmem:[#allocation7_spill] sm:$0xff]  ;;  %v4145_v18 = vld [vmem:[#allocation2 + $0x3d8] sm:$0xff] }
 0x116   :  { %v1277_v55 = vsub.f32 %v1272_v41, %v1275_v58  ;;  %v1346_v15 = vmul.f32 %v3925_v21, %v5444_v25  ;;  %v1134_v49 = vadd.f32 %v1132_v52, %v1110_v62  ;;  %v1349_v22 = vmul.f32 %v3930_v47, %v5445_v16  ;;  %v4137_v37 = vld [vmem:[#allocation2 + $0x1c8] sm:$0xff] }
 0x117   :  { %v1255_v6 = vadd.f32 %v1253_v11, %v1229_v56  ;;  %v1303_v63 = vsub.f32 %v1298_v12, %v1301_v36  ;;  %5446 = vst [vmem:[#allocation6_spill] sm:$0xff] %v4137_v37  ;;  %v1327_v30 = vsub.f32 %v1322_v51, %v1325_v33  ;;  %v1372_v2 = vmul.f32 %v4121_v24, %v3935_v9  ;;  %v5447_v11 = vld [vmem:[#allocation14_spill] sm:$0xff]  ;;  %v5448_v25 = vld [vmem:[#allocation11_spill] sm:$0xff]  ;;  %v5449_v33 = vld [vmem:[#allocation13_spill] sm:$0xff] }
 0x118   :  { %v1375_v41 = vmul.f32 %v4123_v8, %v3944_v35  ;;  %v1396_v58 = vmul.f32 %v3947_v27, %v3920_v10  ;;  %v1160_v52 = vadd.f32 %v1158_v54, %v1134_v49  ;;  %v1351_v62 = vsub.f32 %v1346_v15, %v1349_v22  ;;  %v4157_v22 = vld [vmem:[#allocation2 + $0x118] sm:$0xff] }
 0x119   :  { %v1279_v56 = vadd.f32 %v1277_v55, %v1255_v6  ;;  %v1399_v12 = vmul.f32 %v3950_v40, %v5447_v11  ;;  %v1420_v51 = vmul.f32 %v3965_v5, %v5448_v25  ;;  %v1423_v24 = vmul.f32 %v3968_v7, %v5449_v33  ;;  %5450 = vst [vmem:[#allocation23_spill] sm:$0xff] %v4157_v22  ;;  %v4159_v55 = vld [vmem:[#allocation2 + $0x328] sm:$0xff] }
 0x11a   :  { %v1377_v36 = vsub.f32 %v1372_v2, %v1375_v41  ;;  %v1225_v8 = vmul.f32 %v4137_v37, %v3853_v57  ;;  %v1184_v16 = vadd.f32 %v1182_v48, %v1160_v52  ;;  %v1228_v54 = vmul.f32 %v4145_v18, %v3860_v28  ;;  %v4169_v52 = vld [vmem:[#allocation2 + $0x68] sm:$0xff] }
 0x11b   :  { %v1305_v10 = vadd.f32 %v1303_v63, %v1279_v56  ;;  %v1401_v31 = vsub.f32 %v1396_v58, %v1399_v12  ;;  %v1425_v15 = vsub.f32 %v1420_v51, %v1423_v24  ;;  %v1249_v49 = vmul.f32 %v3867_v3, %v5432_v20  ;;  %5451 = vst [vmem:[#allocation16_spill] sm:$0xff] %v4169_v52  ;;  %v4177_v20 = vld [vmem:[#allocation2 + $0x278] sm:$0xff] }
 0x11c   :  { %v1252_v6 = vmul.f32 %v3874_v42, %v5431_v29  ;;  %v1273_v2 = vmul.f32 %v3877_v1, %v5433_v34  ;;  %v1208_v48 = vadd.f32 %v1206_v19, %v1184_v16  ;;  %v1230_v41 = vsub.f32 %v1225_v8, %v1228_v54 }
 0x11d   :  { %v1329_v63 = vadd.f32 %v1327_v30, %v1305_v10  ;;  %v1276_v58 = vmul.f32 %v3894_v32, %v3686_v53  ;;  %v1299_v24 = vmul.f32 %v4157_v22, %v3901_v17  ;;  %v1302_v12 = vmul.f32 %v4159_v55, %v3904_v14 }
 0x11e   :  { %v1254_v56 = vsub.f32 %v1249_v49, %v1252_v6  ;;  %v1323_v51 = vmul.f32 %v3913_v0, %v5435_v60  ;;  %2443 = vst.msk [vmem:[%s5119_s4 + $0x38] sm:$0xff] %vm51_vm0, %v1208_v48  ;;  %v1326_v19 = vmul.f32 %v3918_v45, %v5434_v26  ;;  %v1347_v8 = vmul.f32 %v3925_v21, %v5411_v46 }
 0x11f   :  { %v1353_v30 = vadd.f32 %v1351_v62, %v1329_v63  ;;  %v1278_v10 = vsub.f32 %v1273_v2, %v1276_v58  ;;  %v1304_v54 = vsub.f32 %v1299_v24, %v1302_v12  ;;  %v1350_v49 = vmul.f32 %v3930_v47, %v5410_v59 }
 0x120   :  { %v1256_v16 = vadd.f32 %v1254_v56, %v1230_v41  ;;  %v1373_v6 = vmul.f32 %v4169_v52, %v3935_v9  ;;  %v1328_v22 = vsub.f32 %v1323_v51, %v1326_v19  ;;  %v1376_v62 = vmul.f32 %v4177_v20, %v3944_v35 }
 0x121   :  { %v1379_v60 = vadd.f32 %v1377_v36, %v1353_v30  ;;  %v1397_v2 = vmul.f32 %v3947_v27, %v3994_v44  ;;  %v1352_v63 = vsub.f32 %v1347_v8, %v1350_v49  ;;  %v1400_v41 = vmul.f32 %v3950_v40, %v3996_v61 }
 0x122   :  { %v1280_v48 = vadd.f32 %v1278_v10, %v1256_v16  ;;  %v1421_v58 = vmul.f32 %v3965_v5, %v3718_v38  ;;  %v1378_v24 = vsub.f32 %v1373_v6, %v1376_v62  ;;  %v1424_v36 = vmul.f32 %v3968_v7, %v3720_v13  ;;  %v5452_v62 = vld [vmem:[#allocation8_spill] sm:$0xff] }
 0x123   :  { %v1403_v56 = vadd.f32 %v1401_v31, %v1379_v60  ;;  %v1233_v12 = vmul.f32 %v4091_v23, %v3853_v57  ;;  %v1402_v30 = vsub.f32 %v1397_v2, %v1400_v41  ;;  %v1235_v10 = vmul.f32 %v4089_v39, %v3860_v28  ;;  %v5453_v2 = vld [vmem:[#allocation26_spill] sm:$0xff]  ;;  %v5454_v41 = vld [vmem:[#allocation15_spill] sm:$0xff] }
 0x124   :  { %v1306_v51 = vadd.f32 %v1304_v54, %v1280_v48  ;;  %v1257_v19 = vmul.f32 %v3867_v3, %v3846_v4  ;;  %v1426_v16 = vsub.f32 %v1421_v58, %v1424_v36  ;;  %v1259_v60 = vmul.f32 %v3874_v42, %v3838_v50 }
 0x125   :  { %v1427_v8 = vadd.f32 %v1425_v15, %v1403_v56  ;;  %v1281_v31 = vmul.f32 %v3877_v1, %v5440_v43  ;;  %v1237_v6 = vadd.f32 %v1235_v10, %v1233_v12  ;;  %v1283_v54 = vmul.f32 %v3894_v32, %v5452_v62  ;;  %v5455_v56 = vld [vmem:[#allocation20_spill] sm:$0xff]  ;;  %v5457_v10 = vld [vmem:[#allocation7_spill] sm:$0xff] }
 0x126   :  { %v1330_v49 = vadd.f32 %v1328_v22, %v1306_v51  ;;  %v1307_v48 = vmul.f32 %v5453_v2, %v3901_v17  ;;  %v1261_v15 = vadd.f32 %v1259_v60, %v1257_v19  ;;  %v1309_v58 = vmul.f32 %v5454_v41, %v3904_v14  ;;  %v5456_v22 = vld [vmem:[#allocation12_spill] sm:$0xff]  ;;  %v5458_v2 = vld [vmem:[#allocation9_spill] sm:$0xff]  ;;  %v5459_v60 = vld [vmem:[#allocation30_spill] sm:$0xff] }
 0x127   :  { %2461 = vst.msk [vmem:[%s5118_s3 + $0x40] sm:$0xff] %vm51_vm0, %v1427_v8  ;;  %v1331_v43 = vmul.f32 %v3913_v0, %v5455_v56  ;;  %v1333_v36 = vmul.f32 %v3918_v45, %v5456_v22  ;;  %v1285_v51 = vadd.f32 %v1283_v54, %v1281_v31  ;;  %v1355_v62 = vmul.f32 %v3925_v21, %v5457_v10  ;;  %v5460_v56 = vld [vmem:[#allocation25_spill] sm:$0xff] }
 0x128   :  { %v1354_v12 = vadd.f32 %v1352_v63, %v1330_v49  ;;  %v1357_v4 = vmul.f32 %v3930_v47, %v5458_v2  ;;  %v1263_v50 = vadd.f32 %v1261_v15, %v1237_v6  ;;  %v1311_v8 = vadd.f32 %v1309_v58, %v1307_v48  ;;  %v5461_v49 = vld [vmem:[#allocation19_spill] sm:$0xff] }
 0x129   :  { %v1335_v19 = vadd.f32 %v1333_v36, %v1331_v43  ;;  %v1381_v41 = vmul.f32 %v5459_v60, %v3935_v9  ;;  %v1383_v38 = vmul.f32 %v5460_v56, %v3944_v35  ;;  %v1405_v63 = vmul.f32 %v3947_v27, %v5447_v11 }
 0x12a   :  { %v1380_v23 = vadd.f32 %v1378_v24, %v1354_v12  ;;  %v1359_v39 = vadd.f32 %v1357_v4, %v1355_v62  ;;  %v1287_v31 = vadd.f32 %v1285_v51, %v1263_v50  ;;  %v1407_v54 = vmul.f32 %v3950_v40, %v5461_v49 }
 0x12b   :  { %v1429_v6 = vmul.f32 %v3965_v5, %v5449_v33  ;;  %v1431_v2 = vmul.f32 %v3968_v7, %v5448_v25  ;;  %v1385_v15 = vadd.f32 %v1383_v38, %v1381_v41  ;;  %v1234_v4 = vmul.f32 %v4145_v18, %v3853_v57  ;;  %v5462_v33 = vld [vmem:[#allocation22_spill] sm:$0xff]  ;;  %v5463_v41 = vld [vmem:[#allocation23_spill] sm:$0xff] }
 0x12c   :  { %v1404_v48 = vadd.f32 %v1402_v30, %v1380_v23  ;;  %v1236_v24 = vmul.f32 %v4137_v37, %v3860_v28  ;;  %v1313_v58 = vadd.f32 %v1311_v8, %v1287_v31  ;;  %v1409_v43 = vadd.f32 %v1407_v54, %v1405_v63 }
 0x12d   :  { %v1433_v50 = vadd.f32 %v1431_v2, %v1429_v6  ;;  %v1258_v36 = vmul.f32 %v3867_v3, %v5431_v29  ;;  %v1260_v10 = vmul.f32 %v3874_v42, %v5462_v33  ;;  %v1282_v38 = vmul.f32 %v3877_v1, %v3686_v53  ;;  %v5464_v53 = vld [vmem:[#allocation29_spill] sm:$0xff] }
 0x12e   :  { %v1428_v12 = vadd.f32 %v1426_v16, %v1404_v48  ;;  %v1238_v51 = vadd.f32 %v1236_v24, %v1234_v4  ;;  %v1337_v23 = vadd.f32 %v1335_v19, %v1313_v58  ;;  %v1284_v25 = vmul.f32 %v3894_v32, %v5433_v34  ;;  %v4273_v58 = vld [vmem:[#allocation2 + $0x1d0] sm:$0xff] }
 0x12f   :  { %v1308_v30 = vmul.f32 %v4159_v55, %v3901_v17  ;;  %v1310_v62 = vmul.f32 %v5463_v41, %v3904_v14  ;;  %v1262_v16 = vadd.f32 %v1260_v10, %v1258_v36  ;;  %v1332_v8 = vmul.f32 %v3913_v0, %v5434_v26  ;;  %5465 = vst [vmem:[#allocation28_spill] sm:$0xff] %v4273_v58  ;;  %v4275_v36 = vld [vmem:[#allocation2 + $0x3e0] sm:$0xff] }
 0x130   :  { %2462 = vst.msk [vmem:[%s5118_s3 + $0x48] sm:$0xff] %vm51_vm0, %v1428_v12  ;;  %v1334_v19 = vmul.f32 %v3918_v45, %v5464_v53  ;;  %v1356_v34 = vmul.f32 %v3925_v21, %v5410_v59  ;;  %v1361_v63 = vadd.f32 %v1359_v39, %v1337_v23  ;;  %v1286_v31 = vadd.f32 %v1284_v25, %v1282_v38  ;;  %v5467_v23 = vld [vmem:[#allocation21_spill] sm:$0xff] }
 0x131   :  { %v1312_v54 = vadd.f32 %v1310_v62, %v1308_v30  ;;  %v1358_v6 = vmul.f32 %v3930_v47, %v5411_v46  ;;  %v1264_v2 = vadd.f32 %v1262_v16, %v1238_v51  ;;  %v1382_v4 = vmul.f32 %v4177_v20, %v3935_v9  ;;  %5466 = vst [vmem:[#allocation10_spill] sm:$0xff] %v4275_v36 }
 0x132   :  { %v1336_v48 = vadd.f32 %v1334_v19, %v1332_v8  ;;  %v1384_v24 = vmul.f32 %v4169_v52, %v3944_v35  ;;  %v1387_v12 = vadd.f32 %v1385_v15, %v1361_v63  ;;  %v1406_v39 = vmul.f32 %v3947_v27, %v3996_v61  ;;  %v4289_v8 = vld [vmem:[#allocation2 + $0x120] sm:$0xff]  ;;  %v4291_v19 = vld [vmem:[#allocation2 + $0x330] sm:$0xff] }
 0x133   :  { %v1360_v59 = vadd.f32 %v1358_v6, %v1356_v34  ;;  %v1408_v46 = vmul.f32 %v3950_v40, %v3994_v44  ;;  %v1288_v51 = vadd.f32 %v1286_v31, %v1264_v2  ;;  %v1430_v38 = vmul.f32 %v3965_v5, %v3720_v13  ;;  %5468 = vst [vmem:[#allocation14_spill] sm:$0xff] %v4289_v8  ;;  %v5470_v31 = vld [vmem:[#allocation17_spill] sm:$0xff]  ;;  %v5471_v6 = vld [vmem:[#allocation24_spill] sm:$0xff] }
 0x134   :  { %v1386_v10 = vadd.f32 %v1384_v24, %v1382_v4  ;;  %v1432_v25 = vmul.f32 %v3968_v7, %v5467_v23  ;;  %v1411_v30 = vadd.f32 %v1409_v43, %v1387_v12  ;;  %v1452_v15 = vmul.f32 %v4273_v58, %v3853_v57  ;;  %5469 = vst [vmem:[#allocation11_spill] sm:$0xff] %v4291_v19  ;;  %v5472_v24 = vld [vmem:[#allocation32_spill] sm:$0xff] }
 0x135   :  { %v1410_v62 = vadd.f32 %v1408_v46, %v1406_v39  ;;  %v1455_v16 = vmul.f32 %v4275_v36, %v3860_v28  ;;  %v1314_v34 = vadd.f32 %v1312_v54, %v1288_v51  ;;  %v1476_v13 = vmul.f32 %v5470_v31, %v3867_v3  ;;  %v5473_v39 = vld [vmem:[#allocation31_spill] sm:$0xff] }
 0x136   :  { %v1434_v63 = vadd.f32 %v1432_v25, %v1430_v38  ;;  %v1479_v2 = vmul.f32 %v5471_v6, %v3874_v42  ;;  %v1435_v43 = vadd.f32 %v1433_v50, %v1411_v30  ;;  %v1500_v12 = vmul.f32 %v3877_v1, %v5472_v24  ;;  %v4305_v38 = vld [vmem:[#allocation2 + $0x70] sm:$0xff]  ;;  %v4307_v25 = vld [vmem:[#allocation2 + $0x280] sm:$0xff]  ;;  %v5476_v30 = vld [vmem:[#allocation15_spill] sm:$0xff] }
 0x137   :  { %v1457_v4 = vsub.f32 %v1452_v15, %v1455_v16  ;;  %v1503_v46 = vmul.f32 %v3894_v32, %v5473_v39  ;;  %v1338_v23 = vadd.f32 %v1336_v48, %v1314_v34  ;;  %v1526_v54 = vmul.f32 %v4289_v8, %v3901_v17  ;;  %5474 = vst [vmem:[#allocation13_spill] sm:$0xff] %v4305_v38  ;;  %v5477_v15 = vld [vmem:[#allocation26_spill] sm:$0xff]  ;;  %v4321_v39 = vld [vmem:[#allocation2 + $0x1d8] sm:$0xff] }
 0x138   :  { %v1481_v58 = vsub.f32 %v1476_v13, %v1479_v2  ;;  %v1529_v51 = vmul.f32 %v4291_v19, %v3904_v14  ;;  %5475 = vst [vmem:[#allocation8_spill] sm:$0xff] %v4307_v25  ;;  %v1550_v48 = vmul.f32 %v5476_v30, %v3913_v0  ;;  %v1553_v16 = vmul.f32 %v5477_v15, %v3918_v45  ;;  %v5478_v19 = vld [vmem:[#allocation20_spill] sm:$0xff]  ;;  %v4329_v30 = vld [vmem:[#allocation2 + $0x3e8] sm:$0xff] }
 0x139   :  { %2463 = vst.msk [vmem:[%s5119_s4 + $0x40] sm:$0xff] %vm51_vm0, %v1435_v43  ;;  %v1505_v50 = vsub.f32 %v1500_v12, %v1503_v46  ;;  %v1574_v34 = vmul.f32 %v3925_v21, %v5456_v22  ;;  %v1362_v13 = vadd.f32 %v1360_v59, %v1338_v23  ;;  %v1577_v24 = vmul.f32 %v3930_v47, %v5478_v19 }
 0x13a   :  { %v1483_v2 = vadd.f32 %v1481_v58, %v1457_v4  ;;  %v1531_v8 = vsub.f32 %v1526_v54, %v1529_v51  ;;  %5479 = vst [vmem:[#allocation12_spill] sm:$0xff] %v4321_v39  ;;  %v1555_v31 = vsub.f32 %v1550_v48, %v1553_v16  ;;  %v1600_v43 = vmul.f32 %v4305_v38, %v3935_v9 }
 0x13b   :  { %v1603_v12 = vmul.f32 %v4307_v25, %v3944_v35  ;;  %v1624_v46 = vmul.f32 %v5460_v56, %v3947_v27  ;;  %5480 = vst [vmem:[#allocation7_spill] sm:$0xff] %v4329_v30  ;;  %v1388_v59 = vadd.f32 %v1386_v10, %v1362_v13  ;;  %v1579_v4 = vsub.f32 %v1574_v34, %v1577_v24  ;;  %v4341_v24 = vld [vmem:[#allocation2 + $0x128] sm:$0xff] }
 0x13c   :  { %v1507_v58 = vadd.f32 %v1505_v50, %v1483_v2  ;;  %v1627_v23 = vmul.f32 %v5459_v60, %v3950_v40  ;;  %v1648_v51 = vmul.f32 %v3965_v5, %v5461_v49  ;;  %v1651_v48 = vmul.f32 %v3968_v7, %v5447_v11  ;;  %5481 = vst [vmem:[#allocation9_spill] sm:$0xff] %v4341_v24  ;;  %v4343_v50 = vld [vmem:[#allocation2 + $0x338] sm:$0xff] }
 0x13d   :  { %v1605_v54 = vsub.f32 %v1600_v43, %v1603_v12  ;;  %v1453_v16 = vmul.f32 %v4321_v39, %v3853_v57  ;;  %v1412_v38 = vadd.f32 %v1410_v62, %v1388_v59  ;;  %v1456_v10 = vmul.f32 %v4329_v30, %v3860_v28  ;;  %5482 = vst [vmem:[#allocation19_spill] sm:$0xff] %v4343_v50  ;;  %v4353_v59 = vld [vmem:[#allocation2 + $0x78] sm:$0xff] }
 0x13e   :  { %v1533_v56 = vadd.f32 %v1531_v8, %v1507_v58  ;;  %v1629_v25 = vsub.f32 %v1624_v46, %v1627_v23  ;;  %v1653_v34 = vsub.f32 %v1648_v51, %v1651_v48  ;;  %v1477_v13 = vmul.f32 %v4137_v37, %v3867_v3  ;;  %v4361_v37 = vld [vmem:[#allocation2 + $0x288] sm:$0xff] }
 0x13f   :  { %v1480_v2 = vmul.f32 %v4145_v18, %v3874_v42  ;;  %v1501_v43 = vmul.f32 %v3877_v1, %v5462_v33  ;;  %v1436_v62 = vadd.f32 %v1434_v63, %v1412_v38  ;;  %v1458_v12 = vsub.f32 %v1453_v16, %v1456_v10 }
 0x140   :  { %v1557_v8 = vadd.f32 %v1555_v31, %v1533_v56  ;;  %v1504_v46 = vmul.f32 %v3894_v32, %v5431_v29  ;;  %v1527_v23 = vmul.f32 %v4341_v24, %v3901_v17  ;;  %v1530_v51 = vmul.f32 %v4343_v50, %v3904_v14 }
 0x141   :  { %v1482_v58 = vsub.f32 %v1477_v13, %v1480_v2  ;;  %v1551_v48 = vmul.f32 %v5463_v41, %v3913_v0  ;;  %2464 = vst.msk [vmem:[%s5119_s4 + $0x48] sm:$0xff] %vm51_vm0, %v1436_v62  ;;  %v1554_v31 = vmul.f32 %v4159_v55, %v3918_v45  ;;  %v1575_v38 = vmul.f32 %v3925_v21, %v5464_v53 }
 0x142   :  { %v1581_v56 = vadd.f32 %v1579_v4, %v1557_v8  ;;  %v1506_v63 = vsub.f32 %v1501_v43, %v1504_v46  ;;  %v1532_v10 = vsub.f32 %v1527_v23, %v1530_v51  ;;  %v1578_v13 = vmul.f32 %v3930_v47, %v5434_v26 }
 0x143   :  { %v1484_v16 = vadd.f32 %v1482_v58, %v1458_v12  ;;  %v1601_v2 = vmul.f32 %v4353_v59, %v3935_v9  ;;  %v1556_v24 = vsub.f32 %v1551_v48, %v1554_v31  ;;  %v1604_v4 = vmul.f32 %v4361_v37, %v3944_v35  ;;  %v5483_v31 = vld [vmem:[#allocation28_spill] sm:$0xff] }
 0x144   :  { %v1607_v41 = vadd.f32 %v1605_v54, %v1581_v56  ;;  %v1625_v43 = vmul.f32 %v4169_v52, %v3947_v27  ;;  %v1580_v8 = vsub.f32 %v1575_v38, %v1578_v13  ;;  %v1628_v12 = vmul.f32 %v4177_v20, %v3950_v40  ;;  %v5486_v52 = vld [vmem:[#allocation32_spill] sm:$0xff] }
 0x145   :  { %v1508_v62 = vadd.f32 %v1506_v63, %v1484_v16  ;;  %v1649_v46 = vmul.f32 %v3965_v5, %v3994_v44  ;;  %v1606_v23 = vsub.f32 %v1601_v2, %v1604_v4  ;;  %v1652_v54 = vmul.f32 %v3968_v7, %v3996_v61  ;;  %v5484_v44 = vld [vmem:[#allocation17_spill] sm:$0xff] }
 0x146   :  { %v1631_v58 = vadd.f32 %v1629_v25, %v1607_v41  ;;  %v1461_v51 = vmul.f32 %v4275_v36, %v3853_v57  ;;  %v1630_v56 = vsub.f32 %v1625_v43, %v1628_v12  ;;  %v1463_v63 = vmul.f32 %v5483_v31, %v3860_v28  ;;  %v5485_v25 = vld [vmem:[#allocation31_spill] sm:$0xff]  ;;  %v5488_v12 = vld [vmem:[#allocation14_spill] sm:$0xff] }
 0x147   :  { %v1534_v48 = vadd.f32 %v1532_v10, %v1508_v62  ;;  %v1485_v38 = vmul.f32 %v5471_v6, %v3867_v3  ;;  %v1654_v13 = vsub.f32 %v1649_v46, %v1652_v54  ;;  %v1487_v41 = vmul.f32 %v5484_v44, %v3874_v42  ;;  %v5487_v43 = vld [vmem:[#allocation11_spill] sm:$0xff] }
 0x148   :  { %v1655_v16 = vadd.f32 %v1653_v34, %v1631_v58  ;;  %v1509_v2 = vmul.f32 %v3877_v1, %v5485_v25  ;;  %v1465_v61 = vadd.f32 %v1463_v63, %v1461_v51  ;;  %v1511_v10 = vmul.f32 %v3894_v32, %v5486_v52  ;;  %v5490_v25 = vld [vmem:[#allocation8_spill] sm:$0xff] }
 0x149   :  { %v1558_v4 = vadd.f32 %v1556_v24, %v1534_v48  ;;  %v1535_v62 = vmul.f32 %v5487_v43, %v3901_v17  ;;  %v1489_v34 = vadd.f32 %v1487_v41, %v1485_v38  ;;  %v1537_v46 = vmul.f32 %v5488_v12, %v3904_v14  ;;  %v5489_v24 = vld [vmem:[#allocation15_spill] sm:$0xff] }
 0x14a   :  { %2482 = vst.msk [vmem:[%s5118_s3 + $0x50] sm:$0xff] %vm51_vm0, %v1655_v16  ;;  %v1559_v58 = vmul.f32 %v5477_v15, %v3913_v0  ;;  %v1561_v54 = vmul.f32 %v5489_v24, %v3918_v45  ;;  %v1513_v52 = vadd.f32 %v1511_v10, %v1509_v2  ;;  %v1583_v48 = vmul.f32 %v3925_v21, %v5478_v19 }
 0x14b   :  { %v1582_v51 = vadd.f32 %v1580_v8, %v1558_v4  ;;  %v1585_v63 = vmul.f32 %v3930_v47, %v5456_v22  ;;  %v1491_v38 = vadd.f32 %v1489_v34, %v1465_v61  ;;  %v1539_v16 = vadd.f32 %v1537_v46, %v1535_v62  ;;  %v5491_v8 = vld [vmem:[#allocation13_spill] sm:$0xff] }
 0x14c   :  { %v1563_v41 = vadd.f32 %v1561_v54, %v1559_v58  ;;  %v1609_v43 = vmul.f32 %v5490_v25, %v3935_v9  ;;  %v1611_v2 = vmul.f32 %v5491_v8, %v3944_v35  ;;  %v1633_v19 = vmul.f32 %v5459_v60, %v3947_v27  ;;  %v5492_v61 = vld [vmem:[#allocation25_spill] sm:$0xff] }
 0x14d   :  { %v1608_v15 = vadd.f32 %v1606_v23, %v1582_v51  ;;  %v1587_v24 = vadd.f32 %v1585_v63, %v1583_v48  ;;  %v1515_v22 = vadd.f32 %v1513_v52, %v1491_v38  ;;  %v1635_v4 = vmul.f32 %v5492_v61, %v3950_v40 }
 0x14e   :  { %v1657_v10 = vmul.f32 %v3965_v5, %v5447_v11  ;;  %v1659_v62 = vmul.f32 %v3968_v7, %v5461_v49  ;;  %v1613_v34 = vadd.f32 %v1611_v2, %v1609_v43  ;;  %v1462_v46 = vmul.f32 %v4329_v30, %v3853_v57 }
 0x14f   :  { %v1632_v23 = vadd.f32 %v1630_v56, %v1608_v15  ;;  %v1464_v58 = vmul.f32 %v4321_v39, %v3860_v28  ;;  %v1541_v54 = vadd.f32 %v1539_v16, %v1515_v22  ;;  %v1637_v51 = vadd.f32 %v1635_v4, %v1633_v19  ;;  %v5493_v15 = vld [vmem:[#allocation6_spill] sm:$0xff]  ;;  %v4485_v22 = vld [vmem:[#allocation2 + $0x3f0] sm:$0xff] }
 0x150   :  { %v1661_v52 = vadd.f32 %v1659_v62, %v1657_v10  ;;  %v1486_v11 = vmul.f32 %v4145_v18, %v3867_v3  ;;  %v1488_v56 = vmul.f32 %v5493_v15, %v3874_v42  ;;  %v1510_v57 = vmul.f32 %v3877_v1, %v5431_v29  ;;  %v5494_v3 = vld [vmem:[#allocation9_spill] sm:$0xff]  ;;  %v5495_v29 = vld [vmem:[#allocation23_spill] sm:$0xff]  ;;  %v4483_v19 = vld [vmem:[#allocation2 + $0x1e0] sm:$0xff]  ;;  %5498 = vst [vmem:[#allocation29_spill] sm:$0xff] %v4485_v22 }
 0x151   :  { %v1656_v49 = vadd.f32 %v1654_v13, %v1632_v23  ;;  %v1466_v48 = vadd.f32 %v1464_v58, %v1462_v46  ;;  %v1565_v28 = vadd.f32 %v1563_v41, %v1541_v54  ;;  %v1512_v43 = vmul.f32 %v3894_v32, %v5462_v33  ;;  %5497 = vst [vmem:[#allocation22_spill] sm:$0xff] %v4483_v19  ;;  %v5499_v4 = vld [vmem:[#allocation18_spill] sm:$0xff]  ;;  %v5500_v62 = vld [vmem:[#allocation27_spill] sm:$0xff] }
 0x152   :  { %v1536_v63 = vmul.f32 %v4343_v50, %v3901_v17  ;;  %v1538_v38 = vmul.f32 %v5494_v3, %v3904_v14  ;;  %v1490_v42 = vadd.f32 %v1488_v56, %v1486_v11  ;;  %v1560_v1 = vmul.f32 %v4159_v55, %v3913_v0  ;;  %v4518_v56 = vld [vmem:[#allocation2 + $0x130] sm:$0xff] }
 0x153   :  { %2483 = vst.msk [vmem:[%s5118_s3 + $0x58] sm:$0xff] %vm51_vm0, %v1656_v49  ;;  %v1562_v32 = vmul.f32 %v5495_v29, %v3918_v45  ;;  %v1584_v17 = vmul.f32 %v3925_v21, %v5434_v26  ;;  %v1589_v14 = vadd.f32 %v1587_v24, %v1565_v28  ;;  %v1514_v33 = vadd.f32 %v1512_v43, %v1510_v57 }
 0x154   :  { %v1540_v13 = vadd.f32 %v1538_v38, %v1536_v63  ;;  %v1586_v16 = vmul.f32 %v3930_v47, %v5464_v53  ;;  %v1492_v41 = vadd.f32 %v1490_v42, %v1466_v48  ;;  %v1610_v0 = vmul.f32 %v4361_v37, %v3935_v9  ;;  %v5496_v47 = vld [vmem:[#allocation16_spill] sm:$0xff]  ;;  %5501 = vst [vmem:[#allocation21_spill] sm:$0xff] %v4518_v56  ;;  %v4526_v63 = vld [vmem:[#allocation2 + $0x340] sm:$0xff] }
 0x155   :  { %v1564_v2 = vadd.f32 %v1562_v32, %v1560_v1  ;;  %v1612_v45 = vmul.f32 %v4353_v59, %v3944_v35  ;;  %v1615_v21 = vadd.f32 %v1613_v34, %v1589_v14  ;;  %v1634_v24 = vmul.f32 %v4177_v20, %v3947_v27  ;;  %5502 = vst [vmem:[#allocation24_spill] sm:$0xff] %v4526_v63 }
 0x156   :  { %v1588_v26 = vadd.f32 %v1586_v16, %v1584_v17  ;;  %v1636_v53 = vmul.f32 %v5496_v47, %v3950_v40  ;;  %v1516_v9 = vadd.f32 %v1514_v33, %v1492_v41  ;;  %v1658_v10 = vmul.f32 %v3965_v5, %v5499_v4  ;;  %v5504_v4 = vld [vmem:[#allocation11_spill] sm:$0xff] }
 0x157   :  { %v1614_v35 = vadd.f32 %v1612_v45, %v1610_v0  ;;  %v1660_v27 = vmul.f32 %v3968_v7, %v5500_v62  ;;  %v1639_v40 = vadd.f32 %v1637_v51, %v1615_v21  ;;  %v4496_v34 = vstv %s4413_s20  ;;  %v5505_v62 = vld [vmem:[#allocation15_spill] sm:$0xff] }
 0x158   :  { %v1638_v23 = vadd.f32 %v1636_v53, %v1634_v24  ;;  %v4499_v46 = vstv %s4417_s24  ;;  %v1542_v58 = vadd.f32 %v1540_v13, %v1516_v9  ;;  %v1680_v11 = vmul.f32 %v4496_v34, %v4483_v19  ;;  %v4564_v53 = vld [vmem:[#allocation2 + $0x80] sm:$0xff] }
 0x159   :  { %v1662_v54 = vadd.f32 %v1660_v27, %v1658_v10  ;;  %v1683_v5 = vmul.f32 %v4499_v46, %v4485_v22  ;;  %v1663_v7 = vadd.f32 %v1661_v52, %v1639_v40  ;;  %v4510_v51 = vstv %s4423_s28  ;;  %5503 = vst [vmem:[#allocation20_spill] sm:$0xff] %v4564_v53 }
 0x15a   :  { %v4513_v49 = vstv %s4431_s6  ;;  %v4516_v48 = vstv %s4437_s11  ;;  %v1566_v57 = vadd.f32 %v1564_v2, %v1542_v58  ;;  %v1704_v43 = vmul.f32 %v4510_v51, %v5483_v31  ;;  %v4573_v58 = vld [vmem:[#allocation2 + $0x290] sm:$0xff] }
 0x15b   :  { %v1685_v28 = vsub.f32 %v1680_v11, %v1683_v5  ;;  %v1707_v52 = vmul.f32 %v4513_v49, %v4275_v36  ;;  %2484 = vst.msk [vmem:[%s5119_s4 + $0x50] sm:$0xff] %vm51_vm0, %v1663_v7  ;;  %v1728_v38 = vmul.f32 %v4516_v48, %v5484_v44  ;;  %v4537_v42 = vstv %s4441_s15  ;;  %v5507_v5 = vld [vmem:[#allocation26_spill] sm:$0xff] }
 0x15c   :  { %v4540_v1 = vstv %s4447_s21  ;;  %v4543_v32 = vstv %s4455_s23  ;;  %v1590_v17 = vadd.f32 %v1588_v26, %v1566_v57  ;;  %v1731_v33 = vmul.f32 %v4537_v42, %v5471_v6  ;;  %5506 = vst [vmem:[#allocation17_spill] sm:$0xff] %v4573_v58 }
 0x15d   :  { %v1709_v14 = vsub.f32 %v1704_v43, %v1707_v52  ;;  %v1754_v13 = vmul.f32 %v4540_v1, %v4518_v56  ;;  %v1757_v16 = vmul.f32 %v4543_v32, %v4526_v63  ;;  %v4554_v41 = vstv %s4467_s29 }
 0x15e   :  { %v4557_v2 = vstv %s4471_s19  ;;  %v4560_v0 = vstv %s4477_s22  ;;  %v1616_v45 = vadd.f32 %v1614_v35, %v1590_v17  ;;  %v1733_v26 = vsub.f32 %v1728_v38, %v1731_v33 }
 0x15f   :  { %v1711_v21 = vadd.f32 %v1709_v14, %v1685_v28  ;;  %v1778_v24 = vmul.f32 %v4554_v41, %v5488_v12  ;;  %v1759_v9 = vsub.f32 %v1754_v13, %v1757_v16  ;;  %v1781_v10 = vmul.f32 %v4557_v2, %v5504_v4  ;;  %v4590_v13 = vld [vmem:[#allocation2 + $0x1e8] sm:$0xff]  ;;  %v4592_v16 = vld [vmem:[#allocation2 + $0x3f8] sm:$0xff] }
 0x160   :  { %v1802_v27 = vmul.f32 %v4560_v0, %v5505_v62  ;;  %v4571_v40 = vstv %s4487_s0  ;;  %v1640_v35 = vadd.f32 %v1638_v23, %v1616_v45  ;;  %v4578_v57 = vstv %s4493_s27  ;;  %5508 = vst [vmem:[#allocation31_spill] sm:$0xff] %v4590_v13 }
 0x161   :  { %v1735_v11 = vadd.f32 %v1733_v26, %v1711_v21  ;;  %v1805_v7 = vmul.f32 %v4571_v40, %v5507_v5  ;;  %v1783_v28 = vsub.f32 %v1778_v24, %v1781_v10  ;;  %v1828_v43 = vmul.f32 %v4578_v57, %v4564_v53  ;;  %5509 = vst [vmem:[#allocation32_spill] sm:$0xff] %v4592_v16  ;;  %v4633_v53 = vld [vmem:[#allocation2 + $0x88] sm:$0xff] }
 0x162   :  { %v4583_v52 = vstv %s4501_s30  ;;  %v4586_v38 = vstv %s4507_s7  ;;  %v1664_v17 = vadd.f32 %v1662_v54, %v1640_v35  ;;  %v4597_v21 = vstv %s4520_s5  ;;  %v4613_v35 = vld [vmem:[#allocation2 + $0x138] sm:$0xff] }
 0x163   :  { %v1761_v14 = vadd.f32 %v1759_v9, %v1735_v11  ;;  %v1807_v33 = vsub.f32 %v1802_v27, %v1805_v7  ;;  %v1831_v23 = vmul.f32 %v4583_v52, %v4573_v58  ;;  %v1852_v45 = vmul.f32 %v4586_v38, %v5491_v8  ;;  %5510 = vst [vmem:[#allocation6_spill] sm:$0xff] %v4613_v35 }
 0x164   :  { %v4600_v26 = vstv %s4528_s8  ;;  %v4603_v24 = vstv %s4545_s14  ;;  %2485 = vst.msk [vmem:[%s5119_s4 + $0x58] sm:$0xff] %vm51_vm0, %v1664_v17  ;;  %v1855_v10 = vmul.f32 %v4597_v21, %v5490_v25  ;;  %v1681_v7 = vmul.f32 %v4496_v34, %v4590_v13 }
 0x165   :  { %v1785_v54 = vadd.f32 %v1783_v28, %v1761_v14  ;;  %v1833_v9 = vsub.f32 %v1828_v43, %v1831_v23  ;;  %v1876_v27 = vmul.f32 %v4600_v26, %v5492_v61  ;;  %v1879_v11 = vmul.f32 %v4603_v24, %v5459_v60  ;;  %v4623_v43 = vld [vmem:[#allocation2 + $0x348] sm:$0xff] }
 0x166   :  { %v1684_v8 = vmul.f32 %v4499_v46, %v4592_v16  ;;  %v1705_v28 = vmul.f32 %v4510_v51, %v4321_v39  ;;  %5511 = vst [vmem:[#allocation16_spill] sm:$0xff] %v4623_v43  ;;  %v1857_v14 = vsub.f32 %v1852_v45, %v1855_v10  ;;  %v1708_v23 = vmul.f32 %v4513_v49, %v4329_v30 }
 0x167   :  { %v1809_v17 = vadd.f32 %v1807_v33, %v1785_v54  ;;  %v1729_v61 = vmul.f32 %v4516_v48, %v5493_v15  ;;  %v1881_v60 = vsub.f32 %v1876_v27, %v1879_v11  ;;  %v1732_v13 = vmul.f32 %v4537_v42, %v4145_v18  ;;  %v4639_v54 = vld [vmem:[#allocation2 + $0x298] sm:$0xff] }
 0x168   :  { %v1686_v25 = vsub.f32 %v1681_v7, %v1684_v8  ;;  %v1755_v16 = vmul.f32 %v4540_v1, %v4613_v35  ;;  %v1710_v58 = vsub.f32 %v1705_v28, %v1708_v23  ;;  %v1758_v33 = vmul.f32 %v4543_v32, %v4623_v43 }
 0x169   :  { %v1835_v39 = vadd.f32 %v1833_v9, %v1809_v17  ;;  %v1779_v45 = vmul.f32 %v4554_v41, %v5494_v3  ;;  %v1734_v10 = vsub.f32 %v1729_v61, %v1732_v13  ;;  %v1782_v8 = vmul.f32 %v4557_v2, %v4343_v50 }
 0x16a   :  { %v1803_v27 = vmul.f32 %v4560_v0, %v5495_v29  ;;  %v1806_v11 = vmul.f32 %v4571_v40, %v4159_v55  ;;  %v1712_v7 = vadd.f32 %v1710_v58, %v1686_v25  ;;  %v1760_v28 = vsub.f32 %v1755_v16, %v1758_v33 }
 0x16b   :  { %v1859_v9 = vadd.f32 %v1857_v14, %v1835_v39  ;;  %v1829_v17 = vmul.f32 %v4578_v57, %v4633_v53  ;;  %v1784_v23 = vsub.f32 %v1779_v45, %v1782_v8  ;;  %v1832_v3 = vmul.f32 %v4583_v52, %v4639_v54 }
 0x16c   :  { %v1736_v13 = vadd.f32 %v1734_v10, %v1712_v7  ;;  %v1808_v35 = vsub.f32 %v1803_v27, %v1806_v11  ;;  %v1853_v50 = vmul.f32 %v4586_v38, %v4353_v59  ;;  %v1856_v29 = vmul.f32 %v4597_v21, %v4361_v37 }
 0x16d   :  { %v1883_v61 = vadd.f32 %v1881_v60, %v1859_v9  ;;  %v1877_v39 = vmul.f32 %v4600_v26, %v5496_v47  ;;  %v1689_v25 = vmul.f32 %v4496_v34, %v4485_v22  ;;  %v1691_v58 = vmul.f32 %v4499_v46, %v4483_v19 }
 0x16e   :  { %v1762_v60 = vadd.f32 %v1760_v28, %v1736_v13  ;;  %v1834_v16 = vsub.f32 %v1829_v17, %v1832_v3  ;;  %v1713_v14 = vmul.f32 %v4510_v51, %v4275_v36  ;;  %v1715_v33 = vmul.f32 %v4513_v49, %v5483_v31 }
 0x16f   :  { %2503 = vst.msk [vmem:[%s5118_s3 + $0x60] sm:$0xff] %vm51_vm0, %v1883_v61  ;;  %v1880_v45 = vmul.f32 %v4603_v24, %v4177_v20  ;;  %v1693_v10 = vadd.f32 %v1691_v58, %v1689_v25  ;;  %v1737_v8 = vmul.f32 %v4516_v48, %v5471_v6  ;;  %v1739_v27 = vmul.f32 %v4537_v42, %v5484_v44 }
 0x170   :  { %v1786_v11 = vadd.f32 %v1784_v23, %v1762_v60  ;;  %v1717_v9 = vadd.f32 %v1715_v33, %v1713_v14  ;;  %v1763_v3 = vmul.f32 %v4540_v1, %v4526_v63  ;;  %v1765_v7 = vmul.f32 %v4543_v32, %v4518_v56  ;;  %v5512_v14 = vld [vmem:[#allocation17_spill] sm:$0xff]  ;;  %v5514_v56 = vld [vmem:[#allocation8_spill] sm:$0xff] }
 0x171   :  { %v1741_v28 = vadd.f32 %v1739_v27, %v1737_v8  ;;  %v1787_v17 = vmul.f32 %v4554_v41, %v5504_v4  ;;  %v1789_v61 = vmul.f32 %v4557_v2, %v5488_v12  ;;  %v1811_v6 = vmul.f32 %v4560_v0, %v5507_v5  ;;  %v5513_v8 = vld [vmem:[#allocation20_spill] sm:$0xff] }
 0x172   :  { %v1810_v13 = vadd.f32 %v1808_v35, %v1786_v11  ;;  %v1719_v44 = vadd.f32 %v1717_v9, %v1693_v10  ;;  %v1767_v23 = vadd.f32 %v1765_v7, %v1763_v3  ;;  %v1813_v25 = vmul.f32 %v4571_v40, %v5505_v62  ;;  %v5515_v11 = vld [vmem:[#allocation13_spill] sm:$0xff]  ;;  %v5516_v62 = vld [vmem:[#allocation32_spill] sm:$0xff]  ;;  %v5518_v7 = vld [vmem:[#allocation31_spill] sm:$0xff] }
 0x173   :  { %v1858_v58 = vsub.f32 %v1853_v50, %v1856_v29  ;;  %v1882_v60 = vsub.f32 %v1877_v39, %v1880_v45  ;;  %v1837_v33 = vmul.f32 %v4578_v57, %v5512_v14  ;;  %v1839_v27 = vmul.f32 %v4583_v52, %v5513_v8  ;;  %v5517_v45 = vld [vmem:[#allocation30_spill] sm:$0xff] }
 0x174   :  { %v1836_v4 = vadd.f32 %v1834_v16, %v1810_v13  ;;  %v1743_v63 = vadd.f32 %v1741_v28, %v1719_v44  ;;  %v1791_v12 = vadd.f32 %v1789_v61, %v1787_v17  ;;  %v1861_v5 = vmul.f32 %v4586_v38, %v5514_v56  ;;  %v5519_v28 = vld [vmem:[#allocation25_spill] sm:$0xff] }
 0x175   :  { %v1815_v35 = vadd.f32 %v1813_v25, %v1811_v6  ;;  %v1841_v10 = vadd.f32 %v1839_v27, %v1837_v33  ;;  %v1863_v9 = vmul.f32 %v4597_v21, %v5515_v11  ;;  %v1690_v50 = vmul.f32 %v4496_v34, %v5516_v62  ;;  %v5520_v6 = vld [vmem:[#allocation12_spill] sm:$0xff]  ;;  %v5521_v27 = vld [vmem:[#allocation6_spill] sm:$0xff] }
 0x176   :  { %v1860_v29 = vadd.f32 %v1858_v58, %v1836_v4  ;;  %v1769_v39 = vadd.f32 %v1767_v23, %v1743_v63  ;;  %v1885_v3 = vmul.f32 %v4600_v26, %v5517_v45  ;;  %v1692_v16 = vmul.f32 %v4499_v46, %v5518_v7 }
 0x177   :  { %v1887_v17 = vmul.f32 %v4603_v24, %v5519_v28  ;;  %v1714_v61 = vmul.f32 %v4510_v51, %v4329_v30  ;;  %v1716_v13 = vmul.f32 %v4513_v49, %v5520_v6  ;;  %v1738_v44 = vmul.f32 %v4516_v48, %v4145_v18  ;;  %v5522_v28 = vld [vmem:[#allocation19_spill] sm:$0xff] }
 0x178   :  { %v1884_v4 = vadd.f32 %v1882_v60, %v1860_v29  ;;  %v1793_v63 = vadd.f32 %v1791_v12, %v1769_v39  ;;  %v1694_v23 = vadd.f32 %v1692_v16, %v1690_v50  ;;  %v1740_v25 = vmul.f32 %v4537_v42, %v5493_v15  ;;  %v5523_v60 = vld [vmem:[#allocation9_spill] sm:$0xff]  ;;  %v5524_v16 = vld [vmem:[#allocation23_spill] sm:$0xff] }
 0x179   :  { %v1718_v58 = vadd.f32 %v1716_v13, %v1714_v61  ;;  %v1764_v33 = vmul.f32 %v4540_v1, %v4623_v43  ;;  %v1766_v45 = vmul.f32 %v4543_v32, %v5521_v27  ;;  %v1788_v30 = vmul.f32 %v4554_v41, %v5522_v28  ;;  %v4729_v28 = vld [vmem:[#allocation2 + $0x1f0] sm:$0xff] }
 0x17a   :  { %2504 = vst.msk [vmem:[%s5118_s3 + $0x68] sm:$0xff] %vm51_vm0, %v1884_v4  ;;  %v1817_v18 = vadd.f32 %v1815_v35, %v1793_v63  ;;  %v1742_v12 = vadd.f32 %v1740_v25, %v1738_v44  ;;  %v1790_v15 = vmul.f32 %v4557_v2, %v5523_v60  ;;  %v1812_v50 = vmul.f32 %v4560_v0, %v4159_v55  ;;  %v4733_v63 = vld [vmem:[#allocation2 + $0x400] sm:$0xff] }
 0x17b   :  { %v1720_v29 = vadd.f32 %v1718_v58, %v1694_v23  ;;  %v1768_v39 = vadd.f32 %v1766_v45, %v1764_v33  ;;  %v1814_v61 = vmul.f32 %v4571_v40, %v5524_v16  ;;  %v1838_v13 = vmul.f32 %v4578_v57, %v4639_v54 }
 0x17c   :  { %v1843_v43 = vadd.f32 %v1841_v10, %v1817_v18  ;;  %v1865_v4 = vadd.f32 %v1863_v9, %v1861_v5  ;;  %v1889_v35 = vadd.f32 %v1887_v17, %v1885_v3  ;;  %v1840_v44 = vmul.f32 %v4583_v52, %v4633_v53  ;;  %v4743_v9 = vld [vmem:[#allocation2 + $0x140] sm:$0xff] }
 0x17d   :  { %v1744_v25 = vadd.f32 %v1742_v12, %v1720_v29  ;;  %v1792_v55 = vadd.f32 %v1790_v15, %v1788_v30  ;;  %v1816_v23 = vadd.f32 %v1814_v61, %v1812_v50  ;;  %v1862_v58 = vmul.f32 %v4586_v38, %v4361_v37  ;;  %5525 = vst [vmem:[#allocation18_spill] sm:$0xff] %v4743_v9 }
 0x17e   :  { %v1867_v33 = vadd.f32 %v1865_v4, %v1843_v43  ;;  %v1864_v45 = vmul.f32 %v4597_v21, %v4353_v59  ;;  %v1886_v10 = vmul.f32 %v4600_v26, %v4177_v20  ;;  %v1908_v5 = vmul.f32 %v4729_v28, %v4496_v34  ;;  %v4749_v43 = vld [vmem:[#allocation2 + $0x350] sm:$0xff] }
 0x17f   :  { %v1770_v3 = vadd.f32 %v1768_v39, %v1744_v25  ;;  %v1842_v17 = vadd.f32 %v1840_v44, %v1838_v13  ;;  %v1911_v30 = vmul.f32 %v4733_v63, %v4499_v46  ;;  %v1932_v18 = vmul.f32 %v4510_v51, %v4483_v19  ;;  %5526 = vst [vmem:[#allocation27_spill] sm:$0xff] %v4749_v43  ;;  %v4761_v13 = vld [vmem:[#allocation2 + $0x90] sm:$0xff]  ;;  %v4783_v19 = vld [vmem:[#allocation2 + $0x408] sm:$0xff] }
 0x180   :  { %v1891_v12 = vadd.f32 %v1889_v35, %v1867_v33  ;;  %v1888_v15 = vmul.f32 %v4603_v24, %v5496_v47  ;;  %v1935_v20 = vmul.f32 %v4513_v49, %v4485_v22  ;;  %v1956_v50 = vmul.f32 %v4516_v48, %v5483_v31  ;;  %5527 = vst [vmem:[#allocation15_spill] sm:$0xff] %v4761_v13  ;;  %v5528_v35 = vld [vmem:[#allocation21_spill] sm:$0xff]  ;;  %v5529_v25 = vld [vmem:[#allocation24_spill] sm:$0xff]  ;;  %v4773_v33 = vld [vmem:[#allocation2 + $0x2a0] sm:$0xff] }
 0x181   :  { %v1794_v29 = vadd.f32 %v1792_v55, %v1770_v3  ;;  %v1913_v39 = vsub.f32 %v1908_v5, %v1911_v30  ;;  %v1959_v16 = vmul.f32 %v4537_v42, %v4275_v36  ;;  %v1982_v61 = vmul.f32 %v4743_v9, %v4540_v1  ;;  %v5530_v30 = vld [vmem:[#allocation14_spill] sm:$0xff]  ;;  %v5531_v31 = vld [vmem:[#allocation11_spill] sm:$0xff]  ;;  %5533 = vst [vmem:[#allocation30_spill] sm:$0xff] %v4783_v19 }
 0x182   :  { %2505 = vst.msk [vmem:[%s5119_s4 + $0x60] sm:$0xff] %vm51_vm0, %v1891_v12  ;;  %v1937_v47 = vsub.f32 %v1932_v18, %v1935_v20  ;;  %v1985_v4 = vmul.f32 %v4749_v43, %v4543_v32  ;;  %v2006_v44 = vmul.f32 %v4554_v41, %v5528_v35  ;;  %v2009_v55 = vmul.f32 %v4557_v2, %v5529_v25  ;;  %v4781_v35 = vld [vmem:[#allocation2 + $0x1f8] sm:$0xff] }
 0x183   :  { %v1818_v5 = vadd.f32 %v1816_v23, %v1794_v29  ;;  %v1866_v3 = vadd.f32 %v1864_v45, %v1862_v58  ;;  %v2030_v9 = vmul.f32 %v4560_v0, %v5530_v30  ;;  %v2033_v12 = vmul.f32 %v4571_v40, %v5531_v31  ;;  %5532 = vst [vmem:[#allocation26_spill] sm:$0xff] %v4781_v35 }
 0x184   :  { %v1939_v18 = vadd.f32 %v1937_v47, %v1913_v39  ;;  %v1961_v20 = vsub.f32 %v1956_v50, %v1959_v16  ;;  %v1987_v36 = vsub.f32 %v1982_v61, %v1985_v4  ;;  %v2056_v43 = vmul.f32 %v4761_v13, %v4578_v57  ;;  %v4799_v47 = vld [vmem:[#allocation2 + $0x358] sm:$0xff] }
 0x185   :  { %v1844_v25 = vadd.f32 %v1842_v17, %v1818_v5  ;;  %v1890_v22 = vadd.f32 %v1888_v15, %v1886_v10  ;;  %v2011_v23 = vsub.f32 %v2006_v44, %v2009_v55  ;;  %v2059_v58 = vmul.f32 %v4773_v33, %v4583_v52  ;;  %v4797_v15 = vld [vmem:[#allocation2 + $0x148] sm:$0xff]  ;;  %5535 = vst [vmem:[#allocation23_spill] sm:$0xff] %v4799_v47 }
 0x186   :  { %v1963_v45 = vadd.f32 %v1961_v20, %v1939_v18  ;;  %v2035_v29 = vsub.f32 %v2030_v9, %v2033_v12  ;;  %v2080_v39 = vmul.f32 %v4586_v38, %v5513_v8  ;;  %v2083_v50 = vmul.f32 %v4597_v21, %v5512_v14  ;;  %5534 = vst [vmem:[#allocation25_spill] sm:$0xff] %v4797_v15  ;;  %v5536_v20 = vld [vmem:[#allocation7_spill] sm:$0xff] }
 0x187   :  { %v1868_v16 = vadd.f32 %v1866_v3, %v1844_v25  ;;  %v2104_v61 = vmul.f32 %v4600_v26, %v5515_v11  ;;  %v1909_v17 = vmul.f32 %v4781_v35, %v4496_v34  ;;  %v1912_v10 = vmul.f32 %v4783_v19, %v4499_v46 }
 0x188   :  { %v1989_v9 = vadd.f32 %v1987_v36, %v1963_v45  ;;  %v2061_v4 = vsub.f32 %v2056_v43, %v2059_v58  ;;  %v2107_v44 = vmul.f32 %v4603_v24, %v5514_v56  ;;  %v1933_v25 = vmul.f32 %v4510_v51, %v5518_v7  ;;  %v4815_v58 = vld [vmem:[#allocation2 + $0x98] sm:$0xff] }
 0x189   :  { %v1892_v55 = vadd.f32 %v1890_v22, %v1868_v16  ;;  %v1914_v5 = vsub.f32 %v1909_v17, %v1912_v10  ;;  %v1936_v3 = vmul.f32 %v4513_v49, %v5516_v62  ;;  %v1957_v12 = vmul.f32 %v4516_v48, %v5520_v6  ;;  %v4817_v22 = vld [vmem:[#allocation2 + $0x2a8] sm:$0xff]  ;;  %v5537_v16 = vld [vmem:[#allocation16_spill] sm:$0xff] }
 0x18a   :  { %v2013_v18 = vadd.f32 %v2011_v23, %v1989_v9  ;;  %v1960_v11 = vmul.f32 %v4537_v42, %v5536_v20  ;;  %v1983_v36 = vmul.f32 %v4797_v15, %v4540_v1  ;;  %v1986_v43 = vmul.f32 %v4799_v47, %v4543_v32  ;;  %v5538_v6 = vld [vmem:[#allocation19_spill] sm:$0xff] }
 0x18b   :  { %2506 = vst.msk [vmem:[%s5119_s4 + $0x68] sm:$0xff] %vm51_vm0, %v1892_v55  ;;  %v1938_v45 = vsub.f32 %v1933_v25, %v1936_v3  ;;  %v2007_v23 = vmul.f32 %v4554_v41, %v5521_v27  ;;  %v2010_v17 = vmul.f32 %v4557_v2, %v5537_v16  ;;  %v2031_v10 = vmul.f32 %v4560_v0, %v5523_v60 }
 0x18c   :  { %v2037_v9 = vadd.f32 %v2035_v29, %v2013_v18  ;;  %v2085_v15 = vsub.f32 %v2080_v39, %v2083_v50  ;;  %v1962_v47 = vsub.f32 %v1957_v12, %v1960_v11  ;;  %v2034_v20 = vmul.f32 %v4571_v40, %v5538_v6  ;;  %v5540_v12 = vld [vmem:[#allocation22_spill] sm:$0xff] }
 0x18d   :  { %v1940_v7 = vadd.f32 %v1938_v45, %v1914_v5  ;;  %v1988_v62 = vsub.f32 %v1983_v36, %v1986_v43  ;;  %v2057_v25 = vmul.f32 %v4815_v58, %v4578_v57  ;;  %v2060_v55 = vmul.f32 %v4817_v22, %v4583_v52  ;;  %v5541_v36 = vld [vmem:[#allocation10_spill] sm:$0xff]  ;;  %v5542_v45 = vld [vmem:[#allocation28_spill] sm:$0xff] }
 0x18e   :  { %v2063_v3 = vadd.f32 %v2061_v4, %v2037_v9  ;;  %v2109_v27 = vsub.f32 %v2104_v61, %v2107_v44  ;;  %v2012_v16 = vsub.f32 %v2007_v23, %v2010_v17  ;;  %v2036_v35 = vsub.f32 %v2031_v10, %v2034_v20  ;;  %v5544_v9 = vld [vmem:[#allocation18_spill] sm:$0xff] }
 0x18f   :  { %v1964_v56 = vadd.f32 %v1962_v47, %v1940_v7  ;;  %v2062_v60 = vsub.f32 %v2057_v25, %v2060_v55  ;;  %v2081_v11 = vmul.f32 %v4586_v38, %v4633_v53  ;;  %v2084_v29 = vmul.f32 %v4597_v21, %v4639_v54  ;;  %v5539_v47 = vld [vmem:[#allocation29_spill] sm:$0xff]  ;;  %v5545_v55 = vld [vmem:[#allocation24_spill] sm:$0xff] }
 0x190   :  { %v2087_v39 = vadd.f32 %v2085_v15, %v2063_v3  ;;  %v2105_v50 = vmul.f32 %v4600_v26, %v4353_v59  ;;  %v1917_v5 = vmul.f32 %v4733_v63, %v4496_v34  ;;  %v1919_v61 = vmul.f32 %v4729_v28, %v4499_v46 }
 0x191   :  { %v1990_v4 = vadd.f32 %v1988_v62, %v1964_v56  ;;  %v2108_v7 = vmul.f32 %v4603_v24, %v4361_v37  ;;  %v1941_v44 = vmul.f32 %v4510_v51, %v5539_v47  ;;  %v1943_v18 = vmul.f32 %v4513_v49, %v5540_v12  ;;  %v5543_v56 = vld [vmem:[#allocation27_spill] sm:$0xff] }
 0x192   :  { %v2111_v15 = vadd.f32 %v2109_v27, %v2087_v39  ;;  %v1921_v20 = vadd.f32 %v1919_v61, %v1917_v5  ;;  %v1965_v43 = vmul.f32 %v4516_v48, %v5541_v36  ;;  %v1967_v23 = vmul.f32 %v4537_v42, %v5542_v45  ;;  %v5546_v39 = vld [vmem:[#allocation21_spill] sm:$0xff] }
 0x193   :  { %v2014_v17 = vadd.f32 %v2012_v16, %v1990_v4  ;;  %v1945_v10 = vadd.f32 %v1943_v18, %v1941_v44  ;;  %v1991_v62 = vmul.f32 %v5543_v56, %v4540_v1  ;;  %v1993_v25 = vmul.f32 %v5544_v9, %v4543_v32 }
 0x194   :  { %2524 = vst.msk [vmem:[%s5118_s3 + $0x70] sm:$0xff] %vm51_vm0, %v2111_v15  ;;  %v1969_v27 = vadd.f32 %v1967_v23, %v1965_v43  ;;  %v2015_v3 = vmul.f32 %v4554_v41, %v5545_v55  ;;  %v2017_v5 = vmul.f32 %v4557_v2, %v5546_v39  ;;  %v2039_v16 = vmul.f32 %v4560_v0, %v5531_v31 }
 0x195   :  { %v2038_v61 = vadd.f32 %v2036_v35, %v2014_v17  ;;  %v1947_v4 = vadd.f32 %v1945_v10, %v1921_v20  ;;  %v1995_v44 = vadd.f32 %v1993_v25, %v1991_v62  ;;  %v2041_v18 = vmul.f32 %v4571_v40, %v5530_v30  ;;  %v5549_v62 = vld [vmem:[#allocation13_spill] sm:$0xff] }
 0x196   :  { %v2086_v36 = vsub.f32 %v2081_v11, %v2084_v29  ;;  %v2110_v45 = vsub.f32 %v2105_v50, %v2108_v7  ;;  %v2065_v15 = vmul.f32 %v4773_v33, %v4578_v57  ;;  %v2067_v43 = vmul.f32 %v4761_v13, %v4583_v52  ;;  %v5547_v50 = vld [vmem:[#allocation8_spill] sm:$0xff] }
 0x197   :  { %v2064_v23 = vadd.f32 %v2062_v60, %v2038_v61  ;;  %v1971_v55 = vadd.f32 %v1969_v27, %v1947_v4  ;;  %v2019_v39 = vadd.f32 %v2017_v5, %v2015_v3  ;;  %v2089_v31 = vmul.f32 %v4586_v38, %v5512_v14  ;;  %v5548_v60 = vld [vmem:[#allocation26_spill] sm:$0xff]  ;;  %v5550_v27 = vld [vmem:[#allocation32_spill] sm:$0xff]  ;;  %v5551_v5 = vld [vmem:[#allocation31_spill] sm:$0xff] }
 0x198   :  { %v2043_v35 = vadd.f32 %v2041_v18, %v2039_v16  ;;  %v2069_v20 = vadd.f32 %v2067_v43, %v2065_v15  ;;  %v2091_v17 = vmul.f32 %v4597_v21, %v5513_v8  ;;  %v1918_v30 = vmul.f32 %v4783_v19, %v4496_v34  ;;  %v5552_v61 = vld [vmem:[#allocation7_spill] sm:$0xff] }
 0x199   :  { %v2088_v11 = vadd.f32 %v2086_v36, %v2064_v23  ;;  %v1997_v29 = vadd.f32 %v1995_v44, %v1971_v55  ;;  %v2113_v7 = vmul.f32 %v4600_v26, %v5547_v50  ;;  %v1920_v10 = vmul.f32 %v5548_v60, %v4499_v46  ;;  %v5553_v36 = vld [vmem:[#allocation12_spill] sm:$0xff]  ;;  %v5554_v23 = vld [vmem:[#allocation23_spill] sm:$0xff] }
 0x19a   :  { %v2115_v25 = vmul.f32 %v4603_v24, %v5549_v62  ;;  %v1942_v3 = vmul.f32 %v4510_v51, %v5550_v27  ;;  %v1944_v16 = vmul.f32 %v4513_v49, %v5551_v5  ;;  %v1966_v4 = vmul.f32 %v4516_v48, %v5552_v61  ;;  %v5555_v62 = vld [vmem:[#allocation25_spill] sm:$0xff]  ;;  %v5556_v27 = vld [vmem:[#allocation16_spill] sm:$0xff] }
 0x19b   :  { %v2112_v18 = vadd.f32 %v2110_v45, %v2088_v11  ;;  %v2021_v55 = vadd.f32 %v2019_v39, %v1997_v29  ;;  %v1922_v44 = vadd.f32 %v1920_v10, %v1918_v30  ;;  %v1968_v15 = vmul.f32 %v4537_v42, %v5553_v36  ;;  %v5557_v30 = vld [vmem:[#allocation6_spill] sm:$0xff] }
 0x19c   :  { %v1946_v43 = vadd.f32 %v1944_v16, %v1942_v3  ;;  %v1992_v50 = vmul.f32 %v5554_v23, %v4540_v1  ;;  %v1994_v19 = vmul.f32 %v5555_v62, %v4543_v32  ;;  %v2016_v60 = vmul.f32 %v4554_v41, %v5556_v27  ;;  %v5558_v16 = vld [vmem:[#allocation9_spill] sm:$0xff]  ;;  %v4913_v27 = vld [vmem:[#allocation2 + $0x200] sm:$0xff] }
 0x19d   :  { %2525 = vst.msk [vmem:[%s5118_s3 + $0x78] sm:$0xff] %vm51_vm0, %v2112_v18  ;;  %v2045_v39 = vadd.f32 %v2043_v35, %v2021_v55  ;;  %v1970_v45 = vadd.f32 %v1968_v15, %v1966_v4  ;;  %v2018_v11 = vmul.f32 %v4557_v2, %v5557_v30  ;;  %v2040_v29 = vmul.f32 %v4560_v0, %v5538_v6  ;;  %v4917_v55 = vld [vmem:[#allocation2 + $0x410] sm:$0xff] }
 0x19e   :  { %v1948_v10 = vadd.f32 %v1946_v43, %v1922_v44  ;;  %v1996_v3 = vadd.f32 %v1994_v19, %v1992_v50  ;;  %v2042_v61 = vmul.f32 %v4571_v40, %v5558_v16  ;;  %v2066_v36 = vmul.f32 %v4817_v22, %v4578_v57 }
 0x19f   :  { %v2071_v23 = vadd.f32 %v2069_v20, %v2045_v39  ;;  %v2093_v18 = vadd.f32 %v2091_v17, %v2089_v31  ;;  %v2117_v35 = vadd.f32 %v2115_v25, %v2113_v7  ;;  %v2068_v4 = vmul.f32 %v4815_v58, %v4583_v52  ;;  %v4927_v17 = vld [vmem:[#allocation2 + $0x150] sm:$0xff] }
 0x1a0   :  { %v1972_v15 = vadd.f32 %v1970_v45, %v1948_v10  ;;  %v2020_v6 = vadd.f32 %v2018_v11, %v2016_v60  ;;  %v2044_v44 = vadd.f32 %v2042_v61, %v2040_v29  ;;  %v2090_v19 = vmul.f32 %v4586_v38, %v4639_v54  ;;  %5559 = vst [vmem:[#allocation14_spill] sm:$0xff] %v4927_v17 }
 0x1a1   :  { %v2095_v43 = vadd.f32 %v2093_v18, %v2071_v23  ;;  %v2092_v50 = vmul.f32 %v4597_v21, %v4633_v53  ;;  %v2114_v20 = vmul.f32 %v4600_v26, %v4361_v37  ;;  %v2136_v31 = vmul.f32 %v4913_v27, %v4496_v34  ;;  %v4933_v23 = vld [vmem:[#allocation2 + $0x360] sm:$0xff] }
 0x1a2   :  { %v1998_v7 = vadd.f32 %v1996_v3, %v1972_v15  ;;  %v2070_v25 = vadd.f32 %v2068_v4, %v2066_v36  ;;  %v2139_v60 = vmul.f32 %v4917_v55, %v4499_v46  ;;  %v2160_v39 = vmul.f32 %v4729_v28, %v4510_v51  ;;  %5560 = vst [vmem:[#allocation11_spill] sm:$0xff] %v4933_v23  ;;  %v4945_v36 = vld [vmem:[#allocation2 + $0xa0] sm:$0xff]  ;;  %v4957_v15 = vld [vmem:[#allocation2 + $0x2b0] sm:$0xff] }
 0x1a3   :  { %v2119_v45 = vadd.f32 %v2117_v35, %v2095_v43  ;;  %v2116_v11 = vmul.f32 %v4603_v24, %v4353_v59  ;;  %v2163_v37 = vmul.f32 %v4733_v63, %v4513_v49  ;;  %v2184_v29 = vmul.f32 %v4516_v48, %v5540_v12  ;;  %v4967_v12 = vld [vmem:[#allocation2 + $0x418] sm:$0xff] }
 0x1a4   :  { %v2022_v10 = vadd.f32 %v2020_v6, %v1998_v7  ;;  %v2141_v3 = vsub.f32 %v2136_v31, %v2139_v60  ;;  %v2187_v16 = vmul.f32 %v4537_v42, %v5539_v47  ;;  %v2210_v61 = vmul.f32 %v4927_v17, %v4540_v1  ;;  %v5561_v31 = vld [vmem:[#allocation21_spill] sm:$0xff]  ;;  %v5562_v60 = vld [vmem:[#allocation24_spill] sm:$0xff]  ;;  %5564 = vst [vmem:[#allocation10_spill] sm:$0xff] %v4967_v12 }
 0x1a5   :  { %2526 = vst.msk [vmem:[%s5119_s4 + $0x70] sm:$0xff] %vm51_vm0, %v2119_v45  ;;  %v2165_v59 = vsub.f32 %v2160_v39, %v2163_v37  ;;  %v2213_v18 = vmul.f32 %v4933_v23, %v4543_v32  ;;  %v2234_v35 = vmul.f32 %v5544_v9, %v4554_v41  ;;  %v2237_v4 = vmul.f32 %v5543_v56, %v4557_v2  ;;  %v4965_v9 = vld [vmem:[#allocation2 + $0x208] sm:$0xff] }
 0x1a6   :  { %v2046_v6 = vadd.f32 %v2044_v44, %v2022_v10  ;;  %v2094_v43 = vadd.f32 %v2092_v50, %v2090_v19  ;;  %v2258_v7 = vmul.f32 %v4560_v0, %v5561_v31  ;;  %v2261_v45 = vmul.f32 %v4571_v40, %v5562_v60  ;;  %5563 = vst [vmem:[#allocation19_spill] sm:$0xff] %v4965_v9 }
 0x1a7   :  { %v2167_v39 = vadd.f32 %v2165_v59, %v2141_v3  ;;  %v2189_v37 = vsub.f32 %v2184_v29, %v2187_v16  ;;  %v2215_v17 = vsub.f32 %v2210_v61, %v2213_v18  ;;  %v2284_v23 = vmul.f32 %v4945_v36, %v4578_v57  ;;  %v4983_v59 = vld [vmem:[#allocation2 + $0x368] sm:$0xff] }
 0x1a8   :  { %v2072_v56 = vadd.f32 %v2070_v25, %v2046_v6  ;;  %v2118_v47 = vadd.f32 %v2116_v11, %v2114_v20  ;;  %v2239_v44 = vsub.f32 %v2234_v35, %v2237_v4  ;;  %v2287_v19 = vmul.f32 %v4957_v15, %v4583_v52  ;;  %v4981_v11 = vld [vmem:[#allocation2 + $0x158] sm:$0xff]  ;;  %5566 = vst [vmem:[#allocation8_spill] sm:$0xff] %v4983_v59 }
 0x1a9   :  { %v2191_v50 = vadd.f32 %v2189_v37, %v2167_v39  ;;  %v2263_v10 = vsub.f32 %v2258_v7, %v2261_v45  ;;  %v2308_v3 = vmul.f32 %v4761_v13, %v4586_v38  ;;  %v2311_v29 = vmul.f32 %v4773_v33, %v4597_v21  ;;  %5565 = vst [vmem:[#allocation28_spill] sm:$0xff] %v4981_v11  ;;  %v5568_v45 = vld [vmem:[#allocation30_spill] sm:$0xff] }
 0x1aa   :  { %v2096_v16 = vadd.f32 %v2094_v43, %v2072_v56  ;;  %v2332_v61 = vmul.f32 %v4600_v26, %v5513_v8  ;;  %v2137_v25 = vmul.f32 %v4965_v9, %v4496_v34  ;;  %v2140_v20 = vmul.f32 %v4967_v12, %v4499_v46  ;;  %v5567_v56 = vld [vmem:[#allocation26_spill] sm:$0xff]  ;;  %v5569_v9 = vld [vmem:[#allocation32_spill] sm:$0xff] }
 0x1ab   :  { %v2217_v18 = vadd.f32 %v2215_v17, %v2191_v50  ;;  %v2289_v35 = vsub.f32 %v2284_v23, %v2287_v19  ;;  %v2335_v4 = vmul.f32 %v4603_v24, %v5512_v14  ;;  %v2161_v6 = vmul.f32 %v5567_v56, %v4510_v51  ;;  %v4999_v19 = vld [vmem:[#allocation2 + $0xa8] sm:$0xff] }
 0x1ac   :  { %v2120_v43 = vadd.f32 %v2118_v47, %v2096_v16  ;;  %v2142_v7 = vsub.f32 %v2137_v25, %v2140_v20  ;;  %v2164_v39 = vmul.f32 %v5568_v45, %v4513_v49  ;;  %v2185_v37 = vmul.f32 %v4516_v48, %v5551_v5  ;;  %v5001_v47 = vld [vmem:[#allocation2 + $0x2b8] sm:$0xff]  ;;  %v5570_v16 = vld [vmem:[#allocation23_spill] sm:$0xff] }
 0x1ad   :  { %v2241_v8 = vadd.f32 %v2239_v44, %v2217_v18  ;;  %v2188_v13 = vmul.f32 %v4537_v42, %v5569_v9  ;;  %v2211_v17 = vmul.f32 %v4981_v11, %v4540_v1  ;;  %v2214_v23 = vmul.f32 %v4983_v59, %v4543_v32  ;;  %v5571_v59 = vld [vmem:[#allocation16_spill] sm:$0xff] }
 0x1ae   :  { %2527 = vst.msk [vmem:[%s5119_s4 + $0x78] sm:$0xff] %vm51_vm0, %v2120_v43  ;;  %v2166_v50 = vsub.f32 %v2161_v6, %v2164_v39  ;;  %v2235_v44 = vmul.f32 %v5555_v62, %v4554_v41  ;;  %v2238_v25 = vmul.f32 %v5570_v16, %v4557_v2  ;;  %v2259_v20 = vmul.f32 %v4560_v0, %v5557_v30 }
 0x1af   :  { %v2265_v18 = vadd.f32 %v2263_v10, %v2241_v8  ;;  %v2313_v14 = vsub.f32 %v2308_v3, %v2311_v29  ;;  %v2190_v11 = vsub.f32 %v2185_v37, %v2188_v13  ;;  %v2262_v5 = vmul.f32 %v4571_v40, %v5571_v59 }
 0x1b0   :  { %v2168_v9 = vadd.f32 %v2166_v50, %v2142_v7  ;;  %v2216_v56 = vsub.f32 %v2211_v17, %v2214_v23  ;;  %v2285_v6 = vmul.f32 %v4999_v19, %v4578_v57  ;;  %v2288_v43 = vmul.f32 %v5001_v47, %v4583_v52  ;;  %v5572_v7 = vld [vmem:[#allocation29_spill] sm:$0xff]  ;;  %v5573_v17 = vld [vmem:[#allocation22_spill] sm:$0xff] }
 0x1b1   :  { %v2291_v39 = vadd.f32 %v2289_v35, %v2265_v18  ;;  %v2337_v62 = vsub.f32 %v2332_v61, %v2335_v4  ;;  %v2240_v16 = vsub.f32 %v2235_v44, %v2238_v25  ;;  %v2264_v45 = vsub.f32 %v2259_v20, %v2262_v5  ;;  %v5575_v50 = vld [vmem:[#allocation14_spill] sm:$0xff] }
 0x1b2   :  { %v2192_v12 = vadd.f32 %v2190_v11, %v2168_v9  ;;  %v2290_v30 = vsub.f32 %v2285_v6, %v2288_v43  ;;  %v2309_v8 = vmul.f32 %v4815_v58, %v4586_v38  ;;  %v2312_v13 = vmul.f32 %v4817_v22, %v4597_v21  ;;  %v5577_v25 = vld [vmem:[#allocation18_spill] sm:$0xff] }
 0x1b3   :  { %v2315_v10 = vadd.f32 %v2313_v14, %v2291_v39  ;;  %v2333_v3 = vmul.f32 %v4600_v26, %v4633_v53  ;;  %v2145_v29 = vmul.f32 %v4917_v55, %v4496_v34  ;;  %v2147_v61 = vmul.f32 %v4913_v27, %v4499_v46 }
 0x1b4   :  { %v2218_v35 = vadd.f32 %v2216_v56, %v2192_v12  ;;  %v2336_v9 = vmul.f32 %v4603_v24, %v4639_v54  ;;  %v2169_v5 = vmul.f32 %v4733_v63, %v4510_v51  ;;  %v2171_v11 = vmul.f32 %v4729_v28, %v4513_v49  ;;  %v5574_v12 = vld [vmem:[#allocation11_spill] sm:$0xff] }
 0x1b5   :  { %v2339_v14 = vadd.f32 %v2337_v62, %v2315_v10  ;;  %v2149_v4 = vadd.f32 %v2147_v61, %v2145_v29  ;;  %v2193_v37 = vmul.f32 %v4516_v48, %v5572_v7  ;;  %v2195_v55 = vmul.f32 %v4537_v42, %v5573_v17  ;;  %v5576_v63 = vld [vmem:[#allocation27_spill] sm:$0xff] }
 0x1b6   :  { %v2242_v23 = vadd.f32 %v2240_v16, %v2218_v35  ;;  %v2173_v27 = vadd.f32 %v2171_v11, %v2169_v5  ;;  %v2219_v56 = vmul.f32 %v5574_v12, %v4540_v1  ;;  %v2221_v44 = vmul.f32 %v5575_v50, %v4543_v32  ;;  %v5579_v17 = vld [vmem:[#allocation15_spill] sm:$0xff] }
 0x1b7   :  { %2545 = vst.msk [vmem:[%s5118_s3 + $0x80] sm:$0xff] %vm51_vm0, %v2339_v14  ;;  %v2197_v28 = vadd.f32 %v2195_v55, %v2193_v37  ;;  %v2243_v62 = vmul.f32 %v5576_v63, %v4554_v41  ;;  %v2245_v20 = vmul.f32 %v5577_v25, %v4557_v2  ;;  %v2267_v16 = vmul.f32 %v4560_v0, %v5562_v60  ;;  %v5580_v55 = vld [vmem:[#allocation19_spill] sm:$0xff]  ;;  %v5586_v63 = vld [vmem:[#allocation28_spill] sm:$0xff] }
 0x1b8   :  { %v2266_v18 = vadd.f32 %v2264_v45, %v2242_v23  ;;  %v2175_v6 = vadd.f32 %v2173_v27, %v2149_v4  ;;  %v2223_v43 = vadd.f32 %v2221_v44, %v2219_v56  ;;  %v2269_v39 = vmul.f32 %v4571_v40, %v5561_v31  ;;  %v5578_v45 = vld [vmem:[#allocation10_spill] sm:$0xff]  ;;  %v5583_v23 = vld [vmem:[#allocation32_spill] sm:$0xff]  ;;  %v5584_v56 = vld [vmem:[#allocation31_spill] sm:$0xff] }
 0x1b9   :  { %v2293_v10 = vmul.f32 %v4957_v15, %v4578_v57  ;;  %v2295_v29 = vmul.f32 %v4945_v36, %v4583_v52  ;;  %v2314_v35 = vsub.f32 %v2309_v8, %v2312_v13  ;;  %v2338_v5 = vsub.f32 %v2333_v3, %v2336_v9  ;;  %v5581_v8 = vld [vmem:[#allocation30_spill] sm:$0xff]  ;;  %v5588_v25 = vld [vmem:[#allocation20_spill] sm:$0xff] }
 0x1ba   :  { %v2292_v61 = vadd.f32 %v2290_v30, %v2266_v18  ;;  %v2199_v11 = vadd.f32 %v2197_v28, %v2175_v6  ;;  %v2247_v14 = vadd.f32 %v2245_v20, %v2243_v62  ;;  %v2271_v7 = vadd.f32 %v2269_v39, %v2267_v16  ;;  %v5582_v3 = vld [vmem:[#allocation26_spill] sm:$0xff]  ;;  %v5585_v28 = vld [vmem:[#allocation8_spill] sm:$0xff] }
 0x1bb   :  { %v2317_v60 = vmul.f32 %v4773_v33, %v4586_v38  ;;  %v2146_v4 = vmul.f32 %v5578_v45, %v4496_v34  ;;  %v2319_v15 = vmul.f32 %v5579_v17, %v4597_v21  ;;  %v2148_v36 = vmul.f32 %v5580_v55, %v4499_v46 }
 0x1bc   :  { %v2316_v37 = vadd.f32 %v2314_v35, %v2292_v61  ;;  %v2225_v31 = vadd.f32 %v2223_v43, %v2199_v11  ;;  %v2297_v30 = vadd.f32 %v2295_v29, %v2293_v10  ;;  %v2170_v13 = vmul.f32 %v5581_v8, %v4510_v51  ;;  %v5591_v35 = vld [vmem:[#allocation6_spill] sm:$0xff] }
 0x1bd   :  { %v2172_v9 = vmul.f32 %v5582_v3, %v4513_v49  ;;  %v2194_v33 = vmul.f32 %v4516_v48, %v5583_v23  ;;  %v2150_v12 = vadd.f32 %v2148_v36, %v2146_v4  ;;  %v2196_v50 = vmul.f32 %v4537_v42, %v5584_v56  ;;  %v5587_v49 = vld [vmem:[#allocation17_spill] sm:$0xff]  ;;  %v5589_v42 = vld [vmem:[#allocation23_spill] sm:$0xff] }
 0x1be   :  { %v2340_v27 = vadd.f32 %v2338_v5, %v2316_v37  ;;  %v2249_v34 = vadd.f32 %v2247_v14, %v2225_v31  ;;  %v2220_v46 = vmul.f32 %v5585_v28, %v4540_v1  ;;  %v2222_v62 = vmul.f32 %v5586_v63, %v4543_v32  ;;  %v5590_v32 = vld [vmem:[#allocation25_spill] sm:$0xff] }
 0x1bf   :  { %v2174_v44 = vadd.f32 %v2172_v9, %v2170_v13  ;;  %v2341_v48 = vmul.f32 %v4600_v26, %v5587_v49  ;;  %v2343_v20 = vmul.f32 %v4603_v24, %v5588_v25  ;;  %v2244_v16 = vmul.f32 %v5589_v42, %v4554_v41 }
 0x1c0   :  { %2546 = vst.msk [vmem:[%s5118_s3 + $0x88] sm:$0xff] %vm51_vm0, %v2340_v27  ;;  %v2273_v51 = vadd.f32 %v2271_v7, %v2249_v34  ;;  %v2198_v1 = vadd.f32 %v2196_v50, %v2194_v33  ;;  %v2224_v6 = vadd.f32 %v2222_v62, %v2220_v46  ;;  %v2246_v43 = vmul.f32 %v5590_v32, %v4557_v2 }
 0x1c1   :  { %v2176_v18 = vadd.f32 %v2174_v44, %v2150_v12  ;;  %v2321_v10 = vadd.f32 %v2319_v15, %v2317_v60  ;;  %v2268_v29 = vmul.f32 %v4560_v0, %v5571_v59  ;;  %v2270_v5 = vmul.f32 %v4571_v40, %v5591_v35 }
 0x1c2   :  { %v2299_v39 = vadd.f32 %v2297_v30, %v2273_v51  ;;  %v2294_v11 = vmul.f32 %v5001_v47, %v4578_v57  ;;  %v2296_v41 = vmul.f32 %v4999_v19, %v4583_v52  ;;  %v2345_v7 = vadd.f32 %v2343_v20, %v2341_v48 }
 0x1c3   :  { %v2200_v61 = vadd.f32 %v2198_v1, %v2176_v18  ;;  %v2248_v4 = vadd.f32 %v2246_v43, %v2244_v16  ;;  %v2318_v60 = vmul.f32 %v4817_v22, %v4586_v38  ;;  %v2272_v0 = vadd.f32 %v2270_v5, %v2268_v29 }
 0x1c4   :  { %v2323_v14 = vadd.f32 %v2321_v10, %v2299_v39  ;;  %v2298_v59 = vadd.f32 %v2296_v41, %v2294_v11  ;;  %v2320_v40 = vmul.f32 %v4815_v58, %v4597_v21  ;;  %v2342_v52 = vmul.f32 %v4600_v26, %v4639_v54 }
 0x1c5   :  { %v2226_v45 = vadd.f32 %v2224_v6, %v2200_v61  ;;  %v2344_v19 = vmul.f32 %v4603_v24, %v4633_v53 }
 0x1c6   :  { %v2347_v2 = vadd.f32 %v2345_v7, %v2323_v14  ;;  %v2322_v38 = vadd.f32 %v2320_v40, %v2318_v60 }
 0x1c7   :  { %v2250_v37 = vadd.f32 %v2248_v4, %v2226_v45  ;;  %v2346_v31 = vadd.f32 %v2344_v19, %v2342_v52 }
 0x1c8   :  { %2547 = vst.msk [vmem:[%s5119_s4 + $0x80] sm:$0xff] %vm51_vm0, %v2347_v2 }
 0x1c9   :  { %v2274_v57 = vadd.f32 %v2272_v0, %v2250_v37 }
 0x1cb   :  { %v2300_v47 = vadd.f32 %v2298_v59, %v2274_v57 }
 0x1cd   :  { %v2324_v22 = vadd.f32 %v2322_v38, %v2300_v47 }
 0x1cf   :  { %v2348_v17 = vadd.f32 %v2346_v31, %v2324_v22 }
 0x1d1   :  { %2548 = vst.msk [vmem:[%s5119_s4 + $0x88] sm:$0xff] %vm51_vm0, %v2348_v17 }
 0x1d2   :  { %2363 = vsyncpa [#allocation4], 1 }

</bundles_post_ra>
